<compile_context>
chip_gen: v5e
topology: v5e:2x2
jax: 0.10.0
libtpu: 0.0.40
codegen_flags: <defaults>
</compile_context>

<pallas_src>
import jax
import jax.numpy as jnp
from jax import lax
from jax.experimental import pallas as pl
from jax.experimental.pallas import tpu as pltpu


_NEG = -1e30


def _round_up(x, m):
    return (x + m - 1) // m * m


# ----------------------------------------------------------------------------
# Fused kernel: BiLSTM (both directions) + masked max-pool + MLP head
# ----------------------------------------------------------------------------
def _fused_classifier_kernel(x_ref, madd_ref, wih_ref, b_ref, whh_ref,
                             w1_ref, b1_ref, w2_ref, b2_ref,
                             out_ref, gx_scr):
    T, TB, E = x_ref.shape                     # time-major batch tile
    H = whh_ref.shape[0] // 2
    G = 4 * H
    NEG = jnp.float32(_NEG)

    # ---- hoisted input projection (both directions, biases folded), stored
    # time-major in bf16 so each timestep reads one contiguous [TB, 8H] slab.
    x = x_ref[...].reshape(T * TB, E)                                   # bf16
    gx = jnp.dot(x, wih_ref[...], preferred_element_type=jnp.float32) + b_ref[...]
    gx_scr[...] = gx.reshape(T, TB, 2 * G).astype(jnp.bfloat16)

    def cell(g, c_prev):                                                # i,f,g,o
        i_g = jax.nn.sigmoid(g[:, 0:H])
        f_g = jax.nn.sigmoid(g[:, H:2 * H])
        g_g = jnp.tanh(g[:, 2 * H:3 * H])
        o_g = jax.nn.sigmoid(g[:, 3 * H:4 * H])
        c_new = f_g * c_prev + i_g * g_g
        return o_g * jnp.tanh(c_new), c_new

    def step(t, carry):
        h_f, c_f, h_b, c_b, p_f, p_b = carry
        tr = T - 1 - t
        gx_f = gx_scr[t]                                                # [TB, 8H]
        gx_b = gx_scr[tr]
        # one block-diagonal recurrent matmul serves both directions (K = 2H)
        h_cat = jnp.concatenate([h_f, h_b], axis=-1).astype(jnp.bfloat16)
        rec = jnp.dot(h_cat, whh_ref[...], preferred_element_type=jnp.float32)
        g_f = gx_f[:, 0:G].astype(jnp.float32) + rec[:, 0:G]
        g_b = gx_b[:, G:2 * G].astype(jnp.float32) + rec[:, G:2 * G]
        h_f_n, c_f_n = cell(g_f, c_f)
        h_b_n, c_b_n = cell(g_b, c_b)
        madd_f = madd_ref[:, pl.ds(t, 1)]                               # [TB, 1]
        madd_b = madd_ref[:, pl.ds(tr, 1)]
        # backward state only advances on real tokens (pack_padded_sequence)
        mb = madd_b >= 0.0
        h_b_n = jnp.where(mb, h_b_n, h_b)
        c_b_n = jnp.where(mb, c_b_n, c_b)
        # online masked max-pool via additive mask (one add + max per dir)
        p_f = jnp.maximum(p_f, h_f_n + madd_f)
        p_b = jnp.maximum(p_b, h_b_n + madd_b)
        return h_f_n, c_f_n, h_b_n, c_b_n, p_f, p_b

    zeros = jnp.zeros((TB, H), jnp.float32)
    negs = jnp.full((TB, H), NEG, jnp.float32)
    carry = (zeros, zeros, zeros, zeros, negs, negs)
    _, _, _, _, p_f, p_b = lax.fori_loop(0, T, step, carry, unroll=(T <= 16))

    pooled = jnp.concatenate([p_f, p_b], axis=-1)                       # [TB, 2H]

    # ---- dense head: Linear(2H, 512) + ReLU + Linear(512, C_pad) ----
    z = jnp.dot(pooled.astype(jnp.bfloat16), w1_ref[...],
                preferred_element_type=jnp.float32) + b1_ref[...]
    z = jnp.maximum(z, 0.0)
    out_ref[...] = jnp.dot(z.astype(jnp.bfloat16), w2_ref[...],
                           preferred_element_type=jnp.float32) + b2_ref[...]


# ----------------------------------------------------------------------------
# Parameter construction (PyTorch-like U(-1/sqrt(fan), 1/sqrt(fan)))
# ----------------------------------------------------------------------------
def init_params(key, embed_dim, hidden, num_classes, mlp_hidden=512, lane_pad=128):
    def uni(k, shape, scale):
        return jax.random.uniform(k, shape, jnp.float32, -scale, scale)

    ks = jax.random.split(key, 12)
    s = 1.0 / float(hidden) ** 0.5

    # nn.LSTM weights pre-transposed to [in, out]; gate order i, f, g, o.
    w_ih_f = uni(ks[0], (embed_dim, 4 * hidden), s)
    w_hh_f = uni(ks[1], (hidden, 4 * hidden), s)
    b_ih_f = uni(ks[2], (1, 4 * hidden), s)
    b_hh_f = uni(ks[3], (1, 4 * hidden), s)
    w_ih_b = uni(ks[4], (embed_dim, 4 * hidden), s)
    w_hh_b = uni(ks[5], (hidden, 4 * hidden), s)
    b_ih_b = uni(ks[6], (1, 4 * hidden), s)
    b_hh_b = uni(ks[7], (1, 4 * hidden), s)

    s1 = 1.0 / float(2 * hidden) ** 0.5
    w1 = uni(ks[8], (2 * hidden, mlp_hidden), s1)
    b1 = uni(ks[9], (1, mlp_hidden), s1)
    s2 = 1.0 / float(mlp_hidden) ** 0.5
    w2 = uni(ks[10], (mlp_hidden, num_classes), s2)
    b2 = uni(ks[11], (1, num_classes), s2)

    # lane-pad the tiny classifier output to a multiple of 128 columns
    c_pad = max(lane_pad, _round_up(num_classes, lane_pad))
    w2p = jnp.zeros((mlp_hidden, c_pad), jnp.float32).at[:, :num_classes].set(w2)
    b2p = jnp.zeros((1, c_pad), jnp.float32).at[:, :num_classes].set(b2)

    # block-diagonal recurrent weight: one [2H, 8H] matmul serves both dirs
    w_hh_cat = jnp.zeros((2 * hidden, 8 * hidden), jnp.float32)
    w_hh_cat = w_hh_cat.at[:hidden, :4 * hidden].set(w_hh_f)
    w_hh_cat = w_hh_cat.at[hidden:, 4 * hidden:].set(w_hh_b)

    return {
        # both directions' input projections fused along N; b_ih + b_hh folded
        "w_ih_cat": jnp.concatenate([w_ih_f, w_ih_b], axis=1).astype(jnp.bfloat16),
        "b_cat": jnp.concatenate([b_ih_f + b_hh_f, b_ih_b + b_hh_b], axis=1),
        "w_hh_cat": w_hh_cat.astype(jnp.bfloat16),
        "w1": w1.astype(jnp.bfloat16),
        "b1": b1,
        "w2p": w2p.astype(jnp.bfloat16),
        "b2p": b2p,
    }


# ----------------------------------------------------------------------------
# Full forward pass (eval mode)
# ----------------------------------------------------------------------------
def classifier_forward(params, emb_bte, mask_bt, num_classes, batch_tile=None):
    # TODO(synk): the ELMo word-encoding layer has no Pallas equivalent; `emb_bte`
    #             stands in for its embedded output (batch_first [B, T, E]).
    B, T, E = emb_bte.shape
    H = params["w_hh_cat"].shape[0] // 2
    Cp = params["w2p"].shape[1]
    mlp_hidden = params["w1"].shape[1]

    # batch tile: multiple of 8 sublanes, capped at 128 rows per grid step
    if batch_tile is None:
        batch_tile = min(128, _round_up(B, 8))
    TB = batch_tile
    Bp = _round_up(B, TB)

    x = emb_bte.astype(jnp.bfloat16)                     # bf16 into the kernel
    mask = mask_bt.astype(jnp.float32)
    if Bp != B:
        x = jnp.pad(x, ((0, Bp - B), (0, 0), (0, 0)))
        mask = jnp.pad(mask, ((0, Bp - B), (0, 0)))      # pad rows fully masked
    x_tbe = jnp.transpose(x, (1, 0, 2))                  # time-major [T, Bp, E]
    madd = jnp.where(mask > 0.0, 0.0, _NEG).astype(jnp.float32)   # additive mask

    grid = (Bp // TB,)
    full = lambda b: (0, 0)                              # weights stay resident

    # conservative scoped-VMEM sizing: weights + double-buffered tiles + scratch
    bf2, f4 = 2, 4
    est = ((E * 8 * H + 2 * H * 8 * H + 2 * H * mlp_hidden + mlp_hidden * Cp) * bf2
           + (8 * H + mlp_hidden + Cp) * f4
           + 2 * (T * TB * E * bf2 + TB * T * f4 + TB * Cp * f4)
           + T * TB * 8 * H * (bf2 + f4)
           + 16 * TB * H * f4)
    vmem_limit = int(min(max(est * 3 // 2, 32 * 1024 * 1024), 110 * 1024 * 1024))

    out_padded = pl.pallas_call(
        _fused_classifier_kernel,
        out_shape=jax.ShapeDtypeStruct((Bp, Cp), jnp.float32),
        grid_spec=pltpu.PrefetchScalarGridSpec(
            num_scalar_prefetch=0,
            grid=grid,
            in_specs=[
                pl.BlockSpec((T, TB, E), lambda b: (0, b, 0)),   # x (time-major, bf16)
                pl.BlockSpec((TB, T), lambda b: (b, 0)),         # additive mask
                pl.BlockSpec((E, 8 * H), full),                  # W_ih (both dirs)
                pl.BlockSpec((1, 8 * H), full),                  # folded biases
                pl.BlockSpec((2 * H, 8 * H), full),              # block-diag W_hh
                pl.BlockSpec((2 * H, mlp_hidden), full),         # W1
                pl.BlockSpec((1, mlp_hidden), full),             # b1
                pl.BlockSpec((mlp_hidden, Cp), full),            # W2 (lane-padded)
                pl.BlockSpec((1, Cp), full),                     # b2
            ],
            out_specs=pl.BlockSpec((TB, Cp), lambda b: (b, 0)),
            scratch_shapes=[pltpu.VMEM((T, TB, 8 * H), jnp.bfloat16)],
        ),
        compiler_params=pltpu.CompilerParams(
            dimension_semantics=("parallel",),                   # v7x: 2 TCs
            vmem_limit_bytes=vmem_limit,
        ),
    )(x_tbe, madd, params["w_ih_cat"], params["b_cat"], params["w_hh_cat"],
      params["w1"], params["b1"], params["w2p"], params["b2p"])

    return out_padded[:B, :num_classes]


if __name__ == "__main__":
    B, T, E, H, C = 8, 8, 128, 128, 4     # batch, seq, embed_dim, lstm hidden, classes

    key = jax.random.PRNGKey(0)
    k_param, k_emb = jax.random.split(key)
    params = init_params(k_param, E, H, C)

    # stand-in for the ELMo-embedded batch (batch_first) and its (ragged) masks
    emb_batch = jax.random.normal(k_emb, (B, T, E), jnp.float32)
    lengths = jnp.array([8, 7, 6, 5, 8, 3, 8, 2], jnp.int32)
    masks = (jnp.arange(T)[None, :] < lengths[:, None]).astype(jnp.float32)

    logits = classifier_forward(params, emb_batch, masks, C)
    jax.block_until_ready(logits)
    assert logits.shape == (B, C) and logits.dtype == jnp.float32
    assert bool(jnp.isfinite(logits).all())
    print("KERNEL_OK")
</pallas_src>

<mosaic_0001>
module attributes {stable_mosaic.version = 11 : i64} {
  func.func @_fused_classifier_kernel(%arg0: i32, %arg1: memref<8x8x128xbf16, #tpu.memory_space<vmem>>, %arg2: memref<8x8xf32, #tpu.memory_space<vmem>>, %arg3: memref<128x1024xbf16, #tpu.memory_space<vmem>>, %arg4: memref<1x1024xf32, #tpu.memory_space<vmem>>, %arg5: memref<256x1024xbf16, #tpu.memory_space<vmem>>, %arg6: memref<256x512xbf16, #tpu.memory_space<vmem>>, %arg7: memref<1x512xf32, #tpu.memory_space<vmem>>, %arg8: memref<512x128xbf16, #tpu.memory_space<vmem>>, %arg9: memref<1x128xf32, #tpu.memory_space<vmem>>, %arg10: memref<8x128xf32, #tpu.memory_space<vmem>>, %arg11: memref<8x8x1024xbf16, #tpu.memory_space<vmem>>) attributes {dimension_semantics = [#tpu.dimension_semantics<parallel>], iteration_bounds = array<i64: 1>, scalar_prefetch = 0 : i64, scratch_operands = 1 : i64, tpu.core_type = #tpu.core_type<tc>, window_params = [{transform_indices = @transform_0, window_bounds = array<i64: 8, 8, 128>}, {transform_indices = @transform_1, window_bounds = array<i64: 8, 8>}, {pipeline_mode = #tpu.pipeline_mode<synchronous>, transform_indices = @transform_2, window_bounds = array<i64: 128, 1024>}, {pipeline_mode = #tpu.pipeline_mode<synchronous>, transform_indices = @transform_3, window_bounds = array<i64: 1, 1024>}, {pipeline_mode = #tpu.pipeline_mode<synchronous>, transform_indices = @transform_4, window_bounds = array<i64: 256, 1024>}, {pipeline_mode = #tpu.pipeline_mode<synchronous>, transform_indices = @transform_5, window_bounds = array<i64: 256, 512>}, {pipeline_mode = #tpu.pipeline_mode<synchronous>, transform_indices = @transform_6, window_bounds = array<i64: 1, 512>}, {pipeline_mode = #tpu.pipeline_mode<synchronous>, transform_indices = @transform_7, window_bounds = array<i64: 512, 128>}, {pipeline_mode = #tpu.pipeline_mode<synchronous>, transform_indices = @transform_8, window_bounds = array<i64: 1, 128>}, {transform_indices = @transform_9, window_bounds = array<i64: 8, 128>}]} {
    %c0 = arith.constant 0 : index
    %c0_0 = arith.constant 0 : index
    %c0_1 = arith.constant 0 : index
    %0 = vector.load %arg1[%c0, %c0_0, %c0_1] : memref<8x8x128xbf16, #tpu.memory_space<vmem>>, vector<8x8x128xbf16>
    %1 = vector.shape_cast %0 : vector<8x8x128xbf16> to vector<64x128xbf16>
    %c0_2 = arith.constant 0 : index
    %c0_3 = arith.constant 0 : index
    %2 = vector.load %arg3[%c0_2, %c0_3] : memref<128x1024xbf16, #tpu.memory_space<vmem>>, vector<128x1024xbf16>
    %cst = arith.constant dense<0.000000e+00> : vector<64x1024xf32>
    %3 = tpu.matmul %1, %2, %cst {dimension_numbers = #tpu.dot_dimension_numbers<[1], [0], [0], [1], [0, 0, 1, 1], [], []>} : vector<64x128xbf16>, vector<128x1024xbf16>, vector<64x1024xf32> -> vector<64x1024xf32>
    %c0_4 = arith.constant 0 : index
    %c0_5 = arith.constant 0 : index
    %4 = vector.load %arg4[%c0_4, %c0_5] : memref<1x1024xf32, #tpu.memory_space<vmem>>, vector<1x1024xf32>
    %5 = vector.broadcast %4 : vector<1x1024xf32> to vector<64x1024xf32>
    %6 = arith.addf %3, %5 : vector<64x1024xf32>
    %7 = vector.shape_cast %6 : vector<64x1024xf32> to vector<8x8x1024xf32>
    %8 = arith.truncf %7 : vector<8x8x1024xf32> to vector<8x8x1024xbf16>
    %c0_6 = arith.constant 0 : index
    %c0_7 = arith.constant 0 : index
    %c0_8 = arith.constant 0 : index
    %9 = vector.load %arg11[%c0_6, %c0_7, %c0_8] : memref<8x8x1024xbf16, #tpu.memory_space<vmem>>, vector<8x8x1024xbf16>
    tpu.vector_store %arg11[%c0_6, %c0_7, %c0_8], %8 {strides = array<i32>} : memref<8x8x1024xbf16, #tpu.memory_space<vmem>>, vector<8x8x1024xbf16>,
    %cst_9 = arith.constant 0.000000e+00 : f32
    %10 = vector.broadcast %cst_9 : f32 to vector<8x128xf32>
    %cst_10 = arith.constant -1.000000e+30 : f32
    %11 = vector.broadcast %cst_10 : f32 to vector<8x128xf32>
    %c0_i32 = arith.constant 0 : i32
    %c7_i32 = arith.constant 7 : i32
    %12 = arith.subi %c7_i32, %c0_i32 : i32
    %13 = arith.index_cast %c0_i32 : i32 to index
    %c0_11 = arith.constant 0 : index
    %c0_12 = arith.constant 0 : index
    %14 = vector.load %arg11[%13, %c0_11, %c0_12] : memref<8x8x1024xbf16, #tpu.memory_space<vmem>>, vector<1x8x1024xbf16>
    %15 = vector.shape_cast %14 : vector<1x8x1024xbf16> to vector<8x1024xbf16>
    %16 = arith.index_cast %12 : i32 to index
    %c0_13 = arith.constant 0 : index
    %c0_14 = arith.constant 0 : index
    %17 = vector.load %arg11[%16, %c0_13, %c0_14] : memref<8x8x1024xbf16, #tpu.memory_space<vmem>>, vector<1x8x1024xbf16>
    %18 = vector.shape_cast %17 : vector<1x8x1024xbf16> to vector<8x1024xbf16>
    %19 = tpu.concatenate %10, %10 in 1 : vector<8x128xf32>, vector<8x128xf32> -> vector<8x256xf32>
    %20 = arith.truncf %19 : vector<8x256xf32> to vector<8x256xbf16>
    %c0_15 = arith.constant 0 : index
    %c0_16 = arith.constant 0 : index
    %21 = vector.load %arg5[%c0_15, %c0_16] : memref<256x1024xbf16, #tpu.memory_space<vmem>>, vector<256x1024xbf16>
    %cst_17 = arith.constant dense<0.000000e+00> : vector<8x1024xf32>
    %22 = tpu.matmul %20, %21, %cst_17 {dimension_numbers = #tpu.dot_dimension_numbers<[1], [0], [0], [1], [0, 0, 1, 1], [], []>} : vector<8x256xbf16>, vector<256x1024xbf16>, vector<8x1024xf32> -> vector<8x1024xf32>
    %23 = vector.extract_strided_slice %15 {offsets = [0, 0], sizes = [8, 512], strides = [1, 1]} : vector<8x1024xbf16> to vector<8x512xbf16>
    %24 = arith.extf %23 : vector<8x512xbf16> to vector<8x512xf32>
    %25 = vector.extract_strided_slice %22 {offsets = [0, 0], sizes = [8, 512], strides = [1, 1]} : vector<8x1024xf32> to vector<8x512xf32>
    %26 = arith.addf %24, %25 : vector<8x512xf32>
    %27 = vector.extract_strided_slice %18 {offsets = [0, 512], sizes = [8, 512], strides = [1, 1]} : vector<8x1024xbf16> to vector<8x512xbf16>
    %28 = arith.extf %27 : vector<8x512xbf16> to vector<8x512xf32>
    %29 = vector.extract_strided_slice %22 {offsets = [0, 512], sizes = [8, 512], strides = [1, 1]} : vector<8x1024xf32> to vector<8x512xf32>
    %30 = arith.addf %28, %29 : vector<8x512xf32>
    %31 = vector.extract_strided_slice %26 {offsets = [0, 0], sizes = [8, 128], strides = [1, 1]} : vector<8x512xf32> to vector<8x128xf32>
    %32 = arith.negf %31 : vector<8x128xf32>
    %33 = math.exp %32 : vector<8x128xf32>
    %cst_18 = arith.constant 1.000000e+00 : f32
    %34 = vector.broadcast %cst_18 : f32 to vector<8x128xf32>
    %35 = arith.addf %34, %33 : vector<8x128xf32>
    %36 = arith.divf %34, %35 : vector<8x128xf32>
    %37 = vector.extract_strided_slice %26 {offsets = [0, 128], sizes = [8, 128], strides = [1, 1]} : vector<8x512xf32> to vector<8x128xf32>
    %38 = arith.negf %37 : vector<8x128xf32>
    %39 = math.exp %38 : vector<8x128xf32>
    %cst_19 = arith.constant 1.000000e+00 : f32
    %40 = vector.broadcast %cst_19 : f32 to vector<8x128xf32>
    %41 = arith.addf %40, %39 : vector<8x128xf32>
    %42 = arith.divf %40, %41 : vector<8x128xf32>
    %43 = vector.extract_strided_slice %26 {offsets = [0, 256], sizes = [8, 128], strides = [1, 1]} : vector<8x512xf32> to vector<8x128xf32>
    %44 = math.tanh %43 : vector<8x128xf32>
    %45 = vector.extract_strided_slice %26 {offsets = [0, 384], sizes = [8, 128], strides = [1, 1]} : vector<8x512xf32> to vector<8x128xf32>
    %46 = arith.negf %45 : vector<8x128xf32>
    %47 = math.exp %46 : vector<8x128xf32>
    %cst_20 = arith.constant 1.000000e+00 : f32
    %48 = vector.broadcast %cst_20 : f32 to vector<8x128xf32>
    %49 = arith.addf %48, %47 : vector<8x128xf32>
    %50 = arith.divf %48, %49 : vector<8x128xf32>
    %51 = arith.mulf %42, %10 : vector<8x128xf32>
    %52 = arith.mulf %36, %44 : vector<8x128xf32>
    %53 = arith.addf %51, %52 : vector<8x128xf32>
    %54 = math.tanh %53 : vector<8x128xf32>
    %55 = arith.mulf %50, %54 : vector<8x128xf32>
    %56 = vector.extract_strided_slice %30 {offsets = [0, 0], sizes = [8, 128], strides = [1, 1]} : vector<8x512xf32> to vector<8x128xf32>
    %57 = arith.negf %56 : vector<8x128xf32>
    %58 = math.exp %57 : vector<8x128xf32>
    %cst_21 = arith.constant 1.000000e+00 : f32
    %59 = vector.broadcast %cst_21 : f32 to vector<8x128xf32>
    %60 = arith.addf %59, %58 : vector<8x128xf32>
    %61 = arith.divf %59, %60 : vector<8x128xf32>
    %62 = vector.extract_strided_slice %30 {offsets = [0, 128], sizes = [8, 128], strides = [1, 1]} : vector<8x512xf32> to vector<8x128xf32>
    %63 = arith.negf %62 : vector<8x128xf32>
    %64 = math.exp %63 : vector<8x128xf32>
    %cst_22 = arith.constant 1.000000e+00 : f32
    %65 = vector.broadcast %cst_22 : f32 to vector<8x128xf32>
    %66 = arith.addf %65, %64 : vector<8x128xf32>
    %67 = arith.divf %65, %66 : vector<8x128xf32>
    %68 = vector.extract_strided_slice %30 {offsets = [0, 256], sizes = [8, 128], strides = [1, 1]} : vector<8x512xf32> to vector<8x128xf32>
    %69 = math.tanh %68 : vector<8x128xf32>
    %70 = vector.extract_strided_slice %30 {offsets = [0, 384], sizes = [8, 128], strides = [1, 1]} : vector<8x512xf32> to vector<8x128xf32>
    %71 = arith.negf %70 : vector<8x128xf32>
    %72 = math.exp %71 : vector<8x128xf32>
    %cst_23 = arith.constant 1.000000e+00 : f32
    %73 = vector.broadcast %cst_23 : f32 to vector<8x128xf32>
    %74 = arith.addf %73, %72 : vector<8x128xf32>
    %75 = arith.divf %73, %74 : vector<8x128xf32>
    %76 = arith.mulf %67, %10 : vector<8x128xf32>
    %77 = arith.mulf %61, %69 : vector<8x128xf32>
    %78 = arith.addf %76, %77 : vector<8x128xf32>
    %79 = math.tanh %78 : vector<8x128xf32>
    %80 = arith.mulf %75, %79 : vector<8x128xf32>
    %c0_24 = arith.constant 0 : index
    %81 = arith.index_cast %c0_i32 : i32 to index
    %82 = vector.load %arg2[%c0_24, %81] : memref<8x8xf32, #tpu.memory_space<vmem>>, vector<8x1xf32>
    %c0_25 = arith.constant 0 : index
    %83 = arith.index_cast %12 : i32 to index
    %84 = vector.load %arg2[%c0_25, %83] : memref<8x8xf32, #tpu.memory_space<vmem>>, vector<8x1xf32>
    %cst_26 = arith.constant 0.000000e+00 : f32
    %85 = vector.broadcast %cst_26 : f32 to vector<8x1xf32>
    %86 = arith.cmpf oge, %84, %85 : vector<8x1xf32>
    %87 = vector.shape_cast %86 : vector<8x1xi1> to vector<8x1xi1>
    %88 = vector.broadcast %87 : vector<8x1xi1> to vector<8x128xi1>
    %89 = arith.select %88, %80, %10 : vector<8x128xi1>, vector<8x128xf32>
    %90 = vector.shape_cast %86 : vector<8x1xi1> to vector<8x1xi1>
    %91 = vector.broadcast %90 : vector<8x1xi1> to vector<8x128xi1>
    %92 = arith.select %91, %78, %10 : vector<8x128xi1>, vector<8x128xf32>
    %93 = vector.broadcast %82 : vector<8x1xf32> to vector<8x128xf32>
    %94 = arith.addf %55, %93 : vector<8x128xf32>
    %95 = arith.maximumf %11, %94 : vector<8x128xf32>
    %96 = vector.broadcast %84 : vector<8x1xf32> to vector<8x128xf32>
    %97 = arith.addf %89, %96 : vector<8x128xf32>
    %98 = arith.maximumf %11, %97 : vector<8x128xf32>
    %c1_i32 = arith.constant 1 : i32
    %c7_i32_27 = arith.constant 7 : i32
    %99 = arith.subi %c7_i32_27, %c1_i32 : i32
    %100 = arith.index_cast %c1_i32 : i32 to index
    %c0_28 = arith.constant 0 : index
    %c0_29 = arith.constant 0 : index
    %101 = vector.load %arg11[%100, %c0_28, %c0_29] : memref<8x8x1024xbf16, #tpu.memory_space<vmem>>, vector<1x8x1024xbf16>
    %102 = vector.shape_cast %101 : vector<1x8x1024xbf16> to vector<8x1024xbf16>
    %103 = arith.index_cast %99 : i32 to index
    %c0_30 = arith.constant 0 : index
    %c0_31 = arith.constant 0 : index
    %104 = vector.load %arg11[%103, %c0_30, %c0_31] : memref<8x8x1024xbf16, #tpu.memory_space<vmem>>, vector<1x8x1024xbf16>
    %105 = vector.shape_cast %104 : vector<1x8x1024xbf16> to vector<8x1024xbf16>
    %106 = tpu.concatenate %55, %89 in 1 : vector<8x128xf32>, vector<8x128xf32> -> vector<8x256xf32>
    %107 = arith.truncf %106 : vector<8x256xf32> to vector<8x256xbf16>
    %c0_32 = arith.constant 0 : index
    %c0_33 = arith.constant 0 : index
    %108 = vector.load %arg5[%c0_32, %c0_33] : memref<256x1024xbf16, #tpu.memory_space<vmem>>, vector<256x1024xbf16>
    %cst_34 = arith.constant dense<0.000000e+00> : vector<8x1024xf32>
    %109 = tpu.matmul %107, %108, %cst_34 {dimension_numbers = #tpu.dot_dimension_numbers<[1], [0], [0], [1], [0, 0, 1, 1], [], []>} : vector<8x256xbf16>, vector<256x1024xbf16>, vector<8x1024xf32> -> vector<8x1024xf32>
    %110 = vector.extract_strided_slice %102 {offsets = [0, 0], sizes = [8, 512], strides = [1, 1]} : vector<8x1024xbf16> to vector<8x512xbf16>
    %111 = arith.extf %110 : vector<8x512xbf16> to vector<8x512xf32>
    %112 = vector.extract_strided_slice %109 {offsets = [0, 0], sizes = [8, 512], strides = [1, 1]} : vector<8x1024xf32> to vector<8x512xf32>
    %113 = arith.addf %111, %112 : vector<8x512xf32>
    %114 = vector.extract_strided_slice %105 {offsets = [0, 512], sizes = [8, 512], strides = [1, 1]} : vector<8x1024xbf16> to vector<8x512xbf16>
    %115 = arith.extf %114 : vector<8x512xbf16> to vector<8x512xf32>
    %116 = vector.extract_strided_slice %109 {offsets = [0, 512], sizes = [8, 512], strides = [1, 1]} : vector<8x1024xf32> to vector<8x512xf32>
    %117 = arith.addf %115, %116 : vector<8x512xf32>
    %118 = vector.extract_strided_slice %113 {offsets = [0, 0], sizes = [8, 128], strides = [1, 1]} : vector<8x512xf32> to vector<8x128xf32>
    %119 = arith.negf %118 : vector<8x128xf32>
    %120 = math.exp %119 : vector<8x128xf32>
    %cst_35 = arith.constant 1.000000e+00 : f32
    %121 = vector.broadcast %cst_35 : f32 to vector<8x128xf32>
    %122 = arith.addf %121, %120 : vector<8x128xf32>
    %123 = arith.divf %121, %122 : vector<8x128xf32>
    %124 = vector.extract_strided_slice %113 {offsets = [0, 128], sizes = [8, 128], strides = [1, 1]} : vector<8x512xf32> to vector<8x128xf32>
    %125 = arith.negf %124 : vector<8x128xf32>
    %126 = math.exp %125 : vector<8x128xf32>
    %cst_36 = arith.constant 1.000000e+00 : f32
    %127 = vector.broadcast %cst_36 : f32 to vector<8x128xf32>
    %128 = arith.addf %127, %126 : vector<8x128xf32>
    %129 = arith.divf %127, %128 : vector<8x128xf32>
    %130 = vector.extract_strided_slice %113 {offsets = [0, 256], sizes = [8, 128], strides = [1, 1]} : vector<8x512xf32> to vector<8x128xf32>
    %131 = math.tanh %130 : vector<8x128xf32>
    %132 = vector.extract_strided_slice %113 {offsets = [0, 384], sizes = [8, 128], strides = [1, 1]} : vector<8x512xf32> to vector<8x128xf32>
    %133 = arith.negf %132 : vector<8x128xf32>
    %134 = math.exp %133 : vector<8x128xf32>
    %cst_37 = arith.constant 1.000000e+00 : f32
    %135 = vector.broadcast %cst_37 : f32 to vector<8x128xf32>
    %136 = arith.addf %135, %134 : vector<8x128xf32>
    %137 = arith.divf %135, %136 : vector<8x128xf32>
    %138 = arith.mulf %129, %53 : vector<8x128xf32>
    %139 = arith.mulf %123, %131 : vector<8x128xf32>
    %140 = arith.addf %138, %139 : vector<8x128xf32>
    %141 = math.tanh %140 : vector<8x128xf32>
    %142 = arith.mulf %137, %141 : vector<8x128xf32>
    %143 = vector.extract_strided_slice %117 {offsets = [0, 0], sizes = [8, 128], strides = [1, 1]} : vector<8x512xf32> to vector<8x128xf32>
    %144 = arith.negf %143 : vector<8x128xf32>
    %145 = math.exp %144 : vector<8x128xf32>
    %cst_38 = arith.constant 1.000000e+00 : f32
    %146 = vector.broadcast %cst_38 : f32 to vector<8x128xf32>
    %147 = arith.addf %146, %145 : vector<8x128xf32>
    %148 = arith.divf %146, %147 : vector<8x128xf32>
    %149 = vector.extract_strided_slice %117 {offsets = [0, 128], sizes = [8, 128], strides = [1, 1]} : vector<8x512xf32> to vector<8x128xf32>
    %150 = arith.negf %149 : vector<8x128xf32>
    %151 = math.exp %150 : vector<8x128xf32>
    %cst_39 = arith.constant 1.000000e+00 : f32
    %152 = vector.broadcast %cst_39 : f32 to vector<8x128xf32>
    %153 = arith.addf %152, %151 : vector<8x128xf32>
    %154 = arith.divf %152, %153 : vector<8x128xf32>
    %155 = vector.extract_strided_slice %117 {offsets = [0, 256], sizes = [8, 128], strides = [1, 1]} : vector<8x512xf32> to vector<8x128xf32>
    %156 = math.tanh %155 : vector<8x128xf32>
    %157 = vector.extract_strided_slice %117 {offsets = [0, 384], sizes = [8, 128], strides = [1, 1]} : vector<8x512xf32> to vector<8x128xf32>
    %158 = arith.negf %157 : vector<8x128xf32>
    %159 = math.exp %158 : vector<8x128xf32>
    %cst_40 = arith.constant 1.000000e+00 : f32
    %160 = vector.broadcast %cst_40 : f32 to vector<8x128xf32>
    %161 = arith.addf %160, %159 : vector<8x128xf32>
    %162 = arith.divf %160, %161 : vector<8x128xf32>
    %163 = arith.mulf %154, %92 : vector<8x128xf32>
    %164 = arith.mulf %148, %156 : vector<8x128xf32>
    %165 = arith.addf %163, %164 : vector<8x128xf32>
    %166 = math.tanh %165 : vector<8x128xf32>
    %167 = arith.mulf %162, %166 : vector<8x128xf32>
    %c0_41 = arith.constant 0 : index
    %168 = arith.index_cast %c1_i32 : i32 to index
    %169 = vector.load %arg2[%c0_41, %168] : memref<8x8xf32, #tpu.memory_space<vmem>>, vector<8x1xf32>
    %c0_42 = arith.constant 0 : index
    %170 = arith.index_cast %99 : i32 to index
    %171 = vector.load %arg2[%c0_42, %170] : memref<8x8xf32, #tpu.memory_space<vmem>>, vector<8x1xf32>
    %cst_43 = arith.constant 0.000000e+00 : f32
    %172 = vector.broadcast %cst_43 : f32 to vector<8x1xf32>
    %173 = arith.cmpf oge, %171, %172 : vector<8x1xf32>
    %174 = vector.shape_cast %173 : vector<8x1xi1> to vector<8x1xi1>
    %175 = vector.broadcast %174 : vector<8x1xi1> to vector<8x128xi1>
    %176 = arith.select %175, %167, %89 : vector<8x128xi1>, vector<8x128xf32>
    %177 = vector.shape_cast %173 : vector<8x1xi1> to vector<8x1xi1>
    %178 = vector.broadcast %177 : vector<8x1xi1> to vector<8x128xi1>
    %179 = arith.select %178, %165, %92 : vector<8x128xi1>, vector<8x128xf32>
    %180 = vector.broadcast %169 : vector<8x1xf32> to vector<8x128xf32>
    %181 = arith.addf %142, %180 : vector<8x128xf32>
    %182 = arith.maximumf %95, %181 : vector<8x128xf32>
    %183 = vector.broadcast %171 : vector<8x1xf32> to vector<8x128xf32>
    %184 = arith.addf %176, %183 : vector<8x128xf32>
    %185 = arith.maximumf %98, %184 : vector<8x128xf32>
    %c2_i32 = arith.constant 2 : i32
    %c7_i32_44 = arith.constant 7 : i32
    %186 = arith.subi %c7_i32_44, %c2_i32 : i32
    %187 = arith.index_cast %c2_i32 : i32 to index
    %c0_45 = arith.constant 0 : index
    %c0_46 = arith.constant 0 : index
    %188 = vector.load %arg11[%187, %c0_45, %c0_46] : memref<8x8x1024xbf16, #tpu.memory_space<vmem>>, vector<1x8x1024xbf16>
    %189 = vector.shape_cast %188 : vector<1x8x1024xbf16> to vector<8x1024xbf16>
    %190 = arith.index_cast %186 : i32 to index
    %c0_47 = arith.constant 0 : index
    %c0_48 = arith.constant 0 : index
    %191 = vector.load %arg11[%190, %c0_47, %c0_48] : memref<8x8x1024xbf16, #tpu.memory_space<vmem>>, vector<1x8x1024xbf16>
    %192 = vector.shape_cast %191 : vector<1x8x1024xbf16> to vector<8x1024xbf16>
    %193 = tpu.concatenate %142, %176 in 1 : vector<8x128xf32>, vector<8x128xf32> -> vector<8x256xf32>
    %194 = arith.truncf %193 : vector<8x256xf32> to vector<8x256xbf16>
    %c0_49 = arith.constant 0 : index
    %c0_50 = arith.constant 0 : index
    %195 = vector.load %arg5[%c0_49, %c0_50] : memref<256x1024xbf16, #tpu.memory_space<vmem>>, vector<256x1024xbf16>
    %cst_51 = arith.constant dense<0.000000e+00> : vector<8x1024xf32>
    %196 = tpu.matmul %194, %195, %cst_51 {dimension_numbers = #tpu.dot_dimension_numbers<[1], [0], [0], [1], [0, 0, 1, 1], [], []>} : vector<8x256xbf16>, vector<256x1024xbf16>, vector<8x1024xf32> -> vector<8x1024xf32>
    %197 = vector.extract_strided_slice %189 {offsets = [0, 0], sizes = [8, 512], strides = [1, 1]} : vector<8x1024xbf16> to vector<8x512xbf16>
    %198 = arith.extf %197 : vector<8x512xbf16> to vector<8x512xf32>
    %199 = vector.extract_strided_slice %196 {offsets = [0, 0], sizes = [8, 512], strides = [1, 1]} : vector<8x1024xf32> to vector<8x512xf32>
    %200 = arith.addf %198, %199 : vector<8x512xf32>
    %201 = vector.extract_strided_slice %192 {offsets = [0, 512], sizes = [8, 512], strides = [1, 1]} : vector<8x1024xbf16> to vector<8x512xbf16>
    %202 = arith.extf %201 : vector<8x512xbf16> to vector<8x512xf32>
    %203 = vector.extract_strided_slice %196 {offsets = [0, 512], sizes = [8, 512], strides = [1, 1]} : vector<8x1024xf32> to vector<8x512xf32>
    %204 = arith.addf %202, %203 : vector<8x512xf32>
    %205 = vector.extract_strided_slice %200 {offsets = [0, 0], sizes = [8, 128], strides = [1, 1]} : vector<8x512xf32> to vector<8x128xf32>
    %206 = arith.negf %205 : vector<8x128xf32>
    %207 = math.exp %206 : vector<8x128xf32>
    %cst_52 = arith.constant 1.000000e+00 : f32
    %208 = vector.broadcast %cst_52 : f32 to vector<8x128xf32>
    %209 = arith.addf %208, %207 : vector<8x128xf32>
    %210 = arith.divf %208, %209 : vector<8x128xf32>
    %211 = vector.extract_strided_slice %200 {offsets = [0, 128], sizes = [8, 128], strides = [1, 1]} : vector<8x512xf32> to vector<8x128xf32>
    %212 = arith.negf %211 : vector<8x128xf32>
    %213 = math.exp %212 : vector<8x128xf32>
    %cst_53 = arith.constant 1.000000e+00 : f32
    %214 = vector.broadcast %cst_53 : f32 to vector<8x128xf32>
    %215 = arith.addf %214, %213 : vector<8x128xf32>
    %216 = arith.divf %214, %215 : vector<8x128xf32>
    %217 = vector.extract_strided_slice %200 {offsets = [0, 256], sizes = [8, 128], strides = [1, 1]} : vector<8x512xf32> to vector<8x128xf32>
    %218 = math.tanh %217 : vector<8x128xf32>
    %219 = vector.extract_strided_slice %200 {offsets = [0, 384], sizes = [8, 128], strides = [1, 1]} : vector<8x512xf32> to vector<8x128xf32>
    %220 = arith.negf %219 : vector<8x128xf32>
    %221 = math.exp %220 : vector<8x128xf32>
    %cst_54 = arith.constant 1.000000e+00 : f32
    %222 = vector.broadcast %cst_54 : f32 to vector<8x128xf32>
    %223 = arith.addf %222, %221 : vector<8x128xf32>
    %224 = arith.divf %222, %223 : vector<8x128xf32>
    %225 = arith.mulf %216, %140 : vector<8x128xf32>
    %226 = arith.mulf %210, %218 : vector<8x128xf32>
    %227 = arith.addf %225, %226 : vector<8x128xf32>
    %228 = math.tanh %227 : vector<8x128xf32>
    %229 = arith.mulf %224, %228 : vector<8x128xf32>
    %230 = vector.extract_strided_slice %204 {offsets = [0, 0], sizes = [8, 128], strides = [1, 1]} : vector<8x512xf32> to vector<8x128xf32>
    %231 = arith.negf %230 : vector<8x128xf32>
    %232 = math.exp %231 : vector<8x128xf32>
    %cst_55 = arith.constant 1.000000e+00 : f32
    %233 = vector.broadcast %cst_55 : f32 to vector<8x128xf32>
    %234 = arith.addf %233, %232 : vector<8x128xf32>
    %235 = arith.divf %233, %234 : vector<8x128xf32>
    %236 = vector.extract_strided_slice %204 {offsets = [0, 128], sizes = [8, 128], strides = [1, 1]} : vector<8x512xf32> to vector<8x128xf32>
    %237 = arith.negf %236 : vector<8x128xf32>
    %238 = math.exp %237 : vector<8x128xf32>
    %cst_56 = arith.constant 1.000000e+00 : f32
    %239 = vector.broadcast %cst_56 : f32 to vector<8x128xf32>
    %240 = arith.addf %239, %238 : vector<8x128xf32>
    %241 = arith.divf %239, %240 : vector<8x128xf32>
    %242 = vector.extract_strided_slice %204 {offsets = [0, 256], sizes = [8, 128], strides = [1, 1]} : vector<8x512xf32> to vector<8x128xf32>
    %243 = math.tanh %242 : vector<8x128xf32>
    %244 = vector.extract_strided_slice %204 {offsets = [0, 384], sizes = [8, 128], strides = [1, 1]} : vector<8x512xf32> to vector<8x128xf32>
    %245 = arith.negf %244 : vector<8x128xf32>
    %246 = math.exp %245 : vector<8x128xf32>
    %cst_57 = arith.constant 1.000000e+00 : f32
    %247 = vector.broadcast %cst_57 : f32 to vector<8x128xf32>
    %248 = arith.addf %247, %246 : vector<8x128xf32>
    %249 = arith.divf %247, %248 : vector<8x128xf32>
    %250 = arith.mulf %241, %179 : vector<8x128xf32>
    %251 = arith.mulf %235, %243 : vector<8x128xf32>
    %252 = arith.addf %250, %251 : vector<8x128xf32>
    %253 = math.tanh %252 : vector<8x128xf32>
    %254 = arith.mulf %249, %253 : vector<8x128xf32>
    %c0_58 = arith.constant 0 : index
    %255 = arith.index_cast %c2_i32 : i32 to index
    %256 = vector.load %arg2[%c0_58, %255] : memref<8x8xf32, #tpu.memory_space<vmem>>, vector<8x1xf32>
    %c0_59 = arith.constant 0 : index
    %257 = arith.index_cast %186 : i32 to index
    %258 = vector.load %arg2[%c0_59, %257] : memref<8x8xf32, #tpu.memory_space<vmem>>, vector<8x1xf32>
    %cst_60 = arith.constant 0.000000e+00 : f32
    %259 = vector.broadcast %cst_60 : f32 to vector<8x1xf32>
    %260 = arith.cmpf oge, %258, %259 : vector<8x1xf32>
    %261 = vector.shape_cast %260 : vector<8x1xi1> to vector<8x1xi1>
    %262 = vector.broadcast %261 : vector<8x1xi1> to vector<8x128xi1>
    %263 = arith.select %262, %254, %176 : vector<8x128xi1>, vector<8x128xf32>
    %264 = vector.shape_cast %260 : vector<8x1xi1> to vector<8x1xi1>
    %265 = vector.broadcast %264 : vector<8x1xi1> to vector<8x128xi1>
    %266 = arith.select %265, %252, %179 : vector<8x128xi1>, vector<8x128xf32>
    %267 = vector.broadcast %256 : vector<8x1xf32> to vector<8x128xf32>
    %268 = arith.addf %229, %267 : vector<8x128xf32>
    %269 = arith.maximumf %182, %268 : vector<8x128xf32>
    %270 = vector.broadcast %258 : vector<8x1xf32> to vector<8x128xf32>
    %271 = arith.addf %263, %270 : vector<8x128xf32>
    %272 = arith.maximumf %185, %271 : vector<8x128xf32>
    %c3_i32 = arith.constant 3 : i32
    %c7_i32_61 = arith.constant 7 : i32
    %273 = arith.subi %c7_i32_61, %c3_i32 : i32
    %274 = arith.index_cast %c3_i32 : i32 to index
    %c0_62 = arith.constant 0 : index
    %c0_63 = arith.constant 0 : index
    %275 = vector.load %arg11[%274, %c0_62, %c0_63] : memref<8x8x1024xbf16, #tpu.memory_space<vmem>>, vector<1x8x1024xbf16>
    %276 = vector.shape_cast %275 : vector<1x8x1024xbf16> to vector<8x1024xbf16>
    %277 = arith.index_cast %273 : i32 to index
    %c0_64 = arith.constant 0 : index
    %c0_65 = arith.constant 0 : index
    %278 = vector.load %arg11[%277, %c0_64, %c0_65] : memref<8x8x1024xbf16, #tpu.memory_space<vmem>>, vector<1x8x1024xbf16>
    %279 = vector.shape_cast %278 : vector<1x8x1024xbf16> to vector<8x1024xbf16>
    %280 = tpu.concatenate %229, %263 in 1 : vector<8x128xf32>, vector<8x128xf32> -> vector<8x256xf32>
    %281 = arith.truncf %280 : vector<8x256xf32> to vector<8x256xbf16>
    %c0_66 = arith.constant 0 : index
    %c0_67 = arith.constant 0 : index
    %282 = vector.load %arg5[%c0_66, %c0_67] : memref<256x1024xbf16, #tpu.memory_space<vmem>>, vector<256x1024xbf16>
    %cst_68 = arith.constant dense<0.000000e+00> : vector<8x1024xf32>
    %283 = tpu.matmul %281, %282, %cst_68 {dimension_numbers = #tpu.dot_dimension_numbers<[1], [0], [0], [1], [0, 0, 1, 1], [], []>} : vector<8x256xbf16>, vector<256x1024xbf16>, vector<8x1024xf32> -> vector<8x1024xf32>
    %284 = vector.extract_strided_slice %276 {offsets = [0, 0], sizes = [8, 512], strides = [1, 1]} : vector<8x1024xbf16> to vector<8x512xbf16>
    %285 = arith.extf %284 : vector<8x512xbf16> to vector<8x512xf32>
    %286 = vector.extract_strided_slice %283 {offsets = [0, 0], sizes = [8, 512], strides = [1, 1]} : vector<8x1024xf32> to vector<8x512xf32>
    %287 = arith.addf %285, %286 : vector<8x512xf32>
    %288 = vector.extract_strided_slice %279 {offsets = [0, 512], sizes = [8, 512], strides = [1, 1]} : vector<8x1024xbf16> to vector<8x512xbf16>
    %289 = arith.extf %288 : vector<8x512xbf16> to vector<8x512xf32>
    %290 = vector.extract_strided_slice %283 {offsets = [0, 512], sizes = [8, 512], strides = [1, 1]} : vector<8x1024xf32> to vector<8x512xf32>
    %291 = arith.addf %289, %290 : vector<8x512xf32>
    %292 = vector.extract_strided_slice %287 {offsets = [0, 0], sizes = [8, 128], strides = [1, 1]} : vector<8x512xf32> to vector<8x128xf32>
    %293 = arith.negf %292 : vector<8x128xf32>
    %294 = math.exp %293 : vector<8x128xf32>
    %cst_69 = arith.constant 1.000000e+00 : f32
    %295 = vector.broadcast %cst_69 : f32 to vector<8x128xf32>
    %296 = arith.addf %295, %294 : vector<8x128xf32>
    %297 = arith.divf %295, %296 : vector<8x128xf32>
    %298 = vector.extract_strided_slice %287 {offsets = [0, 128], sizes = [8, 128], strides = [1, 1]} : vector<8x512xf32> to vector<8x128xf32>
    %299 = arith.negf %298 : vector<8x128xf32>
    %300 = math.exp %299 : vector<8x128xf32>
    %cst_70 = arith.constant 1.000000e+00 : f32
    %301 = vector.broadcast %cst_70 : f32 to vector<8x128xf32>
    %302 = arith.addf %301, %300 : vector<8x128xf32>
    %303 = arith.divf %301, %302 : vector<8x128xf32>
    %304 = vector.extract_strided_slice %287 {offsets = [0, 256], sizes = [8, 128], strides = [1, 1]} : vector<8x512xf32> to vector<8x128xf32>
    %305 = math.tanh %304 : vector<8x128xf32>
    %306 = vector.extract_strided_slice %287 {offsets = [0, 384], sizes = [8, 128], strides = [1, 1]} : vector<8x512xf32> to vector<8x128xf32>
    %307 = arith.negf %306 : vector<8x128xf32>
    %308 = math.exp %307 : vector<8x128xf32>
    %cst_71 = arith.constant 1.000000e+00 : f32
    %309 = vector.broadcast %cst_71 : f32 to vector<8x128xf32>
    %310 = arith.addf %309, %308 : vector<8x128xf32>
    %311 = arith.divf %309, %310 : vector<8x128xf32>
    %312 = arith.mulf %303, %227 : vector<8x128xf32>
    %313 = arith.mulf %297, %305 : vector<8x128xf32>
    %314 = arith.addf %312, %313 : vector<8x128xf32>
    %315 = math.tanh %314 : vector<8x128xf32>
    %316 = arith.mulf %311, %315 : vector<8x128xf32>
    %317 = vector.extract_strided_slice %291 {offsets = [0, 0], sizes = [8, 128], strides = [1, 1]} : vector<8x512xf32> to vector<8x128xf32>
    %318 = arith.negf %317 : vector<8x128xf32>
    %319 = math.exp %318 : vector<8x128xf32>
    %cst_72 = arith.constant 1.000000e+00 : f32
    %320 = vector.broadcast %cst_72 : f32 to vector<8x128xf32>
    %321 = arith.addf %320, %319 : vector<8x128xf32>
    %322 = arith.divf %320, %321 : vector<8x128xf32>
    %323 = vector.extract_strided_slice %291 {offsets = [0, 128], sizes = [8, 128], strides = [1, 1]} : vector<8x512xf32> to vector<8x128xf32>
    %324 = arith.negf %323 : vector<8x128xf32>
    %325 = math.exp %324 : vector<8x128xf32>
    %cst_73 = arith.constant 1.000000e+00 : f32
    %326 = vector.broadcast %cst_73 : f32 to vector<8x128xf32>
    %327 = arith.addf %326, %325 : vector<8x128xf32>
    %328 = arith.divf %326, %327 : vector<8x128xf32>
    %329 = vector.extract_strided_slice %291 {offsets = [0, 256], sizes = [8, 128], strides = [1, 1]} : vector<8x512xf32> to vector<8x128xf32>
    %330 = math.tanh %329 : vector<8x128xf32>
    %331 = vector.extract_strided_slice %291 {offsets = [0, 384], sizes = [8, 128], strides = [1, 1]} : vector<8x512xf32> to vector<8x128xf32>
    %332 = arith.negf %331 : vector<8x128xf32>
    %333 = math.exp %332 : vector<8x128xf32>
    %cst_74 = arith.constant 1.000000e+00 : f32
    %334 = vector.broadcast %cst_74 : f32 to vector<8x128xf32>
    %335 = arith.addf %334, %333 : vector<8x128xf32>
    %336 = arith.divf %334, %335 : vector<8x128xf32>
    %337 = arith.mulf %328, %266 : vector<8x128xf32>
    %338 = arith.mulf %322, %330 : vector<8x128xf32>
    %339 = arith.addf %337, %338 : vector<8x128xf32>
    %340 = math.tanh %339 : vector<8x128xf32>
    %341 = arith.mulf %336, %340 : vector<8x128xf32>
    %c0_75 = arith.constant 0 : index
    %342 = arith.index_cast %c3_i32 : i32 to index
    %343 = vector.load %arg2[%c0_75, %342] : memref<8x8xf32, #tpu.memory_space<vmem>>, vector<8x1xf32>
    %c0_76 = arith.constant 0 : index
    %344 = arith.index_cast %273 : i32 to index
    %345 = vector.load %arg2[%c0_76, %344] : memref<8x8xf32, #tpu.memory_space<vmem>>, vector<8x1xf32>
    %cst_77 = arith.constant 0.000000e+00 : f32
    %346 = vector.broadcast %cst_77 : f32 to vector<8x1xf32>
    %347 = arith.cmpf oge, %345, %346 : vector<8x1xf32>
    %348 = vector.shape_cast %347 : vector<8x1xi1> to vector<8x1xi1>
    %349 = vector.broadcast %348 : vector<8x1xi1> to vector<8x128xi1>
    %350 = arith.select %349, %341, %263 : vector<8x128xi1>, vector<8x128xf32>
    %351 = vector.shape_cast %347 : vector<8x1xi1> to vector<8x1xi1>
    %352 = vector.broadcast %351 : vector<8x1xi1> to vector<8x128xi1>
    %353 = arith.select %352, %339, %266 : vector<8x128xi1>, vector<8x128xf32>
    %354 = vector.broadcast %343 : vector<8x1xf32> to vector<8x128xf32>
    %355 = arith.addf %316, %354 : vector<8x128xf32>
    %356 = arith.maximumf %269, %355 : vector<8x128xf32>
    %357 = vector.broadcast %345 : vector<8x1xf32> to vector<8x128xf32>
    %358 = arith.addf %350, %357 : vector<8x128xf32>
    %359 = arith.maximumf %272, %358 : vector<8x128xf32>
    %c4_i32 = arith.constant 4 : i32
    %c7_i32_78 = arith.constant 7 : i32
    %360 = arith.subi %c7_i32_78, %c4_i32 : i32
    %361 = arith.index_cast %c4_i32 : i32 to index
    %c0_79 = arith.constant 0 : index
    %c0_80 = arith.constant 0 : index
    %362 = vector.load %arg11[%361, %c0_79, %c0_80] : memref<8x8x1024xbf16, #tpu.memory_space<vmem>>, vector<1x8x1024xbf16>
    %363 = vector.shape_cast %362 : vector<1x8x1024xbf16> to vector<8x1024xbf16>
    %364 = arith.index_cast %360 : i32 to index
    %c0_81 = arith.constant 0 : index
    %c0_82 = arith.constant 0 : index
    %365 = vector.load %arg11[%364, %c0_81, %c0_82] : memref<8x8x1024xbf16, #tpu.memory_space<vmem>>, vector<1x8x1024xbf16>
    %366 = vector.shape_cast %365 : vector<1x8x1024xbf16> to vector<8x1024xbf16>
    %367 = tpu.concatenate %316, %350 in 1 : vector<8x128xf32>, vector<8x128xf32> -> vector<8x256xf32>
    %368 = arith.truncf %367 : vector<8x256xf32> to vector<8x256xbf16>
    %c0_83 = arith.constant 0 : index
    %c0_84 = arith.constant 0 : index
    %369 = vector.load %arg5[%c0_83, %c0_84] : memref<256x1024xbf16, #tpu.memory_space<vmem>>, vector<256x1024xbf16>
    %cst_85 = arith.constant dense<0.000000e+00> : vector<8x1024xf32>
    %370 = tpu.matmul %368, %369, %cst_85 {dimension_numbers = #tpu.dot_dimension_numbers<[1], [0], [0], [1], [0, 0, 1, 1], [], []>} : vector<8x256xbf16>, vector<256x1024xbf16>, vector<8x1024xf32> -> vector<8x1024xf32>
    %371 = vector.extract_strided_slice %363 {offsets = [0, 0], sizes = [8, 512], strides = [1, 1]} : vector<8x1024xbf16> to vector<8x512xbf16>
    %372 = arith.extf %371 : vector<8x512xbf16> to vector<8x512xf32>
    %373 = vector.extract_strided_slice %370 {offsets = [0, 0], sizes = [8, 512], strides = [1, 1]} : vector<8x1024xf32> to vector<8x512xf32>
    %374 = arith.addf %372, %373 : vector<8x512xf32>
    %375 = vector.extract_strided_slice %366 {offsets = [0, 512], sizes = [8, 512], strides = [1, 1]} : vector<8x1024xbf16> to vector<8x512xbf16>
    %376 = arith.extf %375 : vector<8x512xbf16> to vector<8x512xf32>
    %377 = vector.extract_strided_slice %370 {offsets = [0, 512], sizes = [8, 512], strides = [1, 1]} : vector<8x1024xf32> to vector<8x512xf32>
    %378 = arith.addf %376, %377 : vector<8x512xf32>
    %379 = vector.extract_strided_slice %374 {offsets = [0, 0], sizes = [8, 128], strides = [1, 1]} : vector<8x512xf32> to vector<8x128xf32>
    %380 = arith.negf %379 : vector<8x128xf32>
    %381 = math.exp %380 : vector<8x128xf32>
    %cst_86 = arith.constant 1.000000e+00 : f32
    %382 = vector.broadcast %cst_86 : f32 to vector<8x128xf32>
    %383 = arith.addf %382, %381 : vector<8x128xf32>
    %384 = arith.divf %382, %383 : vector<8x128xf32>
    %385 = vector.extract_strided_slice %374 {offsets = [0, 128], sizes = [8, 128], strides = [1, 1]} : vector<8x512xf32> to vector<8x128xf32>
    %386 = arith.negf %385 : vector<8x128xf32>
    %387 = math.exp %386 : vector<8x128xf32>
    %cst_87 = arith.constant 1.000000e+00 : f32
    %388 = vector.broadcast %cst_87 : f32 to vector<8x128xf32>
    %389 = arith.addf %388, %387 : vector<8x128xf32>
    %390 = arith.divf %388, %389 : vector<8x128xf32>
    %391 = vector.extract_strided_slice %374 {offsets = [0, 256], sizes = [8, 128], strides = [1, 1]} : vector<8x512xf32> to vector<8x128xf32>
    %392 = math.tanh %391 : vector<8x128xf32>
    %393 = vector.extract_strided_slice %374 {offsets = [0, 384], sizes = [8, 128], strides = [1, 1]} : vector<8x512xf32> to vector<8x128xf32>
    %394 = arith.negf %393 : vector<8x128xf32>
    %395 = math.exp %394 : vector<8x128xf32>
    %cst_88 = arith.constant 1.000000e+00 : f32
    %396 = vector.broadcast %cst_88 : f32 to vector<8x128xf32>
    %397 = arith.addf %396, %395 : vector<8x128xf32>
    %398 = arith.divf %396, %397 : vector<8x128xf32>
    %399 = arith.mulf %390, %314 : vector<8x128xf32>
    %400 = arith.mulf %384, %392 : vector<8x128xf32>
    %401 = arith.addf %399, %400 : vector<8x128xf32>
    %402 = math.tanh %401 : vector<8x128xf32>
    %403 = arith.mulf %398, %402 : vector<8x128xf32>
    %404 = vector.extract_strided_slice %378 {offsets = [0, 0], sizes = [8, 128], strides = [1, 1]} : vector<8x512xf32> to vector<8x128xf32>
    %405 = arith.negf %404 : vector<8x128xf32>
    %406 = math.exp %405 : vector<8x128xf32>
    %cst_89 = arith.constant 1.000000e+00 : f32
    %407 = vector.broadcast %cst_89 : f32 to vector<8x128xf32>
    %408 = arith.addf %407, %406 : vector<8x128xf32>
    %409 = arith.divf %407, %408 : vector<8x128xf32>
    %410 = vector.extract_strided_slice %378 {offsets = [0, 128], sizes = [8, 128], strides = [1, 1]} : vector<8x512xf32> to vector<8x128xf32>
    %411 = arith.negf %410 : vector<8x128xf32>
    %412 = math.exp %411 : vector<8x128xf32>
    %cst_90 = arith.constant 1.000000e+00 : f32
    %413 = vector.broadcast %cst_90 : f32 to vector<8x128xf32>
    %414 = arith.addf %413, %412 : vector<8x128xf32>
    %415 = arith.divf %413, %414 : vector<8x128xf32>
    %416 = vector.extract_strided_slice %378 {offsets = [0, 256], sizes = [8, 128], strides = [1, 1]} : vector<8x512xf32> to vector<8x128xf32>
    %417 = math.tanh %416 : vector<8x128xf32>
    %418 = vector.extract_strided_slice %378 {offsets = [0, 384], sizes = [8, 128], strides = [1, 1]} : vector<8x512xf32> to vector<8x128xf32>
    %419 = arith.negf %418 : vector<8x128xf32>
    %420 = math.exp %419 : vector<8x128xf32>
    %cst_91 = arith.constant 1.000000e+00 : f32
    %421 = vector.broadcast %cst_91 : f32 to vector<8x128xf32>
    %422 = arith.addf %421, %420 : vector<8x128xf32>
    %423 = arith.divf %421, %422 : vector<8x128xf32>
    %424 = arith.mulf %415, %353 : vector<8x128xf32>
    %425 = arith.mulf %409, %417 : vector<8x128xf32>
    %426 = arith.addf %424, %425 : vector<8x128xf32>
    %427 = math.tanh %426 : vector<8x128xf32>
    %428 = arith.mulf %423, %427 : vector<8x128xf32>
    %c0_92 = arith.constant 0 : index
    %429 = arith.index_cast %c4_i32 : i32 to index
    %430 = vector.load %arg2[%c0_92, %429] : memref<8x8xf32, #tpu.memory_space<vmem>>, vector<8x1xf32>
    %c0_93 = arith.constant 0 : index
    %431 = arith.index_cast %360 : i32 to index
    %432 = vector.load %arg2[%c0_93, %431] : memref<8x8xf32, #tpu.memory_space<vmem>>, vector<8x1xf32>
    %cst_94 = arith.constant 0.000000e+00 : f32
    %433 = vector.broadcast %cst_94 : f32 to vector<8x1xf32>
    %434 = arith.cmpf oge, %432, %433 : vector<8x1xf32>
    %435 = vector.shape_cast %434 : vector<8x1xi1> to vector<8x1xi1>
    %436 = vector.broadcast %435 : vector<8x1xi1> to vector<8x128xi1>
    %437 = arith.select %436, %428, %350 : vector<8x128xi1>, vector<8x128xf32>
    %438 = vector.shape_cast %434 : vector<8x1xi1> to vector<8x1xi1>
    %439 = vector.broadcast %438 : vector<8x1xi1> to vector<8x128xi1>
    %440 = arith.select %439, %426, %353 : vector<8x128xi1>, vector<8x128xf32>
    %441 = vector.broadcast %430 : vector<8x1xf32> to vector<8x128xf32>
    %442 = arith.addf %403, %441 : vector<8x128xf32>
    %443 = arith.maximumf %356, %442 : vector<8x128xf32>
    %444 = vector.broadcast %432 : vector<8x1xf32> to vector<8x128xf32>
    %445 = arith.addf %437, %444 : vector<8x128xf32>
    %446 = arith.maximumf %359, %445 : vector<8x128xf32>
    %c5_i32 = arith.constant 5 : i32
    %c7_i32_95 = arith.constant 7 : i32
    %447 = arith.subi %c7_i32_95, %c5_i32 : i32
    %448 = arith.index_cast %c5_i32 : i32 to index
    %c0_96 = arith.constant 0 : index
    %c0_97 = arith.constant 0 : index
    %449 = vector.load %arg11[%448, %c0_96, %c0_97] : memref<8x8x1024xbf16, #tpu.memory_space<vmem>>, vector<1x8x1024xbf16>
    %450 = vector.shape_cast %449 : vector<1x8x1024xbf16> to vector<8x1024xbf16>
    %451 = arith.index_cast %447 : i32 to index
    %c0_98 = arith.constant 0 : index
    %c0_99 = arith.constant 0 : index
    %452 = vector.load %arg11[%451, %c0_98, %c0_99] : memref<8x8x1024xbf16, #tpu.memory_space<vmem>>, vector<1x8x1024xbf16>
    %453 = vector.shape_cast %452 : vector<1x8x1024xbf16> to vector<8x1024xbf16>
    %454 = tpu.concatenate %403, %437 in 1 : vector<8x128xf32>, vector<8x128xf32> -> vector<8x256xf32>
    %455 = arith.truncf %454 : vector<8x256xf32> to vector<8x256xbf16>
    %c0_100 = arith.constant 0 : index
    %c0_101 = arith.constant 0 : index
    %456 = vector.load %arg5[%c0_100, %c0_101] : memref<256x1024xbf16, #tpu.memory_space<vmem>>, vector<256x1024xbf16>
    %cst_102 = arith.constant dense<0.000000e+00> : vector<8x1024xf32>
    %457 = tpu.matmul %455, %456, %cst_102 {dimension_numbers = #tpu.dot_dimension_numbers<[1], [0], [0], [1], [0, 0, 1, 1], [], []>} : vector<8x256xbf16>, vector<256x1024xbf16>, vector<8x1024xf32> -> vector<8x1024xf32>
    %458 = vector.extract_strided_slice %450 {offsets = [0, 0], sizes = [8, 512], strides = [1, 1]} : vector<8x1024xbf16> to vector<8x512xbf16>
    %459 = arith.extf %458 : vector<8x512xbf16> to vector<8x512xf32>
    %460 = vector.extract_strided_slice %457 {offsets = [0, 0], sizes = [8, 512], strides = [1, 1]} : vector<8x1024xf32> to vector<8x512xf32>
    %461 = arith.addf %459, %460 : vector<8x512xf32>
    %462 = vector.extract_strided_slice %453 {offsets = [0, 512], sizes = [8, 512], strides = [1, 1]} : vector<8x1024xbf16> to vector<8x512xbf16>
    %463 = arith.extf %462 : vector<8x512xbf16> to vector<8x512xf32>
    %464 = vector.extract_strided_slice %457 {offsets = [0, 512], sizes = [8, 512], strides = [1, 1]} : vector<8x1024xf32> to vector<8x512xf32>
    %465 = arith.addf %463, %464 : vector<8x512xf32>
    %466 = vector.extract_strided_slice %461 {offsets = [0, 0], sizes = [8, 128], strides = [1, 1]} : vector<8x512xf32> to vector<8x128xf32>
    %467 = arith.negf %466 : vector<8x128xf32>
    %468 = math.exp %467 : vector<8x128xf32>
    %cst_103 = arith.constant 1.000000e+00 : f32
    %469 = vector.broadcast %cst_103 : f32 to vector<8x128xf32>
    %470 = arith.addf %469, %468 : vector<8x128xf32>
    %471 = arith.divf %469, %470 : vector<8x128xf32>
    %472 = vector.extract_strided_slice %461 {offsets = [0, 128], sizes = [8, 128], strides = [1, 1]} : vector<8x512xf32> to vector<8x128xf32>
    %473 = arith.negf %472 : vector<8x128xf32>
    %474 = math.exp %473 : vector<8x128xf32>
    %cst_104 = arith.constant 1.000000e+00 : f32
    %475 = vector.broadcast %cst_104 : f32 to vector<8x128xf32>
    %476 = arith.addf %475, %474 : vector<8x128xf32>
    %477 = arith.divf %475, %476 : vector<8x128xf32>
    %478 = vector.extract_strided_slice %461 {offsets = [0, 256], sizes = [8, 128], strides = [1, 1]} : vector<8x512xf32> to vector<8x128xf32>
    %479 = math.tanh %478 : vector<8x128xf32>
    %480 = vector.extract_strided_slice %461 {offsets = [0, 384], sizes = [8, 128], strides = [1, 1]} : vector<8x512xf32> to vector<8x128xf32>
    %481 = arith.negf %480 : vector<8x128xf32>
    %482 = math.exp %481 : vector<8x128xf32>
    %cst_105 = arith.constant 1.000000e+00 : f32
    %483 = vector.broadcast %cst_105 : f32 to vector<8x128xf32>
    %484 = arith.addf %483, %482 : vector<8x128xf32>
    %485 = arith.divf %483, %484 : vector<8x128xf32>
    %486 = arith.mulf %477, %401 : vector<8x128xf32>
    %487 = arith.mulf %471, %479 : vector<8x128xf32>
    %488 = arith.addf %486, %487 : vector<8x128xf32>
    %489 = math.tanh %488 : vector<8x128xf32>
    %490 = arith.mulf %485, %489 : vector<8x128xf32>
    %491 = vector.extract_strided_slice %465 {offsets = [0, 0], sizes = [8, 128], strides = [1, 1]} : vector<8x512xf32> to vector<8x128xf32>
    %492 = arith.negf %491 : vector<8x128xf32>
    %493 = math.exp %492 : vector<8x128xf32>
    %cst_106 = arith.constant 1.000000e+00 : f32
    %494 = vector.broadcast %cst_106 : f32 to vector<8x128xf32>
    %495 = arith.addf %494, %493 : vector<8x128xf32>
    %496 = arith.divf %494, %495 : vector<8x128xf32>
    %497 = vector.extract_strided_slice %465 {offsets = [0, 128], sizes = [8, 128], strides = [1, 1]} : vector<8x512xf32> to vector<8x128xf32>
    %498 = arith.negf %497 : vector<8x128xf32>
    %499 = math.exp %498 : vector<8x128xf32>
    %cst_107 = arith.constant 1.000000e+00 : f32
    %500 = vector.broadcast %cst_107 : f32 to vector<8x128xf32>
    %501 = arith.addf %500, %499 : vector<8x128xf32>
    %502 = arith.divf %500, %501 : vector<8x128xf32>
    %503 = vector.extract_strided_slice %465 {offsets = [0, 256], sizes = [8, 128], strides = [1, 1]} : vector<8x512xf32> to vector<8x128xf32>
    %504 = math.tanh %503 : vector<8x128xf32>
    %505 = vector.extract_strided_slice %465 {offsets = [0, 384], sizes = [8, 128], strides = [1, 1]} : vector<8x512xf32> to vector<8x128xf32>
    %506 = arith.negf %505 : vector<8x128xf32>
    %507 = math.exp %506 : vector<8x128xf32>
    %cst_108 = arith.constant 1.000000e+00 : f32
    %508 = vector.broadcast %cst_108 : f32 to vector<8x128xf32>
    %509 = arith.addf %508, %507 : vector<8x128xf32>
    %510 = arith.divf %508, %509 : vector<8x128xf32>
    %511 = arith.mulf %502, %440 : vector<8x128xf32>
    %512 = arith.mulf %496, %504 : vector<8x128xf32>
    %513 = arith.addf %511, %512 : vector<8x128xf32>
    %514 = math.tanh %513 : vector<8x128xf32>
    %515 = arith.mulf %510, %514 : vector<8x128xf32>
    %c0_109 = arith.constant 0 : index
    %516 = arith.index_cast %c5_i32 : i32 to index
    %517 = vector.load %arg2[%c0_109, %516] : memref<8x8xf32, #tpu.memory_space<vmem>>, vector<8x1xf32>
    %c0_110 = arith.constant 0 : index
    %518 = arith.index_cast %447 : i32 to index
    %519 = vector.load %arg2[%c0_110, %518] : memref<8x8xf32, #tpu.memory_space<vmem>>, vector<8x1xf32>
    %cst_111 = arith.constant 0.000000e+00 : f32
    %520 = vector.broadcast %cst_111 : f32 to vector<8x1xf32>
    %521 = arith.cmpf oge, %519, %520 : vector<8x1xf32>
    %522 = vector.shape_cast %521 : vector<8x1xi1> to vector<8x1xi1>
    %523 = vector.broadcast %522 : vector<8x1xi1> to vector<8x128xi1>
    %524 = arith.select %523, %515, %437 : vector<8x128xi1>, vector<8x128xf32>
    %525 = vector.shape_cast %521 : vector<8x1xi1> to vector<8x1xi1>
    %526 = vector.broadcast %525 : vector<8x1xi1> to vector<8x128xi1>
    %527 = arith.select %526, %513, %440 : vector<8x128xi1>, vector<8x128xf32>
    %528 = vector.broadcast %517 : vector<8x1xf32> to vector<8x128xf32>
    %529 = arith.addf %490, %528 : vector<8x128xf32>
    %530 = arith.maximumf %443, %529 : vector<8x128xf32>
    %531 = vector.broadcast %519 : vector<8x1xf32> to vector<8x128xf32>
    %532 = arith.addf %524, %531 : vector<8x128xf32>
    %533 = arith.maximumf %446, %532 : vector<8x128xf32>
    %c6_i32 = arith.constant 6 : i32
    %c7_i32_112 = arith.constant 7 : i32
    %534 = arith.subi %c7_i32_112, %c6_i32 : i32
    %535 = arith.index_cast %c6_i32 : i32 to index
    %c0_113 = arith.constant 0 : index
    %c0_114 = arith.constant 0 : index
    %536 = vector.load %arg11[%535, %c0_113, %c0_114] : memref<8x8x1024xbf16, #tpu.memory_space<vmem>>, vector<1x8x1024xbf16>
    %537 = vector.shape_cast %536 : vector<1x8x1024xbf16> to vector<8x1024xbf16>
    %538 = arith.index_cast %534 : i32 to index
    %c0_115 = arith.constant 0 : index
    %c0_116 = arith.constant 0 : index
    %539 = vector.load %arg11[%538, %c0_115, %c0_116] : memref<8x8x1024xbf16, #tpu.memory_space<vmem>>, vector<1x8x1024xbf16>
    %540 = vector.shape_cast %539 : vector<1x8x1024xbf16> to vector<8x1024xbf16>
    %541 = tpu.concatenate %490, %524 in 1 : vector<8x128xf32>, vector<8x128xf32> -> vector<8x256xf32>
    %542 = arith.truncf %541 : vector<8x256xf32> to vector<8x256xbf16>
    %c0_117 = arith.constant 0 : index
    %c0_118 = arith.constant 0 : index
    %543 = vector.load %arg5[%c0_117, %c0_118] : memref<256x1024xbf16, #tpu.memory_space<vmem>>, vector<256x1024xbf16>
    %cst_119 = arith.constant dense<0.000000e+00> : vector<8x1024xf32>
    %544 = tpu.matmul %542, %543, %cst_119 {dimension_numbers = #tpu.dot_dimension_numbers<[1], [0], [0], [1], [0, 0, 1, 1], [], []>} : vector<8x256xbf16>, vector<256x1024xbf16>, vector<8x1024xf32> -> vector<8x1024xf32>
    %545 = vector.extract_strided_slice %537 {offsets = [0, 0], sizes = [8, 512], strides = [1, 1]} : vector<8x1024xbf16> to vector<8x512xbf16>
    %546 = arith.extf %545 : vector<8x512xbf16> to vector<8x512xf32>
    %547 = vector.extract_strided_slice %544 {offsets = [0, 0], sizes = [8, 512], strides = [1, 1]} : vector<8x1024xf32> to vector<8x512xf32>
    %548 = arith.addf %546, %547 : vector<8x512xf32>
    %549 = vector.extract_strided_slice %540 {offsets = [0, 512], sizes = [8, 512], strides = [1, 1]} : vector<8x1024xbf16> to vector<8x512xbf16>
    %550 = arith.extf %549 : vector<8x512xbf16> to vector<8x512xf32>
    %551 = vector.extract_strided_slice %544 {offsets = [0, 512], sizes = [8, 512], strides = [1, 1]} : vector<8x1024xf32> to vector<8x512xf32>
    %552 = arith.addf %550, %551 : vector<8x512xf32>
    %553 = vector.extract_strided_slice %548 {offsets = [0, 0], sizes = [8, 128], strides = [1, 1]} : vector<8x512xf32> to vector<8x128xf32>
    %554 = arith.negf %553 : vector<8x128xf32>
    %555 = math.exp %554 : vector<8x128xf32>
    %cst_120 = arith.constant 1.000000e+00 : f32
    %556 = vector.broadcast %cst_120 : f32 to vector<8x128xf32>
    %557 = arith.addf %556, %555 : vector<8x128xf32>
    %558 = arith.divf %556, %557 : vector<8x128xf32>
    %559 = vector.extract_strided_slice %548 {offsets = [0, 128], sizes = [8, 128], strides = [1, 1]} : vector<8x512xf32> to vector<8x128xf32>
    %560 = arith.negf %559 : vector<8x128xf32>
    %561 = math.exp %560 : vector<8x128xf32>
    %cst_121 = arith.constant 1.000000e+00 : f32
    %562 = vector.broadcast %cst_121 : f32 to vector<8x128xf32>
    %563 = arith.addf %562, %561 : vector<8x128xf32>
    %564 = arith.divf %562, %563 : vector<8x128xf32>
    %565 = vector.extract_strided_slice %548 {offsets = [0, 256], sizes = [8, 128], strides = [1, 1]} : vector<8x512xf32> to vector<8x128xf32>
    %566 = math.tanh %565 : vector<8x128xf32>
    %567 = vector.extract_strided_slice %548 {offsets = [0, 384], sizes = [8, 128], strides = [1, 1]} : vector<8x512xf32> to vector<8x128xf32>
    %568 = arith.negf %567 : vector<8x128xf32>
    %569 = math.exp %568 : vector<8x128xf32>
    %cst_122 = arith.constant 1.000000e+00 : f32
    %570 = vector.broadcast %cst_122 : f32 to vector<8x128xf32>
    %571 = arith.addf %570, %569 : vector<8x128xf32>
    %572 = arith.divf %570, %571 : vector<8x128xf32>
    %573 = arith.mulf %564, %488 : vector<8x128xf32>
    %574 = arith.mulf %558, %566 : vector<8x128xf32>
    %575 = arith.addf %573, %574 : vector<8x128xf32>
    %576 = math.tanh %575 : vector<8x128xf32>
    %577 = arith.mulf %572, %576 : vector<8x128xf32>
    %578 = vector.extract_strided_slice %552 {offsets = [0, 0], sizes = [8, 128], strides = [1, 1]} : vector<8x512xf32> to vector<8x128xf32>
    %579 = arith.negf %578 : vector<8x128xf32>
    %580 = math.exp %579 : vector<8x128xf32>
    %cst_123 = arith.constant 1.000000e+00 : f32
    %581 = vector.broadcast %cst_123 : f32 to vector<8x128xf32>
    %582 = arith.addf %581, %580 : vector<8x128xf32>
    %583 = arith.divf %581, %582 : vector<8x128xf32>
    %584 = vector.extract_strided_slice %552 {offsets = [0, 128], sizes = [8, 128], strides = [1, 1]} : vector<8x512xf32> to vector<8x128xf32>
    %585 = arith.negf %584 : vector<8x128xf32>
    %586 = math.exp %585 : vector<8x128xf32>
    %cst_124 = arith.constant 1.000000e+00 : f32
    %587 = vector.broadcast %cst_124 : f32 to vector<8x128xf32>
    %588 = arith.addf %587, %586 : vector<8x128xf32>
    %589 = arith.divf %587, %588 : vector<8x128xf32>
    %590 = vector.extract_strided_slice %552 {offsets = [0, 256], sizes = [8, 128], strides = [1, 1]} : vector<8x512xf32> to vector<8x128xf32>
    %591 = math.tanh %590 : vector<8x128xf32>
    %592 = vector.extract_strided_slice %552 {offsets = [0, 384], sizes = [8, 128], strides = [1, 1]} : vector<8x512xf32> to vector<8x128xf32>
    %593 = arith.negf %592 : vector<8x128xf32>
    %594 = math.exp %593 : vector<8x128xf32>
    %cst_125 = arith.constant 1.000000e+00 : f32
    %595 = vector.broadcast %cst_125 : f32 to vector<8x128xf32>
    %596 = arith.addf %595, %594 : vector<8x128xf32>
    %597 = arith.divf %595, %596 : vector<8x128xf32>
    %598 = arith.mulf %589, %527 : vector<8x128xf32>
    %599 = arith.mulf %583, %591 : vector<8x128xf32>
    %600 = arith.addf %598, %599 : vector<8x128xf32>
    %601 = math.tanh %600 : vector<8x128xf32>
    %602 = arith.mulf %597, %601 : vector<8x128xf32>
    %c0_126 = arith.constant 0 : index
    %603 = arith.index_cast %c6_i32 : i32 to index
    %604 = vector.load %arg2[%c0_126, %603] : memref<8x8xf32, #tpu.memory_space<vmem>>, vector<8x1xf32>
    %c0_127 = arith.constant 0 : index
    %605 = arith.index_cast %534 : i32 to index
    %606 = vector.load %arg2[%c0_127, %605] : memref<8x8xf32, #tpu.memory_space<vmem>>, vector<8x1xf32>
    %cst_128 = arith.constant 0.000000e+00 : f32
    %607 = vector.broadcast %cst_128 : f32 to vector<8x1xf32>
    %608 = arith.cmpf oge, %606, %607 : vector<8x1xf32>
    %609 = vector.shape_cast %608 : vector<8x1xi1> to vector<8x1xi1>
    %610 = vector.broadcast %609 : vector<8x1xi1> to vector<8x128xi1>
    %611 = arith.select %610, %602, %524 : vector<8x128xi1>, vector<8x128xf32>
    %612 = vector.shape_cast %608 : vector<8x1xi1> to vector<8x1xi1>
    %613 = vector.broadcast %612 : vector<8x1xi1> to vector<8x128xi1>
    %614 = arith.select %613, %600, %527 : vector<8x128xi1>, vector<8x128xf32>
    %615 = vector.broadcast %604 : vector<8x1xf32> to vector<8x128xf32>
    %616 = arith.addf %577, %615 : vector<8x128xf32>
    %617 = arith.maximumf %530, %616 : vector<8x128xf32>
    %618 = vector.broadcast %606 : vector<8x1xf32> to vector<8x128xf32>
    %619 = arith.addf %611, %618 : vector<8x128xf32>
    %620 = arith.maximumf %533, %619 : vector<8x128xf32>
    %c7_i32_129 = arith.constant 7 : i32
    %c7_i32_130 = arith.constant 7 : i32
    %621 = arith.subi %c7_i32_130, %c7_i32_129 : i32
    %622 = arith.index_cast %c7_i32_129 : i32 to index
    %c0_131 = arith.constant 0 : index
    %c0_132 = arith.constant 0 : index
    %623 = vector.load %arg11[%622, %c0_131, %c0_132] : memref<8x8x1024xbf16, #tpu.memory_space<vmem>>, vector<1x8x1024xbf16>
    %624 = vector.shape_cast %623 : vector<1x8x1024xbf16> to vector<8x1024xbf16>
    %625 = arith.index_cast %621 : i32 to index
    %c0_133 = arith.constant 0 : index
    %c0_134 = arith.constant 0 : index
    %626 = vector.load %arg11[%625, %c0_133, %c0_134] : memref<8x8x1024xbf16, #tpu.memory_space<vmem>>, vector<1x8x1024xbf16>
    %627 = vector.shape_cast %626 : vector<1x8x1024xbf16> to vector<8x1024xbf16>
    %628 = tpu.concatenate %577, %611 in 1 : vector<8x128xf32>, vector<8x128xf32> -> vector<8x256xf32>
    %629 = arith.truncf %628 : vector<8x256xf32> to vector<8x256xbf16>
    %c0_135 = arith.constant 0 : index
    %c0_136 = arith.constant 0 : index
    %630 = vector.load %arg5[%c0_135, %c0_136] : memref<256x1024xbf16, #tpu.memory_space<vmem>>, vector<256x1024xbf16>
    %cst_137 = arith.constant dense<0.000000e+00> : vector<8x1024xf32>
    %631 = tpu.matmul %629, %630, %cst_137 {dimension_numbers = #tpu.dot_dimension_numbers<[1], [0], [0], [1], [0, 0, 1, 1], [], []>} : vector<8x256xbf16>, vector<256x1024xbf16>, vector<8x1024xf32> -> vector<8x1024xf32>
    %632 = vector.extract_strided_slice %624 {offsets = [0, 0], sizes = [8, 512], strides = [1, 1]} : vector<8x1024xbf16> to vector<8x512xbf16>
    %633 = arith.extf %632 : vector<8x512xbf16> to vector<8x512xf32>
    %634 = vector.extract_strided_slice %631 {offsets = [0, 0], sizes = [8, 512], strides = [1, 1]} : vector<8x1024xf32> to vector<8x512xf32>
    %635 = arith.addf %633, %634 : vector<8x512xf32>
    %636 = vector.extract_strided_slice %627 {offsets = [0, 512], sizes = [8, 512], strides = [1, 1]} : vector<8x1024xbf16> to vector<8x512xbf16>
    %637 = arith.extf %636 : vector<8x512xbf16> to vector<8x512xf32>
    %638 = vector.extract_strided_slice %631 {offsets = [0, 512], sizes = [8, 512], strides = [1, 1]} : vector<8x1024xf32> to vector<8x512xf32>
    %639 = arith.addf %637, %638 : vector<8x512xf32>
    %640 = vector.extract_strided_slice %635 {offsets = [0, 0], sizes = [8, 128], strides = [1, 1]} : vector<8x512xf32> to vector<8x128xf32>
    %641 = arith.negf %640 : vector<8x128xf32>
    %642 = math.exp %641 : vector<8x128xf32>
    %cst_138 = arith.constant 1.000000e+00 : f32
    %643 = vector.broadcast %cst_138 : f32 to vector<8x128xf32>
    %644 = arith.addf %643, %642 : vector<8x128xf32>
    %645 = arith.divf %643, %644 : vector<8x128xf32>
    %646 = vector.extract_strided_slice %635 {offsets = [0, 128], sizes = [8, 128], strides = [1, 1]} : vector<8x512xf32> to vector<8x128xf32>
    %647 = arith.negf %646 : vector<8x128xf32>
    %648 = math.exp %647 : vector<8x128xf32>
    %cst_139 = arith.constant 1.000000e+00 : f32
    %649 = vector.broadcast %cst_139 : f32 to vector<8x128xf32>
    %650 = arith.addf %649, %648 : vector<8x128xf32>
    %651 = arith.divf %649, %650 : vector<8x128xf32>
    %652 = vector.extract_strided_slice %635 {offsets = [0, 256], sizes = [8, 128], strides = [1, 1]} : vector<8x512xf32> to vector<8x128xf32>
    %653 = math.tanh %652 : vector<8x128xf32>
    %654 = vector.extract_strided_slice %635 {offsets = [0, 384], sizes = [8, 128], strides = [1, 1]} : vector<8x512xf32> to vector<8x128xf32>
    %655 = arith.negf %654 : vector<8x128xf32>
    %656 = math.exp %655 : vector<8x128xf32>
    %cst_140 = arith.constant 1.000000e+00 : f32
    %657 = vector.broadcast %cst_140 : f32 to vector<8x128xf32>
    %658 = arith.addf %657, %656 : vector<8x128xf32>
    %659 = arith.divf %657, %658 : vector<8x128xf32>
    %660 = arith.mulf %651, %575 : vector<8x128xf32>
    %661 = arith.mulf %645, %653 : vector<8x128xf32>
    %662 = arith.addf %660, %661 : vector<8x128xf32>
    %663 = math.tanh %662 : vector<8x128xf32>
    %664 = arith.mulf %659, %663 : vector<8x128xf32>
    %665 = vector.extract_strided_slice %639 {offsets = [0, 0], sizes = [8, 128], strides = [1, 1]} : vector<8x512xf32> to vector<8x128xf32>
    %666 = arith.negf %665 : vector<8x128xf32>
    %667 = math.exp %666 : vector<8x128xf32>
    %cst_141 = arith.constant 1.000000e+00 : f32
    %668 = vector.broadcast %cst_141 : f32 to vector<8x128xf32>
    %669 = arith.addf %668, %667 : vector<8x128xf32>
    %670 = arith.divf %668, %669 : vector<8x128xf32>
    %671 = vector.extract_strided_slice %639 {offsets = [0, 128], sizes = [8, 128], strides = [1, 1]} : vector<8x512xf32> to vector<8x128xf32>
    %672 = arith.negf %671 : vector<8x128xf32>
    %673 = math.exp %672 : vector<8x128xf32>
    %cst_142 = arith.constant 1.000000e+00 : f32
    %674 = vector.broadcast %cst_142 : f32 to vector<8x128xf32>
    %675 = arith.addf %674, %673 : vector<8x128xf32>
    %676 = arith.divf %674, %675 : vector<8x128xf32>
    %677 = vector.extract_strided_slice %639 {offsets = [0, 256], sizes = [8, 128], strides = [1, 1]} : vector<8x512xf32> to vector<8x128xf32>
    %678 = math.tanh %677 : vector<8x128xf32>
    %679 = vector.extract_strided_slice %639 {offsets = [0, 384], sizes = [8, 128], strides = [1, 1]} : vector<8x512xf32> to vector<8x128xf32>
    %680 = arith.negf %679 : vector<8x128xf32>
    %681 = math.exp %680 : vector<8x128xf32>
    %cst_143 = arith.constant 1.000000e+00 : f32
    %682 = vector.broadcast %cst_143 : f32 to vector<8x128xf32>
    %683 = arith.addf %682, %681 : vector<8x128xf32>
    %684 = arith.divf %682, %683 : vector<8x128xf32>
    %685 = arith.mulf %676, %614 : vector<8x128xf32>
    %686 = arith.mulf %670, %678 : vector<8x128xf32>
    %687 = arith.addf %685, %686 : vector<8x128xf32>
    %688 = math.tanh %687 : vector<8x128xf32>
    %689 = arith.mulf %684, %688 : vector<8x128xf32>
    %c0_144 = arith.constant 0 : index
    %690 = arith.index_cast %c7_i32_129 : i32 to index
    %691 = vector.load %arg2[%c0_144, %690] : memref<8x8xf32, #tpu.memory_space<vmem>>, vector<8x1xf32>
    %c0_145 = arith.constant 0 : index
    %692 = arith.index_cast %621 : i32 to index
    %693 = vector.load %arg2[%c0_145, %692] : memref<8x8xf32, #tpu.memory_space<vmem>>, vector<8x1xf32>
    %cst_146 = arith.constant 0.000000e+00 : f32
    %694 = vector.broadcast %cst_146 : f32 to vector<8x1xf32>
    %695 = arith.cmpf oge, %693, %694 : vector<8x1xf32>
    %696 = vector.shape_cast %695 : vector<8x1xi1> to vector<8x1xi1>
    %697 = vector.broadcast %696 : vector<8x1xi1> to vector<8x128xi1>
    %698 = arith.select %697, %689, %611 : vector<8x128xi1>, vector<8x128xf32>
    %699 = vector.shape_cast %695 : vector<8x1xi1> to vector<8x1xi1>
    %700 = vector.broadcast %699 : vector<8x1xi1> to vector<8x128xi1>
    %701 = arith.select %700, %687, %614 : vector<8x128xi1>, vector<8x128xf32>
    %702 = vector.broadcast %691 : vector<8x1xf32> to vector<8x128xf32>
    %703 = arith.addf %664, %702 : vector<8x128xf32>
    %704 = arith.maximumf %617, %703 : vector<8x128xf32>
    %705 = vector.broadcast %693 : vector<8x1xf32> to vector<8x128xf32>
    %706 = arith.addf %698, %705 : vector<8x128xf32>
    %707 = arith.maximumf %620, %706 : vector<8x128xf32>
    %c8_i32 = arith.constant 8 : i32
    %708 = tpu.concatenate %704, %707 in 1 : vector<8x128xf32>, vector<8x128xf32> -> vector<8x256xf32>
    %709 = arith.truncf %708 : vector<8x256xf32> to vector<8x256xbf16>
    %c0_147 = arith.constant 0 : index
    %c0_148 = arith.constant 0 : index
    %710 = vector.load %arg6[%c0_147, %c0_148] : memref<256x512xbf16, #tpu.memory_space<vmem>>, vector<256x512xbf16>
    %cst_149 = arith.constant dense<0.000000e+00> : vector<8x512xf32>
    %711 = tpu.matmul %709, %710, %cst_149 {dimension_numbers = #tpu.dot_dimension_numbers<[1], [0], [0], [1], [0, 0, 1, 1], [], []>} : vector<8x256xbf16>, vector<256x512xbf16>, vector<8x512xf32> -> vector<8x512xf32>
    %c0_150 = arith.constant 0 : index
    %c0_151 = arith.constant 0 : index
    %712 = vector.load %arg7[%c0_150, %c0_151] : memref<1x512xf32, #tpu.memory_space<vmem>>, vector<1x512xf32>
    %713 = vector.broadcast %712 : vector<1x512xf32> to vector<8x512xf32>
    %714 = arith.addf %711, %713 : vector<8x512xf32>
    %cst_152 = arith.constant 0.000000e+00 : f32
    %715 = vector.broadcast %cst_152 : f32 to vector<8x512xf32>
    %716 = arith.maximumf %714, %715 : vector<8x512xf32>
    %717 = arith.truncf %716 : vector<8x512xf32> to vector<8x512xbf16>
    %c0_153 = arith.constant 0 : index
    %c0_154 = arith.constant 0 : index
    %718 = vector.load %arg8[%c0_153, %c0_154] : memref<512x128xbf16, #tpu.memory_space<vmem>>, vector<512x128xbf16>
    %cst_155 = arith.constant dense<0.000000e+00> : vector<8x128xf32>
    %719 = tpu.matmul %717, %718, %cst_155 {dimension_numbers = #tpu.dot_dimension_numbers<[1], [0], [0], [1], [0, 0, 1, 1], [], []>} : vector<8x512xbf16>, vector<512x128xbf16>, vector<8x128xf32> -> vector<8x128xf32>
    %c0_156 = arith.constant 0 : index
    %c0_157 = arith.constant 0 : index
    %720 = vector.load %arg9[%c0_156, %c0_157] : memref<1x128xf32, #tpu.memory_space<vmem>>, vector<1x128xf32>
    %721 = vector.broadcast %720 : vector<1x128xf32> to vector<8x128xf32>
    %722 = arith.addf %719, %721 : vector<8x128xf32>
    %c0_158 = arith.constant 0 : index
    %c0_159 = arith.constant 0 : index
    %723 = vector.load %arg10[%c0_158, %c0_159] : memref<8x128xf32, #tpu.memory_space<vmem>>, vector<8x128xf32>
    tpu.vector_store %arg10[%c0_158, %c0_159], %722 {strides = array<i32>} : memref<8x128xf32, #tpu.memory_space<vmem>>, vector<8x128xf32>,
    return
  }
  func.func @transform_0(%arg0: i32) -> (i32, i32, i32) {
    %c0_i32 = arith.constant 0 : i32
    %c0_i32_0 = arith.constant 0 : i32
    %c0_i32_1 = arith.constant 0 : i32
    return %c0_i32, %arg0, %c0_i32_0 : i32, i32, i32
  }
  func.func @transform_1(%arg0: i32) -> (i32, i32) {
    %c0_i32 = arith.constant 0 : i32
    %c0_i32_0 = arith.constant 0 : i32
    return %arg0, %c0_i32 : i32, i32
  }
  func.func @transform_2(%arg0: i32) -> (i32, i32) {
    %c0_i32 = arith.constant 0 : i32
    %c0_i32_0 = arith.constant 0 : i32
    %c0_i32_1 = arith.constant 0 : i32
    return %c0_i32, %c0_i32_0 : i32, i32
  }
  func.func @transform_3(%arg0: i32) -> (i32, i32) {
    %c0_i32 = arith.constant 0 : i32
    %c0_i32_0 = arith.constant 0 : i32
    %c0_i32_1 = arith.constant 0 : i32
    return %c0_i32, %c0_i32_0 : i32, i32
  }
  func.func @transform_4(%arg0: i32) -> (i32, i32) {
    %c0_i32 = arith.constant 0 : i32
    %c0_i32_0 = arith.constant 0 : i32
    %c0_i32_1 = arith.constant 0 : i32
    return %c0_i32, %c0_i32_0 : i32, i32
  }
  func.func @transform_5(%arg0: i32) -> (i32, i32) {
    %c0_i32 = arith.constant 0 : i32
    %c0_i32_0 = arith.constant 0 : i32
    %c0_i32_1 = arith.constant 0 : i32
    return %c0_i32, %c0_i32_0 : i32, i32
  }
  func.func @transform_6(%arg0: i32) -> (i32, i32) {
    %c0_i32 = arith.constant 0 : i32
    %c0_i32_0 = arith.constant 0 : i32
    %c0_i32_1 = arith.constant 0 : i32
    return %c0_i32, %c0_i32_0 : i32, i32
  }
  func.func @transform_7(%arg0: i32) -> (i32, i32) {
    %c0_i32 = arith.constant 0 : i32
    %c0_i32_0 = arith.constant 0 : i32
    %c0_i32_1 = arith.constant 0 : i32
    return %c0_i32, %c0_i32_0 : i32, i32
  }
  func.func @transform_8(%arg0: i32) -> (i32, i32) {
    %c0_i32 = arith.constant 0 : i32
    %c0_i32_0 = arith.constant 0 : i32
    %c0_i32_1 = arith.constant 0 : i32
    return %c0_i32, %c0_i32_0 : i32, i32
  }
  func.func @transform_9(%arg0: i32) -> (i32, i32) {
    %c0_i32 = arith.constant 0 : i32
    %c0_i32_0 = arith.constant 0 : i32
    return %arg0, %c0_i32 : i32, i32
  }
}

</mosaic_0001>

<bundles_post_ra>
// kernel: tpu_custom_call.1
= control target key start
LH: loop header
LB: loop body
LE: loop exit
PB: predicated region body
PF: predicated region fallthrough
CT: control target
= control target key end

     0   :  { %14 = vsyncpa [#allocation4], 0  ;;  %s9774_s0 = inlined_call_operand.hbm [shape: bf16[8,8,128], index: 0, kind: input, shape index: {}]   ;;  %s9775_s1 = inlined_call_operand.hbm [shape: f32[8,8], index: 1, kind: input, shape index: {}]   ;;  %s9776_s2 = inlined_call_operand.hbm [shape: bf16[128,1024], index: 2, kind: input, shape index: {}]   ;;  %s9777_s3 = inlined_call_operand.hbm [shape: f32[1,1024], index: 3, kind: input, shape index: {}]   ;;  %s9778_s4 = inlined_call_operand.hbm [shape: bf16[256,1024], index: 4, kind: input, shape index: {}]   ;;  %s9779_s5 = inlined_call_operand.hbm [shape: bf16[256,512], index: 5, kind: input, shape index: {}]   ;;  %s9780_s6 = inlined_call_operand.vmem [shape: f32[1,512], index: 6, kind: input, shape index: {}]   ;;  %s9781_s7 = inlined_call_operand.hbm [shape: bf16[512,128], index: 7, kind: input, shape index: {}]   ;;  %s9782_s8 = inlined_call_operand.vmem [shape: f32[1,128], index: 8, kind: input, shape index: {}]   ;;  %s9783_s9 = inlined_call_operand.hbm [shape: f32[8,128], index: 9, kind: output, shape index: {}]  }
   0x1   :  { %15 = vsyncpa [#allocation7], 0 }
   0x2   :  { %16 = vsyncpa [#allocation10], 0 }
   0x3   :  { %17 = vsyncpa [#allocation13], 0  ;;  %s37_s11 = sshll.u32 %s9775_s1, 4  ;;  %s38_s11 = int_to_ptr.hbm [resolvable:$true] %s37_s11 }
   0x4   :  { %18 = vsyncpa [#allocation5], 0  ;;  %s7477_s12 = smov [#allocation6]   ;;  %s61_s16 = sshll.u32 %s9777_s3, 4  ;;  %s62_s16 = int_to_ptr.hbm [resolvable:$true] %s61_s16 }
   0x5   :  { %s39_s13 = sshll.u32 %s7477_s12, 4  ;;  %s7478_s17 = smov [#allocation9]   ;;  %s40_s13 = int_to_ptr.vmem [resolvable:$true] %s39_s13 }
   0x6   :  { %42 = dma.hbm_to_vmem [thread:$0]  %s38_s11, 128, %s40_s13, [#allocation7]  }
   0x7   :  { %s63_s18 = sshll.u32 %s7478_s17, 4  ;;  %s84_s21 = sshll.u32 %s9779_s5, 4  ;;  %s64_s18 = int_to_ptr.vmem [resolvable:$true] %s63_s18  ;;  %s85_s21 = int_to_ptr.hbm [resolvable:$true] %s84_s21 }
   0x8   :  { %66 = dma.hbm_to_vmem [thread:$0]  %s62_s16, 128, %s64_s18, [#allocation10]  }
   0x9   :  { %s7479_s1 = smov [#allocation12]   ;;  %s23_s25 = sshll.u32 %s9774_s0, 4  ;;  %s24_s25 = int_to_ptr.hbm [resolvable:$true] %s23_s25 }
   0xa   :  { %s86_s22 = sshll.u32 %s7479_s1, 4  ;;  %s7480_s26 = smov 256   ;;  %s87_s22 = int_to_ptr.vmem [resolvable:$true] %s86_s22 }
   0xb   :  { %s7481_s3 = smov 16   ;;  %s7482_s27 = smov [#allocation3]  }
   0xc   :  { %92 = dma.hbm_to_vmem [thread:$0]  %s85_s21, 8192, %s87_s22, [#allocation13], %s7480_s26, %s7480_s26, %s7481_s3  }
   0xd   :  { %s25_s28 = sshll.u32 %s7482_s27, 4  ;;  %s7483_s29 = smov 64   ;;  %s26_s28 = int_to_ptr.vmem [resolvable:$true] %s25_s28 }
   0xe   :  { %s7484_s30 = smov 4   ;;  %s47_s11 = sshll.u32 %s9776_s2, 4  ;;  %s48_s11 = int_to_ptr.hbm [resolvable:$true] %s47_s11 }
   0xf   :  { %31 = dma.hbm_to_vmem [thread:$0]  %s24_s25, 512, %s26_s28, [#allocation4], %s7483_s29, %s7483_s29, %s7484_s30  }
  0x10   :  { %s7485_s12 = smov [#allocation8]   ;;  %s71_s15 = sshll.u32 %s9778_s4, 4  ;;  %s72_s15 = int_to_ptr.hbm [resolvable:$true] %s71_s15 }
  0x11   :  { %s49_s13 = sshll.u32 %s7485_s12, 4  ;;  %s7486_s16 = smov 512   ;;  %s50_s13 = int_to_ptr.vmem [resolvable:$true] %s49_s13 }
  0x12   :  { %s7487_s17 = smov 32   ;;  %s7488_s18 = smov [#allocation11]  }
  0x13   :  { %55 = dma.hbm_to_vmem [thread:$0]  %s48_s11, 8192, %s50_s13, [#allocation7], %s7486_s16, %s7486_s16, %s7487_s17  }
  0x14   :  { %s73_s19 = sshll.u32 %s7488_s18, 4  ;;  %s99_s1 = sshll.u32 %s9781_s7, 4  ;;  %s74_s19 = int_to_ptr.vmem [resolvable:$true] %s73_s19  ;;  %s100_s1 = int_to_ptr.hbm [resolvable:$true] %s99_s1 }
  0x15   :  { %79 = dma.hbm_to_vmem [thread:$0]  %s72_s15, 16384, %s74_s19, [#allocation10], %s7486_s16, %s7486_s16, %s7487_s17  }
  0x16   :  { %s7489_s2 = smov [#allocation14]  }
  0x17   :  { %s101_s22 = sshll.u32 %s7489_s2, 4  ;;  %s102_s22 = int_to_ptr.vmem [resolvable:$true] %s101_s22 }
  0x18   :  { %107 = dma.hbm_to_vmem [thread:$0]  %s100_s1, 4096, %s102_s22, [#allocation13], %s7483_s29, %s7483_s29, %s7484_s30  }
  0x19   :  { %7467 = dma.done.wait [#allocation4], 512  }
  0x1a   :  { %7468 = vsyncadd [#allocation4], 4294966784 }
  0x1b   :  { %7469 = dma.done.wait [#allocation7], 8320  }
  0x1c   :  { %7470 = vsyncadd [#allocation7], 4294958976 }
  0x1d   :  { %7471 = dma.done.wait [#allocation10], 16512  }
  0x1e   :  { %7472 = vsyncadd [#allocation10], 4294950784 }
  0x1f   :  { %7473 = dma.done.wait [#allocation13], 12288  }
  0x20   :  { %7474 = vsyncadd [#allocation13], 4294955008  ;;  %v5688_v0 = vld [vmem:[#allocation8 + $0x1c0] sm:$0xf]  ;;  %v6746_v2 = vld [vmem:[#allocation8 + $0x1c4] sm:$0xf] }
  0x21   :  { %v6750_v1 = vld [vmem:[#allocation8 + $0x1dc] sm:$0xf0]  ;;  %v5690_v4 = vld [vmem:[#allocation8 + $0x1e0] sm:$0xf0]  ;;  %v5696_v5 = vld [vmem:[#allocation8 + $0x1c8] sm:$0xf] }
  0x22   :  { %v5689_v3 = vor.u32 %v6750_v1, %v5688_v0  ;;  %v6751_v6 = vld [vmem:[#allocation8 + $0x1e4] sm:$0xf0]  ;;  %v5693_v7 = vor.u32 %v6746_v2, %v5690_v4  ;;  %v6747_v9 = vld [vmem:[#allocation8 + $0x1cc] sm:$0xf]  ;;  %v5656_v11 = vld [vmem:[#allocation8 + $0x180] sm:$0xf] }
  0x23   :  { %v5697_v8 = vor.u32 %v6751_v6, %v5696_v5  ;;  %v5698_v10 = vld [vmem:[#allocation8 + $0x1e8] sm:$0xf0]  ;;  %v6742_v13 = vld [vmem:[#allocation8 + $0x19c] sm:$0xf0]  ;;  %v6738_v14 = vld [vmem:[#allocation8 + $0x184] sm:$0xf] }
  0x24   :  { %572 = vmatpush.bf16.msra.mxu0 %v5689_v3  ;;  %v5701_v12 = vor.u32 %v6747_v9, %v5698_v10  ;;  %v5658_v15 = vld [vmem:[#allocation8 + $0x1a0] sm:$0xf0]  ;;  %601 = vmatpush.bf16.msra.mxu1 %v5693_v7  ;;  %v5657_v16 = vor.u32 %v6742_v13, %v5656_v11  ;;  %v5664_v18 = vld [vmem:[#allocation8 + $0x188] sm:$0xf]  ;;  %v6739_v20 = vld [vmem:[#allocation8 + $0x18c] sm:$0xf] }
  0x25   :  { %630 = vmatpush.bf16.msra.mxu2 %v5697_v8  ;;  %v5661_v17 = vor.u32 %v6738_v14, %v5658_v15  ;;  %v6743_v19 = vld [vmem:[#allocation8 + $0x1a4] sm:$0xf0]  ;;  %v5666_v22 = vld [vmem:[#allocation8 + $0x1a8] sm:$0xf0]  ;;  %v5624_v23 = vld [vmem:[#allocation8 + $0x140] sm:$0xf] }
  0x26   :  { %659 = vmatpush.bf16.msra.mxu3 %v5701_v12  ;;  %v5665_v21 = vor.u32 %v6743_v19, %v5664_v18  ;;  %v6734_v24 = vld [vmem:[#allocation8 + $0x15c] sm:$0xf0]  ;;  %v5669_v25 = vor.u32 %v6739_v20, %v5666_v22  ;;  %v6730_v26 = vld [vmem:[#allocation8 + $0x144] sm:$0xf]  ;;  %v5632_v28 = vld [vmem:[#allocation8 + $0x148] sm:$0xf] }
  0x27   :  { %v5626_v27 = vld [vmem:[#allocation8 + $0x160] sm:$0xf0]  ;;  %v5625_v29 = vor.u32 %v6734_v24, %v5624_v23  ;;  %v6735_v30 = vld [vmem:[#allocation8 + $0x164] sm:$0xf0]  ;;  %v6731_v31 = vld [vmem:[#allocation8 + $0x14c] sm:$0xf] }
  0x28   :  { %573 = vmatpush.bf16.msra.mxu0 %v5657_v16  ;;  %v5634_v32 = vld [vmem:[#allocation8 + $0x168] sm:$0xf0]  ;;  %602 = vmatpush.bf16.msra.mxu1 %v5661_v17  ;;  %v5629_v33 = vor.u32 %v6730_v26, %v5626_v27  ;;  %v5633_v34 = vor.u32 %v6735_v30, %v5632_v28  ;;  %v5592_v35 = vld [vmem:[#allocation8 + $0x100] sm:$0xf]  ;;  %v6722_v37 = vld [vmem:[#allocation8 + $0x104] sm:$0xf] }
  0x29   :  { %631 = vmatpush.bf16.msra.mxu2 %v5665_v21  ;;  %v6726_v36 = vld [vmem:[#allocation8 + $0x11c] sm:$0xf0]  ;;  %v5637_v38 = vor.u32 %v6731_v31, %v5634_v32  ;;  %v5594_v39 = vld [vmem:[#allocation8 + $0x120] sm:$0xf0]  ;;  %v5600_v40 = vld [vmem:[#allocation8 + $0x108] sm:$0xf] }
  0x2a   :  { %660 = vmatpush.bf16.msra.mxu3 %v5669_v25  ;;  %v6727_v41 = vld [vmem:[#allocation8 + $0x124] sm:$0xf0]  ;;  %v6723_v42 = vld [vmem:[#allocation8 + $0x10c] sm:$0xf]  ;;  %v5593_v44 = vor.u32 %v6726_v36, %v5592_v35  ;;  %v5597_v45 = vor.u32 %v6722_v37, %v5594_v39  ;;  %v5560_v47 = vld [vmem:[#allocation8 + $0xc0] sm:$0xf] }
  0x2b   :  { %v5602_v43 = vld [vmem:[#allocation8 + $0x128] sm:$0xf0]  ;;  %v5601_v46 = vor.u32 %v6727_v41, %v5600_v40  ;;  %v6718_v48 = vld [vmem:[#allocation8 + $0xdc] sm:$0xf0]  ;;  %v6714_v49 = vld [vmem:[#allocation8 + $0xc4] sm:$0xf] }
  0x2c   :  { %574 = vmatpush.bf16.msra.mxu0 %v5625_v29  ;;  %603 = vmatpush.bf16.msra.mxu1 %v5629_v33  ;;  %v5605_v50 = vor.u32 %v6723_v42, %v5602_v43  ;;  %v5562_v51 = vld [vmem:[#allocation8 + $0xe0] sm:$0xf0]  ;;  %v5568_v52 = vld [vmem:[#allocation8 + $0xc8] sm:$0xf]  ;;  %v6715_v54 = vld [vmem:[#allocation8 + $0xcc] sm:$0xf]  ;;  %v5561_v56 = vor.u32 %v6718_v48, %v5560_v47 }
  0x2d   :  { %632 = vmatpush.bf16.msra.mxu2 %v5633_v34  ;;  %v6719_v53 = vld [vmem:[#allocation8 + $0xe4] sm:$0xf0]  ;;  %v5570_v55 = vld [vmem:[#allocation8 + $0xe8] sm:$0xf0]  ;;  %v5565_v57 = vor.u32 %v6714_v49, %v5562_v51  ;;  %v5528_v59 = vld [vmem:[#allocation8 + $0x80] sm:$0xf] }
  0x2e   :  { %661 = vmatpush.bf16.msra.mxu3 %v5637_v38  ;;  %v5569_v58 = vor.u32 %v6719_v53, %v5568_v52  ;;  %v6710_v60 = vld [vmem:[#allocation8 + $0x9c] sm:$0xf0]  ;;  %v6706_v61 = vld [vmem:[#allocation8 + $0x84] sm:$0xf]  ;;  %v5573_v62 = vor.u32 %v6715_v54, %v5570_v55  ;;  %v5536_v0 = vld [vmem:[#allocation8 + $0x88] sm:$0xf] }
  0x2f   :  { %v5530_v63 = vld [vmem:[#allocation8 + $0xa0] sm:$0xf0]  ;;  %v6711_v1 = vld [vmem:[#allocation8 + $0xa4] sm:$0xf0]  ;;  %v6707_v2 = vld [vmem:[#allocation8 + $0x8c] sm:$0xf]  ;;  %v5529_v4 = vor.u32 %v6710_v60, %v5528_v59 }
  0x30   :  { %575 = vmatpush.bf16.msra.mxu0 %v5593_v44  ;;  %604 = vmatpush.bf16.msra.mxu1 %v5597_v45  ;;  %v5538_v3 = vld [vmem:[#allocation8 + $0xa8] sm:$0xf0]  ;;  %v5533_v5 = vor.u32 %v6706_v61, %v5530_v63  ;;  %v5537_v6 = vor.u32 %v6711_v1, %v5536_v0  ;;  %v5496_v7 = vld [vmem:[#allocation8 + $0x40] sm:$0xf]  ;;  %v6698_v9 = vld [vmem:[#allocation8 + $0x44] sm:$0xf] }
  0x31   :  { %633 = vmatpush.bf16.msra.mxu2 %v5601_v46  ;;  %v6702_v8 = vld [vmem:[#allocation8 + $0x5c] sm:$0xf0]  ;;  %v5541_v10 = vor.u32 %v6707_v2, %v5538_v3  ;;  %v5498_v11 = vld [vmem:[#allocation8 + $0x60] sm:$0xf0]  ;;  %v5504_v12 = vld [vmem:[#allocation8 + $0x48] sm:$0xf] }
  0x32   :  { %662 = vmatpush.bf16.msra.mxu3 %v5605_v50  ;;  %v6703_v13 = vld [vmem:[#allocation8 + $0x64] sm:$0xf0]  ;;  %v6699_v14 = vld [vmem:[#allocation8 + $0x4c] sm:$0xf]  ;;  %v5497_v16 = vor.u32 %v6702_v8, %v5496_v7  ;;  %v5501_v17 = vor.u32 %v6698_v9, %v5498_v11  ;;  %v5464_v19 = vld [vmem:[#allocation8] sm:$0xf] }
  0x33   :  { %v5506_v15 = vld [vmem:[#allocation8 + $0x68] sm:$0xf0]  ;;  %v5505_v18 = vor.u32 %v6703_v13, %v5504_v12  ;;  %v6694_v20 = vld [vmem:[#allocation8 + $0x1c] sm:$0xf0]  ;;  %v6690_v21 = vld [vmem:[#allocation8 + $0x4] sm:$0xf] }
  0x34   :  { %576 = vmatpush.bf16.msra.mxu0 %v5561_v56  ;;  %605 = vmatpush.bf16.msra.mxu1 %v5565_v57  ;;  %v5509_v22 = vor.u32 %v6699_v14, %v5506_v15  ;;  %v5466_v23 = vld [vmem:[#allocation8 + $0x20] sm:$0xf0]  ;;  %v5472_v24 = vld [vmem:[#allocation8 + $0x8] sm:$0xf]  ;;  %v6691_v26 = vld [vmem:[#allocation8 + $0xc] sm:$0xf]  ;;  %v5465_v28 = vor.u32 %v6694_v20, %v5464_v19 }
  0x35   :  { %634 = vmatpush.bf16.msra.mxu2 %v5569_v58  ;;  %v6695_v25 = vld [vmem:[#allocation8 + $0x24] sm:$0xf0]  ;;  %v5474_v27 = vld [vmem:[#allocation8 + $0x28] sm:$0xf0]  ;;  %v5469_v29 = vor.u32 %v6690_v21, %v5466_v23  ;;  %v7571_v32 = vld [vmem:[#allocation3] sm:$0xff]  ;;  %s7499_s24 = smov [#allocation15]  }
  0x36   :  { %663 = vmatpush.bf16.msra.mxu3 %v5573_v62  ;;  %v5473_v30 = vor.u32 %v6695_v25, %v5472_v24  ;;  %v5477_v31 = vor.u32 %v6691_v26, %v5474_v27  ;;  %v5704_v33 = vld [vmem:[#allocation8 + $0x1d0] sm:$0xf]  ;;  %v6748_v35 = vld [vmem:[#allocation8 + $0x1d4] sm:$0xf]  ;;  %v5712_v38 = vld [vmem:[#allocation8 + $0x1d8] sm:$0xf] }
  0x37   :  { %v6752_v34 = vld [vmem:[#allocation8 + $0x1ec] sm:$0xf0]  ;;  %v5706_v37 = vld [vmem:[#allocation8 + $0x1f0] sm:$0xf0]  ;;  %v6753_v39 = vld [vmem:[#allocation8 + $0x1f4] sm:$0xf0] }
  0x38   :  { %577 = vmatpush.bf16.msra.mxu0 %v5529_v4  ;;  %606 = vmatpush.bf16.msra.mxu1 %v5533_v5  ;;  %v5705_v36 = vor.u32 %v6752_v34, %v5704_v33  ;;  %v5709_v40 = vor.u32 %v6748_v35, %v5706_v37  ;;  %v5713_v41 = vor.u32 %v6753_v39, %v5712_v38  ;;  %v6749_v42 = vld [vmem:[#allocation8 + $0x1dc] sm:$0xf]  ;;  %v5672_v44 = vld [vmem:[#allocation8 + $0x190] sm:$0xf]  ;;  %v6740_v47 = vld [vmem:[#allocation8 + $0x194] sm:$0xf] }
  0x39   :  { %635 = vmatpush.bf16.msra.mxu2 %v5537_v6  ;;  %v5714_v43 = vld [vmem:[#allocation8 + $0x1f8] sm:$0xf0]  ;;  %v6744_v46 = vld [vmem:[#allocation8 + $0x1ac] sm:$0xf0]  ;;  %v5674_v48 = vld [vmem:[#allocation8 + $0x1b0] sm:$0xf0] }
  0x3a   :  { %664 = vmatpush.bf16.msra.mxu3 %v5541_v10  ;;  %v5717_v45 = vor.u32 %v6749_v42, %v5714_v43  ;;  %v5673_v49 = vor.u32 %v6744_v46, %v5672_v44  ;;  %v5677_v50 = vor.u32 %v6740_v47, %v5674_v48  ;;  %v5680_v51 = vld [vmem:[#allocation8 + $0x198] sm:$0xf]  ;;  %v6741_v53 = vld [vmem:[#allocation8 + $0x19c] sm:$0xf]  ;;  %v5640_v56 = vld [vmem:[#allocation8 + $0x150] sm:$0xf] }
  0x3b   :  { %v6745_v52 = vld [vmem:[#allocation8 + $0x1b4] sm:$0xf0]  ;;  %v5682_v55 = vld [vmem:[#allocation8 + $0x1b8] sm:$0xf0]  ;;  %v6736_v57 = vld [vmem:[#allocation8 + $0x16c] sm:$0xf0] }
  0x3c   :  { %578 = vmatpush.bf16.msra.mxu0 %v5497_v16  ;;  %607 = vmatpush.bf16.msra.mxu1 %v5501_v17  ;;  %v5681_v54 = vor.u32 %v6745_v52, %v5680_v51  ;;  %v5685_v58 = vor.u32 %v6741_v53, %v5682_v55  ;;  %v6732_v59 = vld [vmem:[#allocation8 + $0x154] sm:$0xf]  ;;  %v5648_v61 = vld [vmem:[#allocation8 + $0x158] sm:$0xf]  ;;  %v5641_v62 = vor.u32 %v6736_v57, %v5640_v56  ;;  %v6733_v0 = vld [vmem:[#allocation8 + $0x15c] sm:$0xf] }
  0x3d   :  { %636 = vmatpush.bf16.msra.mxu2 %v5505_v18  ;;  %v5642_v60 = vld [vmem:[#allocation8 + $0x170] sm:$0xf0]  ;;  %v6737_v63 = vld [vmem:[#allocation8 + $0x174] sm:$0xf0]  ;;  %v5650_v1 = vld [vmem:[#allocation8 + $0x178] sm:$0xf0] }
  0x3e   :  { %665 = vmatpush.bf16.msra.mxu3 %v5509_v22  ;;  %v5645_v2 = vor.u32 %v6732_v59, %v5642_v60  ;;  %v5649_v3 = vor.u32 %v6737_v63, %v5648_v61  ;;  %v5608_v4 = vld [vmem:[#allocation8 + $0x110] sm:$0xf]  ;;  %v5653_v6 = vor.u32 %v6733_v0, %v5650_v1  ;;  %v6724_v7 = vld [vmem:[#allocation8 + $0x114] sm:$0xf]  ;;  %v5616_v10 = vld [vmem:[#allocation8 + $0x118] sm:$0xf] }
  0x3f   :  { %v6728_v5 = vld [vmem:[#allocation8 + $0x12c] sm:$0xf0]  ;;  %v5610_v8 = vld [vmem:[#allocation8 + $0x130] sm:$0xf0]  ;;  %v6729_v11 = vld [vmem:[#allocation8 + $0x134] sm:$0xf0] }
  0x40   :  { %579 = vmatpush.bf16.msra.mxu0 %v5465_v28  ;;  %608 = vmatpush.bf16.msra.mxu1 %v5469_v29  ;;  %v5609_v9 = vor.u32 %v6728_v5, %v5608_v4  ;;  %v7577_v12 = vld [vmem:[#allocation3 + $0x8] sm:$0xff]  ;;  %v5613_v13 = vor.u32 %v6724_v7, %v5610_v8  ;;  %v6725_v14 = vld [vmem:[#allocation8 + $0x11c] sm:$0xf]  ;;  %v5617_v16 = vor.u32 %v6729_v11, %v5616_v10  ;;  %v5576_v18 = vld [vmem:[#allocation8 + $0xd0] sm:$0xf]  ;;  %s5431_s25 = sshll.u32 %s7499_s24, 4  ;;  %s5432_s25 = int_to_ptr.vmem [resolvable:$true] %s5431_s25 }
  0x41   :  { %637 = vmatpush.bf16.msra.mxu2 %v5473_v30  ;;  %v5618_v15 = vld [vmem:[#allocation8 + $0x138] sm:$0xf0]  ;;  %v6720_v19 = vld [vmem:[#allocation8 + $0xec] sm:$0xf0]  ;;  %v6716_v20 = vld [vmem:[#allocation8 + $0xd4] sm:$0xf] }
  0x42   :  { %666 = vmatpush.bf16.msra.mxu3 %v5477_v31  ;;  %v5621_v17 = vor.u32 %v6725_v14, %v5618_v15  ;;  %v5577_v21 = vor.u32 %v6720_v19, %v5576_v18  ;;  %v5578_v22 = vld [vmem:[#allocation8 + $0xf0] sm:$0xf0]  ;;  %v5584_v23 = vld [vmem:[#allocation8 + $0xd8] sm:$0xf]  ;;  %v6717_v27 = vld [vmem:[#allocation8 + $0xdc] sm:$0xf] }
  0x43   :  { %580 = vmatmul.bf16.vlgmr.msra.gmra.mxu0 %v7571_v32  ;;  %609 = vmatmul.bf16.vlgmr.msra.gmra.mxu1 %v7571_v32  ;;  %v6721_v24 = vld [vmem:[#allocation8 + $0xf4] sm:$0xf0]  ;;  %v5581_v25 = vor.u32 %v6716_v20, %v5578_v22  ;;  %v5586_v28 = vld [vmem:[#allocation8 + $0xf8] sm:$0xf0]  ;;  %v5544_v29 = vld [vmem:[#allocation8 + $0x90] sm:$0xf] }
  0x44   :  { %638 = vmatmul.bf16.vlgmr.msra.gmra.mxu2 %v7571_v32  ;;  %688 = vmatpush.bf16.msrb.mxu0 %v5705_v36  ;;  %v5585_v26 = vor.u32 %v6721_v24, %v5584_v23  ;;  %v5589_v30 = vor.u32 %v6717_v27, %v5586_v28  ;;  %v6712_v31 = vld [vmem:[#allocation8 + $0xac] sm:$0xf0]  ;;  %v6708_v33 = vld [vmem:[#allocation8 + $0x94] sm:$0xf]  ;;  %v5552_v37 = vld [vmem:[#allocation8 + $0x98] sm:$0xf] }
  0x45   :  { %667 = vmatmul.bf16.vlgmr.msra.gmra.mxu3 %v7571_v32  ;;  %717 = vmatpush.bf16.msrb.mxu1 %v5709_v40  ;;  %v5546_v34 = vld [vmem:[#allocation8 + $0xb0] sm:$0xf0]  ;;  %v5545_v35 = vor.u32 %v6712_v31, %v5544_v29  ;;  %v6713_v38 = vld [vmem:[#allocation8 + $0xb4] sm:$0xf0]  ;;  %v6709_v39 = vld [vmem:[#allocation8 + $0x9c] sm:$0xf] }
  0x46   :  { %746 = vmatpush.bf16.msrb.mxu2 %v5713_v41  ;;  %775 = vmatpush.bf16.msrb.mxu3 %v5717_v45  ;;  %v5549_v36 = vor.u32 %v6708_v33, %v5546_v34  ;;  %v5554_v40 = vld [vmem:[#allocation8 + $0xb8] sm:$0xf0]  ;;  %v5512_v41 = vld [vmem:[#allocation8 + $0x50] sm:$0xf]  ;;  %v5553_v43 = vor.u32 %v6713_v38, %v5552_v37  ;;  %v6700_v44 = vld [vmem:[#allocation8 + $0x54] sm:$0xf] }
  0x47   :  { %v6704_v42 = vld [vmem:[#allocation8 + $0x6c] sm:$0xf0]  ;;  %v5514_v45 = vld [vmem:[#allocation8 + $0x70] sm:$0xf0]  ;;  %v5557_v46 = vor.u32 %v6709_v39, %v5554_v40  ;;  %v5520_v48 = vld [vmem:[#allocation8 + $0x58] sm:$0xf] }
  0x48   :  { %689 = vmatpush.bf16.msrb.mxu0 %v5673_v49  ;;  %v5513_v47 = vor.u32 %v6704_v42, %v5512_v41  ;;  %v6705_v49 = vld [vmem:[#allocation8 + $0x74] sm:$0xf0]  ;;  %v5517_v51 = vor.u32 %v6700_v44, %v5514_v45  ;;  %v5522_v52 = vld [vmem:[#allocation8 + $0x78] sm:$0xf0]  ;;  %v5480_v53 = vld [vmem:[#allocation8 + $0x10] sm:$0xf] }
  0x49   :  { %718 = vmatpush.bf16.msrb.mxu1 %v5677_v50  ;;  %v6701_v50 = vld [vmem:[#allocation8 + $0x5c] sm:$0xf]  ;;  %v6692_v55 = vld [vmem:[#allocation8 + $0x14] sm:$0xf]  ;;  %v5521_v57 = vor.u32 %v6705_v49, %v5520_v48  ;;  %v5488_v60 = vld [vmem:[#allocation8 + $0x18] sm:$0xf] }
  0x4a   :  { %747 = vmatpush.bf16.msrb.mxu2 %v5681_v54  ;;  %776 = vmatpush.bf16.msrb.mxu3 %v5685_v58  ;;  %v6696_v54 = vld [vmem:[#allocation8 + $0x2c] sm:$0xf0]  ;;  %v5482_v56 = vld [vmem:[#allocation8 + $0x30] sm:$0xf0]  ;;  %v5525_v58 = vor.u32 %v6701_v50, %v5522_v52  ;;  %v6697_v61 = vld [vmem:[#allocation8 + $0x34] sm:$0xf0] }
  0x4b   :  { %v5481_v59 = vor.u32 %v6696_v54, %v5480_v53  ;;  %v5485_v63 = vor.u32 %v6692_v55, %v5482_v56  ;;  %v6693_v0 = vld [vmem:[#allocation8 + $0x1c] sm:$0xf]  ;;  %v5944_v4 = vld [vmem:[#allocation11 + $0x1c0] sm:$0xf]  ;;  %v5946_v10 = vld [vmem:[#allocation11 + $0x1e0] sm:$0xf0] }
  0x4c   :  { %690 = vmatpush.bf16.msrb.mxu0 %v5641_v62  ;;  %v7583_v62 = vld [vmem:[#allocation3 + $0x10] sm:$0xff]  ;;  %v5490_v1 = vld [vmem:[#allocation8 + $0x38] sm:$0xf0]  ;;  %v7621_v42 = vld [vmem:[#allocation3 + $0x18] sm:$0xff]  ;;  %s5433_s27 = sshll.u32 %s9783_s9, 4  ;;  %s5434_s27 = int_to_ptr.hbm [resolvable:$true] %s5433_s27 }
  0x4d   :  { %719 = vmatpush.bf16.msrb.mxu1 %v5645_v2  ;;  %v5489_v2 = vor.u32 %v6697_v61, %v5488_v60  ;;  %v6814_v5 = vld [vmem:[#allocation11 + $0x1dc] sm:$0xf0]  ;;  %v6874_v14 = vld [vmem:[#allocation11 + $0x3c4] sm:$0xf] }
  0x4e   :  { %748 = vmatpush.bf16.msrb.mxu2 %v5649_v3  ;;  %777 = vmatpush.bf16.msrb.mxu3 %v5653_v6  ;;  %v5493_v3 = vor.u32 %v6693_v0, %v5490_v1  ;;  %v6200_v6 = vld [vmem:[#allocation11 + $0x3c0] sm:$0xf]  ;;  %v7589_v7 = vor.u32 %v6814_v5, %v5944_v4  ;;  %v6202_v15 = vld [vmem:[#allocation11 + $0x3e0] sm:$0xf0] }
  0x4f   :  { %v6878_v8 = vld [vmem:[#allocation11 + $0x3dc] sm:$0xf0]  ;;  %v6802_v23 = vld [vmem:[#allocation11 + $0x184] sm:$0xf] }
  0x50   :  { %691 = vmatpush.bf16.msrb.mxu0 %v5609_v9  ;;  %10104 = vst [vmem:[#allocation21_spill] sm:$0xff] %v7589_v7  ;;  %v6810_v9 = vld [vmem:[#allocation11 + $0x1c4] sm:$0xf]  ;;  %v7591_v11 = vor.u32 %v6878_v8, %v6200_v6  ;;  %v6806_v18 = vld [vmem:[#allocation11 + $0x19c] sm:$0xf0] }
  0x51   :  { %720 = vmatpush.bf16.msrb.mxu1 %v5613_v13  ;;  %v7593_v13 = vor.u32 %v6810_v9, %v5946_v10  ;;  %v6168_v19 = vld [vmem:[#allocation11 + $0x380] sm:$0xf]  ;;  %v5914_v24 = vld [vmem:[#allocation11 + $0x1a0] sm:$0xf0] }
  0x52   :  { %749 = vmatpush.bf16.msrb.mxu2 %v5617_v16  ;;  %778 = vmatpush.bf16.msrb.mxu3 %v5621_v17  ;;  %10105 = vst [vmem:[#allocation22_spill] sm:$0xff] %v7591_v11  ;;  %v5912_v16 = vld [vmem:[#allocation11 + $0x180] sm:$0xf]  ;;  %v7596_v17 = vor.u32 %v6874_v14, %v6202_v15  ;;  %v6170_v27 = vld [vmem:[#allocation11 + $0x3a0] sm:$0xf0] }
  0x53   :  { %585 = vmatmul.bf16.gmra.mxu0 %v7577_v12  ;;  %614 = vmatmul.bf16.gmra.mxu1 %v7577_v12  ;;  %10106 = vst [vmem:[#allocation23_spill] sm:$0xff] %v7593_v13  ;;  %v6870_v20 = vld [vmem:[#allocation11 + $0x39c] sm:$0xf0]  ;;  %v6794_v34 = vld [vmem:[#allocation11 + $0x144] sm:$0xf] }
  0x54   :  { %643 = vmatmul.bf16.gmra.mxu2 %v7577_v12  ;;  %692 = vmatpush.bf16.msrb.mxu0 %v5577_v21  ;;  %10107 = vst [vmem:[#allocation24_spill] sm:$0xff] %v7596_v17  ;;  %v7600_v21 = vor.u32 %v6806_v18, %v5912_v16  ;;  %v7602_v22 = vor.u32 %v6870_v20, %v6168_v19  ;;  %v5880_v28 = vld [vmem:[#allocation11 + $0x140] sm:$0xf]  ;;  %v6858_v37 = vld [vmem:[#allocation11 + $0x344] sm:$0xf] }
  0x55   :  { %672 = vmatmul.bf16.gmra.mxu3 %v7577_v12  ;;  %721 = vmatpush.bf16.msrb.mxu1 %v5581_v25  ;;  %v6866_v25 = vld [vmem:[#allocation11 + $0x384] sm:$0xf]  ;;  %v6798_v29 = vld [vmem:[#allocation11 + $0x15c] sm:$0xf0] }
  0x56   :  { %750 = vmatpush.bf16.msrb.mxu2 %v5585_v26  ;;  %779 = vmatpush.bf16.msrb.mxu3 %v5589_v30  ;;  %10108 = vst [vmem:[#allocation25_spill] sm:$0xff] %v7600_v21  ;;  %v7605_v26 = vor.u32 %v6802_v23, %v5914_v24  ;;  %v7607_v30 = vor.u32 %v6866_v25, %v6170_v27  ;;  %v6136_v31 = vld [vmem:[#allocation11 + $0x340] sm:$0xf]  ;;  %v6138_v38 = vld [vmem:[#allocation11 + $0x360] sm:$0xf0] }
  0x57   :  { %10109 = vst [vmem:[#allocation26_spill] sm:$0xff] %v7602_v22  ;;  %v6862_v33 = vld [vmem:[#allocation11 + $0x35c] sm:$0xf0]  ;;  %v7619_v41 = vor.u32 %v6858_v37, %v6138_v38  ;;  %v6786_v48 = vld [vmem:[#allocation11 + $0x104] sm:$0xf] }
  0x58   :  { %693 = vmatpush.bf16.msrb.mxu0 %v5545_v35  ;;  %10110 = vst [vmem:[#allocation27_spill] sm:$0xff] %v7605_v26  ;;  %v7610_v35 = vor.u32 %v6798_v29, %v5880_v28  ;;  %v7614_v39 = vor.u32 %v6862_v33, %v6136_v31  ;;  %v6790_v44 = vld [vmem:[#allocation11 + $0x11c] sm:$0xf0]  ;;  %v5850_v49 = vld [vmem:[#allocation11 + $0x120] sm:$0xf0] }
  0x59   :  { %722 = vmatpush.bf16.msrb.mxu1 %v5549_v36  ;;  %10111 = vst [vmem:[#allocation28_spill] sm:$0xff] %v7607_v30  ;;  %v5882_v36 = vld [vmem:[#allocation11 + $0x160] sm:$0xf0]  ;;  %v6104_v45 = vld [vmem:[#allocation11 + $0x300] sm:$0xf] }
  0x5a   :  { %751 = vmatpush.bf16.msrb.mxu2 %v5553_v43  ;;  %780 = vmatpush.bf16.msrb.mxu3 %v5557_v46  ;;  %10112 = vst [vmem:[#allocation29_spill] sm:$0xff] %v7610_v35  ;;  %v7616_v40 = vor.u32 %v6794_v34, %v5882_v36  ;;  %v5848_v43 = vld [vmem:[#allocation11 + $0x100] sm:$0xf]  ;;  %v6850_v52 = vld [vmem:[#allocation11 + $0x304] sm:$0xf] }
  0x5b   :  { %10113 = vst [vmem:[#allocation30_spill] sm:$0xff] %v7614_v39  ;;  %v7631_v46 = vor.u32 %v6790_v44, %v5848_v43  ;;  %v6106_v53 = vld [vmem:[#allocation11 + $0x320] sm:$0xf0]  ;;  %v5816_v54 = vld [vmem:[#allocation11 + $0xc0] sm:$0xf] }
  0x5c   :  { %694 = vmatpush.bf16.msrb.mxu0 %v5513_v47  ;;  %10114 = vst [vmem:[#allocation31_spill] sm:$0xff] %v7616_v40  ;;  %v6854_v47 = vld [vmem:[#allocation11 + $0x31c] sm:$0xf0]  ;;  %v7638_v55 = vor.u32 %v6850_v52, %v6106_v53  ;;  %v6778_v61 = vld [vmem:[#allocation11 + $0xc4] sm:$0xf] }
  0x5d   :  { %723 = vmatpush.bf16.msrb.mxu1 %v5517_v51  ;;  %10115 = vst [vmem:[#allocation32_spill] sm:$0xff] %v7619_v41  ;;  %v7633_v50 = vor.u32 %v6854_v47, %v6104_v45  ;;  %v7635_v51 = vor.u32 %v6786_v48, %v5850_v49  ;;  %v6782_v56 = vld [vmem:[#allocation11 + $0xdc] sm:$0xf0]  ;;  %v6842_v0 = vld [vmem:[#allocation11 + $0x2c4] sm:$0xf] }
  0x5e   :  { %752 = vmatpush.bf16.msrb.mxu2 %v5521_v57  ;;  %781 = vmatpush.bf16.msrb.mxu3 %v5525_v58  ;;  %10116 = vst [vmem:[#allocation33_spill] sm:$0xff] %v7631_v46  ;;  %v6072_v57 = vld [vmem:[#allocation11 + $0x2c0] sm:$0xf]  ;;  %v6770_v9 = vld [vmem:[#allocation11 + $0x84] sm:$0xf] }
  0x5f   :  { %10117 = vst [vmem:[#allocation34_spill] sm:$0xff] %v7633_v50  ;;  %v6846_v58 = vld [vmem:[#allocation11 + $0x2dc] sm:$0xf0]  ;;  %v5786_v14 = vld [vmem:[#allocation11 + $0xa0] sm:$0xf0] }
  0x60   :  { %695 = vmatpush.bf16.msrb.mxu0 %v5481_v59  ;;  %10118 = vst [vmem:[#allocation35_spill] sm:$0xff] %v7635_v51  ;;  %v7642_v59 = vor.u32 %v6782_v56, %v5816_v54  ;;  %v7644_v60 = vor.u32 %v6846_v58, %v6072_v57  ;;  %v6774_v4 = vld [vmem:[#allocation11 + $0x9c] sm:$0xf0]  ;;  %v6834_v15 = vld [vmem:[#allocation11 + $0x284] sm:$0xf]  ;;  %v7658_v19 = vor.u32 %v6770_v9, %v5786_v14 }
  0x61   :  { %724 = vmatpush.bf16.msrb.mxu1 %v5485_v63  ;;  %10119 = vst [vmem:[#allocation36_spill] sm:$0xff] %v7638_v55  ;;  %v5818_v63 = vld [vmem:[#allocation11 + $0xe0] sm:$0xf0]  ;;  %v6040_v6 = vld [vmem:[#allocation11 + $0x280] sm:$0xf] }
  0x62   :  { %753 = vmatpush.bf16.msrb.mxu2 %v5489_v2  ;;  %782 = vmatpush.bf16.msrb.mxu3 %v5493_v3  ;;  %10120 = vst [vmem:[#allocation37_spill] sm:$0xff] %v7642_v59  ;;  %v7647_v1 = vor.u32 %v6778_v61, %v5818_v63  ;;  %v6074_v2 = vld [vmem:[#allocation11 + $0x2e0] sm:$0xf0]  ;;  %v5784_v3 = vld [vmem:[#allocation11 + $0x80] sm:$0xf] }
  0x63   :  { %590 = vmatmul.bf16.gmra.mxu0 %v7583_v62  ;;  %619 = vmatmul.bf16.gmra.mxu1 %v7583_v62  ;;  %10121 = vst [vmem:[#allocation38_spill] sm:$0xff] %v7644_v60  ;;  %v7649_v5 = vor.u32 %v6842_v0, %v6074_v2  ;;  %v6838_v8 = vld [vmem:[#allocation11 + $0x29c] sm:$0xf0]  ;;  %v7652_v10 = vor.u32 %v6774_v4, %v5784_v3  ;;  %v6042_v16 = vld [vmem:[#allocation11 + $0x2a0] sm:$0xf0] }
  0x64   :  { %648 = vmatmul.bf16.gmra.mxu2 %v7583_v62  ;;  %1646 = vmatpush.bf16.msra.mxu0 %v7589_v7  ;;  %10122 = vst [vmem:[#allocation39_spill] sm:$0xff] %v7647_v1  ;;  %v7656_v18 = vor.u32 %v6838_v8, %v6040_v6  ;;  %v7661_v20 = vor.u32 %v6834_v15, %v6042_v16  ;;  %v5752_v23 = vld [vmem:[#allocation11 + $0x40] sm:$0xf]  ;;  %v6762_v28 = vld [vmem:[#allocation11 + $0x44] sm:$0xf] }
  0x65   :  { %677 = vmatmul.bf16.gmra.mxu3 %v7583_v62  ;;  %1659 = vmatpush.bf16.msra.mxu1 %v7591_v11  ;;  %10123 = vst [vmem:[#allocation40_spill] sm:$0xff] %v7649_v5  ;;  %v6766_v24 = vld [vmem:[#allocation11 + $0x5c] sm:$0xf0]  ;;  %v5754_v29 = vld [vmem:[#allocation11 + $0x60] sm:$0xf0] }
  0x66   :  { %1672 = vmatpush.bf16.msra.mxu2 %v7593_v13  ;;  %1685 = vmatpush.bf16.msra.mxu3 %v7596_v17  ;;  %10124 = vst [vmem:[#allocation41_spill] sm:$0xff] %v7652_v10  ;;  %v6008_v25 = vld [vmem:[#allocation11 + $0x240] sm:$0xf]  ;;  %v6826_v31 = vld [vmem:[#allocation11 + $0x244] sm:$0xf]  ;;  %v7667_v34 = vor.u32 %v6766_v24, %v5752_v23  ;;  %v7671_v37 = vor.u32 %v6762_v28, %v5754_v29 }
  0x67   :  { %10125 = vst [vmem:[#allocation42_spill] sm:$0xff] %v7656_v18  ;;  %v6830_v27 = vld [vmem:[#allocation11 + $0x25c] sm:$0xf0]  ;;  %v6010_v33 = vld [vmem:[#allocation11 + $0x260] sm:$0xf0] }
  0x68   :  { %1647 = vmatpush.bf16.msra.mxu0 %v7600_v21  ;;  %10126 = vst [vmem:[#allocation43_spill] sm:$0xff] %v7658_v19  ;;  %v7669_v36 = vor.u32 %v6830_v27, %v6008_v25  ;;  %v7674_v38 = vor.u32 %v6826_v31, %v6010_v33  ;;  %v5720_v43 = vld [vmem:[#allocation11] sm:$0xf]  ;;  %v6754_v49 = vld [vmem:[#allocation11 + $0x4] sm:$0xf] }
  0x69   :  { %1660 = vmatpush.bf16.msra.mxu1 %v7602_v22  ;;  %10127 = vst [vmem:[#allocation44_spill] sm:$0xff] %v7661_v20  ;;  %v6758_v44 = vld [vmem:[#allocation11 + $0x1c] sm:$0xf0]  ;;  %v5722_v52 = vld [vmem:[#allocation11 + $0x20] sm:$0xf0] }
  0x6a   :  { %1673 = vmatpush.bf16.msra.mxu2 %v7605_v26  ;;  %1686 = vmatpush.bf16.msra.mxu3 %v7607_v30  ;;  %10128 = vst [vmem:[#allocation45_spill] sm:$0xff] %v7667_v34  ;;  %v5976_v45 = vld [vmem:[#allocation11 + $0x200] sm:$0xf]  ;;  %v7680_v47 = vor.u32 %v6758_v44, %v5720_v43  ;;  %v7686_v54 = vor.u32 %v6754_v49, %v5722_v52  ;;  %v6818_v56 = vld [vmem:[#allocation11 + $0x204] sm:$0xf] }
  0x6b   :  { %10129 = vst [vmem:[#allocation46_spill] sm:$0xff] %v7669_v36  ;;  %v6822_v48 = vld [vmem:[#allocation11 + $0x21c] sm:$0xf0]  ;;  %v5978_v57 = vld [vmem:[#allocation11 + $0x220] sm:$0xf0] }
  0x6c   :  { %1648 = vmatpush.bf16.msra.mxu0 %v7610_v35  ;;  %10130 = vst [vmem:[#allocation47_spill] sm:$0xff] %v7671_v37  ;;  %v7684_v53 = vor.u32 %v6822_v48, %v5976_v45  ;;  %v5952_v58 = vld [vmem:[#allocation11 + $0x1c8] sm:$0xf]  ;;  %v6811_v4 = vld [vmem:[#allocation11 + $0x1cc] sm:$0xf] }
  0x6d   :  { %1661 = vmatpush.bf16.msra.mxu1 %v7614_v39  ;;  %10131 = vst [vmem:[#allocation48_spill] sm:$0xff] %v7674_v38  ;;  %v6815_v61 = vld [vmem:[#allocation11 + $0x1e4] sm:$0xf0]  ;;  %v5954_v6 = vld [vmem:[#allocation11 + $0x1e8] sm:$0xf0] }
  0x6e   :  { %1674 = vmatpush.bf16.msra.mxu2 %v7616_v40  ;;  %1687 = vmatpush.bf16.msra.mxu3 %v7619_v41  ;;  %10132 = vst [vmem:[#allocation49_spill] sm:$0xff] %v7680_v47  ;;  %v6208_v63 = vld [vmem:[#allocation11 + $0x3c8] sm:$0xf]  ;;  %v7691_v2 = vor.u32 %v6815_v61, %v5952_v58  ;;  %v6875_v8 = vld [vmem:[#allocation11 + $0x3cc] sm:$0xf]  ;;  %v7696_v9 = vor.u32 %v6811_v4, %v5954_v6 }
  0x6f   :  { %10133 = vst [vmem:[#allocation50_spill] sm:$0xff] %v7684_v53  ;;  %v6879_v0 = vld [vmem:[#allocation11 + $0x3e4] sm:$0xf0]  ;;  %v6210_v14 = vld [vmem:[#allocation11 + $0x3e8] sm:$0xf0] }
  0x70   :  { %1649 = vmatpush.bf16.msra.mxu0 %v7631_v46  ;;  %10134 = vst [vmem:[#allocation51_spill] sm:$0xff] %v7686_v54  ;;  %v7693_v3 = vor.u32 %v6879_v0, %v6208_v63  ;;  %v5920_v15 = vld [vmem:[#allocation11 + $0x188] sm:$0xf]  ;;  %v7700_v23 = vor.u32 %v6875_v8, %v6210_v14  ;;  %v6803_v27 = vld [vmem:[#allocation11 + $0x18c] sm:$0xf] }
  0x71   :  { %1662 = vmatpush.bf16.msra.mxu1 %v7633_v50  ;;  %10136 = vst [vmem:[#allocation53_spill] sm:$0xff] %v7691_v2  ;;  %v6807_v16 = vld [vmem:[#allocation11 + $0x1a4] sm:$0xf0]  ;;  %v5922_v29 = vld [vmem:[#allocation11 + $0x1a8] sm:$0xf0] }
  0x72   :  { %1675 = vmatpush.bf16.msra.mxu2 %v7635_v51  ;;  %1688 = vmatpush.bf16.msra.mxu3 %v7638_v55  ;;  %10137 = vst [vmem:[#allocation54_spill] sm:$0xff] %v7693_v3  ;;  %v6176_v24 = vld [vmem:[#allocation11 + $0x388] sm:$0xf]  ;;  %v7704_v28 = vor.u32 %v6807_v16, %v5920_v15  ;;  %v6867_v31 = vld [vmem:[#allocation11 + $0x38c] sm:$0xf]  ;;  %v7710_v44 = vor.u32 %v6803_v27, %v5922_v29 }
  0x73   :  { %595 = vmatmul.bf16.gmra.mxu0 %v7621_v42  ;;  %624 = vmatmul.bf16.gmra.mxu1 %v7621_v42  ;;  %10138 = vst [vmem:[#allocation55_spill] sm:$0xff] %v7696_v9  ;;  %v6871_v25 = vld [vmem:[#allocation11 + $0x3a4] sm:$0xf0]  ;;  %v6178_v33 = vld [vmem:[#allocation11 + $0x3a8] sm:$0xf0] }
  0x74   :  { %653 = vmatmul.bf16.gmra.mxu2 %v7621_v42  ;;  %1650 = vmatpush.bf16.msra.mxu0 %v7642_v59  ;;  %10139 = vst [vmem:[#allocation56_spill] sm:$0xff] %v7700_v23  ;;  %v7708_v43 = vor.u32 %v6871_v25, %v6176_v24  ;;  %v7713_v45 = vor.u32 %v6867_v31, %v6178_v33  ;;  %v5888_v48 = vld [vmem:[#allocation11 + $0x148] sm:$0xf]  ;;  %v5890_v58 = vld [vmem:[#allocation11 + $0x168] sm:$0xf0] }
  0x75   :  { %682 = vmatmul.bf16.gmra.mxu3 %v7621_v42  ;;  %1663 = vmatpush.bf16.msra.mxu1 %v7644_v60  ;;  %10140 = vst [vmem:[#allocation57_spill] sm:$0xff] %v7704_v28  ;;  %v6799_v49 = vld [vmem:[#allocation11 + $0x164] sm:$0xf0]  ;;  %v6859_v61 = vld [vmem:[#allocation11 + $0x34c] sm:$0xf] }
  0x76   :  { %1676 = vmatpush.bf16.msra.mxu2 %v7647_v1  ;;  %1689 = vmatpush.bf16.msra.mxu3 %v7649_v5  ;;  %10141 = vst [vmem:[#allocation58_spill] sm:$0xff] %v7708_v43  ;;  %v6144_v52 = vld [vmem:[#allocation11 + $0x348] sm:$0xf]  ;;  %v6146_v63 = vld [vmem:[#allocation11 + $0x368] sm:$0xf0]  ;;  %v7719_v0 = vor.u32 %v6799_v49, %v5888_v48 }
  0x77   :  { %10142 = vst [vmem:[#allocation59_spill] sm:$0xff] %v7710_v44  ;;  %v5856_v8 = vld [vmem:[#allocation11 + $0x108] sm:$0xf]  ;;  %v7726_v16 = vor.u32 %v6859_v61, %v6146_v63  ;;  %v6787_v25 = vld [vmem:[#allocation11 + $0x10c] sm:$0xf] }
  0x78   :  { %1651 = vmatpush.bf16.msra.mxu0 %v7652_v10  ;;  %10143 = vst [vmem:[#allocation60_spill] sm:$0xff] %v7713_v45  ;;  %v6791_v14 = vld [vmem:[#allocation11 + $0x124] sm:$0xf0]  ;;  %v5858_v27 = vld [vmem:[#allocation11 + $0x128] sm:$0xf0] }
  0x79   :  { %1664 = vmatpush.bf16.msra.mxu1 %v7656_v18  ;;  %10144 = vst [vmem:[#allocation61_spill] sm:$0xff] %v7719_v0  ;;  %v6112_v15 = vld [vmem:[#allocation11 + $0x308] sm:$0xf]  ;;  %v6851_v29 = vld [vmem:[#allocation11 + $0x30c] sm:$0xf]  ;;  %v7732_v33 = vor.u32 %v6791_v14, %v5856_v8  ;;  %v7738_v49 = vor.u32 %v6787_v25, %v5858_v27 }
  0x7a   :  { %1677 = vmatpush.bf16.msra.mxu2 %v7658_v19  ;;  %1690 = vmatpush.bf16.msra.mxu3 %v7661_v20  ;;  %10147 = vst [vmem:[#allocation64_spill] sm:$0xff] %v7726_v16  ;;  %v6855_v24 = vld [vmem:[#allocation11 + $0x324] sm:$0xf0]  ;;  %v6114_v31 = vld [vmem:[#allocation11 + $0x328] sm:$0xf0] }
  0x7b   :  { %10148 = vst [vmem:[#allocation65_spill] sm:$0xff] %v7732_v33  ;;  %v7736_v48 = vor.u32 %v6855_v24, %v6112_v15  ;;  %v6779_v61 = vld [vmem:[#allocation11 + $0xcc] sm:$0xf]  ;;  %v5792_v25 = vld [vmem:[#allocation11 + $0x88] sm:$0xf] }
  0x7c   :  { %1652 = vmatpush.bf16.msra.mxu0 %v7667_v34  ;;  %10150 = vst [vmem:[#allocation67_spill] sm:$0xff] %v7738_v49  ;;  %v5826_v63 = vld [vmem:[#allocation11 + $0xe8] sm:$0xf0]  ;;  %v6775_v27 = vld [vmem:[#allocation11 + $0xa4] sm:$0xf0] }
  0x7d   :  { %1665 = vmatpush.bf16.msra.mxu1 %v7669_v36  ;;  %10149 = vst [vmem:[#allocation66_spill] sm:$0xff] %v7736_v48  ;;  %v6843_v8 = vld [vmem:[#allocation11 + $0x2cc] sm:$0xf]  ;;  %v7750_v24 = vor.u32 %v6779_v61, %v5826_v63  ;;  %v5760_v61 = vld [vmem:[#allocation11 + $0x48] sm:$0xf] }
  0x7e   :  { %1678 = vmatpush.bf16.msra.mxu2 %v7671_v37  ;;  %1691 = vmatpush.bf16.msra.mxu3 %v7674_v38  ;;  %v6082_v14 = vld [vmem:[#allocation11 + $0x2e8] sm:$0xf0]  ;;  %v6767_v63 = vld [vmem:[#allocation11 + $0x64] sm:$0xf0] }
  0x7f   :  { %10154 = vst [vmem:[#allocation71_spill] sm:$0xff] %v7750_v24 }
  0x80   :  { %1653 = vmatpush.bf16.msra.mxu0 %v7680_v47 }
  0x81   :  { %1666 = vmatpush.bf16.msra.mxu1 %v7684_v53 }
  0x82   :  { %1679 = vmatpush.bf16.msra.mxu2 %v7686_v54 }
  0x83   :  { %696 = vmatmul.bf16.vlgmr.msrb.gmra.mxu0 %v7571_v32  ;;  %725 = vmatmul.bf16.vlgmr.msrb.gmra.mxu1 %v7571_v32 }
  0x84   :  { %754 = vmatmul.bf16.vlgmr.msrb.gmra.mxu2 %v7571_v32  ;;  %1698 = vmatpush.bf16.msrb.mxu0 %v7691_v2 }
  0x85   :  { %783 = vmatmul.bf16.vlgmr.msrb.gmra.mxu3 %v7571_v32  ;;  %v7689_v32 = vor.u32 %v6818_v56, %v5978_v57  ;;  %1711 = vmatpush.bf16.msrb.mxu1 %v7693_v3  ;;  %v6863_v56 = vld [vmem:[#allocation11 + $0x364] sm:$0xf0]  ;;  %v6795_v57 = vld [vmem:[#allocation11 + $0x14c] sm:$0xf] }
  0x86   :  { %1724 = vmatpush.bf16.msrb.mxu2 %v7696_v9  ;;  %v7721_v4 = vor.u32 %v6863_v56, %v6144_v52  ;;  %v7723_v6 = vor.u32 %v6795_v57, %v5890_v58  ;;  %v5824_v52 = vld [vmem:[#allocation11 + $0xc8] sm:$0xf]  ;;  %v7741_v58 = vor.u32 %v6851_v29, %v6114_v31  ;;  %v7753_v31 = vor.u32 %v6843_v8, %v6082_v14 }
  0x87   :  { %10135 = vst [vmem:[#allocation52_spill] sm:$0xff] %v7689_v32  ;;  %1692 = vmatpush.bf16.msra.mxu3 %v7689_v32  ;;  %v6783_v56 = vld [vmem:[#allocation11 + $0xe4] sm:$0xf0]  ;;  %v6824_v32 = vld [vmem:[#allocation11 + $0x22c] sm:$0xf0] }
  0x88   :  { %1699 = vmatpush.bf16.msrb.mxu0 %v7704_v28  ;;  %10145 = vst [vmem:[#allocation62_spill] sm:$0xff] %v7721_v4  ;;  %v6080_v57 = vld [vmem:[#allocation11 + $0x2c8] sm:$0xf]  ;;  %v5864_v28 = vld [vmem:[#allocation11 + $0x110] sm:$0xf] }
  0x89   :  { %1712 = vmatpush.bf16.msrb.mxu1 %v7708_v43  ;;  %10146 = vst [vmem:[#allocation63_spill] sm:$0xff] %v7723_v6  ;;  %v6048_v29 = vld [vmem:[#allocation11 + $0x288] sm:$0xf] }
  0x8a   :  { %1725 = vmatpush.bf16.msrb.mxu2 %v7710_v44  ;;  %10151 = vst [vmem:[#allocation68_spill] sm:$0xff] %v7741_v58  ;;  %v6016_v8 = vld [vmem:[#allocation11 + $0x248] sm:$0xf] }
  0x8b   :  { %1737 = vmatpush.bf16.msrb.mxu3 %v7700_v23  ;;  %10155 = vst [vmem:[#allocation72_spill] sm:$0xff] %v7753_v31  ;;  %v6792_v23 = vld [vmem:[#allocation11 + $0x12c] sm:$0xf0] }
  0x8c   :  { %1700 = vmatpush.bf16.msrb.mxu0 %v7719_v0  ;;  %v6872_v0 = vld [vmem:[#allocation11 + $0x3ac] sm:$0xf0] }
  0x8d   :  { %1713 = vmatpush.bf16.msrb.mxu1 %v7721_v4  ;;  %v7744_v4 = vor.u32 %v6783_v56, %v5824_v52  ;;  %v6835_v52 = vld [vmem:[#allocation11 + $0x28c] sm:$0xf] }
  0x8e   :  { %1726 = vmatpush.bf16.msrb.mxu2 %v7723_v6  ;;  %v6771_v6 = vld [vmem:[#allocation11 + $0x8c] sm:$0xf] }
  0x8f   :  { %1738 = vmatpush.bf16.msrb.mxu3 %v7713_v45  ;;  %10152 = vst [vmem:[#allocation69_spill] sm:$0xff] %v7744_v4  ;;  %v6050_v56 = vld [vmem:[#allocation11 + $0x2a8] sm:$0xf0]  ;;  %v6804_v45 = vld [vmem:[#allocation11 + $0x194] sm:$0xf] }
  0x90   :  { %1701 = vmatpush.bf16.msrb.mxu0 %v7732_v33  ;;  %v5794_v33 = vld [vmem:[#allocation11 + $0xa8] sm:$0xf0]  ;;  %v7765_v14 = vor.u32 %v6835_v52, %v6050_v56  ;;  %v5984_v52 = vld [vmem:[#allocation11 + $0x208] sm:$0xf] }
  0x91   :  { %1714 = vmatpush.bf16.msrb.mxu1 %v7736_v48  ;;  %v7756_v48 = vor.u32 %v6775_v27, %v5792_v25  ;;  %v6827_v25 = vld [vmem:[#allocation11 + $0x24c] sm:$0xf] }
  0x92   :  { %1727 = vmatpush.bf16.msrb.mxu2 %v7738_v49  ;;  %10159 = vst [vmem:[#allocation76_spill] sm:$0xff] %v7765_v14  ;;  %v6763_v49 = vld [vmem:[#allocation11 + $0x4c] sm:$0xf] }
  0x93   :  { %701 = vmatmul.bf16.gmra.mxu0 %v7577_v12  ;;  %730 = vmatmul.bf16.gmra.mxu1 %v7577_v12  ;;  %10156 = vst [vmem:[#allocation73_spill] sm:$0xff] %v7756_v48  ;;  %v6018_v27 = vld [vmem:[#allocation11 + $0x268] sm:$0xf0] }
  0x94   :  { %759 = vmatmul.bf16.gmra.mxu2 %v7577_v12  ;;  %1739 = vmatpush.bf16.msrb.mxu3 %v7726_v16  ;;  %v6839_v16 = vld [vmem:[#allocation11 + $0x2a4] sm:$0xf0]  ;;  %v7778_v56 = vor.u32 %v6827_v25, %v6018_v27 }
  0x95   :  { %788 = vmatmul.bf16.gmra.mxu3 %v7577_v12  ;;  %v6847_v12 = vld [vmem:[#allocation11 + $0x2e4] sm:$0xf0]  ;;  %1702 = vmatpush.bf16.msrb.mxu0 %v7744_v4  ;;  %v5762_v4 = vld [vmem:[#allocation11 + $0x68] sm:$0xf0] }
  0x96   :  { %v7748_v15 = vor.u32 %v6847_v12, %v6080_v57  ;;  %1728 = vmatpush.bf16.msrb.mxu2 %v7750_v24  ;;  %v7760_v57 = vor.u32 %v6839_v16, %v6048_v29  ;;  %v7762_v12 = vor.u32 %v6771_v6, %v5794_v33  ;;  %v7774_v16 = vor.u32 %v6763_v49, %v5762_v4  ;;  %v5728_v33 = vld [vmem:[#allocation11 + $0x8] sm:$0xf] }
  0x97   :  { %v6759_v29 = vld [vmem:[#allocation11 + $0x24] sm:$0xf0]  ;;  %10163 = vst [vmem:[#allocation80_spill] sm:$0xff] %v7778_v56 }
  0x98   :  { %10153 = vst [vmem:[#allocation70_spill] sm:$0xff] %v7748_v15  ;;  %1740 = vmatpush.bf16.msrb.mxu3 %v7741_v58  ;;  %1715 = vmatpush.bf16.msrb.mxu1 %v7748_v15  ;;  %v6831_v58 = vld [vmem:[#allocation11 + $0x264] sm:$0xf0]  ;;  %v7768_v15 = vor.u32 %v6767_v63, %v5760_v61  ;;  %v6755_v61 = vld [vmem:[#allocation11 + $0xc] sm:$0xf]  ;;  %v7784_v4 = vor.u32 %v6759_v29, %v5728_v33 }
  0x99   :  { %10157 = vst [vmem:[#allocation74_spill] sm:$0xff] %v7760_v57  ;;  %1703 = vmatpush.bf16.msrb.mxu0 %v7756_v48  ;;  %v7772_v6 = vor.u32 %v6831_v58, %v6016_v8  ;;  %v6823_v48 = vld [vmem:[#allocation11 + $0x224] sm:$0xf0]  ;;  %v5730_v63 = vld [vmem:[#allocation11 + $0x28] sm:$0xf0] }
  0x9a   :  { %10158 = vst [vmem:[#allocation75_spill] sm:$0xff] %v7762_v12  ;;  %1729 = vmatpush.bf16.msrb.mxu2 %v7762_v12  ;;  %v6819_v58 = vld [vmem:[#allocation11 + $0x20c] sm:$0xf]  ;;  %v7788_v49 = vor.u32 %v6823_v48, %v5984_v52  ;;  %v7790_v25 = vor.u32 %v6755_v61, %v5730_v63  ;;  %v5960_v29 = vld [vmem:[#allocation11 + $0x1d0] sm:$0xf] }
  0x9b   :  { %10160 = vst [vmem:[#allocation77_spill] sm:$0xff] %v7768_v15  ;;  %v5986_v8 = vld [vmem:[#allocation11 + $0x228] sm:$0xf0]  ;;  %v6816_v52 = vld [vmem:[#allocation11 + $0x1ec] sm:$0xf0] }
  0x9c   :  { %1741 = vmatpush.bf16.msrb.mxu3 %v7753_v31  ;;  %1716 = vmatpush.bf16.msrb.mxu1 %v7760_v57  ;;  %10161 = vst [vmem:[#allocation78_spill] sm:$0xff] %v7772_v6  ;;  %v7793_v27 = vor.u32 %v6819_v58, %v5986_v8  ;;  %v6216_v61 = vld [vmem:[#allocation11 + $0x3d0] sm:$0xf]  ;;  %v6812_v58 = vld [vmem:[#allocation11 + $0x1d4] sm:$0xf]  ;;  %v9836_v31 = vmov 0.0|0.0  }
  0x9d   :  { %10162 = vst [vmem:[#allocation79_spill] sm:$0xff] %v7774_v16  ;;  %1704 = vmatpush.bf16.msrb.mxu0 %v7768_v15  ;;  %v6880_v63 = vld [vmem:[#allocation11 + $0x3ec] sm:$0xf0]  ;;  %v5962_v8 = vld [vmem:[#allocation11 + $0x1f0] sm:$0xf0] }
  0x9e   :  { %10164 = vst [vmem:[#allocation81_spill] sm:$0xff] %v7784_v4  ;;  %1730 = vmatpush.bf16.msrb.mxu2 %v7774_v16  ;;  %v7815_v16 = vor.u32 %v6880_v63, %v6216_v61  ;;  %v7817_v15 = vor.u32 %v6812_v58, %v5962_v8  ;;  %v6808_v57 = vld [vmem:[#allocation11 + $0x1ac] sm:$0xf0]  ;;  %v6186_v61 = vld [vmem:[#allocation11 + $0x3b0] sm:$0xf0] }
  0x9f   :  { %10165 = vst [vmem:[#allocation82_spill] sm:$0xff] %v7788_v49  ;;  %v6184_v12 = vld [vmem:[#allocation11 + $0x390] sm:$0xf] }
  0xa0   :  { %1742 = vmatpush.bf16.msrb.mxu3 %v7765_v14  ;;  %1717 = vmatpush.bf16.msrb.mxu1 %v7772_v6  ;;  %10166 = vst [vmem:[#allocation83_spill] sm:$0xff] %v7790_v25  ;;  %v5928_v14 = vld [vmem:[#allocation11 + $0x190] sm:$0xf] }
  0xa1   :  { %10167 = vst [vmem:[#allocation84_spill] sm:$0xff] %v7793_v27  ;;  %1705 = vmatpush.bf16.msrb.mxu0 %v7784_v4  ;;  %v5896_v63 = vld [vmem:[#allocation11 + $0x150] sm:$0xf] }
  0xa2   :  { %1731 = vmatpush.bf16.msrb.mxu2 %v7790_v25  ;;  %v6218_v25 = vld [vmem:[#allocation11 + $0x3f0] sm:$0xf0]  ;;  %10169 = vst [vmem:[#allocation86_spill] sm:$0xff] %v7815_v16  ;;  %v6800_v58 = vld [vmem:[#allocation11 + $0x16c] sm:$0xf0] }
  0xa3   :  { %706 = vmatmul.bf16.gmra.mxu0 %v7583_v62  ;;  %735 = vmatmul.bf16.gmra.mxu1 %v7583_v62  ;;  %10170 = vst [vmem:[#allocation87_spill] sm:$0xff] %v7817_v15  ;;  %v6152_v8 = vld [vmem:[#allocation11 + $0x350] sm:$0xf] }
  0xa4   :  { %764 = vmatmul.bf16.gmra.mxu2 %v7583_v62  ;;  %1743 = vmatpush.bf16.msrb.mxu3 %v7778_v56  ;;  %v7812_v56 = vor.u32 %v6816_v52, %v5960_v29  ;;  %v6868_v52 = vld [vmem:[#allocation11 + $0x394] sm:$0xf] }
  0xa5   :  { %793 = vmatmul.bf16.gmra.mxu3 %v7583_v62  ;;  %1718 = vmatpush.bf16.msrb.mxu1 %v7788_v49  ;;  %v7803_v62 = vld [vmem:[#allocation9] sm:$0xff]  ;;  %v6876_v49 = vld [vmem:[#allocation11 + $0x3d4] sm:$0xf] }
  0xa6   :  { %v7806_v48 = vperm.slane %v7803_v62, 0  ;;  %v7809_v33 = vperm.slane %v7803_v62, 1  ;;  %10168 = vst [vmem:[#allocation85_spill] sm:$0xff] %v7812_v56  ;;  %v7820_v24 = vor.u32 %v6876_v49, %v6218_v25  ;;  %v7827_v29 = vperm.slane %v7803_v62, 2 }
  0xa7   :  { %v7832_v49 = vperm.slane %v7803_v62, 3  ;;  %v7834_v25 = vor.u32 %v6808_v57, %v5928_v14  ;;  %v5898_v57 = vld [vmem:[#allocation11 + $0x170] sm:$0xf0] }
  0xa8   :  { %1744 = vmatpush.bf16.msrb.mxu3 %v7793_v27  ;;  %10171 = vst [vmem:[#allocation88_spill] sm:$0xff] %v7820_v24 }
  0xa9   :  { %10173 = vst [vmem:[#allocation90_spill] sm:$0xff] %v7834_v25 }
  0xb3   :  { %711 = vmatmul.bf16.gmra.mxu0 %v7621_v42  ;;  %740 = vmatmul.bf16.gmra.mxu1 %v7621_v42 }
  0xb4   :  { %769 = vmatmul.bf16.gmra.mxu2 %v7621_v42 }
  0xb5   :  { %798 = vmatmul.bf16.gmra.mxu3 %v7621_v42 }
  0xc0   :  { %v581_v27 = vpop.f32.mrf.mxu0  ;;  %v610_v42 = vpop.f32.mrf.mxu1 }
  0xc1   :  { %v582_v4 = vadd.f32 %v581_v27, %v7806_v48  ;;  %v611_v6 = vadd.f32 %v610_v42, %v7809_v33  ;;  %v5930_v27 = vld [vmem:[#allocation11 + $0x1b0] sm:$0xf0] }
  0xc3   :  { %1654 = vmatmul.bf16.vlgmr.msra.gmra.mxu0 %v9836_v31  ;;  %v7822_v43 = vpack.c.bf16 %v611_v6, %v582_v4  ;;  %1667 = vmatmul.bf16.vlgmr.msra.gmra.mxu1 %v9836_v31  ;;  %v7838_v6 = vor.u32 %v6872_v0, %v6184_v12  ;;  %v7840_v4 = vor.u32 %v6804_v45, %v5930_v27  ;;  %v6154_v0 = vld [vmem:[#allocation11 + $0x370] sm:$0xf0] }
  0xc4   :  { %1680 = vmatmul.bf16.vlgmr.msra.gmra.mxu2 %v9836_v31  ;;  %1750 = vmatpush.bf16.msra.mxu0 %v7812_v56  ;;  %v6864_v56 = vld [vmem:[#allocation11 + $0x36c] sm:$0xf0] }
  0xc5   :  { %10172 = vst [vmem:[#allocation89_spill] sm:$0xff] %v7822_v43  ;;  %1693 = vmatmul.bf16.vlgmr.msra.gmra.mxu3 %v9836_v31  ;;  %1763 = vmatpush.bf16.msra.mxu1 %v7815_v16  ;;  %v7843_v31 = vor.u32 %v6868_v52, %v6186_v61  ;;  %v6796_v43 = vld [vmem:[#allocation11 + $0x154] sm:$0xf]  ;;  %v7854_v61 = vor.u32 %v6864_v56, %v6152_v8 }
  0xc6   :  { %1776 = vmatpush.bf16.msra.mxu2 %v7817_v15  ;;  %10174 = vst [vmem:[#allocation91_spill] sm:$0xff] %v7838_v6  ;;  %1789 = vmatpush.bf16.msra.mxu3 %v7820_v24  ;;  %v6860_v15 = vld [vmem:[#allocation11 + $0x354] sm:$0xf]  ;;  %v7849_v24 = vor.u32 %v6800_v58, %v5896_v63  ;;  %v6856_v63 = vld [vmem:[#allocation11 + $0x32c] sm:$0xf0] }
  0xc7   :  { %10175 = vst [vmem:[#allocation92_spill] sm:$0xff] %v7840_v4  ;;  %v639_v42 = vpop.f32.mrf.mxu2  ;;  %v6788_v58 = vld [vmem:[#allocation11 + $0x114] sm:$0xf] }
  0xc8   :  { %10176 = vst [vmem:[#allocation93_spill] sm:$0xff] %v7843_v31  ;;  %v640_v14 = vadd.f32 %v639_v42, %v7827_v29  ;;  %v668_v16 = vpop.f32.mrf.mxu3  ;;  %v583_v44 = vpop.f32.mrf.mxu0  ;;  %1751 = vmatpush.bf16.msra.mxu0 %v7834_v25  ;;  %v7856_v42 = vor.u32 %v6796_v43, %v5898_v57  ;;  %v7866_v43 = vor.u32 %v6792_v23, %v5864_v28  ;;  %v6784_v57 = vld [vmem:[#allocation11 + $0xec] sm:$0xf0]  ;;  %v5834_v23 = vld [vmem:[#allocation11 + $0xf0] sm:$0xf0] }
  0xc9   :  { %v669_v45 = vadd.f32 %v668_v16, %v7832_v49  ;;  %v584_v12 = vadd.f32 %v583_v44, %v7806_v48  ;;  %v612_v27 = vpop.f32.mrf.mxu1  ;;  %10177 = vst [vmem:[#allocation94_spill] sm:$0xff] %v7849_v24  ;;  %1764 = vmatpush.bf16.msra.mxu1 %v7838_v6  ;;  %v6120_v16 = vld [vmem:[#allocation11 + $0x310] sm:$0xf]  ;;  %v7861_v44 = vor.u32 %v6860_v15, %v6154_v0  ;;  %v5866_v6 = vld [vmem:[#allocation11 + $0x130] sm:$0xf0] }
  0xca   :  { %1777 = vmatpush.bf16.msra.mxu2 %v7840_v4  ;;  %v613_v52 = vadd.f32 %v612_v27, %v7809_v33  ;;  %10178 = vst [vmem:[#allocation95_spill] sm:$0xff] %v7854_v61  ;;  %1790 = vmatpush.bf16.msra.mxu3 %v7843_v31  ;;  %v6852_v4 = vld [vmem:[#allocation11 + $0x314] sm:$0xf]  ;;  %v7870_v56 = vor.u32 %v6856_v63, %v6120_v16  ;;  %v5832_v15 = vld [vmem:[#allocation11 + $0xd0] sm:$0xf] }
  0xcb   :  { %10179 = vst [vmem:[#allocation96_spill] sm:$0xff] %v7856_v42  ;;  %v7858_v3 = vpack.c.bf16 %v669_v45, %v640_v14  ;;  %v6122_v27 = vld [vmem:[#allocation11 + $0x330] sm:$0xf0]  ;;  %v7872_v8 = vor.u32 %v6788_v58, %v5866_v6  ;;  %v6088_v14 = vld [vmem:[#allocation11 + $0x2d0] sm:$0xf] }
  0xcc   :  { %10181 = vst [vmem:[#allocation98_spill] sm:$0xff] %v7861_v44  ;;  %v7863_v25 = vpack.c.bf16 %v613_v52, %v584_v12  ;;  %1752 = vmatpush.bf16.msra.mxu0 %v7849_v24  ;;  %v7875_v45 = vor.u32 %v6852_v4, %v6122_v27  ;;  %v6848_v12 = vld [vmem:[#allocation11 + $0x2ec] sm:$0xf0]  ;;  %v6780_v52 = vld [vmem:[#allocation11 + $0xd4] sm:$0xf] }
  0xcd   :  { %10180 = vst [vmem:[#allocation97_spill] sm:$0xff] %v7858_v3  ;;  %1765 = vmatpush.bf16.msra.mxu1 %v7854_v61  ;;  %v6844_v31 = vld [vmem:[#allocation11 + $0x2d4] sm:$0xf]  ;;  %v7886_v27 = vor.u32 %v6848_v12, %v6088_v14  ;;  %v6776_v24 = vld [vmem:[#allocation11 + $0xac] sm:$0xf0] }
  0xce   :  { %10182 = vst [vmem:[#allocation99_spill] sm:$0xff] %v7863_v25  ;;  %1778 = vmatpush.bf16.msra.mxu2 %v7856_v42  ;;  %1791 = vmatpush.bf16.msra.mxu3 %v7861_v44  ;;  %v6090_v16 = vld [vmem:[#allocation11 + $0x2f0] sm:$0xf0]  ;;  %v7881_v44 = vor.u32 %v6784_v57, %v5832_v15  ;;  %v5800_v42 = vld [vmem:[#allocation11 + $0x90] sm:$0xf] }
  0xcf   :  { %10183 = vst [vmem:[#allocation100_spill] sm:$0xff] %v7866_v43  ;;  %v641_v0 = vpop.f32.mrf.mxu2  ;;  %v7894_v15 = vor.u32 %v6844_v31, %v6090_v16  ;;  %v6840_v57 = vld [vmem:[#allocation11 + $0x2ac] sm:$0xf0]  ;;  %v6836_v14 = vld [vmem:[#allocation11 + $0x294] sm:$0xf] }
  0xd0   :  { %10184 = vst [vmem:[#allocation101_spill] sm:$0xff] %v7870_v56  ;;  %v642_v28 = vadd.f32 %v641_v0, %v7827_v29  ;;  %v670_v25 = vpop.f32.mrf.mxu3  ;;  %v586_v61 = vpop.f32.mrf.mxu0  ;;  %1753 = vmatpush.bf16.msra.mxu0 %v7866_v43  ;;  %v7888_v0 = vor.u32 %v6780_v52, %v5834_v23  ;;  %v6058_v12 = vld [vmem:[#allocation11 + $0x2b0] sm:$0xf0]  ;;  %v7902_v52 = vor.u32 %v6776_v24, %v5800_v42  ;;  %v6768_v16 = vld [vmem:[#allocation11 + $0x6c] sm:$0xf0] }
  0xd1   :  { %10185 = vst [vmem:[#allocation102_spill] sm:$0xff] %v7872_v8  ;;  %v671_v6 = vadd.f32 %v670_v25, %v7832_v49  ;;  %v587_v63 = vadd.f32 %v586_v61, %v7806_v48  ;;  %v615_v58 = vpop.f32.mrf.mxu1  ;;  %1766 = vmatpush.bf16.msra.mxu1 %v7870_v56  ;;  %v6056_v25 = vld [vmem:[#allocation11 + $0x290] sm:$0xf]  ;;  %v10191_v61 = vmov 0.0|0.0   ;;  %v6772_v56 = vld [vmem:[#allocation11 + $0x94] sm:$0xf] }
  0xd2   :  { %10186 = vst [vmem:[#allocation103_spill] sm:$0xff] %v7875_v45  ;;  %1779 = vmatpush.bf16.msra.mxu2 %v7872_v8  ;;  %v616_v4 = vadd.f32 %v615_v58, %v7809_v33  ;;  %1792 = vmatpush.bf16.msra.mxu3 %v7875_v45  ;;  %v5802_v8 = vld [vmem:[#allocation11 + $0xb0] sm:$0xf0]  ;;  %v7906_v31 = vor.u32 %v6840_v57, %v6056_v25 }
  0xd3   :  { %10187 = vst [vmem:[#allocation104_spill] sm:$0xff] %v7881_v44  ;;  %v7890_v3 = vpack.c.bf16 %v671_v6, %v642_v28  ;;  %1706 = vmatmul.bf16.vlgmr.msrb.gmra.mxu0 %v10191_v61  ;;  %1719 = vmatmul.bf16.vlgmr.msrb.gmra.mxu1 %v10191_v61  ;;  %v7908_v23 = vor.u32 %v6772_v56, %v5802_v8  ;;  %v5768_v28 = vld [vmem:[#allocation11 + $0x50] sm:$0xf]  ;;  %v5770_v24 = vld [vmem:[#allocation11 + $0x70] sm:$0xf0] }
  0xd4   :  { %10188 = vst [vmem:[#allocation105_spill] sm:$0xff] %v7886_v27  ;;  %v7896_v43 = vpack.c.bf16 %v616_v4, %v587_v63  ;;  %1732 = vmatmul.bf16.vlgmr.msrb.gmra.mxu2 %v10191_v61  ;;  %1754 = vmatpush.bf16.msra.mxu0 %v7881_v44  ;;  %v6024_v6 = vld [vmem:[#allocation11 + $0x250] sm:$0xf]  ;;  %v7911_v58 = vor.u32 %v6836_v14, %v6058_v12  ;;  %v6828_v45 = vld [vmem:[#allocation11 + $0x254] sm:$0xf] }
  0xd5   :  { %10189 = vst [vmem:[#allocation106_spill] sm:$0xff] %v7888_v0  ;;  %1745 = vmatmul.bf16.vlgmr.msrb.gmra.mxu3 %v10191_v61  ;;  %1767 = vmatpush.bf16.msra.mxu1 %v7886_v27  ;;  %v6832_v4 = vld [vmem:[#allocation11 + $0x26c] sm:$0xf0]  ;;  %v6026_v25 = vld [vmem:[#allocation11 + $0x270] sm:$0xf0] }
  0xd6   :  { %10190 = vst [vmem:[#allocation107_spill] sm:$0xff] %v7890_v3  ;;  %1780 = vmatpush.bf16.msra.mxu2 %v7888_v0  ;;  %1793 = vmatpush.bf16.msra.mxu3 %v7894_v15  ;;  %v5736_v14 = vld [vmem:[#allocation11 + $0x10] sm:$0xf]  ;;  %v7922_v0 = vor.u32 %v6832_v4, %v6024_v6  ;;  %v6224_v6 = vld [vmem:[#allocation11 + $0x3d8] sm:$0xf] }
  0xd7   :  { %10192 = vst [vmem:[#allocation108_spill] sm:$0xff] %v7894_v15  ;;  %v644_v63 = vpop.f32.mrf.mxu2  ;;  %v7917_v15 = vor.u32 %v6768_v16, %v5768_v28  ;;  %v6760_v12 = vld [vmem:[#allocation11 + $0x2c] sm:$0xf0]  ;;  %v5738_v28 = vld [vmem:[#allocation11 + $0x30] sm:$0xf0] }
  0xd8   :  { %10193 = vst [vmem:[#allocation109_spill] sm:$0xff] %v7896_v43  ;;  %v6764_v43 = vld [vmem:[#allocation11 + $0x54] sm:$0xf]  ;;  %v645_v42 = vadd.f32 %v644_v63, %v7827_v29  ;;  %v673_v3 = vpop.f32.mrf.mxu3  ;;  %v588_v27 = vpop.f32.mrf.mxu0  ;;  %1755 = vmatpush.bf16.msra.mxu0 %v7902_v52  ;;  %v6881_v4 = vld [vmem:[#allocation11 + $0x3f4] sm:$0xf0] }
  0xd9   :  { %10194 = vst [vmem:[#allocation110_spill] sm:$0xff] %v7902_v52  ;;  %v674_v56 = vadd.f32 %v673_v3, %v7832_v49  ;;  %v589_v8 = vadd.f32 %v588_v27, %v7806_v48  ;;  %v617_v57 = vpop.f32.mrf.mxu1  ;;  %1768 = vmatpush.bf16.msra.mxu1 %v7906_v31  ;;  %v7924_v44 = vor.u32 %v6764_v43, %v5770_v24  ;;  %v5992_v3 = vld [vmem:[#allocation11 + $0x210] sm:$0xf]  ;;  %v6756_v52 = vld [vmem:[#allocation11 + $0x14] sm:$0xf] }
  0xda   :  { %10195 = vst [vmem:[#allocation111_spill] sm:$0xff] %v7906_v31  ;;  %1781 = vmatpush.bf16.msra.mxu2 %v7908_v23  ;;  %v618_v63 = vadd.f32 %v617_v57, %v7809_v33  ;;  %1794 = vmatpush.bf16.msra.mxu3 %v7911_v58  ;;  %v7929_v27 = vor.u32 %v6828_v45, %v6026_v25  ;;  %v6820_v16 = vld [vmem:[#allocation11 + $0x214] sm:$0xf]  ;;  %v6817_v57 = vld [vmem:[#allocation11 + $0x1f4] sm:$0xf0] }
  0xdb   :  { %10196 = vst [vmem:[#allocation112_spill] sm:$0xff] %v7908_v23  ;;  %v7926_v53 = vpack.c.bf16 %v674_v56, %v645_v42  ;;  %v5994_v31 = vld [vmem:[#allocation11 + $0x230] sm:$0xf0]  ;;  %v5968_v23 = vld [vmem:[#allocation11 + $0x1d8] sm:$0xf]  ;;  %v7934_v43 = vor.u32 %v6760_v12, %v5736_v14  ;;  %v7938_v45 = vor.u32 %v6824_v32, %v5992_v3  ;;  %v7940_v25 = vor.u32 %v6756_v52, %v5738_v28 }
  0xdc   :  { %10197 = vst [vmem:[#allocation113_spill] sm:$0xff] %v7911_v58  ;;  %v7931_v9 = vpack.c.bf16 %v618_v63, %v589_v8  ;;  %1756 = vmatpush.bf16.msra.mxu0 %v7917_v15  ;;  %v6813_v24 = vld [vmem:[#allocation11 + $0x1dc] sm:$0xf]  ;;  %v7945_v14 = vor.u32 %v6817_v57, %v5968_v23  ;;  %v5936_v32 = vld [vmem:[#allocation11 + $0x198] sm:$0xf] }
  0xdd   :  { %10198 = vst [vmem:[#allocation114_spill] sm:$0xff] %v7922_v0  ;;  %v5970_v42 = vld [vmem:[#allocation11 + $0x1f8] sm:$0xf0]  ;;  %1769 = vmatpush.bf16.msra.mxu1 %v7922_v0  ;;  %v7948_v0 = vor.u32 %v6881_v4, %v6224_v6  ;;  %v6809_v52 = vld [vmem:[#allocation11 + $0x1b4] sm:$0xf0] }
  0xde   :  { %10199 = vst [vmem:[#allocation115_spill] sm:$0xff] %v7924_v44  ;;  %1782 = vmatpush.bf16.msra.mxu2 %v7924_v44  ;;  %v6877_v56 = vld [vmem:[#allocation11 + $0x3dc] sm:$0xf]  ;;  %1795 = vmatpush.bf16.msra.mxu3 %v7929_v27  ;;  %v7950_v44 = vor.u32 %v6813_v24, %v5970_v42  ;;  %v6192_v3 = vld [vmem:[#allocation11 + $0x398] sm:$0xf] }
  0xdf   :  { %10200 = vst [vmem:[#allocation116_spill] sm:$0xff] %v7926_v53  ;;  %v6226_v8 = vld [vmem:[#allocation11 + $0x3f8] sm:$0xf0]  ;;  %v646_v63 = vpop.f32.mrf.mxu2  ;;  %v6873_v57 = vld [vmem:[#allocation11 + $0x3b4] sm:$0xf0] }
  0xe0   :  { %10201 = vst [vmem:[#allocation117_spill] sm:$0xff] %v7929_v27  ;;  %v647_v12 = vadd.f32 %v646_v63, %v7827_v29  ;;  %v675_v53 = vpop.f32.mrf.mxu3  ;;  %v591_v58 = vpop.f32.mrf.mxu0  ;;  %1757 = vmatpush.bf16.msra.mxu0 %v7934_v43  ;;  %v7955_v23 = vor.u32 %v6877_v56, %v6226_v8  ;;  %v6805_v63 = vld [vmem:[#allocation11 + $0x19c] sm:$0xf]  ;;  %v7970_v56 = vor.u32 %v6873_v57, %v6192_v3 }
  0xe1   :  { %10202 = vst [vmem:[#allocation118_spill] sm:$0xff] %v7931_v9  ;;  %v7943_v9 = vor.u32 %v6820_v16, %v5994_v31  ;;  %v676_v28 = vadd.f32 %v675_v53, %v7832_v49  ;;  %v592_v31 = vadd.f32 %v591_v58, %v7806_v48  ;;  %v620_v16 = vpop.f32.mrf.mxu1  ;;  %v5938_v27 = vld [vmem:[#allocation11 + $0x1b8] sm:$0xf0]  ;;  %1770 = vmatpush.bf16.msra.mxu1 %v7938_v45 }
  0xe2   :  { %10203 = vst [vmem:[#allocation119_spill] sm:$0xff] %v7934_v43  ;;  %1783 = vmatpush.bf16.msra.mxu2 %v7940_v25  ;;  %v621_v6 = vadd.f32 %v620_v16, %v7809_v33  ;;  %v6869_v4 = vld [vmem:[#allocation11 + $0x39c] sm:$0xf]  ;;  %v7964_v53 = vor.u32 %v6809_v52, %v5936_v32  ;;  %v7972_v8 = vor.u32 %v6805_v63, %v5938_v27  ;;  %v5904_v16 = vld [vmem:[#allocation11 + $0x158] sm:$0xf] }
  0xe3   :  { %10204 = vst [vmem:[#allocation120_spill] sm:$0xff] %v7938_v45  ;;  %v6194_v24 = vld [vmem:[#allocation11 + $0x3b8] sm:$0xf0]  ;;  %v7960_v42 = vpack.c.bf16 %v676_v28, %v647_v12  ;;  %1796 = vmatpush.bf16.msra.mxu3 %v7943_v9  ;;  %v6801_v45 = vld [vmem:[#allocation11 + $0x174] sm:$0xf0]  ;;  %1758 = vmatmul.bf16.vlgmr.msra.gmra.mxu0 %v10191_v61 }
  0xe4   :  { %10205 = vst [vmem:[#allocation121_spill] sm:$0xff] %v7940_v25  ;;  %1802 = vmatpush.bf16.msrb.mxu0 %v7945_v14  ;;  %v7966_v58 = vpack.c.bf16 %v621_v6, %v592_v31  ;;  %v6160_v12 = vld [vmem:[#allocation11 + $0x358] sm:$0xf]  ;;  %v7976_v28 = vor.u32 %v6869_v4, %v6194_v24  ;;  %v6797_v52 = vld [vmem:[#allocation11 + $0x15c] sm:$0xf]  ;;  %1771 = vmatmul.bf16.vlgmr.msra.gmra.mxu1 %v10191_v61 }
  0xe5   :  { %10206 = vst [vmem:[#allocation122_spill] sm:$0xff] %v7943_v9  ;;  %1815 = vmatpush.bf16.msrb.mxu1 %v7948_v0  ;;  %v6865_v32 = vld [vmem:[#allocation11 + $0x374] sm:$0xf0]  ;;  %v5906_v31 = vld [vmem:[#allocation11 + $0x178] sm:$0xf0]  ;;  %1784 = vmatmul.bf16.vlgmr.msra.gmra.mxu2 %v10191_v61  ;;  %v7982_v63 = vor.u32 %v6801_v45, %v5904_v16 }
  0xe6   :  { %10207 = vst [vmem:[#allocation123_spill] sm:$0xff] %v7945_v14  ;;  %1828 = vmatpush.bf16.msrb.mxu2 %v7950_v44  ;;  %v6861_v3 = vld [vmem:[#allocation11 + $0x35c] sm:$0xf]  ;;  %1797 = vmatmul.bf16.vlgmr.msra.gmra.mxu3 %v10191_v61  ;;  %v5872_v6 = vld [vmem:[#allocation11 + $0x118] sm:$0xf] }
  0xe7   :  { %10208 = vst [vmem:[#allocation124_spill] sm:$0xff] %v7948_v0  ;;  %1841 = vmatpush.bf16.msrb.mxu3 %v7955_v23  ;;  %v6162_v57 = vld [vmem:[#allocation11 + $0x378] sm:$0xf0]  ;;  %v649_v27 = vpop.f32.mrf.mxu2  ;;  %v6793_v0 = vld [vmem:[#allocation11 + $0x134] sm:$0xf0] }
  0xe8   :  { %10209 = vst [vmem:[#allocation125_spill] sm:$0xff] %v7950_v44  ;;  %1803 = vmatpush.bf16.msrb.mxu0 %v7964_v53  ;;  %v650_v4 = vadd.f32 %v649_v27, %v7827_v29  ;;  %v678_v24 = vpop.f32.mrf.mxu3  ;;  %v6128_v9 = vld [vmem:[#allocation11 + $0x318] sm:$0xf]  ;;  %v5874_v27 = vld [vmem:[#allocation11 + $0x138] sm:$0xf0] }
  0xe9   :  { %10210 = vst [vmem:[#allocation126_spill] sm:$0xff] %v7955_v23  ;;  %1816 = vmatpush.bf16.msrb.mxu1 %v7970_v56  ;;  %v7989_v23 = vor.u32 %v6797_v52, %v5906_v31  ;;  %v6857_v44 = vld [vmem:[#allocation11 + $0x334] sm:$0xf0]  ;;  %v679_v45 = vadd.f32 %v678_v24, %v7832_v49  ;;  %v8000_v31 = vor.u32 %v6793_v0, %v5872_v6  ;;  %v9939_v6 = vmov 3  }
  0xea   :  { %10211 = vst [vmem:[#allocation127_spill] sm:$0xff] %v7960_v42  ;;  %1829 = vmatpush.bf16.msrb.mxu2 %v7972_v8  ;;  %v7987_v42 = vor.u32 %v6865_v32, %v6160_v12  ;;  %v6853_v12 = vld [vmem:[#allocation11 + $0x31c] sm:$0xf]  ;;  %v5840_v24 = vld [vmem:[#allocation11 + $0xd8] sm:$0xf]  ;;  %7005 = vset.pattern.permute.xlu2 %v9939_v6 }
  0xeb   :  { %10212 = vst [vmem:[#allocation128_spill] sm:$0xff] %v7964_v53  ;;  %1842 = vmatpush.bf16.msrb.mxu3 %v7976_v28  ;;  %v7994_v53 = vor.u32 %v6861_v3, %v6162_v57  ;;  %v6130_v32 = vld [vmem:[#allocation11 + $0x338] sm:$0xf0]  ;;  %v7997_v52 = vpack.c.bf16 %v679_v45, %v650_v4  ;;  %v6785_v25 = vld [vmem:[#allocation11 + $0xf4] sm:$0xf0]  ;;  %v8010_v57 = vld [vmem:[#allocation6] sm:$0xff] }
  0xec   :  { %10213 = vst [vmem:[#allocation129_spill] sm:$0xff] %v7966_v58  ;;  %v593_v58 = vpop.f32.mrf.mxu0  ;;  %1804 = vmatpush.bf16.msrb.mxu0 %v7982_v63  ;;  %v6849_v3 = vld [vmem:[#allocation11 + $0x2f4] sm:$0xf0]  ;;  %v8013_v0 = vor.u32 %v6853_v12, %v6130_v32  ;;  %vm1997_vm0 = vcmp.ge.f32.partialorder %v8010_v57, 0.0  ;;  %v6098_v4 = vld [vmem:[#allocation11 + $0x2f8] sm:$0xf0] }
  0xed   :  { %10214 = vst [vmem:[#allocation130_spill] sm:$0xff] %v7970_v56  ;;  %v594_v16 = vadd.f32 %v593_v58, %v7806_v48  ;;  %v622_v56 = vpop.f32.mrf.mxu1  ;;  %v6096_v58 = vld [vmem:[#allocation11 + $0x2d8] sm:$0xf]  ;;  %1817 = vmatpush.bf16.msrb.mxu1 %v7987_v42  ;;  %v9942_v45 = vmov 0  }
  0xee   :  { %10215 = vst [vmem:[#allocation131_spill] sm:$0xff] %v7972_v8  ;;  %v6789_v8 = vld [vmem:[#allocation11 + $0x11c] sm:$0xf]  ;;  %v623_v14 = vadd.f32 %v622_v56, %v7809_v33  ;;  %1830 = vmatpush.bf16.msrb.mxu2 %v7989_v23 }
  0xef   :  { %10216 = vst [vmem:[#allocation132_spill] sm:$0xff] %v7976_v28  ;;  %v8002_v28 = vor.u32 %v6857_v44, %v6128_v9  ;;  %v8008_v56 = vor.u32 %v6789_v8, %v5874_v27  ;;  %1843 = vmatpush.bf16.msrb.mxu3 %v7994_v53  ;;  %v6781_v9 = vld [vmem:[#allocation11 + $0xdc] sm:$0xf]  ;;  %v8018_v8 = vsel %vm1997_vm0, 1, %v9942_v45  ;;  %v8021_v27 = vor.u32 %v6785_v25, %v5840_v24  ;;  %v5808_v45 = vld [vmem:[#allocation11 + $0x98] sm:$0xf] }
  0xf0   :  { %10217 = vst [vmem:[#allocation133_spill] sm:$0xff] %v7982_v63  ;;  %v8004_v43 = vpack.c.bf16 %v623_v14, %v594_v16  ;;  %v5842_v44 = vld [vmem:[#allocation11 + $0xf8] sm:$0xf0]  ;;  %1805 = vmatpush.bf16.msrb.mxu0 %v8000_v31  ;;  %v651_v16 = vpop.f32.mrf.mxu2  ;;  %3511 = vperm.xlu2 %7005, %v8018_v8   ;;  %v680_v32 = vpop.f32.mrf.mxu3 }
  0xf1   :  { %10218 = vst [vmem:[#allocation134_spill] sm:$0xff] %v7987_v42  ;;  %v6845_v14 = vld [vmem:[#allocation11 + $0x2dc] sm:$0xf]  ;;  %1818 = vmatpush.bf16.msrb.mxu1 %v8002_v28  ;;  %v652_v12 = vadd.f32 %v651_v16, %v7827_v29  ;;  %v6064_v42 = vld [vmem:[#allocation11 + $0x298] sm:$0xf]  ;;  %v681_v25 = vadd.f32 %v680_v32, %v7832_v49 }
  0xf2   :  { %10219 = vst [vmem:[#allocation135_spill] sm:$0xff] %v7989_v23  ;;  %1831 = vmatpush.bf16.msrb.mxu2 %v8008_v56  ;;  %v6773_v16 = vld [vmem:[#allocation11 + $0x9c] sm:$0xf] }
  0xf3   :  { %10220 = vst [vmem:[#allocation136_spill] sm:$0xff] %v7994_v53  ;;  %v6777_v53 = vld [vmem:[#allocation11 + $0xb4] sm:$0xf0]  ;;  %1844 = vmatpush.bf16.msrb.mxu3 %v8013_v0  ;;  %v5810_v23 = vld [vmem:[#allocation11 + $0xb8] sm:$0xf0] }
  0xf4   :  { %10221 = vst [vmem:[#allocation137_spill] sm:$0xff] %v7997_v52  ;;  %v596_v6 = vpop.f32.mrf.mxu0  ;;  %v8029_v52 = vor.u32 %v6781_v9, %v5842_v44  ;;  %v6066_v9 = vld [vmem:[#allocation11 + $0x2b8] sm:$0xf0]  ;;  %v8037_v44 = vpack.c.bf16 %v681_v25, %v652_v12  ;;  %1806 = vmatpush.bf16.msrb.mxu0 %v8021_v27  ;;  %v8040_v63 = vor.u32 %v6777_v53, %v5808_v45  ;;  %v6833_v25 = vld [vmem:[#allocation11 + $0x274] sm:$0xf0] }
  0xf5   :  { %10222 = vst [vmem:[#allocation138_spill] sm:$0xff] %v8000_v31  ;;  %v597_v24 = vadd.f32 %v596_v6, %v7806_v48  ;;  %v8034_v31 = vor.u32 %v6845_v14, %v6098_v4  ;;  %v8048_v14 = vor.u32 %v6773_v16, %v5810_v23  ;;  %v6032_v4 = vld [vmem:[#allocation11 + $0x258] sm:$0xf]  ;;  %v6765_v53 = vld [vmem:[#allocation11 + $0x5c] sm:$0xf] }
  0xf6   :  { %10223 = vst [vmem:[#allocation139_spill] sm:$0xff] %v8002_v28  ;;  %v625_v28 = vpop.f32.mrf.mxu1  ;;  %1832 = vmatpush.bf16.msrb.mxu2 %v8029_v52  ;;  %v5778_v45 = vld [vmem:[#allocation11 + $0x78] sm:$0xf0] }
  0xf7   :  { %10224 = vst [vmem:[#allocation140_spill] sm:$0xff] %v8004_v43  ;;  %v8027_v43 = vor.u32 %v6849_v3, %v6096_v58  ;;  %v626_v58 = vadd.f32 %v625_v28, %v7809_v33  ;;  %v6837_v3 = vld [vmem:[#allocation11 + $0x29c] sm:$0xf]  ;;  %v6769_v28 = vld [vmem:[#allocation11 + $0x74] sm:$0xf0]  ;;  %1845 = vmatpush.bf16.msrb.mxu3 %v8034_v31 }
  0xf8   :  { %10225 = vst [vmem:[#allocation141_spill] sm:$0xff] %v8008_v56  ;;  %v6841_v56 = vld [vmem:[#allocation11 + $0x2b4] sm:$0xf0]  ;;  %v8051_v12 = vor.u32 %v6837_v3, %v6066_v9  ;;  %1807 = vmatpush.bf16.msrb.mxu0 %v8040_v63  ;;  %v8060_v3 = vor.u32 %v6833_v25, %v6032_v4  ;;  %v8062_v9 = vor.u32 %v6765_v53, %v5778_v45  ;;  %v6821_v25 = vld [vmem:[#allocation11 + $0x21c] sm:$0xf] }
  0xf9   :  { %10226 = vst [vmem:[#allocation142_spill] sm:$0xff] %v8013_v0  ;;  %v5776_v0 = vld [vmem:[#allocation11 + $0x58] sm:$0xf]  ;;  %v8042_v32 = vpack.c.bf16 %v626_v58, %v597_v24  ;;  %1819 = vmatpush.bf16.msrb.mxu1 %v8027_v43  ;;  %v8046_v6 = vor.u32 %v6841_v56, %v6064_v42  ;;  %v6034_v24 = vld [vmem:[#allocation11 + $0x278] sm:$0xf0]  ;;  %v654_v58 = vpop.f32.mrf.mxu2  ;;  %v9968_v42 = vmov 2   ;;  %v683_v56 = vpop.f32.mrf.mxu3 }
  0xfa   :  { %10227 = vst [vmem:[#allocation143_spill] sm:$0xff] %v8027_v43  ;;  %7006 = vset.pattern.permute.xlu2 %v9968_v42  ;;  %1833 = vmatpush.bf16.msrb.mxu2 %v8048_v14  ;;  %v655_v23 = vadd.f32 %v654_v58, %v7827_v29  ;;  %v6761_v43 = vld [vmem:[#allocation11 + $0x34] sm:$0xf0]  ;;  %v6757_v58 = vld [vmem:[#allocation11 + $0x1c] sm:$0xf] }
  0xfb   :  { %10228 = vst [vmem:[#allocation144_spill] sm:$0xff] %v8029_v52  ;;  %1846 = vmatpush.bf16.msrb.mxu3 %v8051_v12  ;;  %v5746_v52 = vld [vmem:[#allocation11 + $0x38] sm:$0xf0]  ;;  %3873 = vperm.xlu2 %7006, %v8018_v8  }
  0xfc   :  { %10229 = vst [vmem:[#allocation145_spill] sm:$0xff] %v8034_v31  ;;  %v598_v16 = vpop.f32.mrf.mxu0  ;;  %v5744_v31 = vld [vmem:[#allocation11 + $0x18] sm:$0xf]  ;;  %v6002_v53 = vld [vmem:[#allocation11 + $0x238] sm:$0xf0] }
  0xfd   :  { %10230 = vst [vmem:[#allocation146_spill] sm:$0xff] %v8037_v44  ;;  %v6829_v44 = vld [vmem:[#allocation11 + $0x25c] sm:$0xf]  ;;  %1820 = vmatpush.bf16.msrb.mxu1 %v8046_v6 }
  0xfe   :  { %10231 = vst [vmem:[#allocation147_spill] sm:$0xff] %v8040_v63  ;;  %v6000_v63 = vld [vmem:[#allocation11 + $0x218] sm:$0xf]  ;;  %v627_v42 = vpop.f32.mrf.mxu1  ;;  %1834 = vmatpush.bf16.msrb.mxu2 %v8062_v9 }
  0xff   :  { %10232 = vst [vmem:[#allocation148_spill] sm:$0xff] %v8042_v32  ;;  %v8054_v32 = vor.u32 %v6769_v28, %v5776_v0  ;;  %v684_v0 = vadd.f32 %v683_v56, %v7832_v49  ;;  %v599_v28 = vadd.f32 %v598_v16, %v7806_v48  ;;  %v628_v4 = vadd.f32 %v627_v42, %v7809_v33 }
 0x100   :  { %10233 = vst [vmem:[#allocation149_spill] sm:$0xff] %v8046_v6  ;;  %v8067_v6 = vor.u32 %v6829_v44, %v6034_v24  ;;  %v8082_v44 = vor.u32 %v6757_v58, %v5746_v52  ;;  %v8085_v33 = vor.u32 %v6821_v25, %v6002_v53  ;;  %v8088_v24 = vperm.slane %v7803_v62, 4 }
 0x101   :  { %10234 = vst [vmem:[#allocation150_spill] sm:$0xff] %v8048_v14  ;;  %v6825_v14 = vld [vmem:[#allocation11 + $0x234] sm:$0xf0]  ;;  %v8071_v45 = vpack.c.bf16 %v684_v0, %v655_v23  ;;  %1808 = vmatpush.bf16.msrb.mxu0 %v8054_v32  ;;  %v8076_v56 = vpack.c.bf16 %v628_v4, %v599_v28  ;;  %1821 = vmatpush.bf16.msrb.mxu1 %v8060_v3  ;;  %v7494_v42 = vmov 7   ;;  %v10246_v28 = vmov 0  }
 0x102   :  { %10235 = vst [vmem:[#allocation151_spill] sm:$0xff] %v8051_v12  ;;  %v8074_v12 = vor.u32 %v6761_v43, %v5744_v31  ;;  %v8080_v48 = vor.u32 %v6825_v14, %v6000_v63  ;;  %1847 = vmatpush.bf16.msrb.mxu3 %v8067_v6  ;;  %7001 = vset.pattern.permute.xlu0 %v7494_v42  ;;  %v8092_v43 = vperm.slane %v7803_v62, 5  ;;  %v656_v63 = vpop.f32.mrf.mxu2  ;;  %v685_v31 = vpop.f32.mrf.mxu3  ;;  %v8118_v25 = vperm.slane %v7803_v62, 7 }
 0x103   :  { %10236 = vst [vmem:[#allocation152_spill] sm:$0xff] %v8054_v32  ;;  %2000 = vperm.xlu0 %7001, %v8018_v8   ;;  %1835 = vmatpush.bf16.msrb.mxu2 %v8082_v44  ;;  %v657_v52 = vadd.f32 %v656_v63, %v7827_v29  ;;  %v686_v23 = vadd.f32 %v685_v31, %v7832_v49  ;;  %v8114_v49 = vperm.slane %v7803_v62, 6 }
 0x104   :  { %10237 = vst [vmem:[#allocation153_spill] sm:$0xff] %v8060_v3  ;;  %v697_v14 = vpop.f32.mrf.mxu0  ;;  %7008 = vset.pattern.permute.xlu2 %v10246_v28 }
 0x105   :  { %10238 = vst [vmem:[#allocation154_spill] sm:$0xff] %v8062_v9  ;;  %1809 = vmatpush.bf16.msrb.mxu0 %v8074_v12  ;;  %1822 = vmatpush.bf16.msrb.mxu1 %v8080_v48  ;;  %v698_v16 = vadd.f32 %v697_v14, %v8088_v24  ;;  %v8106_v4 = vpack.c.bf16 %v686_v23, %v657_v52 }
 0x106   :  { %10239 = vst [vmem:[#allocation155_spill] sm:$0xff] %v8067_v6  ;;  %1848 = vmatpush.bf16.msrb.mxu3 %v8085_v33  ;;  %v726_v0 = vpop.f32.mrf.mxu1  ;;  %2007 = vperm.xlu2 %7008, %v8010_v57  }
 0x107   :  { %10240 = vst [vmem:[#allocation156_spill] sm:$0xff] %v8071_v45  ;;  %v727_v58 = vadd.f32 %v726_v0, %v8092_v43  ;;  %1836 = vmatmul.bf16.vlgmr.msrb.gmra.mxu2 %v10191_v61  ;;  %v10263_v45 = vld [vmem:[#allocation57_spill] sm:$0xff] }
 0x108   :  { %10241 = vst [vmem:[#allocation157_spill] sm:$0xff] %v8074_v12  ;;  %1810 = vmatmul.bf16.vlgmr.msrb.gmra.mxu0 %v10191_v61  ;;  %1823 = vmatmul.bf16.vlgmr.msrb.gmra.mxu1 %v10191_v61 }
 0x109   :  { %10242 = vst [vmem:[#allocation158_spill] sm:$0xff] %v8076_v56  ;;  %1849 = vmatmul.bf16.vlgmr.msrb.gmra.mxu3 %v10191_v61  ;;  %v8111_v29 = vpack.c.bf16 %v727_v58, %v698_v16  ;;  %2030 = vmatpush.bf16.msra.mxu0 %v7589_v7  ;;  %v7495_v58 = vmov 6  }
 0x10a   :  { %10243 = vst [vmem:[#allocation159_spill] sm:$0xff] %v8080_v48  ;;  %2056 = vmatpush.bf16.msra.mxu2 %v7593_v13  ;;  %2043 = vmatpush.bf16.msra.mxu1 %v7591_v11  ;;  %v755_v53 = vpop.f32.mrf.mxu2  ;;  %v784_v61 = vpop.f32.mrf.mxu3 }
 0x10b   :  { %10244 = vst [vmem:[#allocation160_spill] sm:$0xff] %v8082_v44  ;;  %2069 = vmatpush.bf16.msra.mxu3 %v7596_v17  ;;  %v756_v63 = vadd.f32 %v755_v53, %v8114_v49  ;;  %v785_v31 = vadd.f32 %v784_v61, %v8118_v25  ;;  %7002 = vset.pattern.permute.xlu0 %v7495_v58 }
 0x10c   :  { %10245 = vst [vmem:[#allocation161_spill] sm:$0xff] %v8085_v33  ;;  %v699_v52 = vpop.f32.mrf.mxu0  ;;  %2381 = vperm.xlu0 %7002, %v8018_v8  }
 0x10d   :  { %10247 = vst [vmem:[#allocation162_spill] sm:$0xff] %v8106_v4  ;;  %2031 = vmatpush.bf16.msra.mxu0 %v7600_v21  ;;  %v700_v14 = vadd.f32 %v699_v52, %v8088_v24  ;;  %v8131_v16 = vpack.c.bf16 %v785_v31, %v756_v63 }
 0x10e   :  { %10248 = vst [vmem:[#allocation163_spill] sm:$0xff] %v8111_v29  ;;  %v728_v23 = vpop.f32.mrf.mxu1  ;;  %2057 = vmatpush.bf16.msra.mxu2 %v7605_v26  ;;  %2044 = vmatpush.bf16.msra.mxu1 %v7602_v22 }
 0x10f   :  { %v729_v62 = vadd.f32 %v728_v23, %v8092_v43  ;;  %2070 = vmatpush.bf16.msra.mxu3 %v7607_v30  ;;  %10249 = vst [vmem:[#allocation164_spill] sm:$0xff] %v8131_v16  ;;  %7010 = vset.pattern.permute.xlu2 %v7495_v58 }
 0x110   :  { %2393 = vperm.xlu2 %7010, %v8010_v57  }
 0x111   :  { %v8133_v0 = vpack.c.bf16 %v729_v62, %v700_v14  ;;  %2032 = vmatpush.bf16.msra.mxu0 %v7610_v35 }
 0x112   :  { %2058 = vmatpush.bf16.msra.mxu2 %v7616_v40  ;;  %2045 = vmatpush.bf16.msra.mxu1 %v7614_v39  ;;  %v757_v53 = vpop.f32.mrf.mxu2  ;;  %v786_v63 = vpop.f32.mrf.mxu3 }
 0x113   :  { %10250 = vst [vmem:[#allocation165_spill] sm:$0xff] %v8133_v0  ;;  %2071 = vmatpush.bf16.msra.mxu3 %v7619_v41  ;;  %v758_v61 = vadd.f32 %v757_v53, %v8114_v49  ;;  %v787_v31 = vadd.f32 %v786_v63, %v8118_v25  ;;  %v10260_v0 = vld [vmem:[#allocation54_spill] sm:$0xff]  ;;  %v10286_v41 = vld [vmem:[#allocation76_spill] sm:$0xff] }
 0x114   :  { %v702_v52 = vpop.f32.mrf.mxu0  ;;  %7009 = vset.pattern.permute.xlu0 %v7494_v42 }
 0x115   :  { %2033 = vmatpush.bf16.msra.mxu0 %v7631_v46  ;;  %v703_v14 = vadd.f32 %v702_v52, %v8088_v24  ;;  %v8148_v58 = vpack.c.bf16 %v787_v31, %v758_v61  ;;  %2013 = vperm.xlu0 %7009, %v8010_v57  }
 0x116   :  { %v731_v23 = vpop.f32.mrf.mxu1  ;;  %2059 = vmatpush.bf16.msra.mxu2 %v7635_v51  ;;  %2046 = vmatpush.bf16.msra.mxu1 %v7633_v50 }
 0x117   :  { %v732_v62 = vadd.f32 %v731_v23, %v8092_v43  ;;  %10251 = vst [vmem:[#allocation166_spill] sm:$0xff] %v8148_v58  ;;  %2072 = vmatpush.bf16.msra.mxu3 %v7638_v55  ;;  %v10259_v58 = vld [vmem:[#allocation52_spill] sm:$0xff] }
 0x119   :  { %v8151_v53 = vpack.c.bf16 %v732_v62, %v703_v14  ;;  %2034 = vmatpush.bf16.msra.mxu0 %v7642_v59 }
 0x11a   :  { %2060 = vmatpush.bf16.msra.mxu2 %v7647_v1  ;;  %2047 = vmatpush.bf16.msra.mxu1 %v7644_v60  ;;  %v760_v63 = vpop.f32.mrf.mxu2  ;;  %v789_v52 = vpop.f32.mrf.mxu3  ;;  %v10285_v60 = vld [vmem:[#allocation74_spill] sm:$0xff] }
 0x11b   :  { %10252 = vst [vmem:[#allocation167_spill] sm:$0xff] %v8151_v53  ;;  %2073 = vmatpush.bf16.msra.mxu3 %v7649_v5  ;;  %v761_v61 = vadd.f32 %v760_v63, %v8114_v49  ;;  %v790_v14 = vadd.f32 %v789_v52, %v8118_v25  ;;  %v10276_v5 = vld [vmem:[#allocation68_spill] sm:$0xff] }
 0x11c   :  { %v704_v31 = vpop.f32.mrf.mxu0 }
 0x11d   :  { %2035 = vmatpush.bf16.msra.mxu0 %v7652_v10  ;;  %v705_v23 = vadd.f32 %v704_v31, %v8088_v24  ;;  %v8166_v16 = vpack.c.bf16 %v790_v14, %v761_v61  ;;  %v10255_v31 = vmov 3  }
 0x11e   :  { %v733_v62 = vpop.f32.mrf.mxu1  ;;  %2061 = vmatpush.bf16.msra.mxu2 %v7658_v19  ;;  %2048 = vmatpush.bf16.msra.mxu1 %v7656_v18 }
 0x11f   :  { %v734_v42 = vadd.f32 %v733_v62, %v8092_v43  ;;  %10253 = vst [vmem:[#allocation168_spill] sm:$0xff] %v8166_v16  ;;  %2074 = vmatpush.bf16.msra.mxu3 %v7661_v20  ;;  %7013 = vset.pattern.permute.xlu0 %v10255_v31  ;;  %v10256_v31 = vld [vmem:[#allocation55_spill] sm:$0xff] }
 0x120   :  { %3147 = vperm.xlu0 %7013, %v8010_v57   ;;  %v10264_v16 = vld [vmem:[#allocation59_spill] sm:$0xff] }
 0x121   :  { %v8169_v63 = vpack.c.bf16 %v734_v42, %v705_v23  ;;  %2036 = vmatpush.bf16.msra.mxu0 %v7667_v34 }
 0x122   :  { %2062 = vmatpush.bf16.msra.mxu2 %v7671_v37  ;;  %2049 = vmatpush.bf16.msra.mxu1 %v7669_v36  ;;  %v762_v52 = vpop.f32.mrf.mxu2  ;;  %v791_v29 = vpop.f32.mrf.mxu3  ;;  %v10275_v36 = vld [vmem:[#allocation66_spill] sm:$0xff] }
 0x123   :  { %10254 = vst [vmem:[#allocation169_spill] sm:$0xff] %v8169_v63  ;;  %2075 = vmatpush.bf16.msra.mxu3 %v7674_v38  ;;  %v763_v62 = vadd.f32 %v762_v52, %v8114_v49  ;;  %v792_v14 = vadd.f32 %v791_v29, %v8118_v25  ;;  %v10257_v52 = vld [vmem:[#allocation50_spill] sm:$0xff]  ;;  %v10273_v38 = vld [vmem:[#allocation65_spill] sm:$0xff] }
 0x124   :  { %v707_v61 = vpop.f32.mrf.mxu0 }
 0x125   :  { %2037 = vmatpush.bf16.msra.mxu0 %v7680_v47  ;;  %v708_v23 = vadd.f32 %v707_v61, %v8088_v24  ;;  %v8186_v56 = vpack.c.bf16 %v792_v14, %v763_v62  ;;  %v10262_v61 = vld [vmem:[#allocation56_spill] sm:$0xff] }
 0x126   :  { %v736_v42 = vpop.f32.mrf.mxu1  ;;  %2063 = vmatpush.bf16.msra.mxu2 %v7686_v54  ;;  %2050 = vmatpush.bf16.msra.mxu1 %v10257_v52  ;;  %v10266_v14 = vld [vmem:[#allocation60_spill] sm:$0xff] }
 0x127   :  { %v737_v4 = vadd.f32 %v736_v42, %v8092_v43  ;;  %10258 = vst [vmem:[#allocation170_spill] sm:$0xff] %v8186_v56  ;;  %2076 = vmatpush.bf16.msra.mxu3 %v10259_v58  ;;  %v10265_v42 = vld [vmem:[#allocation58_spill] sm:$0xff] }
 0x128   :  { %7016 = vset.pattern.permute.xlu0 %v10246_v28 }
 0x129   :  { %2082 = vmatpush.bf16.msrb.mxu0 %v7691_v2  ;;  %v8190_v29 = vpack.c.bf16 %v737_v4, %v708_v23 }
 0x12a   :  { %2108 = vmatpush.bf16.msrb.mxu2 %v10256_v31  ;;  %2095 = vmatpush.bf16.msrb.mxu1 %v10260_v0  ;;  %v765_v53 = vpop.f32.mrf.mxu2  ;;  %v794_v52 = vpop.f32.mrf.mxu3  ;;  %v10268_v0 = vld [vmem:[#allocation63_spill] sm:$0xff] }
 0x12b   :  { %10261 = vst [vmem:[#allocation171_spill] sm:$0xff] %v8190_v29  ;;  %2121 = vmatpush.bf16.msrb.mxu3 %v10262_v61  ;;  %v766_v63 = vadd.f32 %v765_v53, %v8114_v49  ;;  %v795_v4 = vadd.f32 %v794_v52, %v8118_v25  ;;  %v10267_v29 = vld [vmem:[#allocation61_spill] sm:$0xff]  ;;  %v10270_v53 = vld [vmem:[#allocation62_spill] sm:$0xff]  ;;  %v10274_v52 = vld [vmem:[#allocation67_spill] sm:$0xff] }
 0x12c   :  { %v709_v62 = vpop.f32.mrf.mxu0 }
 0x12d   :  { %2083 = vmatpush.bf16.msrb.mxu0 %v10263_v45  ;;  %v710_v23 = vadd.f32 %v709_v62, %v8088_v24 }
 0x12e   :  { %2109 = vmatpush.bf16.msrb.mxu2 %v10264_v16  ;;  %2096 = vmatpush.bf16.msrb.mxu1 %v10265_v42  ;;  %v738_v56 = vpop.f32.mrf.mxu1  ;;  %v8204_v42 = vpack.c.bf16 %v795_v4, %v766_v63 }
 0x12f   :  { %2122 = vmatpush.bf16.msrb.mxu3 %v10266_v14  ;;  %v739_v61 = vadd.f32 %v738_v56, %v8092_v43  ;;  %v10272_v14 = vld [vmem:[#allocation64_spill] sm:$0xff] }
 0x130   :  { %10269 = vst [vmem:[#allocation172_spill] sm:$0xff] %v8204_v42 }
 0x131   :  { %2084 = vmatpush.bf16.msrb.mxu0 %v10267_v29  ;;  %v8207_v58 = vpack.c.bf16 %v739_v61, %v710_v23  ;;  %v10277_v23 = vld [vmem:[#allocation69_spill] sm:$0xff] }
 0x132   :  { %2110 = vmatpush.bf16.msrb.mxu2 %v10268_v0  ;;  %2097 = vmatpush.bf16.msrb.mxu1 %v10270_v53  ;;  %v767_v62 = vpop.f32.mrf.mxu2  ;;  %v796_v56 = vpop.f32.mrf.mxu3  ;;  %v10282_v53 = vld [vmem:[#allocation72_spill] sm:$0xff] }
 0x133   :  { %10271 = vst [vmem:[#allocation173_spill] sm:$0xff] %v8207_v58  ;;  %2123 = vmatpush.bf16.msrb.mxu3 %v10272_v14  ;;  %v768_v20 = vadd.f32 %v767_v62, %v8114_v49  ;;  %v797_v63 = vadd.f32 %v796_v56, %v8118_v25  ;;  %v10278_v58 = vld [vmem:[#allocation71_spill] sm:$0xff] }
 0x134   :  { %v712_v18 = vpop.f32.mrf.mxu0  ;;  %v10284_v56 = vld [vmem:[#allocation75_spill] sm:$0xff] }
 0x135   :  { %2085 = vmatpush.bf16.msrb.mxu0 %v10273_v38  ;;  %v713_v61 = vadd.f32 %v712_v18, %v8088_v24  ;;  %v8220_v14 = vpack.c.bf16 %v797_v63, %v768_v20 }
 0x136   :  { %2111 = vmatpush.bf16.msrb.mxu2 %v10274_v52  ;;  %2098 = vmatpush.bf16.msrb.mxu1 %v10275_v36  ;;  %v741_v4 = vpop.f32.mrf.mxu1  ;;  %v10280_v36 = vld [vmem:[#allocation70_spill] sm:$0xff] }
 0x137   :  { %2124 = vmatpush.bf16.msrb.mxu3 %v10276_v5  ;;  %v742_v42 = vadd.f32 %v741_v4, %v8092_v43  ;;  %10279 = vst [vmem:[#allocation174_spill] sm:$0xff] %v8220_v14  ;;  %v10283_v5 = vld [vmem:[#allocation73_spill] sm:$0xff] }
 0x139   :  { %2086 = vmatpush.bf16.msrb.mxu0 %v10277_v23  ;;  %v8223_v62 = vpack.c.bf16 %v742_v42, %v713_v61  ;;  %v10287_v42 = vld [vmem:[#allocation77_spill] sm:$0xff]  ;;  %v10288_v61 = vld [vmem:[#allocation79_spill] sm:$0xff] }
 0x13a   :  { %2112 = vmatpush.bf16.msrb.mxu2 %v10278_v58  ;;  %2099 = vmatpush.bf16.msrb.mxu1 %v10280_v36  ;;  %v770_v18 = vpop.f32.mrf.mxu2  ;;  %v799_v4 = vpop.f32.mrf.mxu3 }
 0x13b   :  { %10281 = vst [vmem:[#allocation175_spill] sm:$0xff] %v8223_v62  ;;  %2125 = vmatpush.bf16.msrb.mxu3 %v10282_v53  ;;  %v771_v55 = vadd.f32 %v770_v18, %v8114_v49  ;;  %v800_v20 = vadd.f32 %v799_v4, %v8118_v25  ;;  %v10290_v62 = vld [vmem:[#allocation78_spill] sm:$0xff]  ;;  %v10291_v53 = vld [vmem:[#allocation80_spill] sm:$0xff]  ;;  %v10293_v18 = vld [vmem:[#allocation83_spill] sm:$0xff] }
 0x13c   :  { %v714_v50 = vpop.f32.mrf.mxu0 }
 0x13d   :  { %2087 = vmatpush.bf16.msrb.mxu0 %v10283_v5  ;;  %v8234_v14 = vpack.c.bf16 %v800_v20, %v771_v55  ;;  %v10296_v20 = vld [vmem:[#allocation89_spill] sm:$0xff] }
 0x13e   :  { %2113 = vmatpush.bf16.msrb.mxu2 %v10284_v56  ;;  %2100 = vmatpush.bf16.msrb.mxu1 %v10285_v60  ;;  %v743_v63 = vpop.f32.mrf.mxu1  ;;  %v10292_v60 = vld [vmem:[#allocation81_spill] sm:$0xff]  ;;  %v1855_v30 = vunpack.c.h.bf16 %v10296_v20 }
 0x13f   :  { %2126 = vmatpush.bf16.msrb.mxu3 %v10286_v41  ;;  %10289 = vst [vmem:[#allocation176_spill] sm:$0xff] %v8234_v14  ;;  %v10294_v41 = vld [vmem:[#allocation82_spill] sm:$0xff]  ;;  %v1854_v14 = vunpack.c.l.bf16 %v10296_v20 }
 0x141   :  { %2088 = vmatpush.bf16.msrb.mxu0 %v10287_v42  ;;  %v10295_v42 = vld [vmem:[#allocation84_spill] sm:$0xff] }
 0x142   :  { %2114 = vmatpush.bf16.msrb.mxu2 %v10288_v61  ;;  %2101 = vmatpush.bf16.msrb.mxu1 %v10290_v62  ;;  %v8240_v36 = vpop.f32.mrf.mxu2  ;;  %v8243_v4 = vpop.f32.mrf.mxu3 }
 0x143   :  { %2127 = vmatpush.bf16.msrb.mxu3 %v10291_v53 }
 0x144   :  { %v1655_v39 = vpop.f32.mrf.mxu0 }
 0x145   :  { %2089 = vmatpush.bf16.msrb.mxu0 %v10292_v60 }
 0x146   :  { %2115 = vmatpush.bf16.msrb.mxu2 %v10293_v18  ;;  %2102 = vmatpush.bf16.msrb.mxu1 %v10294_v41  ;;  %v1668_v61 = vpop.f32.mrf.mxu1 }
 0x147   :  { %2128 = vmatpush.bf16.msrb.mxu3 %v10295_v42  ;;  %v1669_v55 = vadd.f32 %v1668_v61, %v1655_v39 }
 0x149   :  { %v1858_v62 = vadd.f32 %v1854_v14, %v1669_v55  ;;  %v10297_v55 = vld [vmem:[#allocation97_spill] sm:$0xff] }
 0x14a   :  { %v1681_v53 = vpop.f32.mrf.mxu2  ;;  %v1694_v60 = vpop.f32.mrf.mxu3 }
 0x14b   :  { %v6230_v56 = vmul.f32 -1.442695, %v1858_v62  ;;  %v1695_v18 = vadd.f32 %v1694_v60, %v1681_v53 }
 0x14c   :  { %v1657_v5 = vpop.f32.mrf.mxu0 }
 0x14d   :  { %7018 = vpow2.f32 %v6230_v56  ;;  %v1859_v41 = vadd.f32 %v1855_v30, %v1695_v18  ;;  %v1856_v56 = vunpack.c.l.bf16 %v10297_v55 }
 0x14e   :  { %v1670_v22 = vpop.f32.mrf.mxu1 }
 0x14f   :  { %v6231_v58 = vmul.f32 -1.442695, %v1859_v41 }
 0x151   :  { %7020 = vpow2.f32 %v6231_v58  ;;  %v1857_v58 = vunpack.c.h.bf16 %v10297_v55 }
 0x152   :  { %v1683_v42 = vpop.f32.mrf.mxu2  ;;  %v1696_v11 = vpop.f32.mrf.mxu3 }
 0x153   :  { %v7019_v23 = vpop.eup %7018  ;;  %v715_v42 = vadd.f32 %v714_v50, %v8088_v24 }
 0x154   :  { %v1873_v17 = vadd.f32 1.0, %v7019_v23  ;;  %v1707_v39 = vpop.f32.mrf.mxu0 }
 0x156   :  { %7022 = vrcp.f32 %v1873_v17  ;;  %v1720_v61 = vpop.f32.mrf.mxu1  ;;  %v1885_v18 = vand.u32 2147483648, %v1873_v17  ;;  %vm1879_vm2 = vweird.f32 %v1873_v17 }
 0x157   :  { %v1721_v14 = vadd.f32 %v1720_v61, %v1707_v39  ;;  %v7021_v62 = vpop.eup %7020  ;;  %v744_v61 = vadd.f32 %v743_v63, %v8092_v43 }
 0x158   :  { %v1892_v33 = vadd.f32 1.0, %v7021_v62 }
 0x159   :  { %v1860_v60 = vadd.f32 %v1856_v56, %v1721_v14  ;;  %v1883_v14 = vand.u32 2147483647, %v1873_v17 }
 0x15a   :  { %v1733_v53 = vpop.f32.mrf.mxu2  ;;  %7024 = vrcp.f32 %v1892_v33  ;;  %v1746_v22 = vpop.f32.mrf.mxu3  ;;  %v1904_v43 = vand.u32 2147483648, %v1892_v33  ;;  %vm1898_vm6 = vweird.f32 %v1892_v33 }
 0x15b   :  { %v1747_v41 = vadd.f32 %v1746_v22, %v1733_v53  ;;  %7026 = vtanh.f32 %v1860_v60  ;;  %v1886_v53 = vor.u32 1.1754944e-38, %v1885_v18  ;;  %vm1884_vm4 = vcmp.eq.f32.partialorder %v1883_v14, 8.507059e+37 }
 0x15c   :  { %v7023_v5 = vpop.eup %7022  ;;  %v1709_v30 = vpop.f32.mrf.mxu0 }
 0x15d   :  { %v1875_v20 = vmul.f32 %v7023_v5, %v1873_v17  ;;  %v1861_v39 = vadd.f32 %v1857_v58, %v1747_v41  ;;  %vm1880_vm1 = vweird.f32 %v7023_v5 }
 0x15e   :  { %v1722_v23 = vpop.f32.mrf.mxu1  ;;  %vm1881_vm3 = vmor %vm1879_vm2, %vm1880_vm1 }
 0x15f   :  { %v1876_v11 = vsub.f32 1.0, %v1875_v20  ;;  %v6232_v56 = vmul.f32 -1.442695, %v1861_v39  ;;  %v834_v20 = vpack.c.bf16 %v744_v61, %v715_v42 }
 0x160   :  { %v7025_v48 = vpop.eup %7024 }
 0x161   :  { %v1877_v62 = vmul.f32 %v7023_v5, %v1876_v11  ;;  %v1894_v30 = vmul.f32 %v7025_v48, %v1892_v33  ;;  %7028 = vpow2.f32 %v6232_v56  ;;  %v7027_v24 = vpop.eup %7026  ;;  %vm1899_vm5 = vweird.f32 %v7025_v48 }
 0x162   :  { %v1735_v55 = vpop.f32.mrf.mxu2  ;;  %v1748_v50 = vpop.f32.mrf.mxu3  ;;  %v1902_v11 = vand.u32 2147483647, %v1892_v33  ;;  %v1905_v56 = vor.u32 1.1754944e-38, %v1904_v43  ;;  %vm1900_vm7 = vmor %vm1898_vm6, %vm1899_vm5 }
 0x163   :  { %v1878_v52 = vadd.f32 %v7023_v5, %v1877_v62  ;;  %v1895_v60 = vsub.f32 1.0, %v1894_v30  ;;  %v1862_v62 = vunpack.c.l.bf16 %v834_v20 }
 0x164   :  { %v1759_v58 = vpop.f32.mrf.mxu0  ;;  %vm1903_vm8 = vcmp.eq.f32.partialorder %v1902_v11, 8.507059e+37 }
 0x165   :  { %v1882_v22 = vsel %vm1881_vm3, %v7023_v5, %v1878_v52  ;;  %v1896_v23 = vmul.f32 %v7025_v48, %v1895_v60  ;;  %v1863_v60 = vunpack.c.h.bf16 %v834_v20 }
 0x166   :  { %v1887_v41 = vsel %vm1884_vm4, %v1886_v53, %v1882_v22  ;;  %v1772_v39 = vpop.f32.mrf.mxu1 }
 0x167   :  { %v1929_v63 = vmul.f32 %v7027_v24, %v1887_v41  ;;  %v1773_v17 = vadd.f32 %v1772_v39, %v1759_v58  ;;  %v7029_v38 = vpop.eup %7028  ;;  %v1897_v18 = vadd.f32 %v7025_v48, %v1896_v23 }
 0x168   :  { %v1912_v52 = vadd.f32 1.0, %v7029_v38 }
 0x169   :  { %v1866_v5 = vadd.f32 %v1862_v62, %v1773_v17  ;;  %v1901_v42 = vsel %vm1900_vm7, %v7025_v48, %v1897_v18 }
 0x16a   :  { %v1906_v61 = vsel %vm1903_vm8, %v1905_v56, %v1901_v42  ;;  %7030 = vrcp.f32 %v1912_v52  ;;  %v1785_v53 = vpop.f32.mrf.mxu2  ;;  %v1798_v55 = vpop.f32.mrf.mxu3  ;;  %v1924_v62 = vand.u32 2147483648, %v1912_v52  ;;  %v1922_v20 = vand.u32 2147483647, %v1912_v52 }
 0x16b   :  { %v6233_v14 = vmul.f32 -1.442695, %v1866_v5  ;;  %v1928_v30 = vmul.f32 0.0, %v1906_v61  ;;  %v1799_v24 = vadd.f32 %v1798_v55, %v1785_v53  ;;  %vm1918_vm10 = vweird.f32 %v1912_v52 }
 0x16c   :  { %v1761_v22 = vpop.f32.mrf.mxu0  ;;  %v1925_v56 = vor.u32 1.1754944e-38, %v1924_v62  ;;  %vm1923_vm12 = vcmp.eq.f32.partialorder %v1922_v20, 8.507059e+37  ;;  %v773_v55 = vadd.f32 %v8240_v36, %v8114_v49  ;;  %v10299_v36 = vld [vmem:[#allocation87_spill] sm:$0xff] }
 0x16d   :  { %7032 = vpow2.f32 %v6233_v14  ;;  %v8252_v50 = vadd.f32 %v1929_v63, %v1928_v30  ;;  %v1867_v41 = vadd.f32 %v1863_v60, %v1799_v24  ;;  %v802_v22 = vadd.f32 %v8243_v4, %v8118_v25 }
 0x16e   :  { %v1774_v33 = vpop.f32.mrf.mxu1 }
 0x16f   :  { %v6234_v58 = vmul.f32 -1.442695, %v1867_v41  ;;  %v835_v41 = vpack.c.bf16 %v802_v22, %v773_v55  ;;  %v10303_v55 = vld [vmem:[#allocation96_spill] sm:$0xff] }
 0x170   :  { %v7031_v43 = vpop.eup %7030 }
 0x171   :  { %v1914_v38 = vmul.f32 %v7031_v43, %v1912_v52  ;;  %7034 = vpow2.f32 %v6234_v58  ;;  %vm1919_vm9 = vweird.f32 %v7031_v43 }
 0x172   :  { %v1787_v11 = vpop.f32.mrf.mxu2  ;;  %v1800_v17 = vpop.f32.mrf.mxu3  ;;  %7036 = vtanh.f32 %v8252_v50  ;;  %vm1920_vm11 = vmor %vm1918_vm10, %vm1919_vm9 }
 0x173   :  { %v7033_v23 = vpop.eup %7032  ;;  %v1915_v39 = vsub.f32 1.0, %v1914_v38  ;;  %v1864_v11 = vunpack.c.l.bf16 %v835_v41  ;;  %v10301_v17 = vld [vmem:[#allocation92_spill] sm:$0xff] }
 0x174   :  { %v8254_v48 = vadd.f32 1.0, %v7033_v23 }
 0x175   :  { %v1916_v63 = vmul.f32 %v7031_v43, %v1915_v39  ;;  %v10300_v39 = vld [vmem:[#allocation90_spill] sm:$0xff] }
 0x176   :  { %7038 = vrcp.f32 %v8254_v48  ;;  %vm1942_vm15 = vweird.f32 %v8254_v48  ;;  %v1946_v22 = vand.u32 2147483647, %v8254_v48 }
 0x177   :  { %v1917_v18 = vadd.f32 %v7031_v43, %v1916_v63  ;;  %v7035_v5 = vpop.eup %7034 }
 0x178   :  { %v7037_v61 = vpop.eup %7036  ;;  %v1955_v14 = vadd.f32 1.0, %v7035_v5  ;;  %vm1947_vm4 = vcmp.eq.f32.partialorder %v1946_v22, 8.507059e+37  ;;  %v10310_v22 = vld [vmem:[#allocation110_spill] sm:$0xff] }
 0x179   :  { %v1921_v42 = vsel %vm1920_vm11, %v7031_v43, %v1917_v18  ;;  %v10298_v43 = vld [vmem:[#allocation85_spill] sm:$0xff]  ;;  %v1948_v18 = vand.u32 2147483648, %v8254_v48 }
 0x17a   :  { %v1926_v30 = vsel %vm1923_vm12, %v1925_v56, %v1921_v42  ;;  %7040 = vrcp.f32 %v1955_v14  ;;  %v1967_v56 = vand.u32 2147483648, %v1955_v14  ;;  %v1965_v42 = vand.u32 2147483647, %v1955_v14 }
 0x17b   :  { %v8262_v24 = vmul.f32 %v7037_v61, %v1926_v30  ;;  %v10302_v30 = vld [vmem:[#allocation94_spill] sm:$0xff]  ;;  %vm1961_vm1 = vweird.f32 %v1955_v14 }
 0x17c   :  { %v7039_v53 = vpop.eup %7038  ;;  %vm1966_vm3 = vcmp.eq.f32.partialorder %v1965_v42, 8.507059e+37 }
 0x17d   :  { %v1938_v60 = vmul.f32 %v7039_v53, %v8254_v48  ;;  %v8267_v52 = vpack.c.bf16 %v8262_v24, %v8262_v24  ;;  %vm1943_vm13 = vweird.f32 %v7039_v53 }
 0x17e   :  { %vm8280_vm0 = vmor %vm1942_vm15, %vm1943_vm13 }
 0x17f   :  { %v1939_v33 = vsub.f32 1.0, %v1938_v60  ;;  %2038 = vmatmul.bf16.vlgmr.msra.gmra.mxu0 %v8267_v52  ;;  %2064 = vmatmul.bf16.vlgmr.msra.gmra.mxu2 %v8267_v52 }
 0x180   :  { %2134 = vmatpush.bf16.msra.mxu0 %v10298_v43  ;;  %2160 = vmatpush.bf16.msra.mxu2 %v10299_v36  ;;  %v7041_v25 = vpop.eup %7040 }
 0x181   :  { %v1940_v58 = vmul.f32 %v7039_v53, %v1939_v33  ;;  %v1957_v38 = vmul.f32 %v7041_v25, %v1955_v14  ;;  %vm1962_vm14 = vweird.f32 %v7041_v25 }
 0x182   :  { %vm1963_vm2 = vmor %vm1961_vm1, %vm1962_vm14 }
 0x183   :  { %v1958_v63 = vsub.f32 1.0, %v1957_v38  ;;  %v1941_v20 = vadd.f32 %v7039_v53, %v1940_v58  ;;  %v1865_v38 = vunpack.c.h.bf16 %v835_v41 }
 0x184   :  { %2135 = vmatpush.bf16.msra.mxu0 %v10300_v39  ;;  %2161 = vmatpush.bf16.msra.mxu2 %v10301_v17  ;;  %v10307_v17 = vld [vmem:[#allocation102_spill] sm:$0xff] }
 0x185   :  { %v1811_v49 = vpop.f32.mrf.mxu0  ;;  %v1824_v4 = vpop.f32.mrf.mxu1  ;;  %v1959_v5 = vmul.f32 %v7041_v25, %v1958_v63  ;;  %v1949_v63 = vor.u32 1.1754944e-38, %v1948_v18  ;;  %v10308_v18 = vld [vmem:[#allocation104_spill] sm:$0xff] }
 0x186   :  { %v1825_v23 = vadd.f32 %v1824_v4, %v1811_v49 }
 0x187   :  { %v1960_v49 = vadd.f32 %v7041_v25, %v1959_v5  ;;  %v2001_v5 = vpop.permute.xlu0 %2000 }
 0x188   :  { %v1868_v62 = vadd.f32 %v1864_v11, %v1825_v23  ;;  %2136 = vmatpush.bf16.msra.mxu0 %v10302_v30  ;;  %2162 = vmatpush.bf16.msra.mxu2 %v10303_v55  ;;  %v1945_v23 = vsel %vm8280_vm0, %v7039_v53, %v1941_v20  ;;  %v1968_v11 = vor.u32 1.1754944e-38, %v1967_v56  ;;  %v10306_v30 = vld [vmem:[#allocation100_spill] sm:$0xff]  ;;  %vm2002_vm5 = vcmp.eq.s32.totalorder %v2001_v5, 1  ;;  %v10309_v56 = vld [vmem:[#allocation106_spill] sm:$0xff]  ;;  %v10329_v5 = vld [vmem:[#allocation147_spill] sm:$0xff] }
 0x189   :  { %v1964_v55 = vsel %vm1963_vm2, %v7041_v25, %v1960_v49  ;;  %v1950_v41 = vsel %vm1947_vm4, %v1949_v63, %v1945_v23  ;;  %v10311_v49 = vld [vmem:[#allocation112_spill] sm:$0xff]  ;;  %v10313_v23 = vld [vmem:[#allocation119_spill] sm:$0xff]  ;;  %v10316_v63 = vld [vmem:[#allocation125_spill] sm:$0xff] }
 0x18a   :  { %7042 = vtanh.f32 %v1868_v62  ;;  %v1837_v61 = vpop.f32.mrf.mxu2  ;;  %v1969_v14 = vsel %vm1966_vm3, %v1968_v11, %v1964_v55  ;;  %v10314_v11 = vld [vmem:[#allocation121_spill] sm:$0xff]  ;;  %vm8314_vm10 = vmpackc.low %vm2002_vm5, %vm2002_vm5 }
 0x18c   :  { %v1850_v60 = vpop.f32.mrf.mxu3  ;;  %2137 = vmatpush.bf16.msra.mxu0 %v10306_v30  ;;  %2163 = vmatpush.bf16.msra.mxu2 %v10307_v17 }
 0x18d   :  { %v1813_v4 = vpop.f32.mrf.mxu0  ;;  %v1851_v58 = vadd.f32 %v1850_v60, %v1837_v61  ;;  %v1826_v62 = vpop.f32.mrf.mxu1  ;;  %v1991_v60 = vmul.f32 0.0, %v1969_v14 }
 0x18e   :  { %v10315_v62 = vld [vmem:[#allocation123_spill] sm:$0xff] }
 0x18f   :  { %v1869_v48 = vadd.f32 %v1865_v38, %v1851_v58  ;;  %2090 = vmatmul.bf16.vlgmr.msrb.gmra.mxu0 %v8267_v52  ;;  %2116 = vmatmul.bf16.vlgmr.msrb.gmra.mxu2 %v8267_v52  ;;  %v10312_v38 = vld [vmem:[#allocation115_spill] sm:$0xff] }
 0x190   :  { %v7043_v61 = vpop.eup %7042  ;;  %2138 = vmatpush.bf16.msra.mxu0 %v10308_v18  ;;  %2164 = vmatpush.bf16.msra.mxu2 %v10309_v56 }
 0x191   :  { %v6235_v33 = vmul.f32 -1.442695, %v1869_v48  ;;  %v1992_v53 = vmul.f32 %v7043_v61, %v1950_v41  ;;  %v10317_v61 = vld [vmem:[#allocation128_spill] sm:$0xff]  ;;  %v10318_v41 = vld [vmem:[#allocation131_spill] sm:$0xff] }
 0x192   :  { %v1839_v20 = vpop.f32.mrf.mxu2 }
 0x193   :  { %7044 = vpow2.f32 %v6235_v33  ;;  %v1993_v25 = vadd.f32 %v1992_v53, %v1991_v60 }
 0x194   :  { %v1852_v42 = vpop.f32.mrf.mxu3  ;;  %2139 = vmatpush.bf16.msra.mxu0 %v10310_v22  ;;  %2165 = vmatpush.bf16.msra.mxu2 %v10311_v49 }
 0x195   :  { %v8294_v55 = vsel %vm2002_vm5, %v1993_v25, 0.0  ;;  %v10319_v42 = vld [vmem:[#allocation133_spill] sm:$0xff] }
 0x198   :  { %2140 = vmatpush.bf16.msra.mxu0 %v7917_v15  ;;  %2166 = vmatpush.bf16.msra.mxu2 %v10312_v38 }
 0x199   :  { %v7045_v4 = vpop.eup %7044 }
 0x19a   :  { %v1975_v58 = vadd.f32 1.0, %v7045_v4  ;;  %v10320_v4 = vld [vmem:[#allocation135_spill] sm:$0xff] }
 0x19c   :  { %7046 = vrcp.f32 %v1975_v58  ;;  %2141 = vmatpush.bf16.msra.mxu0 %v10313_v23  ;;  %2167 = vmatpush.bf16.msra.mxu2 %v10314_v11  ;;  %v1987_v33 = vand.u32 2147483648, %v1975_v58  ;;  %v1985_v20 = vand.u32 2147483647, %v1975_v58  ;;  %vm1981_vm7 = vweird.f32 %v1975_v58 }
 0x19d   :  { %7048 = vtanh.f32 %v1993_v25 }
 0x19e   :  { %vm1986_vm9 = vcmp.eq.f32.partialorder %v1985_v20, 8.507059e+37  ;;  %v7496_v20 = vmov 5  }
 0x19f   :  { %2142 = vmatmul.bf16.vlgmr.msra.gmra.mxu0 %v8267_v52  ;;  %2168 = vmatmul.bf16.vlgmr.msra.gmra.mxu2 %v8267_v52 }
 0x1a0   :  { %2186 = vmatpush.bf16.msrb.mxu0 %v10315_v62  ;;  %2212 = vmatpush.bf16.msrb.mxu2 %v10316_v63  ;;  %v1988_v62 = vor.u32 1.1754944e-38, %v1987_v33  ;;  %v10332_v33 = vld [vmem:[#allocation93_spill] sm:$0xff] }
 0x1a1   :  { %7003 = vset.pattern.permute.xlu1 %v7496_v20  ;;  %7012 = vset.pattern.permute.xlu2 %v7496_v20  ;;  %v10338_v20 = vld [vmem:[#allocation108_spill] sm:$0xff] }
 0x1a2   :  { %v7047_v48 = vpop.eup %7046  ;;  %2761 = vperm.xlu1 %7003, %v8018_v8   ;;  %2773 = vperm.xlu2 %7012, %v8010_v57   ;;  %v10337_v57 = vld [vmem:[#allocation105_spill] sm:$0xff] }
 0x1a3   :  { %v1977_v14 = vmul.f32 %v7047_v48, %v1975_v58  ;;  %vm1982_vm6 = vweird.f32 %v7047_v48  ;;  %v7049_v23 = vpop.eup %7048 }
 0x1a4   :  { %2187 = vmatpush.bf16.msrb.mxu0 %v10317_v61  ;;  %2213 = vmatpush.bf16.msrb.mxu2 %v10318_v41  ;;  %vm1983_vm8 = vmor %vm1981_vm7, %vm1982_vm6  ;;  %v10321_v61 = vld [vmem:[#allocation138_spill] sm:$0xff]  ;;  %v10322_v41 = vld [vmem:[#allocation141_spill] sm:$0xff] }
 0x1a5   :  { %v1978_v60 = vsub.f32 1.0, %v1977_v14 }
 0x1a7   :  { %v1979_v53 = vmul.f32 %v7047_v48, %v1978_v60  ;;  %v10375_v60 = vld [vmem:[#allocation36_spill] sm:$0xff] }
 0x1a8   :  { %2188 = vmatpush.bf16.msrb.mxu0 %v10319_v42  ;;  %2214 = vmatpush.bf16.msrb.mxu2 %v10320_v4 }
 0x1a9   :  { %v1980_v63 = vadd.f32 %v7047_v48, %v1979_v53 }
 0x1aa   :  { %7015 = vset.pattern.permute.xlu2 %v10246_v28  ;;  %v10343_v28 = vld [vmem:[#allocation120_spill] sm:$0xff] }
 0x1ab   :  { %v1984_v11 = vsel %vm1983_vm8, %v7047_v48, %v1980_v63  ;;  %v10326_v63 = vld [vmem:[#allocation144_spill] sm:$0xff]  ;;  %v10331_v48 = vld [vmem:[#allocation91_spill] sm:$0xff]  ;;  %4597 = vperm.xlu2 %7015, %v8018_v8  }
 0x1ac   :  { %2189 = vmatpush.bf16.msrb.mxu0 %v10321_v61  ;;  %2215 = vmatpush.bf16.msrb.mxu2 %v10322_v41  ;;  %v1989_v25 = vsel %vm1986_vm9, %v1988_v62, %v1984_v11  ;;  %v10328_v11 = vld [vmem:[#allocation88_spill] sm:$0xff]  ;;  %v10330_v62 = vld [vmem:[#allocation150_spill] sm:$0xff] }
 0x1ad   :  { %v1995_v14 = vmul.f32 %v7049_v23, %v1989_v25  ;;  %v10327_v23 = vld [vmem:[#allocation86_spill] sm:$0xff]  ;;  %v10333_v25 = vld [vmem:[#allocation95_spill] sm:$0xff] }
 0x1af   :  { %v8319_v53 = vsel %vm2002_vm5, %v1995_v14, 0.0  ;;  %v8321_v58 = vpack.c.bf16 %v1995_v14, %v1995_v14  ;;  %v10334_v14 = vld [vmem:[#allocation98_spill] sm:$0xff] }
 0x1b0   :  { %10325 = vst [vmem:[#allocation89_spill] sm:$0xff] %v8319_v53  ;;  %2190 = vmatpush.bf16.msrb.mxu0 %v8021_v27  ;;  %2216 = vmatpush.bf16.msrb.mxu2 %v10326_v63 }
 0x1b1   :  { %6238 = vmatmul.msk.bf16.vlgmr.msra.gmra.mxu1 %vm8314_vm10, %v8321_v58  ;;  %6241 = vmatmul.msk.bf16.vlgmr.msra.gmra.mxu3 %vm8314_vm10, %v8321_v58 }
 0x1b2   :  { %2147 = vmatpush.bf16.msra.mxu1 %v10327_v23  ;;  %2173 = vmatpush.bf16.msra.mxu3 %v10328_v11 }
 0x1b4   :  { %2191 = vmatpush.bf16.msrb.mxu0 %v10329_v5  ;;  %2217 = vmatpush.bf16.msrb.mxu2 %v10330_v62 }
 0x1b6   :  { %2148 = vmatpush.bf16.msra.mxu1 %v10331_v48  ;;  %2174 = vmatpush.bf16.msra.mxu3 %v10332_v33 }
 0x1b8   :  { %2192 = vmatpush.bf16.msrb.mxu0 %v8054_v32  ;;  %2218 = vmatpush.bf16.msrb.mxu2 %v8062_v9  ;;  %v10335_v9 = vld [vmem:[#allocation101_spill] sm:$0xff]  ;;  %v10336_v32 = vld [vmem:[#allocation103_spill] sm:$0xff] }
 0x1ba   :  { %2149 = vmatpush.bf16.msra.mxu1 %v10333_v25  ;;  %2175 = vmatpush.bf16.msra.mxu3 %v10334_v14 }
 0x1bc   :  { %2193 = vmatpush.bf16.msrb.mxu0 %v8074_v12  ;;  %2219 = vmatpush.bf16.msrb.mxu2 %v8082_v44 }
 0x1be   :  { %2150 = vmatpush.bf16.msra.mxu1 %v10335_v9  ;;  %2176 = vmatpush.bf16.msra.mxu3 %v10336_v32 }
 0x1bf   :  { %2194 = vmatmul.bf16.vlgmr.msrb.gmra.mxu0 %v8267_v52  ;;  %2220 = vmatmul.bf16.vlgmr.msrb.gmra.mxu2 %v8267_v52  ;;  %v10339_v52 = vld [vmem:[#allocation111_spill] sm:$0xff] }
 0x1c0   :  { %2410 = vmatpush.bf16.msra.mxu0 %v7589_v7  ;;  %2436 = vmatpush.bf16.msra.mxu2 %v7593_v13  ;;  %v7497_v13 = vmov 4   ;;  %v10340_v7 = vld [vmem:[#allocation113_spill] sm:$0xff] }
 0x1c1   :  { %6244 = vmatmul.msk.bf16.vlgmr.msrb.gmra.mxu1 %vm8314_vm10, %v8321_v58  ;;  %6247 = vmatmul.msk.bf16.vlgmr.msrb.gmra.mxu3 %vm8314_vm10, %v8321_v58 }
 0x1c2   :  { %2151 = vmatpush.bf16.msra.mxu1 %v10337_v57  ;;  %2177 = vmatpush.bf16.msra.mxu3 %v10338_v20  ;;  %v10341_v20 = vld [vmem:[#allocation114_spill] sm:$0xff]  ;;  %v10342_v57 = vld [vmem:[#allocation117_spill] sm:$0xff] }
 0x1c3   :  { %7004 = vset.pattern.permute.xlu1 %v7497_v13 }
 0x1c4   :  { %2411 = vmatpush.bf16.msra.mxu0 %v7600_v21  ;;  %3141 = vperm.xlu1 %7004, %v8018_v8   ;;  %v7498_v21 = vmov 1  }
 0x1c5   :  { %2437 = vmatpush.bf16.msra.mxu2 %v7605_v26 }
 0x1c6   :  { %2152 = vmatpush.bf16.msra.mxu1 %v10339_v52  ;;  %2178 = vmatpush.bf16.msra.mxu3 %v10340_v7  ;;  %v10344_v7 = vld [vmem:[#allocation122_spill] sm:$0xff] }
 0x1c7   :  { %v10346_v52 = vld [vmem:[#allocation126_spill] sm:$0xff] }
 0x1c8   :  { %2412 = vmatpush.bf16.msra.mxu0 %v7610_v35  ;;  %v10345_v35 = vld [vmem:[#allocation124_spill] sm:$0xff] }
 0x1c9   :  { %2438 = vmatpush.bf16.msra.mxu2 %v7616_v40 }
 0x1ca   :  { %2153 = vmatpush.bf16.msra.mxu1 %v10341_v20  ;;  %2179 = vmatpush.bf16.msra.mxu3 %v10342_v57 }
 0x1cc   :  { %2413 = vmatpush.bf16.msra.mxu0 %v7631_v46  ;;  %7007 = vset.pattern.permute.xlu1 %v7498_v21  ;;  %v10347_v21 = vld [vmem:[#allocation130_spill] sm:$0xff] }
 0x1cd   :  { %2439 = vmatpush.bf16.msra.mxu2 %v7635_v51  ;;  %4235 = vperm.xlu1 %7007, %v8018_v8   ;;  %v10348_v8 = vld [vmem:[#allocation132_spill] sm:$0xff] }
 0x1ce   :  { %2154 = vmatpush.bf16.msra.mxu1 %v10343_v28  ;;  %2180 = vmatpush.bf16.msra.mxu3 %v10344_v7  ;;  %v10352_v7 = vld [vmem:[#allocation142_spill] sm:$0xff] }
 0x1d0   :  { %2414 = vmatpush.bf16.msra.mxu0 %v7642_v59  ;;  %v10349_v59 = vld [vmem:[#allocation134_spill] sm:$0xff] }
 0x1d1   :  { %2440 = vmatpush.bf16.msra.mxu2 %v7647_v1  ;;  %6250 = vmatmul.msk.bf16.vlgmr.msra.gmra.mxu1 %vm8314_vm10, %v8321_v58  ;;  %v10350_v1 = vld [vmem:[#allocation136_spill] sm:$0xff] }
 0x1d2   :  { %2199 = vmatpush.bf16.msrb.mxu1 %v10345_v35  ;;  %2225 = vmatpush.bf16.msrb.mxu3 %v10346_v52  ;;  %v7274_v52 = vld [vmem:[#allocation6] sm:$0xff]  ;;  %v10351_v35 = vld [vmem:[#allocation139_spill] sm:$0xff] }
 0x1d3   :  { %6253 = vmatmul.msk.bf16.vlgmr.msra.gmra.mxu3 %vm8314_vm10, %v8321_v58 }
 0x1d4   :  { %2415 = vmatpush.bf16.msra.mxu0 %v7652_v10 }
 0x1d5   :  { %2441 = vmatpush.bf16.msra.mxu2 %v7658_v19  ;;  %2387 = vperm.xlu1 %7007, %v7274_v52   ;;  %v10353_v19 = vmov 2  }
 0x1d6   :  { %2200 = vmatpush.bf16.msrb.mxu1 %v10347_v21  ;;  %2226 = vmatpush.bf16.msrb.mxu3 %v10348_v8 }
 0x1d8   :  { %2416 = vmatpush.bf16.msra.mxu0 %v7667_v34 }
 0x1d9   :  { %2442 = vmatpush.bf16.msra.mxu2 %v7671_v37 }
 0x1da   :  { %2201 = vmatpush.bf16.msrb.mxu1 %v10349_v59  ;;  %2227 = vmatpush.bf16.msrb.mxu3 %v10350_v1  ;;  %v10354_v59 = vld [vmem:[#allocation143_spill] sm:$0xff]  ;;  %v10355_v1 = vld [vmem:[#allocation145_spill] sm:$0xff] }
 0x1dc   :  { %2417 = vmatpush.bf16.msra.mxu0 %v7680_v47  ;;  %v10357_v47 = vld [vmem:[#allocation151_spill] sm:$0xff] }
 0x1dd   :  { %2443 = vmatpush.bf16.msra.mxu2 %v7686_v54  ;;  %7011 = vset.pattern.permute.xlu1 %v10353_v19  ;;  %v10358_v19 = vld [vmem:[#allocation65_spill] sm:$0xff] }
 0x1de   :  { %2202 = vmatpush.bf16.msrb.mxu1 %v10351_v35  ;;  %2228 = vmatpush.bf16.msrb.mxu3 %v10352_v7  ;;  %v10356_v7 = vld [vmem:[#allocation149_spill] sm:$0xff] }
 0x1df   :  { %2767 = vperm.xlu1 %7011, %v7274_v52  }
 0x1e0   :  { %2462 = vmatpush.bf16.msrb.mxu0 %v7691_v2  ;;  %v10402_v2 = vld [vmem:[#allocation99_spill] sm:$0xff] }
 0x1e1   :  { %2488 = vmatpush.bf16.msrb.mxu2 %v10256_v31 }
 0x1e2   :  { %2203 = vmatpush.bf16.msrb.mxu1 %v10354_v59  ;;  %2229 = vmatpush.bf16.msrb.mxu3 %v10355_v1  ;;  %v10359_v1 = vld [vmem:[#allocation67_spill] sm:$0xff]  ;;  %v10394_v59 = vld [vmem:[#allocation70_spill] sm:$0xff] }
 0x1e4   :  { %2463 = vmatpush.bf16.msrb.mxu0 %v10263_v45  ;;  %v10360_v45 = vld [vmem:[#allocation159_spill] sm:$0xff] }
 0x1e5   :  { %2489 = vmatpush.bf16.msrb.mxu2 %v10264_v16  ;;  %v10361_v16 = vld [vmem:[#allocation161_spill] sm:$0xff] }
 0x1e6   :  { %2204 = vmatpush.bf16.msrb.mxu1 %v10356_v7  ;;  %2230 = vmatpush.bf16.msrb.mxu3 %v10357_v47  ;;  %v10362_v7 = vld [vmem:[#allocation22_spill] sm:$0xff]  ;;  %v10363_v47 = vld [vmem:[#allocation24_spill] sm:$0xff] }
 0x1e7   :  { %7014 = vset.pattern.permute.xlu1 %v7497_v13  ;;  %v10366_v13 = vld [vmem:[#allocation26_spill] sm:$0xff] }
 0x1e8   :  { %2464 = vmatpush.bf16.msrb.mxu0 %v10267_v29  ;;  %3153 = vperm.xlu1 %7014, %v7274_v52   ;;  %v10364_v29 = vld [vmem:[#allocation69_spill] sm:$0xff]  ;;  %v10367_v52 = vld [vmem:[#allocation28_spill] sm:$0xff] }
 0x1e9   :  { %2490 = vmatpush.bf16.msrb.mxu2 %v10268_v0  ;;  %v10365_v0 = vld [vmem:[#allocation71_spill] sm:$0xff] }
 0x1ea   :  { %2205 = vmatpush.bf16.msrb.mxu1 %v8060_v3  ;;  %2231 = vmatpush.bf16.msrb.mxu3 %v8067_v6  ;;  %v10388_v6 = vld [vmem:[#allocation58_spill] sm:$0xff] }
 0x1eb   :  { %v10390_v3 = vld [vmem:[#allocation62_spill] sm:$0xff] }
 0x1ec   :  { %2465 = vmatpush.bf16.msrb.mxu0 %v10358_v19 }
 0x1ed   :  { %2491 = vmatpush.bf16.msrb.mxu2 %v10359_v1  ;;  %v10374_v1 = vld [vmem:[#allocation34_spill] sm:$0xff] }
 0x1ee   :  { %2206 = vmatpush.bf16.msrb.mxu1 %v10360_v45  ;;  %2232 = vmatpush.bf16.msrb.mxu3 %v10361_v16  ;;  %v10368_v16 = vld [vmem:[#allocation73_spill] sm:$0xff]  ;;  %v10373_v45 = vld [vmem:[#allocation79_spill] sm:$0xff] }
 0x1f0   :  { %2466 = vmatpush.bf16.msrb.mxu0 %v10364_v29  ;;  %v10371_v29 = vld [vmem:[#allocation32_spill] sm:$0xff] }
 0x1f1   :  { %2492 = vmatpush.bf16.msrb.mxu2 %v10365_v0  ;;  %6256 = vmatmul.msk.bf16.vlgmr.msrb.gmra.mxu1 %vm8314_vm10, %v8321_v58  ;;  %v10372_v0 = vld [vmem:[#allocation77_spill] sm:$0xff] }
 0x1f2   :  { %2423 = vmatpush.bf16.msra.mxu1 %v10362_v7  ;;  %2449 = vmatpush.bf16.msra.mxu3 %v10363_v47  ;;  %v10369_v7 = vld [vmem:[#allocation75_spill] sm:$0xff]  ;;  %v10370_v47 = vld [vmem:[#allocation30_spill] sm:$0xff] }
 0x1f3   :  { %6259 = vmatmul.msk.bf16.vlgmr.msrb.gmra.mxu3 %vm8314_vm10, %v8321_v58  ;;  %v10376_v58 = vld [vmem:[#allocation81_spill] sm:$0xff] }
 0x1f4   :  { %2467 = vmatpush.bf16.msrb.mxu0 %v10368_v16  ;;  %v10379_v16 = vld [vmem:[#allocation40_spill] sm:$0xff] }
 0x1f5   :  { %2493 = vmatpush.bf16.msrb.mxu2 %v10369_v7 }
 0x1f6   :  { %2424 = vmatpush.bf16.msra.mxu1 %v10366_v13  ;;  %2450 = vmatpush.bf16.msra.mxu3 %v10367_v52  ;;  %v10377_v13 = vld [vmem:[#allocation83_spill] sm:$0xff]  ;;  %v10378_v52 = vld [vmem:[#allocation38_spill] sm:$0xff] }
 0x1f8   :  { %2468 = vmatpush.bf16.msrb.mxu0 %v10372_v0  ;;  %v10382_v0 = vld [vmem:[#allocation46_spill] sm:$0xff] }
 0x1f9   :  { %2494 = vmatpush.bf16.msrb.mxu2 %v10373_v45  ;;  %v10383_v45 = vld [vmem:[#allocation48_spill] sm:$0xff] }
 0x1fa   :  { %2425 = vmatpush.bf16.msra.mxu1 %v10370_v47  ;;  %2451 = vmatpush.bf16.msra.mxu3 %v10371_v29  ;;  %v10380_v47 = vld [vmem:[#allocation42_spill] sm:$0xff]  ;;  %v10381_v29 = vld [vmem:[#allocation44_spill] sm:$0xff] }
 0x1fc   :  { %2469 = vmatpush.bf16.msrb.mxu0 %v10376_v58  ;;  %v2039_v7 = vpop.f32.mrf.mxu0  ;;  %v10385_v58 = vld [vmem:[#allocation52_spill] sm:$0xff] }
 0x1fd   :  { %2495 = vmatpush.bf16.msrb.mxu2 %v10377_v13  ;;  %v10386_v13 = vld [vmem:[#allocation54_spill] sm:$0xff] }
 0x1fe   :  { %2426 = vmatpush.bf16.msra.mxu1 %v10374_v1  ;;  %2452 = vmatpush.bf16.msra.mxu3 %v10375_v60  ;;  %v10384_v60 = vld [vmem:[#allocation50_spill] sm:$0xff] }
 0x202   :  { %2427 = vmatpush.bf16.msra.mxu1 %v10378_v52  ;;  %2453 = vmatpush.bf16.msra.mxu3 %v10379_v16  ;;  %v2065_v1 = vpop.f32.mrf.mxu2  ;;  %v10387_v52 = vld [vmem:[#allocation56_spill] sm:$0xff] }
 0x204   :  { %v2041_v19 = vpop.f32.mrf.mxu0 }
 0x205   :  { %v10392_v19 = vld [vmem:[#allocation66_spill] sm:$0xff] }
 0x206   :  { %2428 = vmatpush.bf16.msra.mxu1 %v10380_v47  ;;  %2454 = vmatpush.bf16.msra.mxu3 %v10381_v29  ;;  %v10389_v47 = vld [vmem:[#allocation60_spill] sm:$0xff] }
 0x20a   :  { %2429 = vmatpush.bf16.msra.mxu1 %v10382_v0  ;;  %2455 = vmatpush.bf16.msra.mxu3 %v10383_v45  ;;  %v2067_v16 = vpop.f32.mrf.mxu2  ;;  %v10391_v0 = vld [vmem:[#allocation64_spill] sm:$0xff] }
 0x20c   :  { %v2091_v29 = vpop.f32.mrf.mxu0 }
 0x20e   :  { %2430 = vmatpush.bf16.msra.mxu1 %v10384_v60  ;;  %2456 = vmatpush.bf16.msra.mxu3 %v10385_v58  ;;  %v10393_v60 = vld [vmem:[#allocation68_spill] sm:$0xff] }
 0x212   :  { %2475 = vmatpush.bf16.msrb.mxu1 %v10386_v13  ;;  %2501 = vmatpush.bf16.msrb.mxu3 %v10387_v52  ;;  %v2117_v45 = vpop.f32.mrf.mxu2  ;;  %v10395_v13 = vld [vmem:[#allocation72_spill] sm:$0xff]  ;;  %v10396_v52 = vld [vmem:[#allocation74_spill] sm:$0xff] }
 0x214   :  { %v2093_v58 = vpop.f32.mrf.mxu0 }
 0x215   :  { %v10401_v58 = vld [vmem:[#allocation84_spill] sm:$0xff] }
 0x216   :  { %2476 = vmatpush.bf16.msrb.mxu1 %v10388_v6  ;;  %2502 = vmatpush.bf16.msrb.mxu3 %v10389_v47  ;;  %v10397_v6 = vld [vmem:[#allocation76_spill] sm:$0xff] }
 0x21a   :  { %2477 = vmatpush.bf16.msrb.mxu1 %v10390_v3  ;;  %2503 = vmatpush.bf16.msrb.mxu3 %v10391_v0  ;;  %v2119_v16 = vpop.f32.mrf.mxu2  ;;  %v10398_v3 = vld [vmem:[#allocation78_spill] sm:$0xff]  ;;  %v10399_v0 = vld [vmem:[#allocation80_spill] sm:$0xff] }
 0x21c   :  { %v8456_v47 = vpop.f32.mrf.mxu0 }
 0x21e   :  { %2478 = vmatpush.bf16.msrb.mxu1 %v10392_v19  ;;  %2504 = vmatpush.bf16.msrb.mxu3 %v10393_v60  ;;  %v10400_v19 = vld [vmem:[#allocation82_spill] sm:$0xff] }
 0x222   :  { %2479 = vmatpush.bf16.msrb.mxu1 %v10394_v59  ;;  %2505 = vmatpush.bf16.msrb.mxu3 %v10395_v13  ;;  %v8460_v31 = vpop.f32.mrf.mxu2 }
 0x224   :  { %v2145_v59 = vpop.f32.mrf.mxu0 }
 0x226   :  { %2480 = vmatpush.bf16.msrb.mxu1 %v10396_v52  ;;  %2506 = vmatpush.bf16.msrb.mxu3 %v10397_v6  ;;  %v2238_v52 = vunpack.c.l.bf16 %v10402_v2 }
 0x22a   :  { %2481 = vmatpush.bf16.msrb.mxu1 %v10398_v3  ;;  %2507 = vmatpush.bf16.msrb.mxu3 %v10399_v0  ;;  %v2171_v60 = vpop.f32.mrf.mxu2  ;;  %v2239_v3 = vunpack.c.h.bf16 %v10402_v2 }
 0x22e   :  { %2482 = vmatpush.bf16.msrb.mxu1 %v10400_v19  ;;  %2508 = vmatpush.bf16.msrb.mxu3 %v10401_v58  ;;  %v2052_v13 = vpop.f32.mrf.mxu1 }
 0x22f   :  { %v2053_v16 = vadd.f32 %v2052_v13, %v2039_v7 }
 0x231   :  { %v2242_v54 = vadd.f32 %v2238_v52, %v2053_v16 }
 0x233   :  { %v6260_v6 = vmul.f32 -1.442695, %v2242_v54  ;;  %v10403_v54 = vld [vmem:[#allocation107_spill] sm:$0xff] }
 0x234   :  { %v2078_v35 = vpop.f32.mrf.mxu3  ;;  %v2240_v16 = vunpack.c.l.bf16 %v10403_v54 }
 0x235   :  { %7050 = vpow2.f32 %v6260_v6  ;;  %v2079_v37 = vadd.f32 %v2078_v35, %v2065_v1 }
 0x236   :  { %v2054_v0 = vpop.f32.mrf.mxu1 }
 0x237   :  { %v2243_v34 = vadd.f32 %v2239_v3, %v2079_v37  ;;  %v2241_v3 = vunpack.c.h.bf16 %v10403_v54 }
 0x239   :  { %v6261_v10 = vmul.f32 -1.442695, %v2243_v34 }
 0x23b   :  { %v7051_v8 = vpop.eup %7050  ;;  %7052 = vpow2.f32 %v6261_v10 }
 0x23c   :  { %v2257_v19 = vadd.f32 1.0, %v7051_v8  ;;  %v2080_v58 = vpop.f32.mrf.mxu3  ;;  %v8466_v59 = vpop.f32.mrf.mxu0 }
 0x23d   :  { %v8472_v8 = vpop.permute.xlu1 %2761 }
 0x23e   :  { %7054 = vrcp.f32 %v2257_v19  ;;  %v2104_v7 = vpop.f32.mrf.mxu1  ;;  %10404 = vst [vmem:[#allocation97_spill] sm:$0xff] %v8472_v8  ;;  %v2267_v21 = vand.u32 2147483647, %v2257_v19  ;;  %vm2263_vm12 = vweird.f32 %v2257_v19 }
 0x23f   :  { %v2105_v13 = vadd.f32 %v2104_v7, %v2091_v29  ;;  %v2269_v7 = vand.u32 2147483648, %v2257_v19 }
 0x240   :  { %vm2268_vm14 = vcmp.eq.f32.partialorder %v2267_v21, 8.507059e+37 }
 0x241   :  { %v7053_v60 = vpop.eup %7052  ;;  %v2244_v1 = vadd.f32 %v2240_v16, %v2105_v13  ;;  %v2270_v54 = vor.u32 1.1754944e-38, %v2269_v7 }
 0x242   :  { %v2276_v52 = vadd.f32 1.0, %v7053_v60  ;;  %v8469_v6 = vpop.f32.mrf.mxu2 }
 0x244   :  { %v7055_v35 = vpop.eup %7054  ;;  %7056 = vrcp.f32 %v2276_v52  ;;  %v2130_v37 = vpop.f32.mrf.mxu3  ;;  %vm2282_vm0 = vweird.f32 %v2276_v52 }
 0x245   :  { %v2197_v34 = vpop.f32.mrf.mxu0  ;;  %v2259_v2 = vmul.f32 %v7055_v35, %v2257_v19  ;;  %v2131_v10 = vadd.f32 %v2130_v37, %v2117_v45  ;;  %7058 = vtanh.f32 %v2244_v1  ;;  %vm2264_vm11 = vweird.f32 %v7055_v35  ;;  %v8474_v45 = vpop.permute.xlu2 %3511 }
 0x246   :  { %v2106_v0 = vpop.f32.mrf.mxu1  ;;  %10405 = vst [vmem:[#allocation85_spill] sm:$0xff] %v8474_v45  ;;  %vm2265_vm13 = vmor %vm2263_vm12, %vm2264_vm11  ;;  %v2288_v1 = vand.u32 2147483648, %v2276_v52  ;;  %v8478_v19 = vpop.permute.xlu1 %3141 }
 0x247   :  { %v2260_v58 = vsub.f32 1.0, %v2259_v2  ;;  %v2245_v29 = vadd.f32 %v2241_v3, %v2131_v10  ;;  %v2286_v0 = vand.u32 2147483647, %v2276_v52  ;;  %10407 = vst [vmem:[#allocation87_spill] sm:$0xff] %v8478_v19 }
 0x248   :  { %v2289_v21 = vor.u32 1.1754944e-38, %v2288_v1 }
 0x249   :  { %v2261_v60 = vmul.f32 %v7055_v35, %v2260_v58  ;;  %v6262_v28 = vmul.f32 -1.442695, %v2245_v29  ;;  %v10406_v29 = vld [vmem:[#allocation175_spill] sm:$0xff]  ;;  %vm2287_vm2 = vcmp.eq.f32.partialorder %v2286_v0, 8.507059e+37 }
 0x24a   :  { %v7057_v51 = vpop.eup %7056  ;;  %v2223_v46 = vpop.f32.mrf.mxu2  ;;  %v2246_v8 = vunpack.c.l.bf16 %v10406_v29 }
 0x24b   :  { %v2278_v13 = vmul.f32 %v7057_v51, %v2276_v52  ;;  %v2262_v16 = vadd.f32 %v7055_v35, %v2261_v60  ;;  %7060 = vpow2.f32 %v6262_v28  ;;  %v7059_v10 = vpop.eup %7058  ;;  %vm2283_vm15 = vweird.f32 %v7057_v51 }
 0x24c   :  { %v2132_v37 = vpop.f32.mrf.mxu3  ;;  %vm2284_vm1 = vmor %vm2282_vm0, %vm2283_vm15 }
 0x24d   :  { %v2279_v34 = vsub.f32 1.0, %v2278_v13  ;;  %v2266_v2 = vsel %vm2265_vm13, %v7055_v35, %v2262_v16 }
 0x24e   :  { %v2271_v3 = vsel %vm2268_vm14, %v2270_v54, %v2266_v2  ;;  %v2156_v58 = vpop.f32.mrf.mxu1  ;;  %v8487_v0 = vpop.permute.xlu1 %4235 }
 0x24f   :  { %v2280_v46 = vmul.f32 %v7057_v51, %v2279_v34  ;;  %v2313_v60 = vmul.f32 %v7059_v10, %v2271_v3  ;;  %v2157_v28 = vadd.f32 %v2156_v58, %v8456_v47  ;;  %v2247_v10 = vunpack.c.h.bf16 %v10406_v29  ;;  %v8483_v3 = vpop.permute.xlu2 %3873  ;;  %10409 = vst [vmem:[#allocation100_spill] sm:$0xff] %v8487_v0 }
 0x250   :  { %10408 = vst [vmem:[#allocation90_spill] sm:$0xff] %v8483_v3 }
 0x251   :  { %v7061_v45 = vpop.eup %7060  ;;  %v2281_v7 = vadd.f32 %v7057_v51, %v2280_v46  ;;  %v2250_v13 = vadd.f32 %v2246_v8, %v2157_v28 }
 0x252   :  { %v2296_v35 = vadd.f32 1.0, %v7061_v45 }
 0x253   :  { %v2285_v16 = vsel %vm2284_vm1, %v7057_v51, %v2281_v7  ;;  %v6263_v54 = vmul.f32 -1.442695, %v2250_v13 }
 0x254   :  { %v2290_v37 = vsel %vm2287_vm2, %v2289_v21, %v2285_v16  ;;  %7062 = vrcp.f32 %v2296_v35  ;;  %vm2302_vm4 = vweird.f32 %v2296_v35 }
 0x255   :  { %v2312_v34 = vmul.f32 %v2290_v37, %v8252_v50  ;;  %7064 = vpow2.f32 %v6263_v54 }
 0x256   :  { %v2182_v2 = vpop.f32.mrf.mxu3  ;;  %v2158_v52 = vpop.f32.mrf.mxu1 }
 0x257   :  { %v2183_v47 = vadd.f32 %v2182_v2, %v8460_v31  ;;  %v8485_v8 = vadd.f32 %v2313_v60, %v2312_v34  ;;  %v2308_v31 = vand.u32 2147483648, %v2296_v35  ;;  %v2306_v60 = vand.u32 2147483647, %v2296_v35  ;;  %v8493_v13 = vpop.permute.xlu2 %2007  ;;  %v8497_v52 = vpop.permute.xlu1 %2387 }
 0x258   :  { %10410 = vst [vmem:[#allocation102_spill] sm:$0xff] %v8493_v13  ;;  %v2010_v34 = vadd.f32 %v8493_v13, %v8262_v24  ;;  %v10417_v13 = vld [vmem:[#allocation96_spill] sm:$0xff] }
 0x259   :  { %v2251_v1 = vadd.f32 %v2247_v10, %v2183_v47  ;;  %v2309_v37 = vor.u32 1.1754944e-38, %v2308_v31  ;;  %vm2307_vm6 = vcmp.eq.f32.partialorder %v2306_v60, 8.507059e+37  ;;  %10411 = vst [vmem:[#allocation104_spill] sm:$0xff] %v8497_v52 }
 0x25a   :  { %v7063_v51 = vpop.eup %7062 }
 0x25b   :  { %v6264_v45 = vmul.f32 -1.442695, %v2251_v1  ;;  %v7065_v58 = vpop.eup %7064  ;;  %v2298_v46 = vmul.f32 %v7063_v51, %v2296_v35  ;;  %vm2303_vm3 = vweird.f32 %v7063_v51 }
 0x25c   :  { %v8489_v28 = vadd.f32 1.0, %v7065_v58  ;;  %vm2304_vm5 = vmor %vm2302_vm4, %vm2303_vm3 }
 0x25d   :  { %7066 = vpow2.f32 %v6264_v45  ;;  %v2299_v7 = vsub.f32 1.0, %v2298_v46  ;;  %v2011_v46 = vmax.f32 %v2010_v34, -1e+30 }
 0x25e   :  { %v2184_v50 = vpop.f32.mrf.mxu3  ;;  %7068 = vtanh.f32 %v8485_v8  ;;  %vm2326_vm9 = vweird.f32 %v8489_v28 }
 0x25f   :  { %7070 = vrcp.f32 %v8489_v28  ;;  %v2300_v29 = vmul.f32 %v7063_v51, %v2299_v7 }
 0x261   :  { %v2301_v16 = vadd.f32 %v7063_v51, %v2300_v29 }
 0x263   :  { %v7067_v21 = vpop.eup %7066  ;;  %v2305_v47 = vsel %vm2304_vm5, %v7063_v51, %v2301_v16  ;;  %v10412_v16 = vld [vmem:[#allocation176_spill] sm:$0xff] }
 0x264   :  { %v2339_v54 = vadd.f32 1.0, %v7067_v21  ;;  %v7069_v2 = vpop.eup %7068  ;;  %v2310_v1 = vsel %vm2307_vm6, %v2309_v37, %v2305_v47  ;;  %v2248_v37 = vunpack.c.l.bf16 %v10412_v16 }
 0x265   :  { %v7071_v10 = vpop.eup %7070  ;;  %v2316_v58 = vmul.f32 %v7069_v2, %v2310_v1  ;;  %v10413_v1 = vld [vmem:[#allocation92_spill] sm:$0xff] }
 0x266   :  { %7072 = vrcp.f32 %v2339_v54  ;;  %v2322_v45 = vmul.f32 %v7071_v10, %v8489_v28  ;;  %v2351_v34 = vand.u32 2147483648, %v2339_v54  ;;  %vm2327_vm7 = vweird.f32 %v7071_v10 }
 0x267   :  { %v2390_v35 = vadd.f32 %v8497_v52, %v2316_v58  ;;  %v8501_v7 = vpack.c.bf16 %v2316_v58, %v2316_v58  ;;  %vm2345_vm10 = vweird.f32 %v2339_v54  ;;  %vm8515_vm11 = vmor %vm2326_vm9, %vm2327_vm7 }
 0x268   :  { %v2323_v50 = vsub.f32 1.0, %v2322_v45 }
 0x269   :  { %v8503_v31 = vmax.f32 %v2011_v46, %v2390_v35  ;;  %2418 = vmatmul.bf16.vlgmr.msra.gmra.mxu0 %v8501_v7  ;;  %2444 = vmatmul.bf16.vlgmr.msra.gmra.mxu2 %v8501_v7  ;;  %v2349_v46 = vand.u32 2147483647, %v2339_v54  ;;  %v2330_v35 = vand.u32 2147483647, %v8489_v28 }
 0x26a   :  { %2514 = vmatpush.bf16.msra.mxu0 %v10298_v43  ;;  %2540 = vmatpush.bf16.msra.mxu2 %v10299_v36  ;;  %v2324_v60 = vmul.f32 %v7071_v10, %v2323_v50  ;;  %v2332_v50 = vand.u32 2147483648, %v8489_v28 }
 0x26b   :  { %vm2350_vm13 = vcmp.eq.f32.partialorder %v2349_v46, 8.507059e+37  ;;  %vm2331_vm14 = vcmp.eq.f32.partialorder %v2330_v35, 8.507059e+37 }
 0x26c   :  { %v7073_v24 = vpop.eup %7072  ;;  %v2325_v58 = vadd.f32 %v7071_v10, %v2324_v60  ;;  %v2249_v60 = vunpack.c.h.bf16 %v10412_v16  ;;  %v2333_v0 = vor.u32 1.1754944e-38, %v2332_v50  ;;  %v2382_v16 = vpop.permute.xlu0 %2381  ;;  %v10420_v50 = vld [vmem:[#allocation123_spill] sm:$0xff] }
 0x26d   :  { %v2341_v51 = vmul.f32 %v7073_v24, %v2339_v54  ;;  %vm2346_vm8 = vweird.f32 %v7073_v24  ;;  %vm2383_vm15 = vcmp.eq.s32.totalorder %v2382_v16, 1  ;;  %v10425_v16 = vld [vmem:[#allocation152_spill] sm:$0xff] }
 0x26e   :  { %v2208_v29 = vpop.f32.mrf.mxu1  ;;  %2515 = vmatpush.bf16.msra.mxu0 %v10300_v39  ;;  %2541 = vmatpush.bf16.msra.mxu2 %v10413_v1  ;;  %vm2347_vm12 = vmor %vm2345_vm10, %vm2346_vm8  ;;  %v2329_v54 = vsel %vm8515_vm11, %v7071_v10, %v2325_v58  ;;  %v10419_v58 = vld [vmem:[#allocation121_spill] sm:$0xff] }
 0x26f   :  { %v2209_v21 = vadd.f32 %v2208_v29, %v8466_v59  ;;  %v2342_v2 = vsub.f32 1.0, %v2341_v51 }
 0x271   :  { %v2252_v47 = vadd.f32 %v2248_v37, %v2209_v21  ;;  %v2343_v45 = vmul.f32 %v7073_v24, %v2342_v2  ;;  %v2352_v21 = vor.u32 1.1754944e-38, %v2351_v34  ;;  %v10416_v2 = vld [vmem:[#allocation94_spill] sm:$0xff] }
 0x272   :  { %2516 = vmatpush.bf16.msra.mxu0 %v10416_v2  ;;  %2542 = vmatpush.bf16.msra.mxu2 %v10417_v13 }
 0x273   :  { %7074 = vtanh.f32 %v2252_v47  ;;  %v2344_v51 = vadd.f32 %v7073_v24, %v2343_v45 }
 0x275   :  { %v2348_v47 = vsel %vm2347_vm12, %v7073_v24, %v2344_v51  ;;  %v10422_v51 = vld [vmem:[#allocation128_spill] sm:$0xff] }
 0x276   :  { %v2234_v29 = vpop.f32.mrf.mxu3  ;;  %v2210_v52 = vpop.f32.mrf.mxu1  ;;  %v2353_v28 = vsel %vm2350_vm13, %v2352_v21, %v2348_v47  ;;  %2517 = vmatpush.bf16.msra.mxu0 %v10306_v30  ;;  %2543 = vmatpush.bf16.msra.mxu2 %v10307_v17  ;;  %v10423_v21 = vld [vmem:[#allocation131_spill] sm:$0xff] }
 0x277   :  { %v2235_v37 = vadd.f32 %v2234_v29, %v8469_v6  ;;  %v2375_v34 = vmul.f32 %v2353_v28, %v8294_v55  ;;  %v2334_v6 = vsel %vm2331_vm14, %v2333_v0, %v2329_v54 }
 0x279   :  { %v2253_v45 = vadd.f32 %v2249_v60, %v2235_v37  ;;  %v7075_v3 = vpop.eup %7074  ;;  %2470 = vmatmul.bf16.vlgmr.msrb.gmra.mxu0 %v8501_v7  ;;  %2496 = vmatmul.bf16.vlgmr.msrb.gmra.mxu2 %v8501_v7 }
 0x27a   :  { %v2376_v19 = vmul.f32 %v7075_v3, %v2334_v6  ;;  %2518 = vmatpush.bf16.msra.mxu0 %v10308_v18  ;;  %2544 = vmatpush.bf16.msra.mxu2 %v10309_v56 }
 0x27b   :  { %v6265_v29 = vmul.f32 -1.442695, %v2253_v45 }
 0x27c   :  { %v2377_v10 = vadd.f32 %v2376_v19, %v2375_v34  ;;  %v10418_v19 = vld [vmem:[#allocation119_spill] sm:$0xff] }
 0x27d   :  { %7076 = vpow2.f32 %v6265_v29 }
 0x27e   :  { %v2236_v24 = vpop.f32.mrf.mxu3  ;;  %v8535_v0 = vsel %vm2383_vm15, %v2377_v10, %v8294_v55  ;;  %2519 = vmatpush.bf16.msra.mxu0 %v10310_v22  ;;  %2545 = vmatpush.bf16.msra.mxu2 %v10311_v49  ;;  %v10421_v55 = vld [vmem:[#allocation125_spill] sm:$0xff] }
 0x282   :  { %2520 = vmatpush.bf16.msra.mxu0 %v7917_v15  ;;  %2546 = vmatpush.bf16.msra.mxu2 %v10312_v38 }
 0x283   :  { %v7077_v52 = vpop.eup %7076 }
 0x284   :  { %v2359_v3 = vadd.f32 1.0, %v7077_v52  ;;  %v10426_v52 = vld [vmem:[#allocation154_spill] sm:$0xff] }
 0x286   :  { %7078 = vrcp.f32 %v2359_v3  ;;  %2521 = vmatpush.bf16.msra.mxu0 %v10418_v19  ;;  %2547 = vmatpush.bf16.msra.mxu2 %v10419_v58  ;;  %v2371_v37 = vand.u32 2147483648, %v2359_v3  ;;  %v2369_v54 = vand.u32 2147483647, %v2359_v3  ;;  %vm2365_vm1 = vweird.f32 %v2359_v3 }
 0x287   :  { %7080 = vtanh.f32 %v2377_v10 }
 0x288   :  { %v2372_v28 = vor.u32 1.1754944e-38, %v2371_v37  ;;  %vm2370_vm3 = vcmp.eq.f32.partialorder %v2369_v54, 8.507059e+37  ;;  %v10431_v37 = vld [vmem:[#allocation25_spill] sm:$0xff] }
 0x289   :  { %2522 = vmatmul.bf16.vlgmr.msra.gmra.mxu0 %v8501_v7  ;;  %2548 = vmatmul.bf16.vlgmr.msra.gmra.mxu2 %v8501_v7  ;;  %v10433_v54 = vld [vmem:[#allocation113_spill] sm:$0xff] }
 0x28a   :  { %2566 = vmatpush.bf16.msrb.mxu0 %v10420_v50  ;;  %2592 = vmatpush.bf16.msrb.mxu2 %v10421_v55 }
 0x28c   :  { %v7079_v46 = vpop.eup %7078 }
 0x28d   :  { %v2361_v59 = vmul.f32 %v7079_v46, %v2359_v3  ;;  %vm2366_vm0 = vweird.f32 %v7079_v46  ;;  %v7081_v34 = vpop.eup %7080  ;;  %v10427_v3 = vld [vmem:[#allocation21_spill] sm:$0xff] }
 0x28e   :  { %2567 = vmatpush.bf16.msrb.mxu0 %v10422_v51  ;;  %2593 = vmatpush.bf16.msrb.mxu2 %v10423_v21  ;;  %vm2367_vm2 = vmor %vm2365_vm1, %vm2366_vm0 }
 0x28f   :  { %v2362_v35 = vsub.f32 1.0, %v2361_v59  ;;  %v10429_v59 = vld [vmem:[#allocation105_spill] sm:$0xff] }
 0x291   :  { %v2363_v60 = vmul.f32 %v7079_v46, %v2362_v35  ;;  %v10430_v35 = vld [vmem:[#allocation108_spill] sm:$0xff] }
 0x292   :  { %2568 = vmatpush.bf16.msrb.mxu0 %v10319_v42  ;;  %2594 = vmatpush.bf16.msrb.mxu2 %v10320_v4 }
 0x293   :  { %v2364_v47 = vadd.f32 %v7079_v46, %v2363_v60  ;;  %v10432_v60 = vld [vmem:[#allocation111_spill] sm:$0xff] }
 0x295   :  { %v2368_v45 = vsel %vm2367_vm2, %v7079_v46, %v2364_v47  ;;  %v10428_v46 = vld [vmem:[#allocation23_spill] sm:$0xff]  ;;  %v10434_v47 = vld [vmem:[#allocation29_spill] sm:$0xff] }
 0x296   :  { %v2373_v6 = vsel %vm2370_vm3, %v2372_v28, %v2368_v45  ;;  %2569 = vmatpush.bf16.msrb.mxu0 %v10321_v61  ;;  %2595 = vmatpush.bf16.msrb.mxu2 %v10322_v41  ;;  %v10436_v28 = vld [vmem:[#allocation35_spill] sm:$0xff]  ;;  %v10437_v45 = vld [vmem:[#allocation120_spill] sm:$0xff] }
 0x297   :  { %v2379_v29 = vmul.f32 %v7081_v34, %v2373_v6  ;;  %v10438_v34 = vld [vmem:[#allocation122_spill] sm:$0xff]  ;;  %v10439_v6 = vld [vmem:[#allocation124_spill] sm:$0xff] }
 0x299   :  { %v8555_v10 = vsel %vm2383_vm15, %v2379_v29, %v8319_v53  ;;  %v10440_v29 = vld [vmem:[#allocation126_spill] sm:$0xff]  ;;  %v10441_v53 = vld [vmem:[#allocation37_spill] sm:$0xff] }
 0x29a   :  { %10424 = vst [vmem:[#allocation106_spill] sm:$0xff] %v8555_v10  ;;  %v8559_v24 = vpack.c.bf16 %v8555_v10, %v8555_v10  ;;  %2570 = vmatpush.bf16.msrb.mxu0 %v8021_v27  ;;  %2596 = vmatpush.bf16.msrb.mxu2 %v10326_v63 }
 0x29c   :  { %2431 = vmatmul.bf16.vlgmr.msra.gmra.mxu1 %v8559_v24  ;;  %2457 = vmatmul.bf16.vlgmr.msra.gmra.mxu3 %v8559_v24 }
 0x29d   :  { %2527 = vmatpush.bf16.msra.mxu1 %v10327_v23  ;;  %2553 = vmatpush.bf16.msra.mxu3 %v10328_v11 }
 0x29e   :  { %2571 = vmatpush.bf16.msrb.mxu0 %v10329_v5  ;;  %2597 = vmatpush.bf16.msrb.mxu2 %v10330_v62 }
 0x2a1   :  { %2528 = vmatpush.bf16.msra.mxu1 %v10331_v48  ;;  %2554 = vmatpush.bf16.msra.mxu3 %v10332_v33 }
 0x2a2   :  { %2572 = vmatpush.bf16.msrb.mxu0 %v10425_v16  ;;  %2598 = vmatpush.bf16.msrb.mxu2 %v10426_v52 }
 0x2a5   :  { %2529 = vmatpush.bf16.msra.mxu1 %v10333_v25  ;;  %2555 = vmatpush.bf16.msra.mxu3 %v10334_v14 }
 0x2a6   :  { %2573 = vmatpush.bf16.msrb.mxu0 %v8074_v12  ;;  %2599 = vmatpush.bf16.msrb.mxu2 %v8082_v44 }
 0x2a9   :  { %2530 = vmatpush.bf16.msra.mxu1 %v10335_v9  ;;  %2556 = vmatpush.bf16.msra.mxu3 %v10336_v32 }
 0x2aa   :  { %2790 = vmatpush.bf16.msra.mxu0 %v10427_v3  ;;  %2816 = vmatpush.bf16.msra.mxu2 %v10428_v46 }
 0x2ab   :  { %2574 = vmatmul.bf16.vlgmr.msrb.gmra.mxu0 %v8501_v7  ;;  %2600 = vmatmul.bf16.vlgmr.msrb.gmra.mxu2 %v8501_v7  ;;  %v10435_v7 = vld [vmem:[#allocation33_spill] sm:$0xff] }
 0x2ac   :  { %2483 = vmatmul.bf16.vlgmr.msrb.gmra.mxu1 %v8559_v24  ;;  %2509 = vmatmul.bf16.vlgmr.msrb.gmra.mxu3 %v8559_v24 }
 0x2ad   :  { %2531 = vmatpush.bf16.msra.mxu1 %v10429_v59  ;;  %2557 = vmatpush.bf16.msra.mxu3 %v10430_v35  ;;  %v10511_v35 = vld [vmem:[#allocation109_spill] sm:$0xff] }
 0x2ae   :  { %2791 = vmatpush.bf16.msra.mxu0 %v10431_v37  ;;  %2817 = vmatpush.bf16.msra.mxu2 %v7605_v26  ;;  %v10503_v26 = vld [vmem:[#allocation70_spill] sm:$0xff] }
 0x2b1   :  { %2532 = vmatpush.bf16.msra.mxu1 %v10432_v60  ;;  %2558 = vmatpush.bf16.msra.mxu3 %v10433_v54  ;;  %v10497_v54 = vld [vmem:[#allocation58_spill] sm:$0xff] }
 0x2b2   :  { %2792 = vmatpush.bf16.msra.mxu0 %v10434_v47  ;;  %2818 = vmatpush.bf16.msra.mxu2 %v7616_v40  ;;  %v10442_v47 = vld [vmem:[#allocation39_spill] sm:$0xff]  ;;  %v10453_v40 = vld [vmem:[#allocation49_spill] sm:$0xff]  ;;  %v10499_v60 = vld [vmem:[#allocation62_spill] sm:$0xff] }
 0x2b5   :  { %2533 = vmatpush.bf16.msra.mxu1 %v10341_v20  ;;  %2559 = vmatpush.bf16.msra.mxu3 %v10342_v57  ;;  %v10443_v57 = vld [vmem:[#allocation130_spill] sm:$0xff] }
 0x2b6   :  { %2793 = vmatpush.bf16.msra.mxu0 %v10435_v7  ;;  %2819 = vmatpush.bf16.msra.mxu2 %v10436_v28  ;;  %v10444_v7 = vld [vmem:[#allocation132_spill] sm:$0xff]  ;;  %v10445_v28 = vld [vmem:[#allocation41_spill] sm:$0xff]  ;;  %v10452_v20 = vld [vmem:[#allocation142_spill] sm:$0xff] }
 0x2b9   :  { %2534 = vmatpush.bf16.msra.mxu1 %v10437_v45  ;;  %2560 = vmatpush.bf16.msra.mxu3 %v10438_v34  ;;  %v10446_v45 = vld [vmem:[#allocation43_spill] sm:$0xff]  ;;  %v10447_v34 = vld [vmem:[#allocation134_spill] sm:$0xff] }
 0x2ba   :  { %2794 = vmatpush.bf16.msra.mxu0 %v10441_v53  ;;  %2820 = vmatpush.bf16.msra.mxu2 %v10442_v47  ;;  %v10450_v53 = vld [vmem:[#allocation47_spill] sm:$0xff] }
 0x2bb   :  { %v10451_v47 = vld [vmem:[#allocation139_spill] sm:$0xff] }
 0x2bc   :  { %2535 = vmatmul.bf16.vlgmr.msra.gmra.mxu1 %v8559_v24  ;;  %2561 = vmatmul.bf16.vlgmr.msra.gmra.mxu3 %v8559_v24 }
 0x2bd   :  { %2579 = vmatpush.bf16.msrb.mxu1 %v10439_v6  ;;  %2605 = vmatpush.bf16.msrb.mxu3 %v10440_v29  ;;  %v10448_v6 = vld [vmem:[#allocation136_spill] sm:$0xff]  ;;  %v10449_v29 = vld [vmem:[#allocation45_spill] sm:$0xff] }
 0x2be   :  { %2795 = vmatpush.bf16.msra.mxu0 %v10445_v28  ;;  %2821 = vmatpush.bf16.msra.mxu2 %v10446_v45  ;;  %v10456_v28 = vld [vmem:[#allocation55_spill] sm:$0xff] }
 0x2bf   :  { %v10457_v45 = vld [vmem:[#allocation143_spill] sm:$0xff] }
 0x2c1   :  { %2580 = vmatpush.bf16.msrb.mxu1 %v10443_v57  ;;  %2606 = vmatpush.bf16.msrb.mxu3 %v10444_v7  ;;  %v10454_v57 = vld [vmem:[#allocation51_spill] sm:$0xff]  ;;  %v10455_v7 = vld [vmem:[#allocation53_spill] sm:$0xff] }
 0x2c2   :  { %2796 = vmatpush.bf16.msra.mxu0 %v10449_v29  ;;  %2822 = vmatpush.bf16.msra.mxu2 %v10450_v53  ;;  %v10460_v29 = vld [vmem:[#allocation59_spill] sm:$0xff]  ;;  %v10461_v53 = vld [vmem:[#allocation149_spill] sm:$0xff] }
 0x2c5   :  { %2581 = vmatpush.bf16.msrb.mxu1 %v10447_v34  ;;  %2607 = vmatpush.bf16.msrb.mxu3 %v10448_v6  ;;  %v10458_v34 = vld [vmem:[#allocation145_spill] sm:$0xff] }
 0x2c6   :  { %2797 = vmatpush.bf16.msra.mxu0 %v10453_v40  ;;  %2823 = vmatpush.bf16.msra.mxu2 %v10454_v57  ;;  %v10459_v6 = vld [vmem:[#allocation57_spill] sm:$0xff]  ;;  %v10464_v40 = vld [vmem:[#allocation63_spill] sm:$0xff] }
 0x2c7   :  { %v10465_v57 = vld [vmem:[#allocation153_spill] sm:$0xff] }
 0x2c9   :  { %2582 = vmatpush.bf16.msrb.mxu1 %v10451_v47  ;;  %2608 = vmatpush.bf16.msrb.mxu3 %v10452_v20  ;;  %v10462_v47 = vld [vmem:[#allocation151_spill] sm:$0xff]  ;;  %v10463_v20 = vld [vmem:[#allocation61_spill] sm:$0xff] }
 0x2ca   :  { %2842 = vmatpush.bf16.msrb.mxu0 %v10455_v7  ;;  %2868 = vmatpush.bf16.msrb.mxu2 %v10456_v28  ;;  %v10466_v7 = vld [vmem:[#allocation155_spill] sm:$0xff]  ;;  %v10467_v28 = vld [vmem:[#allocation65_spill] sm:$0xff] }
 0x2cd   :  { %2583 = vmatpush.bf16.msrb.mxu1 %v10457_v45  ;;  %2609 = vmatpush.bf16.msrb.mxu3 %v10458_v34  ;;  %v10468_v45 = vld [vmem:[#allocation67_spill] sm:$0xff] }
 0x2ce   :  { %2843 = vmatpush.bf16.msrb.mxu0 %v10459_v6  ;;  %2869 = vmatpush.bf16.msrb.mxu2 %v10460_v29  ;;  %v10469_v34 = vld [vmem:[#allocation159_spill] sm:$0xff]  ;;  %v10470_v6 = vld [vmem:[#allocation161_spill] sm:$0xff]  ;;  %v10471_v29 = vld [vmem:[#allocation22_spill] sm:$0xff] }
 0x2d1   :  { %2584 = vmatpush.bf16.msrb.mxu1 %v10461_v53  ;;  %2610 = vmatpush.bf16.msrb.mxu3 %v10462_v47  ;;  %v10472_v53 = vld [vmem:[#allocation24_spill] sm:$0xff]  ;;  %v10473_v47 = vld [vmem:[#allocation69_spill] sm:$0xff] }
 0x2d2   :  { %2844 = vmatpush.bf16.msrb.mxu0 %v10463_v20  ;;  %2870 = vmatpush.bf16.msrb.mxu2 %v10464_v40  ;;  %v10474_v20 = vld [vmem:[#allocation71_spill] sm:$0xff] }
 0x2d5   :  { %2585 = vmatpush.bf16.msrb.mxu1 %v10465_v57  ;;  %2611 = vmatpush.bf16.msrb.mxu3 %v10466_v7  ;;  %v10475_v7 = vld [vmem:[#allocation26_spill] sm:$0xff]  ;;  %v10484_v57 = vld [vmem:[#allocation36_spill] sm:$0xff] }
 0x2d6   :  { %2845 = vmatpush.bf16.msrb.mxu0 %v10467_v28  ;;  %2871 = vmatpush.bf16.msrb.mxu2 %v10468_v45  ;;  %v10476_v28 = vld [vmem:[#allocation28_spill] sm:$0xff]  ;;  %v10477_v45 = vld [vmem:[#allocation73_spill] sm:$0xff] }
 0x2d9   :  { %2586 = vmatpush.bf16.msrb.mxu1 %v10469_v34  ;;  %2612 = vmatpush.bf16.msrb.mxu3 %v10470_v6  ;;  %v10478_v34 = vld [vmem:[#allocation75_spill] sm:$0xff]  ;;  %v10479_v6 = vld [vmem:[#allocation30_spill] sm:$0xff] }
 0x2da   :  { %2846 = vmatpush.bf16.msrb.mxu0 %v10473_v47  ;;  %2872 = vmatpush.bf16.msrb.mxu2 %v10474_v20  ;;  %v10482_v47 = vld [vmem:[#allocation79_spill] sm:$0xff]  ;;  %v10483_v20 = vld [vmem:[#allocation34_spill] sm:$0xff] }
 0x2dc   :  { %2587 = vmatmul.bf16.vlgmr.msrb.gmra.mxu1 %v8559_v24  ;;  %2613 = vmatmul.bf16.vlgmr.msrb.gmra.mxu3 %v8559_v24  ;;  %v10485_v24 = vld [vmem:[#allocation81_spill] sm:$0xff] }
 0x2dd   :  { %2803 = vmatpush.bf16.msra.mxu1 %v10471_v29  ;;  %2829 = vmatpush.bf16.msra.mxu3 %v10472_v53  ;;  %v10480_v29 = vld [vmem:[#allocation32_spill] sm:$0xff]  ;;  %v10481_v53 = vld [vmem:[#allocation77_spill] sm:$0xff] }
 0x2de   :  { %2847 = vmatpush.bf16.msrb.mxu0 %v10477_v45  ;;  %2873 = vmatpush.bf16.msrb.mxu2 %v10478_v34  ;;  %v10488_v45 = vld [vmem:[#allocation40_spill] sm:$0xff] }
 0x2e1   :  { %2804 = vmatpush.bf16.msra.mxu1 %v10475_v7  ;;  %2830 = vmatpush.bf16.msra.mxu3 %v10476_v28  ;;  %v10486_v7 = vld [vmem:[#allocation83_spill] sm:$0xff]  ;;  %v10487_v28 = vld [vmem:[#allocation38_spill] sm:$0xff] }
 0x2e2   :  { %2848 = vmatpush.bf16.msrb.mxu0 %v10481_v53  ;;  %2874 = vmatpush.bf16.msrb.mxu2 %v10482_v47  ;;  %v10491_v53 = vld [vmem:[#allocation46_spill] sm:$0xff]  ;;  %v10492_v47 = vld [vmem:[#allocation48_spill] sm:$0xff] }
 0x2e5   :  { %2805 = vmatpush.bf16.msra.mxu1 %v10479_v6  ;;  %2831 = vmatpush.bf16.msra.mxu3 %v10480_v29  ;;  %v10489_v6 = vld [vmem:[#allocation42_spill] sm:$0xff]  ;;  %v10490_v29 = vld [vmem:[#allocation44_spill] sm:$0xff] }
 0x2e6   :  { %2849 = vmatpush.bf16.msrb.mxu0 %v10485_v24  ;;  %2875 = vmatpush.bf16.msrb.mxu2 %v10486_v7  ;;  %v2419_v34 = vpop.f32.mrf.mxu0  ;;  %v10494_v24 = vld [vmem:[#allocation52_spill] sm:$0xff]  ;;  %v10495_v7 = vld [vmem:[#allocation54_spill] sm:$0xff] }
 0x2e9   :  { %2806 = vmatpush.bf16.msra.mxu1 %v10483_v20  ;;  %2832 = vmatpush.bf16.msra.mxu3 %v10484_v57  ;;  %v10493_v57 = vld [vmem:[#allocation50_spill] sm:$0xff] }
 0x2ec   :  { %v2445_v20 = vpop.f32.mrf.mxu2 }
 0x2ed   :  { %2807 = vmatpush.bf16.msra.mxu1 %v10487_v28  ;;  %2833 = vmatpush.bf16.msra.mxu3 %v10488_v45  ;;  %v10496_v28 = vld [vmem:[#allocation56_spill] sm:$0xff] }
 0x2ee   :  { %v2421_v40 = vpop.f32.mrf.mxu0 }
 0x2ef   :  { %v10501_v40 = vld [vmem:[#allocation66_spill] sm:$0xff] }
 0x2f1   :  { %2808 = vmatpush.bf16.msra.mxu1 %v10489_v6  ;;  %2834 = vmatpush.bf16.msra.mxu3 %v10490_v29  ;;  %v10498_v6 = vld [vmem:[#allocation60_spill] sm:$0xff] }
 0x2f4   :  { %v2447_v45 = vpop.f32.mrf.mxu2 }
 0x2f5   :  { %2809 = vmatpush.bf16.msra.mxu1 %v10491_v53  ;;  %2835 = vmatpush.bf16.msra.mxu3 %v10492_v47  ;;  %v10500_v53 = vld [vmem:[#allocation64_spill] sm:$0xff] }
 0x2f6   :  { %v2471_v29 = vpop.f32.mrf.mxu0 }
 0x2f9   :  { %2810 = vmatpush.bf16.msra.mxu1 %v10493_v57  ;;  %2836 = vmatpush.bf16.msra.mxu3 %v10494_v24  ;;  %v10502_v57 = vld [vmem:[#allocation68_spill] sm:$0xff] }
 0x2fc   :  { %v2497_v47 = vpop.f32.mrf.mxu2 }
 0x2fd   :  { %2855 = vmatpush.bf16.msrb.mxu1 %v10495_v7  ;;  %2881 = vmatpush.bf16.msrb.mxu3 %v10496_v28  ;;  %v10504_v7 = vld [vmem:[#allocation72_spill] sm:$0xff]  ;;  %v10505_v28 = vld [vmem:[#allocation74_spill] sm:$0xff] }
 0x2fe   :  { %v2473_v24 = vpop.f32.mrf.mxu0 }
 0x2ff   :  { %v10510_v24 = vld [vmem:[#allocation84_spill] sm:$0xff] }
 0x301   :  { %2856 = vmatpush.bf16.msrb.mxu1 %v10497_v54  ;;  %2882 = vmatpush.bf16.msrb.mxu3 %v10498_v6  ;;  %v10506_v54 = vld [vmem:[#allocation76_spill] sm:$0xff] }
 0x304   :  { %v2499_v45 = vpop.f32.mrf.mxu2 }
 0x305   :  { %2857 = vmatpush.bf16.msrb.mxu1 %v10499_v60  ;;  %2883 = vmatpush.bf16.msrb.mxu3 %v10500_v53  ;;  %v10507_v60 = vld [vmem:[#allocation78_spill] sm:$0xff]  ;;  %v10508_v53 = vld [vmem:[#allocation80_spill] sm:$0xff] }
 0x306   :  { %v8671_v6 = vpop.f32.mrf.mxu0 }
 0x309   :  { %2858 = vmatpush.bf16.msrb.mxu1 %v10501_v40  ;;  %2884 = vmatpush.bf16.msrb.mxu3 %v10502_v57  ;;  %v10509_v40 = vld [vmem:[#allocation82_spill] sm:$0xff] }
 0x30c   :  { %v8675_v37 = vpop.f32.mrf.mxu2 }
 0x30d   :  { %2859 = vmatpush.bf16.msrb.mxu1 %v10503_v26  ;;  %2885 = vmatpush.bf16.msrb.mxu3 %v10504_v7 }
 0x30e   :  { %v2525_v26 = vpop.f32.mrf.mxu0 }
 0x311   :  { %2860 = vmatpush.bf16.msrb.mxu1 %v10505_v28  ;;  %2886 = vmatpush.bf16.msrb.mxu3 %v10506_v54  ;;  %v2618_v28 = vunpack.c.l.bf16 %v10511_v35 }
 0x314   :  { %v2551_v7 = vpop.f32.mrf.mxu2 }
 0x315   :  { %2861 = vmatpush.bf16.msrb.mxu1 %v10507_v60  ;;  %2887 = vmatpush.bf16.msrb.mxu3 %v10508_v53  ;;  %v2619_v60 = vunpack.c.h.bf16 %v10511_v35 }
 0x319   :  { %2862 = vmatpush.bf16.msrb.mxu1 %v10509_v40  ;;  %2888 = vmatpush.bf16.msrb.mxu3 %v10510_v24  ;;  %v2432_v57 = vpop.f32.mrf.mxu1 }
 0x31a   :  { %v2433_v45 = vadd.f32 %v2432_v57, %v2419_v34 }
 0x31c   :  { %v2622_v59 = vadd.f32 %v2618_v28, %v2433_v45 }
 0x31e   :  { %v6266_v54 = vmul.f32 -1.442695, %v2622_v59  ;;  %v10512_v59 = vld [vmem:[#allocation116_spill] sm:$0xff] }
 0x31f   :  { %v2458_v32 = vpop.f32.mrf.mxu3  ;;  %v2620_v45 = vunpack.c.l.bf16 %v10512_v59 }
 0x320   :  { %7082 = vpow2.f32 %v6266_v54  ;;  %v2459_v9 = vadd.f32 %v2458_v32, %v2445_v20 }
 0x321   :  { %v2434_v53 = vpop.f32.mrf.mxu1 }
 0x322   :  { %v2623_v46 = vadd.f32 %v2619_v60, %v2459_v9 }
 0x324   :  { %v6267_v3 = vmul.f32 -1.442695, %v2623_v46 }
 0x326   :  { %v7083_v44 = vpop.eup %7082  ;;  %7084 = vpow2.f32 %v6267_v3 }
 0x327   :  { %v2637_v40 = vadd.f32 1.0, %v7083_v44  ;;  %v2460_v24 = vpop.f32.mrf.mxu3  ;;  %v2621_v44 = vunpack.c.h.bf16 %v10512_v59 }
 0x328   :  { %v8681_v7 = vpop.f32.mrf.mxu0 }
 0x329   :  { %7086 = vrcp.f32 %v2637_v40  ;;  %v2484_v26 = vpop.f32.mrf.mxu1  ;;  %v2649_v12 = vand.u32 2147483648, %v2637_v40  ;;  %vm2643_vm5 = vweird.f32 %v2637_v40 }
 0x32a   :  { %v2485_v57 = vadd.f32 %v2484_v26, %v2471_v29  ;;  %v2647_v26 = vand.u32 2147483647, %v2637_v40 }
 0x32c   :  { %v7085_v34 = vpop.eup %7084  ;;  %v2624_v32 = vadd.f32 %v2620_v45, %v2485_v57  ;;  %v2650_v45 = vor.u32 1.1754944e-38, %v2649_v12  ;;  %vm2648_vm7 = vcmp.eq.f32.partialorder %v2647_v26, 8.507059e+37 }
 0x32d   :  { %v2656_v28 = vadd.f32 1.0, %v7085_v34 }
 0x32e   :  { %v8684_v9 = vpop.f32.mrf.mxu2 }
 0x32f   :  { %v7087_v54 = vpop.eup %7086  ;;  %7088 = vrcp.f32 %v2656_v28  ;;  %v2510_v20 = vpop.f32.mrf.mxu3  ;;  %vm2662_vm9 = vweird.f32 %v2656_v28 }
 0x330   :  { %v2639_v53 = vmul.f32 %v7087_v54, %v2637_v40  ;;  %v2511_v46 = vadd.f32 %v2510_v20, %v2497_v47  ;;  %v2577_v24 = vpop.f32.mrf.mxu0  ;;  %7090 = vtanh.f32 %v2624_v32  ;;  %vm2644_vm4 = vweird.f32 %v7087_v54 }
 0x331   :  { %v2486_v3 = vpop.f32.mrf.mxu1  ;;  %vm2645_vm6 = vmor %vm2643_vm5, %vm2644_vm4 }
 0x332   :  { %v2640_v35 = vsub.f32 1.0, %v2639_v53  ;;  %v2625_v60 = vadd.f32 %v2621_v44, %v2511_v46  ;;  %v2668_v44 = vand.u32 2147483648, %v2656_v28 }
 0x334   :  { %v2641_v29 = vmul.f32 %v7087_v54, %v2640_v35  ;;  %v6268_v34 = vmul.f32 -1.442695, %v2625_v60  ;;  %v2666_v35 = vand.u32 2147483647, %v2656_v28 }
 0x335   :  { %v7089_v14 = vpop.eup %7088 }
 0x336   :  { %v2658_v25 = vmul.f32 %v7089_v14, %v2656_v28  ;;  %v2642_v57 = vadd.f32 %v7087_v54, %v2641_v29  ;;  %7092 = vpow2.f32 %v6268_v34  ;;  %v2603_v53 = vpop.f32.mrf.mxu2  ;;  %v7091_v46 = vpop.eup %7090  ;;  %vm2663_vm8 = vweird.f32 %v7089_v14  ;;  %v10513_v29 = vld [vmem:[#allocation173_spill] sm:$0xff] }
 0x337   :  { %v2512_v47 = vpop.f32.mrf.mxu3  ;;  %v2626_v40 = vunpack.c.l.bf16 %v10513_v29  ;;  %vm2664_vm10 = vmor %vm2662_vm9, %vm2663_vm8  ;;  %vm2667_vm11 = vcmp.eq.f32.partialorder %v2666_v35, 8.507059e+37  ;;  %v2627_v53 = vunpack.c.h.bf16 %v10513_v29 }
 0x338   :  { %v2659_v20 = vsub.f32 1.0, %v2658_v25  ;;  %v2646_v59 = vsel %vm2645_vm6, %v7087_v54, %v2642_v57  ;;  %v2669_v25 = vor.u32 1.1754944e-38, %v2668_v44 }
 0x339   :  { %v2651_v3 = vsel %vm2648_vm7, %v2650_v45, %v2646_v59  ;;  %v2536_v60 = vpop.f32.mrf.mxu1 }
 0x33a   :  { %v2660_v32 = vmul.f32 %v7089_v14, %v2659_v20  ;;  %v2693_v24 = vmul.f32 %v7091_v46, %v2651_v3  ;;  %v2537_v52 = vadd.f32 %v2536_v60, %v8671_v6 }
 0x33c   :  { %v7093_v34 = vpop.eup %7092  ;;  %v2661_v12 = vadd.f32 %v7089_v14, %v2660_v32  ;;  %v2630_v26 = vadd.f32 %v2626_v40, %v2537_v52 }
 0x33d   :  { %v2676_v54 = vadd.f32 1.0, %v7093_v34 }
 0x33e   :  { %v2665_v57 = vsel %vm2664_vm10, %v7089_v14, %v2661_v12  ;;  %v6269_v45 = vmul.f32 -1.442695, %v2630_v26 }
 0x33f   :  { %v2670_v47 = vsel %vm2667_vm11, %v2669_v25, %v2665_v57  ;;  %7094 = vrcp.f32 %v2676_v54  ;;  %v2562_v59 = vpop.f32.mrf.mxu3  ;;  %vm2682_vm13 = vweird.f32 %v2676_v54 }
 0x340   :  { %v2692_v20 = vmul.f32 %v2670_v47, %v8485_v8  ;;  %7096 = vpow2.f32 %v6269_v45  ;;  %v2563_v6 = vadd.f32 %v2562_v59, %v8675_v37  ;;  %v2688_v8 = vand.u32 2147483648, %v2676_v54  ;;  %v8698_v47 = vpop.permute.xlu1 %2767 }
 0x341   :  { %v2538_v28 = vpop.f32.mrf.mxu1  ;;  %10514 = vst [vmem:[#allocation110_spill] sm:$0xff] %v8698_v47 }
 0x342   :  { %v8692_v46 = vadd.f32 %v2693_v24, %v2692_v20  ;;  %v2631_v3 = vadd.f32 %v2627_v53, %v2563_v6  ;;  %v2686_v24 = vand.u32 2147483647, %v2676_v54  ;;  %v2689_v12 = vor.u32 1.1754944e-38, %v2688_v8 }
 0x344   :  { %v6270_v32 = vmul.f32 -1.442695, %v2631_v3  ;;  %vm2687_vm15 = vcmp.eq.f32.partialorder %v2686_v24, 8.507059e+37  ;;  %v10542_v3 = vld [vmem:[#allocation122_spill] sm:$0xff] }
 0x345   :  { %v7095_v44 = vpop.eup %7094 }
 0x346   :  { %v2678_v52 = vmul.f32 %v7095_v44, %v2676_v54  ;;  %v7097_v14 = vpop.eup %7096  ;;  %7098 = vpow2.f32 %v6270_v32  ;;  %vm2683_vm12 = vweird.f32 %v7095_v44 }
 0x347   :  { %v8694_v35 = vadd.f32 1.0, %v7097_v14  ;;  %v2564_v60 = vpop.f32.mrf.mxu3  ;;  %7100 = vtanh.f32 %v8692_v46  ;;  %vm2684_vm14 = vmor %vm2682_vm13, %vm2683_vm12 }
 0x348   :  { %v2679_v40 = vsub.f32 1.0, %v2678_v52 }
 0x349   :  { %7102 = vrcp.f32 %v8694_v35  ;;  %vm2706_vm2 = vweird.f32 %v8694_v35 }
 0x34a   :  { %v2680_v37 = vmul.f32 %v7095_v44, %v2679_v40  ;;  %v10515_v40 = vld [vmem:[#allocation174_spill] sm:$0xff] }
 0x34b   :  { %v2628_v8 = vunpack.c.l.bf16 %v10515_v40 }
 0x34c   :  { %v2681_v29 = vadd.f32 %v7095_v44, %v2680_v37  ;;  %v7099_v34 = vpop.eup %7098 }
 0x34d   :  { %v2719_v25 = vadd.f32 1.0, %v7099_v34  ;;  %v7101_v57 = vpop.eup %7100 }
 0x34e   :  { %v2685_v26 = vsel %vm2684_vm14, %v7095_v44, %v2681_v29 }
 0x34f   :  { %v2690_v45 = vsel %vm2687_vm15, %v2689_v12, %v2685_v26  ;;  %v7103_v20 = vpop.eup %7102  ;;  %7104 = vrcp.f32 %v2719_v25  ;;  %v2731_v24 = vand.u32 2147483648, %v2719_v25  ;;  %v2729_v26 = vand.u32 2147483647, %v2719_v25 }
 0x350   :  { %v2696_v59 = vmul.f32 %v7101_v57, %v2690_v45  ;;  %v2702_v6 = vmul.f32 %v7103_v20, %v8694_v35  ;;  %vm2707_vm0 = vweird.f32 %v7103_v20  ;;  %v2712_v57 = vand.u32 2147483648, %v8694_v35 }
 0x351   :  { %vm2725_vm3 = vweird.f32 %v2719_v25  ;;  %vm8718_vm4 = vmor %vm2706_vm2, %vm2707_vm0  ;;  %v2710_v45 = vand.u32 2147483647, %v8694_v35  ;;  %vm2730_vm6 = vcmp.eq.f32.partialorder %v2729_v26, 8.507059e+37 }
 0x352   :  { %v8702_v53 = vadd.f32 %v8698_v47, %v2696_v59  ;;  %v8704_v28 = vpack.c.bf16 %v2696_v59, %v2696_v59  ;;  %v2703_v54 = vsub.f32 1.0, %v2702_v6  ;;  %v10543_v47 = vld [vmem:[#allocation124_spill] sm:$0xff] }
 0x353   :  { %vm2711_vm7 = vcmp.eq.f32.partialorder %v2710_v45, 8.507059e+37 }
 0x354   :  { %2798 = vmatmul.bf16.vlgmr.msra.gmra.mxu0 %v8704_v28  ;;  %2824 = vmatmul.bf16.vlgmr.msra.gmra.mxu2 %v8704_v28  ;;  %v2704_v14 = vmul.f32 %v7103_v20, %v2703_v54  ;;  %v2732_v54 = vor.u32 1.1754944e-38, %v2731_v24 }
 0x355   :  { %2894 = vmatpush.bf16.msra.mxu0 %v10298_v43  ;;  %2920 = vmatpush.bf16.msra.mxu2 %v10299_v36  ;;  %v7105_v44 = vpop.eup %7104 }
 0x356   :  { %v2721_v32 = vmul.f32 %v7105_v44, %v2719_v25  ;;  %vm2726_vm1 = vweird.f32 %v7105_v44  ;;  %v2705_v12 = vadd.f32 %v7103_v20, %v2704_v14 }
 0x357   :  { %vm2727_vm5 = vmor %vm2725_vm3, %vm2726_vm1 }
 0x358   :  { %v2722_v37 = vsub.f32 1.0, %v2721_v32  ;;  %v2709_v25 = vsel %vm8718_vm4, %v7103_v20, %v2705_v12 }
 0x359   :  { %v2588_v52 = vpop.f32.mrf.mxu1  ;;  %2895 = vmatpush.bf16.msra.mxu0 %v10300_v39  ;;  %2921 = vmatpush.bf16.msra.mxu2 %v10413_v1 }
 0x35a   :  { %v2589_v60 = vadd.f32 %v2588_v52, %v8681_v7  ;;  %v2723_v34 = vmul.f32 %v7105_v44, %v2722_v37  ;;  %v2629_v52 = vunpack.c.h.bf16 %v10515_v40 }
 0x35c   :  { %v2632_v29 = vadd.f32 %v2628_v8, %v2589_v60  ;;  %v2724_v59 = vadd.f32 %v7105_v44, %v2723_v34  ;;  %v2713_v8 = vor.u32 1.1754944e-38, %v2712_v57 }
 0x35d   :  { %2896 = vmatpush.bf16.msra.mxu0 %v10416_v2  ;;  %2922 = vmatpush.bf16.msra.mxu2 %v10417_v13 }
 0x35e   :  { %7106 = vtanh.f32 %v2632_v29  ;;  %v2728_v14 = vsel %vm2727_vm5, %v7105_v44, %v2724_v59 }
 0x35f   :  { %v2614_v6 = vpop.f32.mrf.mxu3  ;;  %v2733_v35 = vsel %vm2730_vm6, %v2732_v54, %v2728_v14 }
 0x360   :  { %v2615_v32 = vadd.f32 %v2614_v6, %v8684_v9  ;;  %v2755_v29 = vmul.f32 %v2733_v35, %v8535_v0  ;;  %v2714_v9 = vsel %vm2711_vm7, %v2713_v8, %v2709_v25  ;;  %v10518_v6 = vld [vmem:[#allocation97_spill] sm:$0xff] }
 0x361   :  { %v2590_v60 = vpop.f32.mrf.mxu1  ;;  %2897 = vmatpush.bf16.msra.mxu0 %v10306_v30  ;;  %2923 = vmatpush.bf16.msra.mxu2 %v10307_v17  ;;  %vm2763_vm8 = vcmp.eq.s32.totalorder %v10518_v6, 1  ;;  %v10524_v6 = vld [vmem:[#allocation160_spill] sm:$0xff] }
 0x362   :  { %v2633_v37 = vadd.f32 %v2629_v52, %v2615_v32 }
 0x364   :  { %v7107_v24 = vpop.eup %7106  ;;  %v6271_v34 = vmul.f32 -1.442695, %v2633_v37  ;;  %2850 = vmatmul.bf16.vlgmr.msrb.gmra.mxu0 %v8704_v28  ;;  %2876 = vmatmul.bf16.vlgmr.msrb.gmra.mxu2 %v8704_v28 }
 0x365   :  { %v2756_v40 = vmul.f32 %v7107_v24, %v2714_v9  ;;  %2898 = vmatpush.bf16.msra.mxu0 %v10308_v18  ;;  %2924 = vmatpush.bf16.msra.mxu2 %v10309_v56  ;;  %v10520_v24 = vld [vmem:[#allocation154_spill] sm:$0xff]  ;;  %v10521_v9 = vld [vmem:[#allocation95_spill] sm:$0xff] }
 0x366   :  { %7108 = vpow2.f32 %v6271_v34  ;;  %v10522_v34 = vld [vmem:[#allocation98_spill] sm:$0xff] }
 0x367   :  { %v2757_v20 = vadd.f32 %v2756_v40, %v2755_v29  ;;  %v2616_v44 = vpop.f32.mrf.mxu3  ;;  %v10523_v40 = vld [vmem:[#allocation157_spill] sm:$0xff] }
 0x368   :  { %v10526_v44 = vld [vmem:[#allocation23_spill] sm:$0xff] }
 0x369   :  { %v8740_v12 = vsel %vm2763_vm8, %v2757_v20, %v8535_v0  ;;  %2899 = vmatpush.bf16.msra.mxu0 %v10310_v22  ;;  %2925 = vmatpush.bf16.msra.mxu2 %v10311_v49 }
 0x36c   :  { %v7109_v26 = vpop.eup %7108 }
 0x36d   :  { %v2739_v57 = vadd.f32 1.0, %v7109_v26  ;;  %2900 = vmatpush.bf16.msra.mxu0 %v7917_v15  ;;  %2926 = vmatpush.bf16.msra.mxu2 %v10312_v38  ;;  %v10527_v26 = vld [vmem:[#allocation101_spill] sm:$0xff] }
 0x36f   :  { %7110 = vrcp.f32 %v2739_v57  ;;  %v2751_v59 = vand.u32 2147483648, %v2739_v57  ;;  %v2749_v32 = vand.u32 2147483647, %v2739_v57  ;;  %vm2745_vm10 = vweird.f32 %v2739_v57 }
 0x370   :  { %7112 = vtanh.f32 %v2757_v20  ;;  %v10525_v20 = vld [vmem:[#allocation21_spill] sm:$0xff] }
 0x371   :  { %2901 = vmatpush.bf16.msra.mxu0 %v10418_v19  ;;  %2927 = vmatpush.bf16.msra.mxu2 %v10419_v58  ;;  %v2752_v25 = vor.u32 1.1754944e-38, %v2751_v59  ;;  %vm2750_vm12 = vcmp.eq.f32.partialorder %v2749_v32, 8.507059e+37  ;;  %v10532_v59 = vld [vmem:[#allocation27_spill] sm:$0xff]  ;;  %v10534_v32 = vld [vmem:[#allocation113_spill] sm:$0xff] }
 0x374   :  { %2902 = vmatmul.bf16.vlgmr.msra.gmra.mxu0 %v8704_v28  ;;  %2928 = vmatmul.bf16.vlgmr.msra.gmra.mxu2 %v8704_v28 }
 0x375   :  { %2946 = vmatpush.bf16.msrb.mxu0 %v10420_v50  ;;  %2972 = vmatpush.bf16.msrb.mxu2 %v10421_v55  ;;  %v7111_v0 = vpop.eup %7110 }
 0x376   :  { %v2741_v7 = vmul.f32 %v7111_v0, %v2739_v57  ;;  %vm2746_vm9 = vweird.f32 %v7111_v0  ;;  %v7113_v60 = vpop.eup %7112  ;;  %v10528_v57 = vld [vmem:[#allocation103_spill] sm:$0xff] }
 0x377   :  { %vm2747_vm11 = vmor %vm2745_vm10, %vm2746_vm9 }
 0x378   :  { %v2742_v45 = vsub.f32 1.0, %v2741_v7  ;;  %v10530_v7 = vld [vmem:[#allocation108_spill] sm:$0xff] }
 0x379   :  { %2947 = vmatpush.bf16.msrb.mxu0 %v10422_v51  ;;  %2973 = vmatpush.bf16.msrb.mxu2 %v10423_v21 }
 0x37a   :  { %v2743_v54 = vmul.f32 %v7111_v0, %v2742_v45  ;;  %v10531_v45 = vld [vmem:[#allocation25_spill] sm:$0xff] }
 0x37c   :  { %v2744_v52 = vadd.f32 %v7111_v0, %v2743_v54  ;;  %v10533_v54 = vld [vmem:[#allocation111_spill] sm:$0xff] }
 0x37d   :  { %2948 = vmatpush.bf16.msrb.mxu0 %v10319_v42  ;;  %2974 = vmatpush.bf16.msrb.mxu2 %v10320_v4 }
 0x37e   :  { %v2748_v14 = vsel %vm2747_vm11, %v7111_v0, %v2744_v52  ;;  %v10529_v0 = vld [vmem:[#allocation105_spill] sm:$0xff] }
 0x37f   :  { %v2753_v8 = vsel %vm2750_vm12, %v2752_v25, %v2748_v14  ;;  %v10535_v52 = vld [vmem:[#allocation29_spill] sm:$0xff]  ;;  %v10536_v25 = vld [vmem:[#allocation31_spill] sm:$0xff] }
 0x380   :  { %v2759_v35 = vmul.f32 %v7113_v60, %v2753_v8  ;;  %v10538_v14 = vld [vmem:[#allocation117_spill] sm:$0xff]  ;;  %v10540_v8 = vld [vmem:[#allocation35_spill] sm:$0xff] }
 0x381   :  { %2949 = vmatpush.bf16.msrb.mxu0 %v10321_v61  ;;  %2975 = vmatpush.bf16.msrb.mxu2 %v10322_v41  ;;  %v10539_v60 = vld [vmem:[#allocation33_spill] sm:$0xff] }
 0x382   :  { %v8761_v37 = vsel %vm2763_vm8, %v2759_v35, %v8555_v10  ;;  %v10541_v35 = vld [vmem:[#allocation120_spill] sm:$0xff]  ;;  %v10544_v10 = vld [vmem:[#allocation126_spill] sm:$0xff] }
 0x383   :  { %10519 = vst [vmem:[#allocation112_spill] sm:$0xff] %v8761_v37  ;;  %v8765_v29 = vpack.c.bf16 %v8761_v37, %v8761_v37 }
 0x385   :  { %2950 = vmatpush.bf16.msrb.mxu0 %v8021_v27  ;;  %2976 = vmatpush.bf16.msrb.mxu2 %v10326_v63 }
 0x386   :  { %2811 = vmatmul.bf16.vlgmr.msra.gmra.mxu1 %v8765_v29  ;;  %2837 = vmatmul.bf16.vlgmr.msra.gmra.mxu3 %v8765_v29 }
 0x387   :  { %2907 = vmatpush.bf16.msra.mxu1 %v10327_v23  ;;  %2933 = vmatpush.bf16.msra.mxu3 %v10328_v11 }
 0x389   :  { %2951 = vmatpush.bf16.msrb.mxu0 %v10329_v5  ;;  %2977 = vmatpush.bf16.msrb.mxu2 %v10330_v62 }
 0x38b   :  { %2908 = vmatpush.bf16.msra.mxu1 %v10331_v48  ;;  %2934 = vmatpush.bf16.msra.mxu3 %v10332_v33 }
 0x38d   :  { %2952 = vmatpush.bf16.msrb.mxu0 %v10425_v16  ;;  %2978 = vmatpush.bf16.msrb.mxu2 %v10520_v24 }
 0x38f   :  { %2909 = vmatpush.bf16.msra.mxu1 %v10521_v9  ;;  %2935 = vmatpush.bf16.msra.mxu3 %v10522_v34 }
 0x391   :  { %2953 = vmatpush.bf16.msrb.mxu0 %v10523_v40  ;;  %2979 = vmatpush.bf16.msrb.mxu2 %v10524_v6 }
 0x393   :  { %2910 = vmatpush.bf16.msra.mxu1 %v10527_v26  ;;  %2936 = vmatpush.bf16.msra.mxu3 %v10528_v57 }
 0x394   :  { %2954 = vmatmul.bf16.vlgmr.msrb.gmra.mxu0 %v8704_v28  ;;  %2980 = vmatmul.bf16.vlgmr.msrb.gmra.mxu2 %v8704_v28  ;;  %v10537_v28 = vld [vmem:[#allocation114_spill] sm:$0xff] }
 0x395   :  { %3160 = vmatpush.bf16.msra.mxu0 %v10525_v20  ;;  %3186 = vmatpush.bf16.msra.mxu2 %v10526_v44 }
 0x396   :  { %2863 = vmatmul.bf16.vlgmr.msrb.gmra.mxu1 %v8765_v29  ;;  %2889 = vmatmul.bf16.vlgmr.msrb.gmra.mxu3 %v8765_v29 }
 0x397   :  { %2911 = vmatpush.bf16.msra.mxu1 %v10529_v0  ;;  %2937 = vmatpush.bf16.msra.mxu3 %v10530_v7  ;;  %v10615_v0 = vld [vmem:[#allocation118_spill] sm:$0xff] }
 0x399   :  { %3161 = vmatpush.bf16.msra.mxu0 %v10531_v45  ;;  %3187 = vmatpush.bf16.msra.mxu2 %v10532_v59  ;;  %v10603_v59 = vld [vmem:[#allocation62_spill] sm:$0xff] }
 0x39a   :  { %v10607_v45 = vld [vmem:[#allocation70_spill] sm:$0xff] }
 0x39b   :  { %2912 = vmatpush.bf16.msra.mxu1 %v10533_v54  ;;  %2938 = vmatpush.bf16.msra.mxu3 %v10534_v32  ;;  %v10545_v32 = vld [vmem:[#allocation37_spill] sm:$0xff]  ;;  %v10601_v54 = vld [vmem:[#allocation58_spill] sm:$0xff] }
 0x39d   :  { %3162 = vmatpush.bf16.msra.mxu0 %v10535_v52  ;;  %3188 = vmatpush.bf16.msra.mxu2 %v10536_v25  ;;  %v10546_v52 = vld [vmem:[#allocation39_spill] sm:$0xff]  ;;  %v10557_v25 = vld [vmem:[#allocation49_spill] sm:$0xff] }
 0x39f   :  { %2913 = vmatpush.bf16.msra.mxu1 %v10537_v28  ;;  %2939 = vmatpush.bf16.msra.mxu3 %v10538_v14  ;;  %v10547_v14 = vld [vmem:[#allocation130_spill] sm:$0xff] }
 0x3a0   :  { %v10556_v28 = vld [vmem:[#allocation142_spill] sm:$0xff] }
 0x3a1   :  { %3163 = vmatpush.bf16.msra.mxu0 %v10539_v60  ;;  %3189 = vmatpush.bf16.msra.mxu2 %v10540_v8  ;;  %v10548_v60 = vld [vmem:[#allocation132_spill] sm:$0xff]  ;;  %v10549_v8 = vld [vmem:[#allocation41_spill] sm:$0xff] }
 0x3a3   :  { %2914 = vmatpush.bf16.msra.mxu1 %v10541_v35  ;;  %2940 = vmatpush.bf16.msra.mxu3 %v10542_v3  ;;  %v10550_v35 = vld [vmem:[#allocation43_spill] sm:$0xff]  ;;  %v10551_v3 = vld [vmem:[#allocation134_spill] sm:$0xff] }
 0x3a5   :  { %3164 = vmatpush.bf16.msra.mxu0 %v10545_v32  ;;  %3190 = vmatpush.bf16.msra.mxu2 %v10546_v52  ;;  %v10554_v32 = vld [vmem:[#allocation47_spill] sm:$0xff] }
 0x3a6   :  { %2915 = vmatmul.bf16.vlgmr.msra.gmra.mxu1 %v8765_v29  ;;  %2941 = vmatmul.bf16.vlgmr.msra.gmra.mxu3 %v8765_v29  ;;  %v10555_v52 = vld [vmem:[#allocation139_spill] sm:$0xff] }
 0x3a7   :  { %2959 = vmatpush.bf16.msrb.mxu1 %v10543_v47  ;;  %2985 = vmatpush.bf16.msrb.mxu3 %v10544_v10  ;;  %v10552_v47 = vld [vmem:[#allocation136_spill] sm:$0xff]  ;;  %v10553_v10 = vld [vmem:[#allocation45_spill] sm:$0xff] }
 0x3a9   :  { %3165 = vmatpush.bf16.msra.mxu0 %v10549_v8  ;;  %3191 = vmatpush.bf16.msra.mxu2 %v10550_v35  ;;  %v10560_v8 = vld [vmem:[#allocation55_spill] sm:$0xff] }
 0x3aa   :  { %v10561_v35 = vld [vmem:[#allocation143_spill] sm:$0xff] }
 0x3ab   :  { %2960 = vmatpush.bf16.msrb.mxu1 %v10547_v14  ;;  %2986 = vmatpush.bf16.msrb.mxu3 %v10548_v60  ;;  %v10558_v14 = vld [vmem:[#allocation51_spill] sm:$0xff]  ;;  %v10559_v60 = vld [vmem:[#allocation53_spill] sm:$0xff] }
 0x3ad   :  { %3166 = vmatpush.bf16.msra.mxu0 %v10553_v10  ;;  %3192 = vmatpush.bf16.msra.mxu2 %v10554_v32  ;;  %v10564_v10 = vld [vmem:[#allocation59_spill] sm:$0xff]  ;;  %v10565_v32 = vld [vmem:[#allocation149_spill] sm:$0xff] }
 0x3af   :  { %2961 = vmatpush.bf16.msrb.mxu1 %v10551_v3  ;;  %2987 = vmatpush.bf16.msrb.mxu3 %v10552_v47  ;;  %v10562_v3 = vld [vmem:[#allocation145_spill] sm:$0xff] }
 0x3b0   :  { %v10563_v47 = vld [vmem:[#allocation57_spill] sm:$0xff] }
 0x3b1   :  { %3167 = vmatpush.bf16.msra.mxu0 %v10557_v25  ;;  %3193 = vmatpush.bf16.msra.mxu2 %v10558_v14  ;;  %v10568_v25 = vld [vmem:[#allocation63_spill] sm:$0xff]  ;;  %v10569_v14 = vld [vmem:[#allocation153_spill] sm:$0xff] }
 0x3b3   :  { %2962 = vmatpush.bf16.msrb.mxu1 %v10555_v52  ;;  %2988 = vmatpush.bf16.msrb.mxu3 %v10556_v28  ;;  %v10566_v52 = vld [vmem:[#allocation151_spill] sm:$0xff]  ;;  %v10567_v28 = vld [vmem:[#allocation61_spill] sm:$0xff] }
 0x3b5   :  { %3212 = vmatpush.bf16.msrb.mxu0 %v10559_v60  ;;  %3238 = vmatpush.bf16.msrb.mxu2 %v10560_v8  ;;  %v10570_v60 = vld [vmem:[#allocation155_spill] sm:$0xff]  ;;  %v10571_v8 = vld [vmem:[#allocation65_spill] sm:$0xff] }
 0x3b7   :  { %2963 = vmatpush.bf16.msrb.mxu1 %v10561_v35  ;;  %2989 = vmatpush.bf16.msrb.mxu3 %v10562_v3  ;;  %v10572_v35 = vld [vmem:[#allocation67_spill] sm:$0xff] }
 0x3b8   :  { %v10573_v3 = vld [vmem:[#allocation159_spill] sm:$0xff] }
 0x3b9   :  { %3213 = vmatpush.bf16.msrb.mxu0 %v10563_v47  ;;  %3239 = vmatpush.bf16.msrb.mxu2 %v10564_v10  ;;  %v10574_v47 = vld [vmem:[#allocation161_spill] sm:$0xff]  ;;  %v10575_v10 = vld [vmem:[#allocation22_spill] sm:$0xff] }
 0x3bb   :  { %2964 = vmatpush.bf16.msrb.mxu1 %v10565_v32  ;;  %2990 = vmatpush.bf16.msrb.mxu3 %v10566_v52  ;;  %v10576_v32 = vld [vmem:[#allocation24_spill] sm:$0xff]  ;;  %v10577_v52 = vld [vmem:[#allocation69_spill] sm:$0xff] }
 0x3bd   :  { %3214 = vmatpush.bf16.msrb.mxu0 %v10567_v28  ;;  %3240 = vmatpush.bf16.msrb.mxu2 %v10568_v25  ;;  %v10578_v28 = vld [vmem:[#allocation71_spill] sm:$0xff] }
 0x3bf   :  { %2965 = vmatpush.bf16.msrb.mxu1 %v10569_v14  ;;  %2991 = vmatpush.bf16.msrb.mxu3 %v10570_v60  ;;  %v10579_v60 = vld [vmem:[#allocation26_spill] sm:$0xff]  ;;  %v10588_v14 = vld [vmem:[#allocation36_spill] sm:$0xff] }
 0x3c1   :  { %3215 = vmatpush.bf16.msrb.mxu0 %v10571_v8  ;;  %3241 = vmatpush.bf16.msrb.mxu2 %v10572_v35  ;;  %v10580_v8 = vld [vmem:[#allocation28_spill] sm:$0xff]  ;;  %v10581_v35 = vld [vmem:[#allocation73_spill] sm:$0xff] }
 0x3c3   :  { %2966 = vmatpush.bf16.msrb.mxu1 %v10573_v3  ;;  %2992 = vmatpush.bf16.msrb.mxu3 %v10574_v47  ;;  %v10582_v3 = vld [vmem:[#allocation75_spill] sm:$0xff]  ;;  %v10583_v47 = vld [vmem:[#allocation30_spill] sm:$0xff] }
 0x3c5   :  { %3216 = vmatpush.bf16.msrb.mxu0 %v10577_v52  ;;  %3242 = vmatpush.bf16.msrb.mxu2 %v10578_v28  ;;  %v10586_v52 = vld [vmem:[#allocation79_spill] sm:$0xff]  ;;  %v10587_v28 = vld [vmem:[#allocation34_spill] sm:$0xff] }
 0x3c6   :  { %2967 = vmatmul.bf16.vlgmr.msrb.gmra.mxu1 %v8765_v29  ;;  %2993 = vmatmul.bf16.vlgmr.msrb.gmra.mxu3 %v8765_v29  ;;  %v10589_v29 = vld [vmem:[#allocation81_spill] sm:$0xff] }
 0x3c7   :  { %3173 = vmatpush.bf16.msra.mxu1 %v10575_v10  ;;  %3199 = vmatpush.bf16.msra.mxu3 %v10576_v32  ;;  %v10584_v10 = vld [vmem:[#allocation32_spill] sm:$0xff]  ;;  %v10585_v32 = vld [vmem:[#allocation77_spill] sm:$0xff] }
 0x3c9   :  { %3217 = vmatpush.bf16.msrb.mxu0 %v10581_v35  ;;  %3243 = vmatpush.bf16.msrb.mxu2 %v10582_v3  ;;  %v10592_v35 = vld [vmem:[#allocation40_spill] sm:$0xff] }
 0x3cb   :  { %3174 = vmatpush.bf16.msra.mxu1 %v10579_v60  ;;  %3200 = vmatpush.bf16.msra.mxu3 %v10580_v8  ;;  %v10590_v60 = vld [vmem:[#allocation83_spill] sm:$0xff]  ;;  %v10591_v8 = vld [vmem:[#allocation38_spill] sm:$0xff] }
 0x3cd   :  { %3218 = vmatpush.bf16.msrb.mxu0 %v10585_v32  ;;  %3244 = vmatpush.bf16.msrb.mxu2 %v10586_v52  ;;  %v10595_v32 = vld [vmem:[#allocation46_spill] sm:$0xff]  ;;  %v10596_v52 = vld [vmem:[#allocation48_spill] sm:$0xff] }
 0x3cf   :  { %3175 = vmatpush.bf16.msra.mxu1 %v10583_v47  ;;  %3201 = vmatpush.bf16.msra.mxu3 %v10584_v10  ;;  %v10593_v47 = vld [vmem:[#allocation42_spill] sm:$0xff]  ;;  %v10594_v10 = vld [vmem:[#allocation44_spill] sm:$0xff] }
 0x3d1   :  { %3219 = vmatpush.bf16.msrb.mxu0 %v10589_v29  ;;  %3245 = vmatpush.bf16.msrb.mxu2 %v10590_v60  ;;  %v2799_v3 = vpop.f32.mrf.mxu0  ;;  %v10598_v29 = vld [vmem:[#allocation52_spill] sm:$0xff]  ;;  %v10599_v60 = vld [vmem:[#allocation54_spill] sm:$0xff] }
 0x3d3   :  { %3176 = vmatpush.bf16.msra.mxu1 %v10587_v28  ;;  %3202 = vmatpush.bf16.msra.mxu3 %v10588_v14  ;;  %v10597_v14 = vld [vmem:[#allocation50_spill] sm:$0xff] }
 0x3d7   :  { %3177 = vmatpush.bf16.msra.mxu1 %v10591_v8  ;;  %3203 = vmatpush.bf16.msra.mxu3 %v10592_v35  ;;  %v2825_v28 = vpop.f32.mrf.mxu2  ;;  %v10600_v8 = vld [vmem:[#allocation56_spill] sm:$0xff] }
 0x3d9   :  { %v2801_v25 = vpop.f32.mrf.mxu0 }
 0x3da   :  { %v10605_v25 = vld [vmem:[#allocation66_spill] sm:$0xff] }
 0x3db   :  { %3178 = vmatpush.bf16.msra.mxu1 %v10593_v47  ;;  %3204 = vmatpush.bf16.msra.mxu3 %v10594_v10  ;;  %v10602_v47 = vld [vmem:[#allocation60_spill] sm:$0xff] }
 0x3df   :  { %3179 = vmatpush.bf16.msra.mxu1 %v10595_v32  ;;  %3205 = vmatpush.bf16.msra.mxu3 %v10596_v52  ;;  %v2827_v35 = vpop.f32.mrf.mxu2  ;;  %v10604_v32 = vld [vmem:[#allocation64_spill] sm:$0xff] }
 0x3e1   :  { %v2851_v10 = vpop.f32.mrf.mxu0 }
 0x3e3   :  { %3180 = vmatpush.bf16.msra.mxu1 %v10597_v14  ;;  %3206 = vmatpush.bf16.msra.mxu3 %v10598_v29  ;;  %v10606_v14 = vld [vmem:[#allocation68_spill] sm:$0xff] }
 0x3e7   :  { %3225 = vmatpush.bf16.msrb.mxu1 %v10599_v60  ;;  %3251 = vmatpush.bf16.msrb.mxu3 %v10600_v8  ;;  %v2877_v52 = vpop.f32.mrf.mxu2  ;;  %v10608_v60 = vld [vmem:[#allocation72_spill] sm:$0xff]  ;;  %v10609_v8 = vld [vmem:[#allocation74_spill] sm:$0xff] }
 0x3e9   :  { %v2853_v29 = vpop.f32.mrf.mxu0 }
 0x3ea   :  { %v10614_v29 = vld [vmem:[#allocation84_spill] sm:$0xff] }
 0x3eb   :  { %3226 = vmatpush.bf16.msrb.mxu1 %v10601_v54  ;;  %3252 = vmatpush.bf16.msrb.mxu3 %v10602_v47  ;;  %v10610_v54 = vld [vmem:[#allocation76_spill] sm:$0xff] }
 0x3ef   :  { %3227 = vmatpush.bf16.msrb.mxu1 %v10603_v59  ;;  %3253 = vmatpush.bf16.msrb.mxu3 %v10604_v32  ;;  %v2879_v35 = vpop.f32.mrf.mxu2  ;;  %v10611_v59 = vld [vmem:[#allocation78_spill] sm:$0xff]  ;;  %v10612_v32 = vld [vmem:[#allocation80_spill] sm:$0xff] }
 0x3f1   :  { %v8877_v47 = vpop.f32.mrf.mxu0 }
 0x3f3   :  { %3228 = vmatpush.bf16.msrb.mxu1 %v10605_v25  ;;  %3254 = vmatpush.bf16.msrb.mxu3 %v10606_v14  ;;  %v10613_v25 = vld [vmem:[#allocation82_spill] sm:$0xff] }
 0x3f7   :  { %3229 = vmatpush.bf16.msrb.mxu1 %v10607_v45  ;;  %3255 = vmatpush.bf16.msrb.mxu3 %v10608_v60  ;;  %v8881_v7 = vpop.f32.mrf.mxu2 }
 0x3f9   :  { %v2905_v45 = vpop.f32.mrf.mxu0 }
 0x3fb   :  { %3230 = vmatpush.bf16.msrb.mxu1 %v10609_v8  ;;  %3256 = vmatpush.bf16.msrb.mxu3 %v10610_v54  ;;  %v2998_v8 = vunpack.c.l.bf16 %v10615_v0 }
 0x3ff   :  { %3231 = vmatpush.bf16.msrb.mxu1 %v10611_v59  ;;  %3257 = vmatpush.bf16.msrb.mxu3 %v10612_v32  ;;  %v2931_v14 = vpop.f32.mrf.mxu2  ;;  %v2999_v59 = vunpack.c.h.bf16 %v10615_v0 }
 0x403   :  { %3232 = vmatpush.bf16.msrb.mxu1 %v10613_v25  ;;  %3258 = vmatpush.bf16.msrb.mxu3 %v10614_v29  ;;  %v2812_v60 = vpop.f32.mrf.mxu1 }
 0x404   :  { %v2813_v35 = vadd.f32 %v2812_v60, %v2799_v3 }
 0x406   :  { %v3002_v44 = vadd.f32 %v2998_v8, %v2813_v35 }
 0x408   :  { %v6272_v54 = vmul.f32 -1.442695, %v3002_v44  ;;  %v10616_v44 = vld [vmem:[#allocation127_spill] sm:$0xff] }
 0x409   :  { %v2838_v20 = vpop.f32.mrf.mxu3  ;;  %v3000_v35 = vunpack.c.l.bf16 %v10616_v44 }
 0x40a   :  { %7114 = vpow2.f32 %v6272_v54  ;;  %v2839_v6 = vadd.f32 %v2838_v20, %v2825_v28 }
 0x40b   :  { %v2814_v32 = vpop.f32.mrf.mxu1 }
 0x40c   :  { %v3003_v40 = vadd.f32 %v2999_v59, %v2839_v6 }
 0x40e   :  { %v6273_v57 = vmul.f32 -1.442695, %v3003_v40 }
 0x410   :  { %v7115_v26 = vpop.eup %7114  ;;  %7116 = vpow2.f32 %v6273_v57 }
 0x411   :  { %v3017_v25 = vadd.f32 1.0, %v7115_v26  ;;  %v2840_v29 = vpop.f32.mrf.mxu3  ;;  %v8887_v45 = vpop.f32.mrf.mxu0  ;;  %v3001_v26 = vunpack.c.h.bf16 %v10616_v44 }
 0x413   :  { %7118 = vrcp.f32 %v3017_v25  ;;  %v2864_v3 = vpop.f32.mrf.mxu1  ;;  %v3029_v24 = vand.u32 2147483648, %v3017_v25  ;;  %vm3023_vm14 = vweird.f32 %v3017_v25 }
 0x414   :  { %v2865_v14 = vadd.f32 %v2864_v3, %v2851_v10  ;;  %v3027_v3 = vand.u32 2147483647, %v3017_v25 }
 0x416   :  { %v7117_v60 = vpop.eup %7116  ;;  %v3004_v0 = vadd.f32 %v3000_v35, %v2865_v14  ;;  %v3030_v14 = vor.u32 1.1754944e-38, %v3029_v24  ;;  %vm3028_vm0 = vcmp.eq.f32.partialorder %v3027_v3, 8.507059e+37 }
 0x417   :  { %v3036_v8 = vadd.f32 1.0, %v7117_v60  ;;  %v8890_v54 = vpop.f32.mrf.mxu2 }
 0x419   :  { %v7119_v20 = vpop.eup %7118  ;;  %7120 = vrcp.f32 %v3036_v8  ;;  %v2890_v6 = vpop.f32.mrf.mxu3  ;;  %vm3042_vm2 = vweird.f32 %v3036_v8 }
 0x41a   :  { %v2957_v40 = vpop.f32.mrf.mxu0  ;;  %v3019_v59 = vmul.f32 %v7119_v20, %v3017_v25  ;;  %v2891_v57 = vadd.f32 %v2890_v6, %v2877_v52  ;;  %7122 = vtanh.f32 %v3004_v0  ;;  %vm3024_vm13 = vweird.f32 %v7119_v20 }
 0x41b   :  { %v2866_v32 = vpop.f32.mrf.mxu1  ;;  %vm3025_vm15 = vmor %vm3023_vm14, %vm3024_vm13  ;;  %v3048_v40 = vand.u32 2147483648, %v3036_v8 }
 0x41c   :  { %v3020_v28 = vsub.f32 1.0, %v3019_v59  ;;  %v3005_v29 = vadd.f32 %v3001_v26, %v2891_v57  ;;  %v10617_v57 = vld [vmem:[#allocation171_spill] sm:$0xff]  ;;  %v3046_v32 = vand.u32 2147483647, %v3036_v8 }
 0x41d   :  { %v3006_v26 = vunpack.c.l.bf16 %v10617_v57 }
 0x41e   :  { %v3021_v10 = vmul.f32 %v7119_v20, %v3020_v28  ;;  %v6274_v60 = vmul.f32 -1.442695, %v3005_v29  ;;  %vm3047_vm4 = vcmp.eq.f32.partialorder %v3046_v32, 8.507059e+37 }
 0x41f   :  { %v7121_v16 = vpop.eup %7120  ;;  %v2983_v34 = vpop.f32.mrf.mxu2 }
 0x420   :  { %v3038_v9 = vmul.f32 %v7121_v16, %v3036_v8  ;;  %v3022_v62 = vadd.f32 %v7119_v20, %v3021_v10  ;;  %7124 = vpow2.f32 %v6274_v60  ;;  %v7123_v6 = vpop.eup %7122  ;;  %vm3043_vm1 = vweird.f32 %v7121_v16 }
 0x421   :  { %v2892_v52 = vpop.f32.mrf.mxu3  ;;  %vm3044_vm3 = vmor %vm3042_vm2, %vm3043_vm1 }
 0x422   :  { %v3039_v35 = vsub.f32 1.0, %v3038_v9  ;;  %v3026_v44 = vsel %vm3025_vm15, %v7119_v20, %v3022_v62  ;;  %v3049_v9 = vor.u32 1.1754944e-38, %v3048_v40 }
 0x423   :  { %v3031_v59 = vsel %vm3028_vm0, %v3030_v14, %v3026_v44  ;;  %v2916_v0 = vpop.f32.mrf.mxu1 }
 0x424   :  { %v3040_v28 = vmul.f32 %v7121_v16, %v3039_v35  ;;  %v3073_v34 = vmul.f32 %v7123_v6, %v3031_v59  ;;  %v2917_v29 = vadd.f32 %v2916_v0, %v8877_v47  ;;  %v3007_v35 = vunpack.c.h.bf16 %v10617_v57 }
 0x426   :  { %v7125_v25 = vpop.eup %7124  ;;  %v3010_v10 = vadd.f32 %v3006_v26, %v2917_v29  ;;  %v3041_v24 = vadd.f32 %v7121_v16, %v3040_v28  ;;  %v8900_v26 = vpop.permute.xlu0 %2013 }
 0x427   :  { %v3056_v62 = vadd.f32 1.0, %v7125_v25  ;;  %10618 = vst [vmem:[#allocation115_spill] sm:$0xff] %v8900_v26  ;;  %v10653_v26 = vld [vmem:[#allocation37_spill] sm:$0xff] }
 0x428   :  { %v6275_v20 = vmul.f32 -1.442695, %v3010_v10  ;;  %v3045_v3 = vsel %vm3044_vm3, %v7121_v16, %v3041_v24 }
 0x429   :  { %7126 = vrcp.f32 %v3056_v62  ;;  %v2942_v60 = vpop.f32.mrf.mxu3  ;;  %v3050_v14 = vsel %vm3047_vm4, %v3049_v9, %v3045_v3  ;;  %v3066_v57 = vand.u32 2147483647, %v3056_v62  ;;  %vm3062_vm6 = vweird.f32 %v3056_v62 }
 0x42a   :  { %7128 = vpow2.f32 %v6275_v20  ;;  %v2943_v52 = vadd.f32 %v2942_v60, %v8881_v7  ;;  %v3072_v47 = vmul.f32 %v3050_v14, %v8692_v46  ;;  %v3068_v46 = vand.u32 2147483648, %v3056_v62 }
 0x42b   :  { %v2918_v44 = vpop.f32.mrf.mxu1  ;;  %vm3067_vm8 = vcmp.eq.f32.partialorder %v3066_v57, 8.507059e+37 }
 0x42c   :  { %v3011_v8 = vadd.f32 %v3007_v35, %v2943_v52  ;;  %v8898_v6 = vadd.f32 %v3073_v34, %v3072_v47  ;;  %v3069_v24 = vor.u32 1.1754944e-38, %v3068_v46  ;;  %v10621_v46 = vld [vmem:[#allocation172_spill] sm:$0xff] }
 0x42e   :  { %v6276_v59 = vmul.f32 -1.442695, %v3011_v8  ;;  %v8906_v60 = vpop.permute.xlu0 %3147 }
 0x42f   :  { %v7127_v40 = vpop.eup %7126  ;;  %10619 = vst [vmem:[#allocation133_spill] sm:$0xff] %v8906_v60 }
 0x430   :  { %v7129_v0 = vpop.eup %7128  ;;  %7130 = vpow2.f32 %v6276_v59  ;;  %v3058_v16 = vmul.f32 %v7127_v40, %v3056_v62  ;;  %vm3063_vm5 = vweird.f32 %v7127_v40  ;;  %v10620_v62 = vmax.f32 %v8503_v31, %v8702_v53 }
 0x431   :  { %v8902_v32 = vadd.f32 1.0, %v7129_v0  ;;  %v2944_v28 = vpop.f32.mrf.mxu3  ;;  %7132 = vtanh.f32 %v8898_v6  ;;  %vm3064_vm7 = vmor %vm3062_vm6, %vm3063_vm5 }
 0x432   :  { %v3059_v29 = vsub.f32 1.0, %v3058_v16 }
 0x433   :  { %7134 = vrcp.f32 %v8902_v32  ;;  %vm3086_vm11 = vweird.f32 %v8902_v32 }
 0x434   :  { %v3060_v7 = vmul.f32 %v7127_v40, %v3059_v29 }
 0x436   :  { %v7131_v34 = vpop.eup %7130  ;;  %v3061_v25 = vadd.f32 %v7127_v40, %v3060_v7  ;;  %v3008_v7 = vunpack.c.l.bf16 %v10621_v46 }
 0x437   :  { %v3099_v10 = vadd.f32 1.0, %v7131_v34  ;;  %v7133_v9 = vpop.eup %7132 }
 0x438   :  { %v3065_v20 = vsel %vm3064_vm7, %v7127_v40, %v3061_v25 }
 0x439   :  { %v7135_v3 = vpop.eup %7134  ;;  %7136 = vrcp.f32 %v3099_v10  ;;  %v3070_v14 = vsel %vm3067_vm8, %v3069_v24, %v3065_v20  ;;  %v3111_v31 = vand.u32 2147483648, %v3099_v10  ;;  %v3109_v24 = vand.u32 2147483647, %v3099_v10 }
 0x43a   :  { %v3082_v52 = vmul.f32 %v7135_v3, %v8902_v32  ;;  %v3076_v35 = vmul.f32 %v7133_v9, %v3070_v14  ;;  %vm3087_vm9 = vweird.f32 %v7135_v3  ;;  %v3092_v9 = vand.u32 2147483648, %v8902_v32 }
 0x43b   :  { %vm3105_vm12 = vweird.f32 %v3099_v10  ;;  %vm8927_vm13 = vmor %vm3086_vm11, %vm3087_vm9  ;;  %v3090_v20 = vand.u32 2147483647, %v8902_v32  ;;  %vm3110_vm15 = vcmp.eq.f32.partialorder %v3109_v24, 8.507059e+37 }
 0x43c   :  { %v3083_v47 = vsub.f32 1.0, %v3082_v52  ;;  %v3150_v44 = vadd.f32 %v8906_v60, %v3076_v35  ;;  %v8910_v8 = vpack.c.bf16 %v3076_v35, %v3076_v35  ;;  %v3112_v35 = vor.u32 1.1754944e-38, %v3111_v31  ;;  %v10624_v31 = vld [vmem:[#allocation87_spill] sm:$0xff]  ;;  %v10651_v60 = vld [vmem:[#allocation124_spill] sm:$0xff] }
 0x43d   :  { %vm3091_vm0 = vcmp.eq.f32.partialorder %v3090_v20, 8.507059e+37  ;;  %vm3143_vm1 = vcmp.eq.s32.totalorder %v10624_v31, 1  ;;  %v10633_v31 = vld [vmem:[#allocation157_spill] sm:$0xff] }
 0x43e   :  { %v8915_v59 = vmax.f32 %v10620_v62, %v3150_v44  ;;  %3168 = vmatmul.bf16.vlgmr.msra.gmra.mxu0 %v8910_v8  ;;  %3194 = vmatmul.bf16.vlgmr.msra.gmra.mxu2 %v8910_v8  ;;  %v3084_v28 = vmul.f32 %v7135_v3, %v3083_v47  ;;  %v3009_v44 = vunpack.c.h.bf16 %v10621_v46 }
 0x43f   :  { %v7137_v40 = vpop.eup %7136  ;;  %3264 = vmatpush.bf16.msra.mxu0 %v10298_v43  ;;  %3290 = vmatpush.bf16.msra.mxu2 %v10299_v36 }
 0x440   :  { %v3101_v0 = vmul.f32 %v7137_v40, %v3099_v10  ;;  %vm3106_vm10 = vweird.f32 %v7137_v40  ;;  %v3085_v25 = vadd.f32 %v7135_v3, %v3084_v28 }
 0x441   :  { %vm3107_vm14 = vmor %vm3105_vm12, %vm3106_vm10 }
 0x442   :  { %v3102_v57 = vsub.f32 1.0, %v3101_v0  ;;  %v3089_v10 = vsel %vm8927_vm13, %v7135_v3, %v3085_v25 }
 0x443   :  { %v2968_v16 = vpop.f32.mrf.mxu1  ;;  %3265 = vmatpush.bf16.msra.mxu0 %v10300_v39  ;;  %3291 = vmatpush.bf16.msra.mxu2 %v10413_v1 }
 0x444   :  { %v2969_v29 = vadd.f32 %v2968_v16, %v8887_v45  ;;  %v3103_v34 = vmul.f32 %v7137_v40, %v3102_v57  ;;  %v3093_v16 = vor.u32 1.1754944e-38, %v3092_v9 }
 0x446   :  { %v3012_v53 = vadd.f32 %v3008_v7, %v2969_v29  ;;  %v3104_v14 = vadd.f32 %v7137_v40, %v3103_v34 }
 0x447   :  { %3266 = vmatpush.bf16.msra.mxu0 %v10416_v2  ;;  %3292 = vmatpush.bf16.msra.mxu2 %v10417_v13 }
 0x448   :  { %7138 = vtanh.f32 %v3012_v53  ;;  %v3108_v62 = vsel %vm3107_vm14, %v7137_v40, %v3104_v14 }
 0x449   :  { %v2994_v52 = vpop.f32.mrf.mxu3  ;;  %v3113_v32 = vsel %vm3110_vm15, %v3112_v35, %v3108_v62 }
 0x44a   :  { %v2995_v47 = vadd.f32 %v2994_v52, %v8890_v54  ;;  %v3135_v29 = vmul.f32 %v3113_v32, %v8740_v12  ;;  %v3094_v54 = vsel %vm3091_vm0, %v3093_v16, %v3089_v10  ;;  %v10626_v32 = vld [vmem:[#allocation150_spill] sm:$0xff] }
 0x44b   :  { %v2970_v0 = vpop.f32.mrf.mxu1  ;;  %3267 = vmatpush.bf16.msra.mxu0 %v10306_v30  ;;  %3293 = vmatpush.bf16.msra.mxu2 %v10307_v17 }
 0x44c   :  { %v3013_v28 = vadd.f32 %v3009_v44, %v2995_v47 }
 0x44e   :  { %v7139_v7 = vpop.eup %7138  ;;  %v6277_v57 = vmul.f32 -1.442695, %v3013_v28  ;;  %3220 = vmatmul.bf16.vlgmr.msrb.gmra.mxu0 %v8910_v8  ;;  %3246 = vmatmul.bf16.vlgmr.msrb.gmra.mxu2 %v8910_v8  ;;  %v10627_v28 = vld [vmem:[#allocation95_spill] sm:$0xff] }
 0x44f   :  { %v3136_v46 = vmul.f32 %v7139_v7, %v3094_v54  ;;  %3268 = vmatpush.bf16.msra.mxu0 %v10308_v18  ;;  %3294 = vmatpush.bf16.msra.mxu2 %v10309_v56  ;;  %v10629_v7 = vld [vmem:[#allocation152_spill] sm:$0xff]  ;;  %v10630_v54 = vld [vmem:[#allocation154_spill] sm:$0xff] }
 0x450   :  { %7140 = vpow2.f32 %v6277_v57  ;;  %v10631_v57 = vld [vmem:[#allocation101_spill] sm:$0xff] }
 0x451   :  { %v3137_v3 = vadd.f32 %v3136_v46, %v3135_v29  ;;  %v2996_v40 = vpop.f32.mrf.mxu3  ;;  %v10628_v29 = vld [vmem:[#allocation98_spill] sm:$0xff]  ;;  %v10632_v46 = vld [vmem:[#allocation103_spill] sm:$0xff] }
 0x452   :  { %v10635_v40 = vld [vmem:[#allocation21_spill] sm:$0xff] }
 0x453   :  { %v8949_v53 = vsel %vm3143_vm1, %v3137_v3, %v8740_v12  ;;  %3269 = vmatpush.bf16.msra.mxu0 %v10310_v22  ;;  %3295 = vmatpush.bf16.msra.mxu2 %v10311_v49 }
 0x456   :  { %v7141_v34 = vpop.eup %7140 }
 0x457   :  { %v3119_v25 = vadd.f32 1.0, %v7141_v34  ;;  %3270 = vmatpush.bf16.msra.mxu0 %v7917_v15  ;;  %3296 = vmatpush.bf16.msra.mxu2 %v10312_v38  ;;  %v10636_v34 = vld [vmem:[#allocation23_spill] sm:$0xff] }
 0x459   :  { %7142 = vrcp.f32 %v3119_v25  ;;  %v3131_v45 = vand.u32 2147483648, %v3119_v25  ;;  %v3129_v14 = vand.u32 2147483647, %v3119_v25  ;;  %vm3125_vm3 = vweird.f32 %v3119_v25 }
 0x45a   :  { %7144 = vtanh.f32 %v3137_v3  ;;  %v10634_v3 = vld [vmem:[#allocation160_spill] sm:$0xff] }
 0x45b   :  { %3271 = vmatpush.bf16.msra.mxu0 %v10418_v19  ;;  %3297 = vmatpush.bf16.msra.mxu2 %v10419_v58  ;;  %v3132_v35 = vor.u32 1.1754944e-38, %v3131_v45  ;;  %vm3130_vm5 = vcmp.eq.f32.partialorder %v3129_v14, 8.507059e+37  ;;  %v10641_v45 = vld [vmem:[#allocation111_spill] sm:$0xff]  ;;  %v10643_v14 = vld [vmem:[#allocation29_spill] sm:$0xff] }
 0x45e   :  { %3272 = vmatmul.bf16.vlgmr.msra.gmra.mxu0 %v8910_v8  ;;  %3298 = vmatmul.bf16.vlgmr.msra.gmra.mxu2 %v8910_v8 }
 0x45f   :  { %v7143_v24 = vpop.eup %7142  ;;  %3316 = vmatpush.bf16.msrb.mxu0 %v10420_v50  ;;  %3342 = vmatpush.bf16.msrb.mxu2 %v10421_v55 }
 0x460   :  { %v3121_v12 = vmul.f32 %v7143_v24, %v3119_v25  ;;  %vm3126_vm2 = vweird.f32 %v7143_v24  ;;  %v7145_v44 = vpop.eup %7144  ;;  %v10637_v25 = vld [vmem:[#allocation105_spill] sm:$0xff] }
 0x461   :  { %vm3127_vm4 = vmor %vm3125_vm3, %vm3126_vm2 }
 0x462   :  { %v3122_v9 = vsub.f32 1.0, %v3121_v12  ;;  %v10639_v12 = vld [vmem:[#allocation25_spill] sm:$0xff] }
 0x463   :  { %3317 = vmatpush.bf16.msrb.mxu0 %v10422_v51  ;;  %3343 = vmatpush.bf16.msrb.mxu2 %v10423_v21 }
 0x464   :  { %v3123_v20 = vmul.f32 %v7143_v24, %v3122_v9  ;;  %v10640_v9 = vld [vmem:[#allocation27_spill] sm:$0xff] }
 0x466   :  { %v3124_v52 = vadd.f32 %v7143_v24, %v3123_v20  ;;  %v10642_v20 = vld [vmem:[#allocation113_spill] sm:$0xff] }
 0x467   :  { %3318 = vmatpush.bf16.msrb.mxu0 %v10319_v42  ;;  %3344 = vmatpush.bf16.msrb.mxu2 %v10320_v4 }
 0x468   :  { %v3128_v47 = vsel %vm3127_vm4, %v7143_v24, %v3124_v52  ;;  %v10638_v24 = vld [vmem:[#allocation108_spill] sm:$0xff]  ;;  %v10644_v52 = vld [vmem:[#allocation31_spill] sm:$0xff] }
 0x469   :  { %v3133_v10 = vsel %vm3130_vm5, %v3132_v35, %v3128_v47  ;;  %v10645_v35 = vld [vmem:[#allocation114_spill] sm:$0xff]  ;;  %v10646_v47 = vld [vmem:[#allocation117_spill] sm:$0xff] }
 0x46a   :  { %v3139_v62 = vmul.f32 %v7145_v44, %v3133_v10  ;;  %v10648_v44 = vld [vmem:[#allocation35_spill] sm:$0xff]  ;;  %v10649_v10 = vld [vmem:[#allocation120_spill] sm:$0xff] }
 0x46b   :  { %3319 = vmatpush.bf16.msrb.mxu0 %v10321_v61  ;;  %3345 = vmatpush.bf16.msrb.mxu2 %v10322_v41 }
 0x46c   :  { %v8970_v0 = vsel %vm3143_vm1, %v3139_v62, %v8761_v37  ;;  %v10650_v62 = vld [vmem:[#allocation122_spill] sm:$0xff] }
 0x46d   :  { %10625 = vst [vmem:[#allocation135_spill] sm:$0xff] %v8970_v0  ;;  %v8974_v16 = vpack.c.bf16 %v8970_v0, %v8970_v0  ;;  %v10652_v37 = vld [vmem:[#allocation126_spill] sm:$0xff] }
 0x46f   :  { %3181 = vmatmul.bf16.vlgmr.msra.gmra.mxu1 %v8974_v16  ;;  %3207 = vmatmul.bf16.vlgmr.msra.gmra.mxu3 %v8974_v16 }
 0x470   :  { %3277 = vmatpush.bf16.msra.mxu1 %v10327_v23  ;;  %3303 = vmatpush.bf16.msra.mxu3 %v10328_v11 }
 0x471   :  { %3320 = vmatpush.bf16.msrb.mxu0 %v8021_v27  ;;  %3346 = vmatpush.bf16.msrb.mxu2 %v10326_v63 }
 0x474   :  { %3278 = vmatpush.bf16.msra.mxu1 %v10331_v48  ;;  %3304 = vmatpush.bf16.msra.mxu3 %v10332_v33 }
 0x475   :  { %3321 = vmatpush.bf16.msrb.mxu0 %v10329_v5  ;;  %3347 = vmatpush.bf16.msrb.mxu2 %v10626_v32 }
 0x478   :  { %3279 = vmatpush.bf16.msra.mxu1 %v10627_v28  ;;  %3305 = vmatpush.bf16.msra.mxu3 %v10628_v29 }
 0x479   :  { %3322 = vmatpush.bf16.msrb.mxu0 %v10629_v7  ;;  %3348 = vmatpush.bf16.msrb.mxu2 %v10630_v54 }
 0x47c   :  { %3280 = vmatpush.bf16.msra.mxu1 %v10631_v57  ;;  %3306 = vmatpush.bf16.msra.mxu3 %v10632_v46 }
 0x47d   :  { %3323 = vmatpush.bf16.msrb.mxu0 %v10633_v31  ;;  %3349 = vmatpush.bf16.msrb.mxu2 %v10634_v3 }
 0x47f   :  { %3233 = vmatmul.bf16.vlgmr.msrb.gmra.mxu1 %v8974_v16  ;;  %3259 = vmatmul.bf16.vlgmr.msrb.gmra.mxu3 %v8974_v16 }
 0x480   :  { %3324 = vmatmul.bf16.vlgmr.msrb.gmra.mxu0 %v8910_v8  ;;  %3350 = vmatmul.bf16.vlgmr.msrb.gmra.mxu2 %v8910_v8  ;;  %v10647_v8 = vld [vmem:[#allocation33_spill] sm:$0xff] }
 0x481   :  { %3522 = vmatpush.bf16.msra.mxu0 %v10635_v40  ;;  %3548 = vmatpush.bf16.msra.mxu2 %v10636_v34 }
 0x482   :  { %3281 = vmatpush.bf16.msra.mxu1 %v10637_v25  ;;  %3307 = vmatpush.bf16.msra.mxu3 %v10638_v24  ;;  %v10723_v24 = vld [vmem:[#allocation129_spill] sm:$0xff] }
 0x485   :  { %3523 = vmatpush.bf16.msra.mxu0 %v10639_v12  ;;  %3549 = vmatpush.bf16.msra.mxu2 %v10640_v9  ;;  %v10715_v9 = vld [vmem:[#allocation70_spill] sm:$0xff] }
 0x486   :  { %3282 = vmatpush.bf16.msra.mxu1 %v10641_v45  ;;  %3308 = vmatpush.bf16.msra.mxu3 %v10642_v20  ;;  %v10709_v20 = vld [vmem:[#allocation58_spill] sm:$0xff] }
 0x487   :  { %v10711_v45 = vld [vmem:[#allocation62_spill] sm:$0xff] }
 0x489   :  { %3524 = vmatpush.bf16.msra.mxu0 %v10643_v14  ;;  %3550 = vmatpush.bf16.msra.mxu2 %v10644_v52  ;;  %v10654_v14 = vld [vmem:[#allocation39_spill] sm:$0xff]  ;;  %v10665_v52 = vld [vmem:[#allocation49_spill] sm:$0xff] }
 0x48a   :  { %3283 = vmatpush.bf16.msra.mxu1 %v10645_v35  ;;  %3309 = vmatpush.bf16.msra.mxu3 %v10646_v47  ;;  %v10655_v47 = vld [vmem:[#allocation130_spill] sm:$0xff] }
 0x48b   :  { %v10664_v35 = vld [vmem:[#allocation142_spill] sm:$0xff] }
 0x48d   :  { %3525 = vmatpush.bf16.msra.mxu0 %v10647_v8  ;;  %3551 = vmatpush.bf16.msra.mxu2 %v10648_v44  ;;  %v10656_v8 = vld [vmem:[#allocation132_spill] sm:$0xff]  ;;  %v10657_v44 = vld [vmem:[#allocation41_spill] sm:$0xff] }
 0x48e   :  { %3284 = vmatpush.bf16.msra.mxu1 %v10649_v10  ;;  %3310 = vmatpush.bf16.msra.mxu3 %v10650_v62  ;;  %v10658_v10 = vld [vmem:[#allocation43_spill] sm:$0xff]  ;;  %v10659_v62 = vld [vmem:[#allocation134_spill] sm:$0xff] }
 0x491   :  { %3526 = vmatpush.bf16.msra.mxu0 %v10653_v26  ;;  %3552 = vmatpush.bf16.msra.mxu2 %v10654_v14  ;;  %v10662_v26 = vld [vmem:[#allocation47_spill] sm:$0xff] }
 0x492   :  { %3329 = vmatpush.bf16.msrb.mxu1 %v10651_v60  ;;  %3355 = vmatpush.bf16.msrb.mxu3 %v10652_v37  ;;  %v10660_v60 = vld [vmem:[#allocation136_spill] sm:$0xff]  ;;  %v10661_v37 = vld [vmem:[#allocation45_spill] sm:$0xff]  ;;  %v10663_v14 = vld [vmem:[#allocation139_spill] sm:$0xff] }
 0x493   :  { %3285 = vmatmul.bf16.vlgmr.msra.gmra.mxu1 %v8974_v16  ;;  %3311 = vmatmul.bf16.vlgmr.msra.gmra.mxu3 %v8974_v16 }
 0x495   :  { %3527 = vmatpush.bf16.msra.mxu0 %v10657_v44  ;;  %3553 = vmatpush.bf16.msra.mxu2 %v10658_v10  ;;  %v10668_v44 = vld [vmem:[#allocation55_spill] sm:$0xff] }
 0x496   :  { %3330 = vmatpush.bf16.msrb.mxu1 %v10655_v47  ;;  %3356 = vmatpush.bf16.msrb.mxu3 %v10656_v8  ;;  %v10666_v47 = vld [vmem:[#allocation51_spill] sm:$0xff]  ;;  %v10667_v8 = vld [vmem:[#allocation53_spill] sm:$0xff] }
 0x497   :  { %v10669_v10 = vld [vmem:[#allocation143_spill] sm:$0xff] }
 0x499   :  { %3528 = vmatpush.bf16.msra.mxu0 %v10661_v37  ;;  %3554 = vmatpush.bf16.msra.mxu2 %v10662_v26  ;;  %v10672_v37 = vld [vmem:[#allocation59_spill] sm:$0xff]  ;;  %v10673_v26 = vld [vmem:[#allocation149_spill] sm:$0xff] }
 0x49a   :  { %3331 = vmatpush.bf16.msrb.mxu1 %v10659_v62  ;;  %3357 = vmatpush.bf16.msrb.mxu3 %v10660_v60  ;;  %v10670_v62 = vld [vmem:[#allocation145_spill] sm:$0xff] }
 0x49b   :  { %v10671_v60 = vld [vmem:[#allocation57_spill] sm:$0xff] }
 0x49d   :  { %3529 = vmatpush.bf16.msra.mxu0 %v10665_v52  ;;  %3555 = vmatpush.bf16.msra.mxu2 %v10666_v47  ;;  %v10676_v52 = vld [vmem:[#allocation63_spill] sm:$0xff]  ;;  %v10677_v47 = vld [vmem:[#allocation153_spill] sm:$0xff] }
 0x49e   :  { %3332 = vmatpush.bf16.msrb.mxu1 %v10663_v14  ;;  %3358 = vmatpush.bf16.msrb.mxu3 %v10664_v35  ;;  %v10674_v14 = vld [vmem:[#allocation151_spill] sm:$0xff]  ;;  %v10675_v35 = vld [vmem:[#allocation61_spill] sm:$0xff] }
 0x4a1   :  { %3574 = vmatpush.bf16.msrb.mxu0 %v10667_v8  ;;  %3600 = vmatpush.bf16.msrb.mxu2 %v10668_v44  ;;  %v10678_v8 = vld [vmem:[#allocation155_spill] sm:$0xff]  ;;  %v10679_v44 = vld [vmem:[#allocation65_spill] sm:$0xff] }
 0x4a2   :  { %3333 = vmatpush.bf16.msrb.mxu1 %v10669_v10  ;;  %3359 = vmatpush.bf16.msrb.mxu3 %v10670_v62  ;;  %v10680_v10 = vld [vmem:[#allocation67_spill] sm:$0xff] }
 0x4a3   :  { %v10681_v62 = vld [vmem:[#allocation159_spill] sm:$0xff] }
 0x4a5   :  { %3575 = vmatpush.bf16.msrb.mxu0 %v10671_v60  ;;  %3601 = vmatpush.bf16.msrb.mxu2 %v10672_v37  ;;  %v10682_v60 = vld [vmem:[#allocation161_spill] sm:$0xff]  ;;  %v10683_v37 = vld [vmem:[#allocation22_spill] sm:$0xff] }
 0x4a6   :  { %3334 = vmatpush.bf16.msrb.mxu1 %v10673_v26  ;;  %3360 = vmatpush.bf16.msrb.mxu3 %v10674_v14  ;;  %v10684_v26 = vld [vmem:[#allocation24_spill] sm:$0xff]  ;;  %v10685_v14 = vld [vmem:[#allocation69_spill] sm:$0xff] }
 0x4a9   :  { %3576 = vmatpush.bf16.msrb.mxu0 %v10675_v35  ;;  %3602 = vmatpush.bf16.msrb.mxu2 %v10676_v52  ;;  %v10686_v35 = vld [vmem:[#allocation71_spill] sm:$0xff] }
 0x4aa   :  { %3335 = vmatpush.bf16.msrb.mxu1 %v10677_v47  ;;  %3361 = vmatpush.bf16.msrb.mxu3 %v10678_v8  ;;  %v10687_v8 = vld [vmem:[#allocation26_spill] sm:$0xff]  ;;  %v10696_v47 = vld [vmem:[#allocation36_spill] sm:$0xff] }
 0x4ad   :  { %3577 = vmatpush.bf16.msrb.mxu0 %v10679_v44  ;;  %3603 = vmatpush.bf16.msrb.mxu2 %v10680_v10  ;;  %v10688_v44 = vld [vmem:[#allocation28_spill] sm:$0xff]  ;;  %v10689_v10 = vld [vmem:[#allocation73_spill] sm:$0xff] }
 0x4ae   :  { %3336 = vmatpush.bf16.msrb.mxu1 %v10681_v62  ;;  %3362 = vmatpush.bf16.msrb.mxu3 %v10682_v60  ;;  %v10690_v62 = vld [vmem:[#allocation75_spill] sm:$0xff]  ;;  %v10691_v60 = vld [vmem:[#allocation30_spill] sm:$0xff] }
 0x4b1   :  { %3578 = vmatpush.bf16.msrb.mxu0 %v10685_v14  ;;  %3604 = vmatpush.bf16.msrb.mxu2 %v10686_v35  ;;  %v10694_v14 = vld [vmem:[#allocation79_spill] sm:$0xff]  ;;  %v10695_v35 = vld [vmem:[#allocation34_spill] sm:$0xff] }
 0x4b2   :  { %3535 = vmatpush.bf16.msra.mxu1 %v10683_v37  ;;  %3561 = vmatpush.bf16.msra.mxu3 %v10684_v26  ;;  %v10692_v37 = vld [vmem:[#allocation32_spill] sm:$0xff]  ;;  %v10693_v26 = vld [vmem:[#allocation77_spill] sm:$0xff] }
 0x4b3   :  { %3337 = vmatmul.bf16.vlgmr.msrb.gmra.mxu1 %v8974_v16  ;;  %3363 = vmatmul.bf16.vlgmr.msrb.gmra.mxu3 %v8974_v16  ;;  %v10697_v16 = vld [vmem:[#allocation81_spill] sm:$0xff] }
 0x4b5   :  { %3579 = vmatpush.bf16.msrb.mxu0 %v10689_v10  ;;  %3605 = vmatpush.bf16.msrb.mxu2 %v10690_v62  ;;  %v10700_v10 = vld [vmem:[#allocation40_spill] sm:$0xff] }
 0x4b6   :  { %3536 = vmatpush.bf16.msra.mxu1 %v10687_v8  ;;  %3562 = vmatpush.bf16.msra.mxu3 %v10688_v44  ;;  %v10698_v8 = vld [vmem:[#allocation83_spill] sm:$0xff]  ;;  %v10699_v44 = vld [vmem:[#allocation38_spill] sm:$0xff] }
 0x4b9   :  { %3580 = vmatpush.bf16.msrb.mxu0 %v10693_v26  ;;  %3606 = vmatpush.bf16.msrb.mxu2 %v10694_v14  ;;  %v10703_v26 = vld [vmem:[#allocation46_spill] sm:$0xff]  ;;  %v10704_v14 = vld [vmem:[#allocation48_spill] sm:$0xff] }
 0x4ba   :  { %3537 = vmatpush.bf16.msra.mxu1 %v10691_v60  ;;  %3563 = vmatpush.bf16.msra.mxu3 %v10692_v37  ;;  %v10701_v60 = vld [vmem:[#allocation42_spill] sm:$0xff]  ;;  %v10702_v37 = vld [vmem:[#allocation44_spill] sm:$0xff] }
 0x4bb   :  { %v3169_v62 = vpop.f32.mrf.mxu0 }
 0x4bd   :  { %3581 = vmatpush.bf16.msrb.mxu0 %v10697_v16  ;;  %3607 = vmatpush.bf16.msrb.mxu2 %v10698_v8  ;;  %v10706_v16 = vld [vmem:[#allocation52_spill] sm:$0xff]  ;;  %v10707_v8 = vld [vmem:[#allocation54_spill] sm:$0xff] }
 0x4be   :  { %3538 = vmatpush.bf16.msra.mxu1 %v10695_v35  ;;  %3564 = vmatpush.bf16.msra.mxu3 %v10696_v47  ;;  %v10705_v47 = vld [vmem:[#allocation50_spill] sm:$0xff] }
 0x4c1   :  { %v3195_v35 = vpop.f32.mrf.mxu2 }
 0x4c2   :  { %3539 = vmatpush.bf16.msra.mxu1 %v10699_v44  ;;  %3565 = vmatpush.bf16.msra.mxu3 %v10700_v10  ;;  %v10708_v44 = vld [vmem:[#allocation56_spill] sm:$0xff] }
 0x4c3   :  { %v3171_v52 = vpop.f32.mrf.mxu0 }
 0x4c4   :  { %v10713_v52 = vld [vmem:[#allocation66_spill] sm:$0xff] }
 0x4c6   :  { %3540 = vmatpush.bf16.msra.mxu1 %v10701_v60  ;;  %3566 = vmatpush.bf16.msra.mxu3 %v10702_v37  ;;  %v10710_v60 = vld [vmem:[#allocation60_spill] sm:$0xff] }
 0x4c9   :  { %v3197_v10 = vpop.f32.mrf.mxu2 }
 0x4ca   :  { %3541 = vmatpush.bf16.msra.mxu1 %v10703_v26  ;;  %3567 = vmatpush.bf16.msra.mxu3 %v10704_v14  ;;  %v10712_v26 = vld [vmem:[#allocation64_spill] sm:$0xff] }
 0x4cb   :  { %v3221_v37 = vpop.f32.mrf.mxu0 }
 0x4ce   :  { %3542 = vmatpush.bf16.msra.mxu1 %v10705_v47  ;;  %3568 = vmatpush.bf16.msra.mxu3 %v10706_v16  ;;  %v10714_v47 = vld [vmem:[#allocation68_spill] sm:$0xff] }
 0x4d1   :  { %v3247_v14 = vpop.f32.mrf.mxu2 }
 0x4d2   :  { %3587 = vmatpush.bf16.msrb.mxu1 %v10707_v8  ;;  %3613 = vmatpush.bf16.msrb.mxu3 %v10708_v44  ;;  %v10716_v8 = vld [vmem:[#allocation72_spill] sm:$0xff]  ;;  %v10717_v44 = vld [vmem:[#allocation74_spill] sm:$0xff] }
 0x4d3   :  { %v3223_v16 = vpop.f32.mrf.mxu0 }
 0x4d4   :  { %v10722_v16 = vld [vmem:[#allocation84_spill] sm:$0xff] }
 0x4d6   :  { %3588 = vmatpush.bf16.msrb.mxu1 %v10709_v20  ;;  %3614 = vmatpush.bf16.msrb.mxu3 %v10710_v60  ;;  %v10718_v20 = vld [vmem:[#allocation76_spill] sm:$0xff] }
 0x4d9   :  { %v3249_v10 = vpop.f32.mrf.mxu2 }
 0x4da   :  { %3589 = vmatpush.bf16.msrb.mxu1 %v10711_v45  ;;  %3615 = vmatpush.bf16.msrb.mxu3 %v10712_v26  ;;  %v10719_v45 = vld [vmem:[#allocation78_spill] sm:$0xff]  ;;  %v10720_v26 = vld [vmem:[#allocation80_spill] sm:$0xff] }
 0x4db   :  { %v9086_v60 = vpop.f32.mrf.mxu0 }
 0x4de   :  { %3590 = vmatpush.bf16.msrb.mxu1 %v10713_v52  ;;  %3616 = vmatpush.bf16.msrb.mxu3 %v10714_v47  ;;  %v10721_v52 = vld [vmem:[#allocation82_spill] sm:$0xff] }
 0x4e1   :  { %v9090_v12 = vpop.f32.mrf.mxu2 }
 0x4e2   :  { %3591 = vmatpush.bf16.msrb.mxu1 %v10715_v9  ;;  %3617 = vmatpush.bf16.msrb.mxu3 %v10716_v8 }
 0x4e3   :  { %v3275_v9 = vpop.f32.mrf.mxu0 }
 0x4e6   :  { %3592 = vmatpush.bf16.msrb.mxu1 %v10717_v44  ;;  %3618 = vmatpush.bf16.msrb.mxu3 %v10718_v20  ;;  %v3368_v44 = vunpack.c.l.bf16 %v10723_v24 }
 0x4e9   :  { %v3301_v8 = vpop.f32.mrf.mxu2 }
 0x4ea   :  { %3593 = vmatpush.bf16.msrb.mxu1 %v10719_v45  ;;  %3619 = vmatpush.bf16.msrb.mxu3 %v10720_v26  ;;  %v3369_v45 = vunpack.c.h.bf16 %v10723_v24 }
 0x4ec   :  { %v3182_v47 = vpop.f32.mrf.mxu1 }
 0x4ed   :  { %v3183_v10 = vadd.f32 %v3182_v47, %v3169_v62 }
 0x4ee   :  { %3594 = vmatpush.bf16.msrb.mxu1 %v10721_v52  ;;  %3620 = vmatpush.bf16.msrb.mxu3 %v10722_v16 }
 0x4ef   :  { %v3372_v25 = vadd.f32 %v3368_v44, %v3183_v10 }
 0x4f1   :  { %v6278_v20 = vmul.f32 -1.442695, %v3372_v25  ;;  %v10724_v25 = vld [vmem:[#allocation137_spill] sm:$0xff] }
 0x4f2   :  { %v3208_v46 = vpop.f32.mrf.mxu3  ;;  %v3370_v10 = vunpack.c.l.bf16 %v10724_v25 }
 0x4f3   :  { %7146 = vpow2.f32 %v6278_v20  ;;  %v3209_v57 = vadd.f32 %v3208_v46, %v3195_v35 }
 0x4f4   :  { %v3184_v26 = vpop.f32.mrf.mxu1 }
 0x4f5   :  { %v3373_v34 = vadd.f32 %v3369_v45, %v3209_v57 }
 0x4f7   :  { %v6279_v40 = vmul.f32 -1.442695, %v3373_v34 }
 0x4f9   :  { %v7147_v3 = vpop.eup %7146  ;;  %7148 = vpow2.f32 %v6279_v40 }
 0x4fa   :  { %v3387_v52 = vadd.f32 1.0, %v7147_v3  ;;  %v3210_v16 = vpop.f32.mrf.mxu3  ;;  %v3371_v3 = vunpack.c.h.bf16 %v10724_v25 }
 0x4fc   :  { %7150 = vrcp.f32 %v3387_v52  ;;  %v3234_v9 = vpop.f32.mrf.mxu1  ;;  %v3399_v31 = vand.u32 2147483648, %v3387_v52  ;;  %vm3393_vm7 = vweird.f32 %v3387_v52 }
 0x4fd   :  { %v9096_v8 = vpop.f32.mrf.mxu0  ;;  %v3235_v47 = vadd.f32 %v3234_v9, %v3221_v37  ;;  %v3397_v9 = vand.u32 2147483647, %v3387_v52 }
 0x4ff   :  { %v7149_v62 = vpop.eup %7148  ;;  %v3374_v46 = vadd.f32 %v3370_v10, %v3235_v47  ;;  %v3400_v10 = vor.u32 1.1754944e-38, %v3399_v31  ;;  %vm3398_vm9 = vcmp.eq.f32.partialorder %v3397_v9, 8.507059e+37 }
 0x500   :  { %v3406_v44 = vadd.f32 1.0, %v7149_v62 }
 0x502   :  { %v7151_v20 = vpop.eup %7150  ;;  %7152 = vrcp.f32 %v3406_v44  ;;  %v3260_v24 = vpop.f32.mrf.mxu3  ;;  %vm3412_vm11 = vweird.f32 %v3406_v44 }
 0x503   :  { %v3389_v26 = vmul.f32 %v7151_v20, %v3387_v52  ;;  %v9099_v57 = vpop.f32.mrf.mxu2  ;;  %v3261_v34 = vadd.f32 %v3260_v24, %v3247_v14  ;;  %7154 = vtanh.f32 %v3374_v46  ;;  %vm3394_vm6 = vweird.f32 %v7151_v20 }
 0x504   :  { %v3236_v40 = vpop.f32.mrf.mxu1  ;;  %vm3395_vm8 = vmor %vm3393_vm7, %vm3394_vm6 }
 0x505   :  { %v3390_v45 = vsub.f32 1.0, %v3389_v26  ;;  %v3375_v35 = vadd.f32 %v3371_v3, %v3261_v34  ;;  %v3327_v16 = vpop.f32.mrf.mxu0  ;;  %v3418_v3 = vand.u32 2147483648, %v3406_v44 }
 0x507   :  { %v3391_v37 = vmul.f32 %v7151_v20, %v3390_v45  ;;  %v6280_v62 = vmul.f32 -1.442695, %v3375_v35  ;;  %v3416_v45 = vand.u32 2147483647, %v3406_v44 }
 0x508   :  { %v7153_v29 = vpop.eup %7152 }
 0x509   :  { %v3408_v28 = vmul.f32 %v7153_v29, %v3406_v44  ;;  %v3392_v47 = vadd.f32 %v7151_v20, %v3391_v37  ;;  %7156 = vpow2.f32 %v6280_v62  ;;  %v7155_v34 = vpop.eup %7154  ;;  %vm3413_vm10 = vweird.f32 %v7153_v29  ;;  %v10725_v37 = vld [vmem:[#allocation169_spill] sm:$0xff] }
 0x50a   :  { %v3262_v14 = vpop.f32.mrf.mxu3  ;;  %v3376_v52 = vunpack.c.l.bf16 %v10725_v37  ;;  %vm3414_vm12 = vmor %vm3412_vm11, %vm3413_vm10  ;;  %vm3417_vm13 = vcmp.eq.f32.partialorder %v3416_v45, 8.507059e+37 }
 0x50b   :  { %v3409_v24 = vsub.f32 1.0, %v3408_v28  ;;  %v3396_v25 = vsel %vm3395_vm8, %v7151_v20, %v3392_v47  ;;  %v3353_v26 = vpop.f32.mrf.mxu2  ;;  %v3419_v28 = vor.u32 1.1754944e-38, %v3418_v3 }
 0x50c   :  { %v3401_v40 = vsel %vm3398_vm9, %v3400_v10, %v3396_v25 }
 0x50d   :  { %v3410_v46 = vmul.f32 %v7153_v29, %v3409_v24  ;;  %v3443_v16 = vmul.f32 %v7155_v34, %v3401_v40 }
 0x50f   :  { %v7157_v62 = vpop.eup %7156  ;;  %v3411_v31 = vadd.f32 %v7153_v29, %v3410_v46 }
 0x510   :  { %v3286_v35 = vpop.f32.mrf.mxu1  ;;  %v3426_v20 = vadd.f32 1.0, %v7157_v62 }
 0x511   :  { %v3287_v54 = vadd.f32 %v3286_v35, %v9086_v60  ;;  %v3415_v47 = vsel %vm3414_vm12, %v7153_v29, %v3411_v31  ;;  %v3377_v60 = vunpack.c.h.bf16 %v10725_v37 }
 0x512   :  { %v3420_v14 = vsel %vm3417_vm13, %v3419_v28, %v3415_v47  ;;  %7158 = vrcp.f32 %v3426_v20  ;;  %v3436_v37 = vand.u32 2147483647, %v3426_v20  ;;  %vm3432_vm15 = vweird.f32 %v3426_v20 }
 0x513   :  { %v3380_v9 = vadd.f32 %v3376_v52, %v3287_v54  ;;  %v3442_v10 = vmul.f32 %v3420_v14, %v8898_v6  ;;  %v3438_v6 = vand.u32 2147483648, %v3426_v20 }
 0x514   :  { %vm3437_vm1 = vcmp.eq.f32.partialorder %v3436_v37, 8.507059e+37 }
 0x515   :  { %v6281_v24 = vmul.f32 -1.442695, %v3380_v9  ;;  %v9107_v34 = vadd.f32 %v3443_v16, %v3442_v10  ;;  %v3439_v31 = vor.u32 1.1754944e-38, %v3438_v6 }
 0x516   :  { %v3312_v25 = vpop.f32.mrf.mxu3 }
 0x517   :  { %v3313_v26 = vadd.f32 %v3312_v25, %v9090_v12  ;;  %7160 = vpow2.f32 %v6281_v24  ;;  %v9113_v25 = vpop.permute.xlu1 %3153 }
 0x518   :  { %v3288_v44 = vpop.f32.mrf.mxu1  ;;  %v7159_v3 = vpop.eup %7158  ;;  %10726 = vst [vmem:[#allocation138_spill] sm:$0xff] %v9113_v25 }
 0x519   :  { %v3381_v40 = vadd.f32 %v3377_v60, %v3313_v26  ;;  %v3428_v54 = vmul.f32 %v7159_v3, %v3426_v20  ;;  %vm3433_vm14 = vweird.f32 %v7159_v3 }
 0x51a   :  { %vm3434_vm0 = vmor %vm3432_vm15, %vm3433_vm14 }
 0x51b   :  { %v6282_v46 = vmul.f32 -1.442695, %v3381_v40  ;;  %v3429_v45 = vsub.f32 1.0, %v3428_v54  ;;  %v10754_v40 = vld [vmem:[#allocation122_spill] sm:$0xff] }
 0x51d   :  { %7162 = vpow2.f32 %v6282_v46  ;;  %v7161_v29 = vpop.eup %7160  ;;  %v3430_v12 = vmul.f32 %v7159_v3, %v3429_v45 }
 0x51e   :  { %v3314_v35 = vpop.f32.mrf.mxu3  ;;  %7164 = vtanh.f32 %v9107_v34  ;;  %v9110_v52 = vadd.f32 1.0, %v7161_v29 }
 0x51f   :  { %v3431_v16 = vadd.f32 %v7159_v3, %v3430_v12  ;;  %v10727_v35 = vld [vmem:[#allocation170_spill] sm:$0xff] }
 0x520   :  { %7166 = vrcp.f32 %v9110_v52  ;;  %v3378_v6 = vunpack.c.l.bf16 %v10727_v35  ;;  %vm3456_vm4 = vweird.f32 %v9110_v52 }
 0x521   :  { %v3435_v28 = vsel %vm3434_vm0, %v7159_v3, %v3431_v16 }
 0x522   :  { %v3440_v14 = vsel %vm3437_vm1, %v3439_v31, %v3435_v28 }
 0x523   :  { %v7163_v62 = vpop.eup %7162 }
 0x524   :  { %v3469_v9 = vadd.f32 1.0, %v7163_v62  ;;  %v7165_v47 = vpop.eup %7164 }
 0x525   :  { %v3446_v10 = vmul.f32 %v7165_v47, %v3440_v14  ;;  %v3462_v47 = vand.u32 2147483648, %v9110_v52  ;;  %v3460_v14 = vand.u32 2147483647, %v9110_v52 }
 0x526   :  { %7168 = vrcp.f32 %v3469_v9  ;;  %v7167_v24 = vpop.eup %7166  ;;  %v3481_v37 = vand.u32 2147483648, %v3469_v9  ;;  %v3479_v28 = vand.u32 2147483647, %v3469_v9  ;;  %vm3475_vm5 = vweird.f32 %v3469_v9 }
 0x527   :  { %v9115_v26 = vpack.c.bf16 %v3446_v10, %v3446_v10  ;;  %v3452_v60 = vmul.f32 %v7167_v24, %v9110_v52  ;;  %v9119_v44 = vadd.f32 %v3446_v10, %v9113_v25  ;;  %vm3457_vm2 = vweird.f32 %v7167_v24  ;;  %v10755_v25 = vld [vmem:[#allocation124_spill] sm:$0xff] }
 0x528   :  { %vm9133_vm6 = vmor %vm3456_vm4, %vm3457_vm2  ;;  %vm3480_vm8 = vcmp.eq.f32.partialorder %v3479_v28, 8.507059e+37  ;;  %vm3461_vm9 = vcmp.eq.f32.partialorder %v3460_v14, 8.507059e+37 }
 0x529   :  { %v3453_v20 = vsub.f32 1.0, %v3452_v60  ;;  %3530 = vmatmul.bf16.vlgmr.msra.gmra.mxu0 %v9115_v26  ;;  %3556 = vmatmul.bf16.vlgmr.msra.gmra.mxu2 %v9115_v26 }
 0x52a   :  { %3626 = vmatpush.bf16.msra.mxu0 %v10298_v43  ;;  %3652 = vmatpush.bf16.msra.mxu2 %v10299_v36 }
 0x52b   :  { %v3454_v29 = vmul.f32 %v7167_v24, %v3453_v20  ;;  %v3482_v20 = vor.u32 1.1754944e-38, %v3481_v37 }
 0x52c   :  { %v7169_v3 = vpop.eup %7168 }
 0x52d   :  { %v3471_v46 = vmul.f32 %v7169_v3, %v3469_v9  ;;  %vm3476_vm3 = vweird.f32 %v7169_v3  ;;  %v3455_v31 = vadd.f32 %v7167_v24, %v3454_v29 }
 0x52e   :  { %3627 = vmatpush.bf16.msra.mxu0 %v10300_v39  ;;  %3653 = vmatpush.bf16.msra.mxu2 %v10413_v1  ;;  %vm3477_vm7 = vmor %vm3475_vm5, %vm3476_vm3 }
 0x52f   :  { %v3472_v12 = vsub.f32 1.0, %v3471_v46  ;;  %v3459_v9 = vsel %vm9133_vm6, %v7167_v24, %v3455_v31 }
 0x530   :  { %v3338_v54 = vpop.f32.mrf.mxu1 }
 0x531   :  { %v3339_v45 = vadd.f32 %v3338_v54, %v9096_v8  ;;  %v3473_v62 = vmul.f32 %v7169_v3, %v3472_v12  ;;  %v3379_v54 = vunpack.c.h.bf16 %v10727_v35 }
 0x532   :  { %3628 = vmatpush.bf16.msra.mxu0 %v10416_v2  ;;  %3654 = vmatpush.bf16.msra.mxu2 %v10417_v13 }
 0x533   :  { %v3382_v16 = vadd.f32 %v3378_v6, %v3339_v45  ;;  %v3474_v10 = vadd.f32 %v7169_v3, %v3473_v62  ;;  %v3463_v6 = vor.u32 1.1754944e-38, %v3462_v47 }
 0x535   :  { %7170 = vtanh.f32 %v3382_v16  ;;  %v3478_v29 = vsel %vm3477_vm7, %v7169_v3, %v3474_v10 }
 0x536   :  { %v3364_v60 = vpop.f32.mrf.mxu3  ;;  %v3483_v52 = vsel %vm3480_vm8, %v3482_v20, %v3478_v29  ;;  %3629 = vmatpush.bf16.msra.mxu0 %v10306_v30  ;;  %3655 = vmatpush.bf16.msra.mxu2 %v10307_v17 }
 0x537   :  { %v3365_v46 = vadd.f32 %v3364_v60, %v9099_v57  ;;  %v3505_v16 = vmul.f32 %v3483_v52, %v8949_v53  ;;  %v3464_v57 = vsel %vm3461_vm9, %v3463_v6, %v3459_v9  ;;  %v10730_v60 = vld [vmem:[#allocation85_spill] sm:$0xff] }
 0x538   :  { %v3340_v45 = vpop.f32.mrf.mxu1  ;;  %vm3513_vm10 = vcmp.eq.s32.totalorder %v10730_v60, 1  ;;  %v10736_v60 = vld [vmem:[#allocation160_spill] sm:$0xff] }
 0x539   :  { %v3383_v12 = vadd.f32 %v3379_v54, %v3365_v46  ;;  %3582 = vmatmul.bf16.vlgmr.msrb.gmra.mxu0 %v9115_v26  ;;  %3608 = vmatmul.bf16.vlgmr.msrb.gmra.mxu2 %v9115_v26 }
 0x53a   :  { %3630 = vmatpush.bf16.msra.mxu0 %v10308_v18  ;;  %3656 = vmatpush.bf16.msra.mxu2 %v10309_v56 }
 0x53b   :  { %v7171_v37 = vpop.eup %7170  ;;  %v6283_v62 = vmul.f32 -1.442695, %v3383_v12 }
 0x53c   :  { %v3506_v35 = vmul.f32 %v7171_v37, %v3464_v57  ;;  %v10732_v37 = vld [vmem:[#allocation154_spill] sm:$0xff]  ;;  %v10733_v57 = vld [vmem:[#allocation95_spill] sm:$0xff] }
 0x53d   :  { %7172 = vpow2.f32 %v6283_v62  ;;  %v10734_v62 = vld [vmem:[#allocation98_spill] sm:$0xff] }
 0x53e   :  { %v3507_v24 = vadd.f32 %v3506_v35, %v3505_v16  ;;  %v3366_v3 = vpop.f32.mrf.mxu3  ;;  %3631 = vmatpush.bf16.msra.mxu0 %v10310_v22  ;;  %3657 = vmatpush.bf16.msra.mxu2 %v10311_v49  ;;  %v10735_v35 = vld [vmem:[#allocation157_spill] sm:$0xff] }
 0x53f   :  { %v10738_v3 = vld [vmem:[#allocation23_spill] sm:$0xff] }
 0x540   :  { %v9155_v31 = vsel %vm3513_vm10, %v3507_v24, %v8949_v53 }
 0x542   :  { %3632 = vmatpush.bf16.msra.mxu0 %v7917_v15  ;;  %3658 = vmatpush.bf16.msra.mxu2 %v10312_v38 }
 0x543   :  { %v7173_v28 = vpop.eup %7172 }
 0x544   :  { %v3489_v47 = vadd.f32 1.0, %v7173_v28  ;;  %v10739_v28 = vld [vmem:[#allocation101_spill] sm:$0xff] }
 0x546   :  { %7174 = vrcp.f32 %v3489_v47  ;;  %3633 = vmatpush.bf16.msra.mxu0 %v10418_v19  ;;  %3659 = vmatpush.bf16.msra.mxu2 %v10419_v58  ;;  %v3501_v10 = vand.u32 2147483648, %v3489_v47  ;;  %v3499_v46 = vand.u32 2147483647, %v3489_v47  ;;  %vm3495_vm12 = vweird.f32 %v3489_v47 }
 0x547   :  { %7176 = vtanh.f32 %v3507_v24  ;;  %v10737_v24 = vld [vmem:[#allocation21_spill] sm:$0xff] }
 0x548   :  { %v3502_v9 = vor.u32 1.1754944e-38, %v3501_v10  ;;  %vm3500_vm14 = vcmp.eq.f32.partialorder %v3499_v46, 8.507059e+37  ;;  %v10744_v10 = vld [vmem:[#allocation27_spill] sm:$0xff]  ;;  %v10746_v46 = vld [vmem:[#allocation113_spill] sm:$0xff] }
 0x549   :  { %3634 = vmatmul.bf16.vlgmr.msra.gmra.mxu0 %v9115_v26  ;;  %3660 = vmatmul.bf16.vlgmr.msra.gmra.mxu2 %v9115_v26 }
 0x54a   :  { %3678 = vmatpush.bf16.msrb.mxu0 %v10420_v50  ;;  %3704 = vmatpush.bf16.msrb.mxu2 %v10421_v55 }
 0x54c   :  { %v7175_v53 = vpop.eup %7174 }
 0x54d   :  { %v3491_v8 = vmul.f32 %v7175_v53, %v3489_v47  ;;  %vm3496_vm11 = vweird.f32 %v7175_v53  ;;  %v7177_v45 = vpop.eup %7176  ;;  %v10740_v47 = vld [vmem:[#allocation103_spill] sm:$0xff] }
 0x54e   :  { %3679 = vmatpush.bf16.msrb.mxu0 %v10422_v51  ;;  %3705 = vmatpush.bf16.msrb.mxu2 %v10423_v21  ;;  %vm3497_vm13 = vmor %vm3495_vm12, %vm3496_vm11 }
 0x54f   :  { %v3492_v14 = vsub.f32 1.0, %v3491_v8  ;;  %v10742_v8 = vld [vmem:[#allocation108_spill] sm:$0xff] }
 0x551   :  { %v3493_v20 = vmul.f32 %v7175_v53, %v3492_v14  ;;  %v10743_v14 = vld [vmem:[#allocation25_spill] sm:$0xff] }
 0x552   :  { %3680 = vmatpush.bf16.msrb.mxu0 %v10319_v42  ;;  %3706 = vmatpush.bf16.msrb.mxu2 %v10320_v4 }
 0x553   :  { %v3494_v54 = vadd.f32 %v7175_v53, %v3493_v20  ;;  %v10745_v20 = vld [vmem:[#allocation111_spill] sm:$0xff] }
 0x555   :  { %v3498_v29 = vsel %vm3497_vm13, %v7175_v53, %v3494_v54  ;;  %v10741_v53 = vld [vmem:[#allocation105_spill] sm:$0xff] }
 0x556   :  { %v3503_v6 = vsel %vm3500_vm14, %v3502_v9, %v3498_v29  ;;  %3681 = vmatpush.bf16.msrb.mxu0 %v10321_v61  ;;  %3707 = vmatpush.bf16.msrb.mxu2 %v10322_v41  ;;  %v10747_v54 = vld [vmem:[#allocation29_spill] sm:$0xff]  ;;  %v10748_v9 = vld [vmem:[#allocation31_spill] sm:$0xff] }
 0x557   :  { %v3509_v52 = vmul.f32 %v7177_v45, %v3503_v6  ;;  %v10750_v29 = vld [vmem:[#allocation117_spill] sm:$0xff]  ;;  %v10752_v6 = vld [vmem:[#allocation35_spill] sm:$0xff] }
 0x558   :  { %v10751_v45 = vld [vmem:[#allocation33_spill] sm:$0xff] }
 0x559   :  { %v9176_v12 = vsel %vm3513_vm10, %v3509_v52, %v8970_v0  ;;  %v10753_v52 = vld [vmem:[#allocation120_spill] sm:$0xff]  ;;  %v10756_v0 = vld [vmem:[#allocation126_spill] sm:$0xff] }
 0x55a   :  { %10731 = vst [vmem:[#allocation141_spill] sm:$0xff] %v9176_v12  ;;  %v9180_v16 = vpack.c.bf16 %v9176_v12, %v9176_v12  ;;  %3682 = vmatpush.bf16.msrb.mxu0 %v8021_v27  ;;  %3708 = vmatpush.bf16.msrb.mxu2 %v10326_v63 }
 0x55c   :  { %3543 = vmatmul.bf16.vlgmr.msra.gmra.mxu1 %v9180_v16  ;;  %3569 = vmatmul.bf16.vlgmr.msra.gmra.mxu3 %v9180_v16 }
 0x55d   :  { %3639 = vmatpush.bf16.msra.mxu1 %v10327_v23  ;;  %3665 = vmatpush.bf16.msra.mxu3 %v10328_v11 }
 0x55e   :  { %3683 = vmatpush.bf16.msrb.mxu0 %v10329_v5  ;;  %3709 = vmatpush.bf16.msrb.mxu2 %v10626_v32 }
 0x561   :  { %3640 = vmatpush.bf16.msra.mxu1 %v10331_v48  ;;  %3666 = vmatpush.bf16.msra.mxu3 %v10332_v33 }
 0x562   :  { %3684 = vmatpush.bf16.msrb.mxu0 %v10629_v7  ;;  %3710 = vmatpush.bf16.msrb.mxu2 %v10732_v37 }
 0x565   :  { %3641 = vmatpush.bf16.msra.mxu1 %v10733_v57  ;;  %3667 = vmatpush.bf16.msra.mxu3 %v10734_v62 }
 0x566   :  { %3685 = vmatpush.bf16.msrb.mxu0 %v10735_v35  ;;  %3711 = vmatpush.bf16.msrb.mxu2 %v10736_v60 }
 0x569   :  { %3642 = vmatpush.bf16.msra.mxu1 %v10739_v28  ;;  %3668 = vmatpush.bf16.msra.mxu3 %v10740_v47 }
 0x56a   :  { %3884 = vmatpush.bf16.msra.mxu0 %v10737_v24  ;;  %3910 = vmatpush.bf16.msra.mxu2 %v10738_v3 }
 0x56b   :  { %3686 = vmatmul.bf16.vlgmr.msrb.gmra.mxu0 %v9115_v26  ;;  %3712 = vmatmul.bf16.vlgmr.msrb.gmra.mxu2 %v9115_v26  ;;  %v10749_v26 = vld [vmem:[#allocation114_spill] sm:$0xff] }
 0x56c   :  { %3595 = vmatmul.bf16.vlgmr.msrb.gmra.mxu1 %v9180_v16  ;;  %3621 = vmatmul.bf16.vlgmr.msrb.gmra.mxu3 %v9180_v16 }
 0x56d   :  { %3643 = vmatpush.bf16.msra.mxu1 %v10741_v53  ;;  %3669 = vmatpush.bf16.msra.mxu3 %v10742_v8  ;;  %v10827_v53 = vld [vmem:[#allocation140_spill] sm:$0xff] }
 0x56e   :  { %3885 = vmatpush.bf16.msra.mxu0 %v10743_v14  ;;  %3911 = vmatpush.bf16.msra.mxu2 %v10744_v10  ;;  %v10815_v10 = vld [vmem:[#allocation62_spill] sm:$0xff] }
 0x56f   :  { %v10819_v14 = vld [vmem:[#allocation70_spill] sm:$0xff] }
 0x571   :  { %3644 = vmatpush.bf16.msra.mxu1 %v10745_v20  ;;  %3670 = vmatpush.bf16.msra.mxu3 %v10746_v46  ;;  %v10757_v46 = vld [vmem:[#allocation37_spill] sm:$0xff]  ;;  %v10813_v20 = vld [vmem:[#allocation58_spill] sm:$0xff] }
 0x572   :  { %3886 = vmatpush.bf16.msra.mxu0 %v10747_v54  ;;  %3912 = vmatpush.bf16.msra.mxu2 %v10748_v9  ;;  %v10758_v54 = vld [vmem:[#allocation39_spill] sm:$0xff]  ;;  %v10769_v9 = vld [vmem:[#allocation49_spill] sm:$0xff] }
 0x575   :  { %3645 = vmatpush.bf16.msra.mxu1 %v10749_v26  ;;  %3671 = vmatpush.bf16.msra.mxu3 %v10750_v29  ;;  %v10759_v29 = vld [vmem:[#allocation130_spill] sm:$0xff] }
 0x576   :  { %3887 = vmatpush.bf16.msra.mxu0 %v10751_v45  ;;  %3913 = vmatpush.bf16.msra.mxu2 %v10752_v6  ;;  %v10760_v45 = vld [vmem:[#allocation132_spill] sm:$0xff]  ;;  %v10761_v6 = vld [vmem:[#allocation41_spill] sm:$0xff]  ;;  %v10768_v26 = vld [vmem:[#allocation142_spill] sm:$0xff] }
 0x579   :  { %3646 = vmatpush.bf16.msra.mxu1 %v10753_v52  ;;  %3672 = vmatpush.bf16.msra.mxu3 %v10754_v40  ;;  %v10762_v52 = vld [vmem:[#allocation43_spill] sm:$0xff]  ;;  %v10763_v40 = vld [vmem:[#allocation134_spill] sm:$0xff] }
 0x57a   :  { %3888 = vmatpush.bf16.msra.mxu0 %v10757_v46  ;;  %3914 = vmatpush.bf16.msra.mxu2 %v10758_v54  ;;  %v10766_v46 = vld [vmem:[#allocation47_spill] sm:$0xff] }
 0x57b   :  { %v10767_v54 = vld [vmem:[#allocation139_spill] sm:$0xff] }
 0x57c   :  { %3647 = vmatmul.bf16.vlgmr.msra.gmra.mxu1 %v9180_v16  ;;  %3673 = vmatmul.bf16.vlgmr.msra.gmra.mxu3 %v9180_v16 }
 0x57d   :  { %3691 = vmatpush.bf16.msrb.mxu1 %v10755_v25  ;;  %3717 = vmatpush.bf16.msrb.mxu3 %v10756_v0  ;;  %v10764_v25 = vld [vmem:[#allocation136_spill] sm:$0xff]  ;;  %v10765_v0 = vld [vmem:[#allocation45_spill] sm:$0xff] }
 0x57e   :  { %3889 = vmatpush.bf16.msra.mxu0 %v10761_v6  ;;  %3915 = vmatpush.bf16.msra.mxu2 %v10762_v52  ;;  %v10772_v6 = vld [vmem:[#allocation55_spill] sm:$0xff] }
 0x57f   :  { %v10773_v52 = vld [vmem:[#allocation143_spill] sm:$0xff] }
 0x581   :  { %3692 = vmatpush.bf16.msrb.mxu1 %v10759_v29  ;;  %3718 = vmatpush.bf16.msrb.mxu3 %v10760_v45  ;;  %v10770_v29 = vld [vmem:[#allocation51_spill] sm:$0xff]  ;;  %v10771_v45 = vld [vmem:[#allocation53_spill] sm:$0xff] }
 0x582   :  { %3890 = vmatpush.bf16.msra.mxu0 %v10765_v0  ;;  %3916 = vmatpush.bf16.msra.mxu2 %v10766_v46  ;;  %v10776_v0 = vld [vmem:[#allocation59_spill] sm:$0xff]  ;;  %v10777_v46 = vld [vmem:[#allocation149_spill] sm:$0xff] }
 0x585   :  { %3693 = vmatpush.bf16.msrb.mxu1 %v10763_v40  ;;  %3719 = vmatpush.bf16.msrb.mxu3 %v10764_v25  ;;  %v10774_v40 = vld [vmem:[#allocation145_spill] sm:$0xff] }
 0x586   :  { %3891 = vmatpush.bf16.msra.mxu0 %v10769_v9  ;;  %3917 = vmatpush.bf16.msra.mxu2 %v10770_v29  ;;  %v10775_v25 = vld [vmem:[#allocation57_spill] sm:$0xff]  ;;  %v10780_v9 = vld [vmem:[#allocation63_spill] sm:$0xff] }
 0x587   :  { %v10781_v29 = vld [vmem:[#allocation153_spill] sm:$0xff] }
 0x589   :  { %3694 = vmatpush.bf16.msrb.mxu1 %v10767_v54  ;;  %3720 = vmatpush.bf16.msrb.mxu3 %v10768_v26  ;;  %v10778_v54 = vld [vmem:[#allocation151_spill] sm:$0xff]  ;;  %v10779_v26 = vld [vmem:[#allocation61_spill] sm:$0xff] }
 0x58a   :  { %3936 = vmatpush.bf16.msrb.mxu0 %v10771_v45  ;;  %3962 = vmatpush.bf16.msrb.mxu2 %v10772_v6  ;;  %v10782_v45 = vld [vmem:[#allocation155_spill] sm:$0xff]  ;;  %v10783_v6 = vld [vmem:[#allocation65_spill] sm:$0xff] }
 0x58d   :  { %3695 = vmatpush.bf16.msrb.mxu1 %v10773_v52  ;;  %3721 = vmatpush.bf16.msrb.mxu3 %v10774_v40  ;;  %v10784_v52 = vld [vmem:[#allocation67_spill] sm:$0xff] }
 0x58e   :  { %3937 = vmatpush.bf16.msrb.mxu0 %v10775_v25  ;;  %3963 = vmatpush.bf16.msrb.mxu2 %v10776_v0  ;;  %v10785_v40 = vld [vmem:[#allocation159_spill] sm:$0xff]  ;;  %v10786_v25 = vld [vmem:[#allocation161_spill] sm:$0xff]  ;;  %v10787_v0 = vld [vmem:[#allocation22_spill] sm:$0xff] }
 0x591   :  { %3696 = vmatpush.bf16.msrb.mxu1 %v10777_v46  ;;  %3722 = vmatpush.bf16.msrb.mxu3 %v10778_v54  ;;  %v10788_v46 = vld [vmem:[#allocation24_spill] sm:$0xff]  ;;  %v10789_v54 = vld [vmem:[#allocation69_spill] sm:$0xff] }
 0x592   :  { %3938 = vmatpush.bf16.msrb.mxu0 %v10779_v26  ;;  %3964 = vmatpush.bf16.msrb.mxu2 %v10780_v9  ;;  %v10790_v26 = vld [vmem:[#allocation71_spill] sm:$0xff] }
 0x595   :  { %3697 = vmatpush.bf16.msrb.mxu1 %v10781_v29  ;;  %3723 = vmatpush.bf16.msrb.mxu3 %v10782_v45  ;;  %v10791_v45 = vld [vmem:[#allocation26_spill] sm:$0xff]  ;;  %v10800_v29 = vld [vmem:[#allocation36_spill] sm:$0xff] }
 0x596   :  { %3939 = vmatpush.bf16.msrb.mxu0 %v10783_v6  ;;  %3965 = vmatpush.bf16.msrb.mxu2 %v10784_v52  ;;  %v10792_v6 = vld [vmem:[#allocation28_spill] sm:$0xff]  ;;  %v10793_v52 = vld [vmem:[#allocation73_spill] sm:$0xff] }
 0x599   :  { %3698 = vmatpush.bf16.msrb.mxu1 %v10785_v40  ;;  %3724 = vmatpush.bf16.msrb.mxu3 %v10786_v25  ;;  %v10794_v40 = vld [vmem:[#allocation75_spill] sm:$0xff]  ;;  %v10795_v25 = vld [vmem:[#allocation30_spill] sm:$0xff] }
 0x59a   :  { %3940 = vmatpush.bf16.msrb.mxu0 %v10789_v54  ;;  %3966 = vmatpush.bf16.msrb.mxu2 %v10790_v26  ;;  %v10798_v54 = vld [vmem:[#allocation79_spill] sm:$0xff]  ;;  %v10799_v26 = vld [vmem:[#allocation34_spill] sm:$0xff] }
 0x59c   :  { %3699 = vmatmul.bf16.vlgmr.msrb.gmra.mxu1 %v9180_v16  ;;  %3725 = vmatmul.bf16.vlgmr.msrb.gmra.mxu3 %v9180_v16  ;;  %v10801_v16 = vld [vmem:[#allocation81_spill] sm:$0xff] }
 0x59d   :  { %3897 = vmatpush.bf16.msra.mxu1 %v10787_v0  ;;  %3923 = vmatpush.bf16.msra.mxu3 %v10788_v46  ;;  %v10796_v0 = vld [vmem:[#allocation32_spill] sm:$0xff]  ;;  %v10797_v46 = vld [vmem:[#allocation77_spill] sm:$0xff] }
 0x59e   :  { %3941 = vmatpush.bf16.msrb.mxu0 %v10793_v52  ;;  %3967 = vmatpush.bf16.msrb.mxu2 %v10794_v40  ;;  %v10804_v52 = vld [vmem:[#allocation40_spill] sm:$0xff] }
 0x5a1   :  { %3898 = vmatpush.bf16.msra.mxu1 %v10791_v45  ;;  %3924 = vmatpush.bf16.msra.mxu3 %v10792_v6  ;;  %v10802_v45 = vld [vmem:[#allocation83_spill] sm:$0xff]  ;;  %v10803_v6 = vld [vmem:[#allocation38_spill] sm:$0xff] }
 0x5a2   :  { %3942 = vmatpush.bf16.msrb.mxu0 %v10797_v46  ;;  %3968 = vmatpush.bf16.msrb.mxu2 %v10798_v54  ;;  %v10807_v46 = vld [vmem:[#allocation46_spill] sm:$0xff]  ;;  %v10808_v54 = vld [vmem:[#allocation48_spill] sm:$0xff] }
 0x5a5   :  { %3899 = vmatpush.bf16.msra.mxu1 %v10795_v25  ;;  %3925 = vmatpush.bf16.msra.mxu3 %v10796_v0  ;;  %v10805_v25 = vld [vmem:[#allocation42_spill] sm:$0xff]  ;;  %v10806_v0 = vld [vmem:[#allocation44_spill] sm:$0xff] }
 0x5a6   :  { %3943 = vmatpush.bf16.msrb.mxu0 %v10801_v16  ;;  %3969 = vmatpush.bf16.msrb.mxu2 %v10802_v45  ;;  %v3531_v40 = vpop.f32.mrf.mxu0  ;;  %v10810_v16 = vld [vmem:[#allocation52_spill] sm:$0xff]  ;;  %v10811_v45 = vld [vmem:[#allocation54_spill] sm:$0xff] }
 0x5a9   :  { %3900 = vmatpush.bf16.msra.mxu1 %v10799_v26  ;;  %3926 = vmatpush.bf16.msra.mxu3 %v10800_v29  ;;  %v10809_v29 = vld [vmem:[#allocation50_spill] sm:$0xff] }
 0x5ac   :  { %v3557_v26 = vpop.f32.mrf.mxu2 }
 0x5ad   :  { %3901 = vmatpush.bf16.msra.mxu1 %v10803_v6  ;;  %3927 = vmatpush.bf16.msra.mxu3 %v10804_v52  ;;  %v10812_v6 = vld [vmem:[#allocation56_spill] sm:$0xff] }
 0x5ae   :  { %v3533_v9 = vpop.f32.mrf.mxu0 }
 0x5af   :  { %v10817_v9 = vld [vmem:[#allocation66_spill] sm:$0xff] }
 0x5b1   :  { %3902 = vmatpush.bf16.msra.mxu1 %v10805_v25  ;;  %3928 = vmatpush.bf16.msra.mxu3 %v10806_v0  ;;  %v10814_v25 = vld [vmem:[#allocation60_spill] sm:$0xff] }
 0x5b4   :  { %v3559_v52 = vpop.f32.mrf.mxu2 }
 0x5b5   :  { %3903 = vmatpush.bf16.msra.mxu1 %v10807_v46  ;;  %3929 = vmatpush.bf16.msra.mxu3 %v10808_v54  ;;  %v10816_v46 = vld [vmem:[#allocation64_spill] sm:$0xff] }
 0x5b6   :  { %v3583_v0 = vpop.f32.mrf.mxu0 }
 0x5b9   :  { %3904 = vmatpush.bf16.msra.mxu1 %v10809_v29  ;;  %3930 = vmatpush.bf16.msra.mxu3 %v10810_v16  ;;  %v10818_v29 = vld [vmem:[#allocation68_spill] sm:$0xff] }
 0x5bc   :  { %v3609_v54 = vpop.f32.mrf.mxu2 }
 0x5bd   :  { %3949 = vmatpush.bf16.msrb.mxu1 %v10811_v45  ;;  %3975 = vmatpush.bf16.msrb.mxu3 %v10812_v6  ;;  %v10820_v45 = vld [vmem:[#allocation72_spill] sm:$0xff]  ;;  %v10821_v6 = vld [vmem:[#allocation74_spill] sm:$0xff] }
 0x5be   :  { %v3585_v16 = vpop.f32.mrf.mxu0 }
 0x5bf   :  { %v10826_v16 = vld [vmem:[#allocation84_spill] sm:$0xff] }
 0x5c1   :  { %3950 = vmatpush.bf16.msrb.mxu1 %v10813_v20  ;;  %3976 = vmatpush.bf16.msrb.mxu3 %v10814_v25  ;;  %v10822_v20 = vld [vmem:[#allocation76_spill] sm:$0xff] }
 0x5c4   :  { %v3611_v52 = vpop.f32.mrf.mxu2 }
 0x5c5   :  { %3951 = vmatpush.bf16.msrb.mxu1 %v10815_v10  ;;  %3977 = vmatpush.bf16.msrb.mxu3 %v10816_v46  ;;  %v10823_v10 = vld [vmem:[#allocation78_spill] sm:$0xff]  ;;  %v10824_v46 = vld [vmem:[#allocation80_spill] sm:$0xff] }
 0x5c6   :  { %v9292_v25 = vpop.f32.mrf.mxu0 }
 0x5c9   :  { %3952 = vmatpush.bf16.msrb.mxu1 %v10817_v9  ;;  %3978 = vmatpush.bf16.msrb.mxu3 %v10818_v29  ;;  %v10825_v9 = vld [vmem:[#allocation82_spill] sm:$0xff] }
 0x5cc   :  { %v9296_v8 = vpop.f32.mrf.mxu2 }
 0x5cd   :  { %3953 = vmatpush.bf16.msrb.mxu1 %v10819_v14  ;;  %3979 = vmatpush.bf16.msrb.mxu3 %v10820_v45 }
 0x5ce   :  { %v3637_v14 = vpop.f32.mrf.mxu0 }
 0x5d1   :  { %3954 = vmatpush.bf16.msrb.mxu1 %v10821_v6  ;;  %3980 = vmatpush.bf16.msrb.mxu3 %v10822_v20  ;;  %v3730_v6 = vunpack.c.l.bf16 %v10827_v53 }
 0x5d4   :  { %v3663_v29 = vpop.f32.mrf.mxu2 }
 0x5d5   :  { %3955 = vmatpush.bf16.msrb.mxu1 %v10823_v10  ;;  %3981 = vmatpush.bf16.msrb.mxu3 %v10824_v46  ;;  %v3731_v10 = vunpack.c.h.bf16 %v10827_v53 }
 0x5d9   :  { %3956 = vmatpush.bf16.msrb.mxu1 %v10825_v9  ;;  %3982 = vmatpush.bf16.msrb.mxu3 %v10826_v16  ;;  %v3544_v45 = vpop.f32.mrf.mxu1 }
 0x5da   :  { %v3545_v52 = vadd.f32 %v3544_v45, %v3531_v40 }
 0x5dc   :  { %v3734_v3 = vadd.f32 %v3730_v6, %v3545_v52 }
 0x5de   :  { %v6284_v20 = vmul.f32 -1.442695, %v3734_v3  ;;  %v10828_v3 = vld [vmem:[#allocation146_spill] sm:$0xff] }
 0x5df   :  { %v3570_v24 = vpop.f32.mrf.mxu3  ;;  %v3732_v52 = vunpack.c.l.bf16 %v10828_v3 }
 0x5e0   :  { %7178 = vpow2.f32 %v6284_v20  ;;  %v3571_v60 = vadd.f32 %v3570_v24, %v3557_v26 }
 0x5e1   :  { %v3546_v46 = vpop.f32.mrf.mxu1 }
 0x5e2   :  { %v3735_v35 = vadd.f32 %v3731_v10, %v3571_v60 }
 0x5e4   :  { %v6285_v47 = vmul.f32 -1.442695, %v3735_v35 }
 0x5e6   :  { %v7179_v28 = vpop.eup %7178  ;;  %7180 = vpow2.f32 %v6285_v47 }
 0x5e7   :  { %v3749_v9 = vadd.f32 1.0, %v7179_v28  ;;  %v3572_v16 = vpop.f32.mrf.mxu3  ;;  %v3733_v28 = vunpack.c.h.bf16 %v10828_v3 }
 0x5e8   :  { %v9302_v14 = vpop.f32.mrf.mxu0 }
 0x5e9   :  { %7182 = vrcp.f32 %v3749_v9  ;;  %v3596_v40 = vpop.f32.mrf.mxu1  ;;  %v3761_v37 = vand.u32 2147483648, %v3749_v9  ;;  %vm3755_vm0 = vweird.f32 %v3749_v9 }
 0x5ea   :  { %v3597_v29 = vadd.f32 %v3596_v40, %v3583_v0  ;;  %v3759_v40 = vand.u32 2147483647, %v3749_v9 }
 0x5ec   :  { %v7181_v45 = vpop.eup %7180  ;;  %v3736_v53 = vadd.f32 %v3732_v52, %v3597_v29  ;;  %v3762_v29 = vor.u32 1.1754944e-38, %v3761_v37  ;;  %vm3760_vm2 = vcmp.eq.f32.partialorder %v3759_v40, 8.507059e+37 }
 0x5ed   :  { %v3768_v6 = vadd.f32 1.0, %v7181_v45 }
 0x5ee   :  { %v9305_v20 = vpop.f32.mrf.mxu2 }
 0x5ef   :  { %v7183_v24 = vpop.eup %7182  ;;  %7184 = vrcp.f32 %v3768_v6  ;;  %v3622_v60 = vpop.f32.mrf.mxu3  ;;  %vm3774_vm4 = vweird.f32 %v3768_v6 }
 0x5f0   :  { %v3689_v35 = vpop.f32.mrf.mxu0  ;;  %v3751_v10 = vmul.f32 %v7183_v24, %v3749_v9  ;;  %v3623_v47 = vadd.f32 %v3622_v60, %v3609_v54  ;;  %7186 = vtanh.f32 %v3736_v53  ;;  %vm3756_vm15 = vweird.f32 %v7183_v24 }
 0x5f1   :  { %v3598_v46 = vpop.f32.mrf.mxu1  ;;  %vm3757_vm1 = vmor %vm3755_vm0, %vm3756_vm15  ;;  %v3780_v35 = vand.u32 2147483648, %v3768_v6  ;;  %v3778_v53 = vand.u32 2147483647, %v3768_v6 }
 0x5f2   :  { %v3752_v26 = vsub.f32 1.0, %v3751_v10  ;;  %v3737_v16 = vadd.f32 %v3733_v28, %v3623_v47  ;;  %v10829_v28 = vld [vmem:[#allocation167_spill] sm:$0xff] }
 0x5f3   :  { %v3738_v46 = vunpack.c.l.bf16 %v10829_v28  ;;  %vm3779_vm6 = vcmp.eq.f32.partialorder %v3778_v53, 8.507059e+37 }
 0x5f4   :  { %v3753_v0 = vmul.f32 %v7183_v24, %v3752_v26  ;;  %v6286_v45 = vmul.f32 -1.442695, %v3737_v16 }
 0x5f5   :  { %v7185_v7 = vpop.eup %7184 }
 0x5f6   :  { %v3715_v62 = vpop.f32.mrf.mxu2  ;;  %v3770_v57 = vmul.f32 %v7185_v7, %v3768_v6  ;;  %v3754_v32 = vadd.f32 %v7183_v24, %v3753_v0  ;;  %7188 = vpow2.f32 %v6286_v45  ;;  %v7187_v60 = vpop.eup %7186  ;;  %vm3775_vm3 = vweird.f32 %v7185_v7 }
 0x5f7   :  { %v3624_v54 = vpop.f32.mrf.mxu3  ;;  %vm3776_vm5 = vmor %vm3774_vm4, %vm3775_vm3 }
 0x5f8   :  { %v3771_v52 = vsub.f32 1.0, %v3770_v57  ;;  %v3758_v3 = vsel %vm3757_vm1, %v7183_v24, %v3754_v32  ;;  %v3781_v57 = vor.u32 1.1754944e-38, %v3780_v35 }
 0x5f9   :  { %v3763_v10 = vsel %vm3760_vm2, %v3762_v29, %v3758_v3  ;;  %v3648_v47 = vpop.f32.mrf.mxu1 }
 0x5fa   :  { %v3772_v26 = vmul.f32 %v7185_v7, %v3771_v52  ;;  %v3805_v62 = vmul.f32 %v7187_v60, %v3763_v10  ;;  %v3649_v16 = vadd.f32 %v3648_v47, %v9292_v25  ;;  %v3739_v25 = vunpack.c.h.bf16 %v10829_v28 }
 0x5fc   :  { %v7189_v9 = vpop.eup %7188  ;;  %v3773_v0 = vadd.f32 %v7185_v7, %v3772_v26  ;;  %v3742_v37 = vadd.f32 %v3738_v46, %v3649_v16  ;;  %v9318_v26 = vpop.permute.xlu2 %2393 }
 0x5fd   :  { %v3788_v32 = vadd.f32 1.0, %v7189_v9 }
 0x5fe   :  { %v3777_v24 = vsel %vm3776_vm5, %v7185_v7, %v3773_v0  ;;  %v6287_v40 = vmul.f32 -1.442695, %v3742_v37 }
 0x5ff   :  { %v3782_v45 = vsel %vm3779_vm6, %v3781_v57, %v3777_v24  ;;  %7190 = vrcp.f32 %v3788_v32  ;;  %v3674_v29 = vpop.f32.mrf.mxu3  ;;  %vm3794_vm8 = vweird.f32 %v3788_v32 }
 0x600   :  { %v3804_v54 = vmul.f32 %v3782_v45, %v9107_v34  ;;  %7192 = vpow2.f32 %v6287_v40  ;;  %v3675_v52 = vadd.f32 %v3674_v29, %v9296_v8  ;;  %v3800_v8 = vand.u32 2147483648, %v3788_v32 }
 0x601   :  { %v3650_v3 = vpop.f32.mrf.mxu1 }
 0x602   :  { %v9313_v6 = vadd.f32 %v3805_v62, %v3804_v54  ;;  %v3743_v60 = vadd.f32 %v3739_v25, %v3675_v52  ;;  %v3798_v62 = vand.u32 2147483647, %v3788_v32  ;;  %v3801_v0 = vor.u32 1.1754944e-38, %v3800_v8  ;;  %v10832_v8 = vld [vmem:[#allocation168_spill] sm:$0xff] }
 0x604   :  { %v6288_v10 = vmul.f32 -1.442695, %v3743_v60  ;;  %vm3799_vm10 = vcmp.eq.f32.partialorder %v3798_v62, 8.507059e+37  ;;  %v9322_v52 = vpop.permute.xlu2 %2773 }
 0x605   :  { %v7191_v35 = vpop.eup %7190  ;;  %10830 = vst [vmem:[#allocation144_spill] sm:$0xff] %v9322_v52 }
 0x606   :  { %v7193_v47 = vpop.eup %7192  ;;  %v3790_v7 = vmul.f32 %v7191_v35, %v3788_v32  ;;  %7194 = vpow2.f32 %v6288_v10  ;;  %vm3795_vm7 = vweird.f32 %v7191_v35  ;;  %v10831_v32 = vmax.f32 %v8915_v59, %v9119_v44 }
 0x607   :  { %v9315_v53 = vadd.f32 1.0, %v7193_v47  ;;  %v3676_v46 = vpop.f32.mrf.mxu3  ;;  %7196 = vtanh.f32 %v9313_v6  ;;  %vm3796_vm9 = vmor %vm3794_vm8, %vm3795_vm7 }
 0x608   :  { %v3791_v34 = vsub.f32 1.0, %v3790_v7 }
 0x609   :  { %7198 = vrcp.f32 %v9315_v53  ;;  %vm3818_vm13 = vweird.f32 %v9315_v53 }
 0x60a   :  { %v3792_v28 = vmul.f32 %v7191_v35, %v3791_v34 }
 0x60c   :  { %v7195_v16 = vpop.eup %7194  ;;  %v3793_v9 = vadd.f32 %v7191_v35, %v3792_v28  ;;  %v3740_v28 = vunpack.c.l.bf16 %v10832_v8 }
 0x60d   :  { %v3831_v37 = vadd.f32 1.0, %v7195_v16  ;;  %v7197_v57 = vpop.eup %7196 }
 0x60e   :  { %v3797_v24 = vsel %vm3796_vm9, %v7191_v35, %v3793_v9 }
 0x60f   :  { %v7199_v40 = vpop.eup %7198  ;;  %v3802_v45 = vsel %vm3799_vm10, %v3801_v0, %v3797_v24  ;;  %7200 = vrcp.f32 %v3831_v37  ;;  %v3843_v16 = vand.u32 2147483648, %v3831_v37  ;;  %v3841_v0 = vand.u32 2147483647, %v3831_v37 }
 0x610   :  { %v3808_v29 = vmul.f32 %v7197_v57, %v3802_v45  ;;  %v3814_v54 = vmul.f32 %v7199_v40, %v9315_v53  ;;  %vm3819_vm11 = vweird.f32 %v7199_v40  ;;  %v3824_v57 = vand.u32 2147483648, %v9315_v53 }
 0x611   :  { %vm3837_vm14 = vweird.f32 %v3831_v37  ;;  %vm9342_vm15 = vmor %vm3818_vm13, %vm3819_vm11  ;;  %v3822_v24 = vand.u32 2147483647, %v9315_v53  ;;  %vm3842_vm1 = vcmp.eq.f32.partialorder %v3841_v0, 8.507059e+37 }
 0x612   :  { %v9324_v25 = vpack.c.bf16 %v3808_v29, %v3808_v29  ;;  %v3815_v3 = vsub.f32 1.0, %v3814_v54  ;;  %v3878_v60 = vadd.f32 %v3808_v29, %v9322_v52  ;;  %v3844_v54 = vor.u32 1.1754944e-38, %v3843_v16  ;;  %v10835_v16 = vld [vmem:[#allocation90_spill] sm:$0xff]  ;;  %v10870_v52 = vld [vmem:[#allocation136_spill] sm:$0xff] }
 0x613   :  { %vm3823_vm2 = vcmp.eq.f32.partialorder %v3822_v24, 8.507059e+37  ;;  %vm3875_vm3 = vcmp.eq.s32.totalorder %v10835_v16, 1  ;;  %v10843_v16 = vld [vmem:[#allocation157_spill] sm:$0xff] }
 0x614   :  { %3892 = vmatmul.bf16.vlgmr.msra.gmra.mxu0 %v9324_v25  ;;  %3918 = vmatmul.bf16.vlgmr.msra.gmra.mxu2 %v9324_v25  ;;  %v9332_v10 = vmax.f32 %v10831_v32, %v3878_v60  ;;  %v3816_v46 = vmul.f32 %v7199_v40, %v3815_v3  ;;  %v3741_v60 = vunpack.c.h.bf16 %v10832_v8 }
 0x615   :  { %v7201_v35 = vpop.eup %7200  ;;  %3988 = vmatpush.bf16.msra.mxu0 %v10298_v43  ;;  %4014 = vmatpush.bf16.msra.mxu2 %v10299_v36 }
 0x616   :  { %v3833_v47 = vmul.f32 %v7201_v35, %v3831_v37  ;;  %vm3838_vm12 = vweird.f32 %v7201_v35  ;;  %v3817_v44 = vadd.f32 %v7199_v40, %v3816_v46 }
 0x617   :  { %vm3839_vm0 = vmor %vm3837_vm14, %vm3838_vm12 }
 0x618   :  { %v3834_v62 = vsub.f32 1.0, %v3833_v47  ;;  %v3821_v37 = vsel %vm9342_vm15, %v7199_v40, %v3817_v44 }
 0x619   :  { %v3700_v7 = vpop.f32.mrf.mxu1  ;;  %3989 = vmatpush.bf16.msra.mxu0 %v10300_v39  ;;  %4015 = vmatpush.bf16.msra.mxu2 %v10413_v1 }
 0x61a   :  { %v3701_v34 = vadd.f32 %v3700_v7, %v9302_v14  ;;  %v3835_v59 = vmul.f32 %v7201_v35, %v3834_v62  ;;  %v3825_v7 = vor.u32 1.1754944e-38, %v3824_v57 }
 0x61c   :  { %v3744_v9 = vadd.f32 %v3740_v28, %v3701_v34  ;;  %v3836_v45 = vadd.f32 %v7201_v35, %v3835_v59 }
 0x61d   :  { %3990 = vmatpush.bf16.msra.mxu0 %v10416_v2  ;;  %4016 = vmatpush.bf16.msra.mxu2 %v10417_v13 }
 0x61e   :  { %7202 = vtanh.f32 %v3744_v9  ;;  %v3840_v32 = vsel %vm3839_vm0, %v7201_v35, %v3836_v45 }
 0x61f   :  { %v3726_v29 = vpop.f32.mrf.mxu3  ;;  %v3845_v53 = vsel %vm3842_vm1, %v3844_v54, %v3840_v32 }
 0x620   :  { %v3727_v3 = vadd.f32 %v3726_v29, %v9305_v20  ;;  %v3867_v34 = vmul.f32 %v3845_v53, %v9155_v31  ;;  %v3826_v20 = vsel %vm3823_vm2, %v3825_v7, %v3821_v37  ;;  %v10836_v53 = vld [vmem:[#allocation150_spill] sm:$0xff] }
 0x621   :  { %v3702_v47 = vpop.f32.mrf.mxu1  ;;  %3991 = vmatpush.bf16.msra.mxu0 %v10306_v30  ;;  %4017 = vmatpush.bf16.msra.mxu2 %v10307_v17 }
 0x622   :  { %v3745_v46 = vadd.f32 %v3741_v60, %v3727_v3 }
 0x624   :  { %v7203_v28 = vpop.eup %7202  ;;  %v6289_v62 = vmul.f32 -1.442695, %v3745_v46  ;;  %3944 = vmatmul.bf16.vlgmr.msrb.gmra.mxu0 %v9324_v25  ;;  %3970 = vmatmul.bf16.vlgmr.msrb.gmra.mxu2 %v9324_v25  ;;  %v10837_v46 = vld [vmem:[#allocation95_spill] sm:$0xff] }
 0x625   :  { %v3868_v8 = vmul.f32 %v7203_v28, %v3826_v20  ;;  %3992 = vmatpush.bf16.msra.mxu0 %v10308_v18  ;;  %4018 = vmatpush.bf16.msra.mxu2 %v10309_v56  ;;  %v10839_v28 = vld [vmem:[#allocation152_spill] sm:$0xff]  ;;  %v10840_v20 = vld [vmem:[#allocation154_spill] sm:$0xff] }
 0x626   :  { %7204 = vpow2.f32 %v6289_v62  ;;  %v10841_v62 = vld [vmem:[#allocation101_spill] sm:$0xff] }
 0x627   :  { %v3869_v40 = vadd.f32 %v3868_v8, %v3867_v34  ;;  %v3728_v35 = vpop.f32.mrf.mxu3  ;;  %v10838_v34 = vld [vmem:[#allocation98_spill] sm:$0xff]  ;;  %v10842_v8 = vld [vmem:[#allocation103_spill] sm:$0xff] }
 0x628   :  { %v10845_v35 = vld [vmem:[#allocation21_spill] sm:$0xff] }
 0x629   :  { %v9364_v9 = vsel %vm3875_vm3, %v3869_v40, %v9155_v31  ;;  %3993 = vmatpush.bf16.msra.mxu0 %v10310_v22  ;;  %4019 = vmatpush.bf16.msra.mxu2 %v10311_v49 }
 0x62c   :  { %v7205_v59 = vpop.eup %7204 }
 0x62d   :  { %v3851_v44 = vadd.f32 1.0, %v7205_v59  ;;  %3994 = vmatpush.bf16.msra.mxu0 %v7917_v15  ;;  %4020 = vmatpush.bf16.msra.mxu2 %v10312_v38  ;;  %v10846_v59 = vld [vmem:[#allocation23_spill] sm:$0xff] }
 0x62f   :  { %7206 = vrcp.f32 %v3851_v44  ;;  %v3863_v14 = vand.u32 2147483648, %v3851_v44  ;;  %v3861_v45 = vand.u32 2147483647, %v3851_v44  ;;  %vm3857_vm5 = vweird.f32 %v3851_v44 }
 0x630   :  { %7208 = vtanh.f32 %v3869_v40  ;;  %v10844_v40 = vld [vmem:[#allocation160_spill] sm:$0xff] }
 0x631   :  { %3995 = vmatpush.bf16.msra.mxu0 %v10418_v19  ;;  %4021 = vmatpush.bf16.msra.mxu2 %v10419_v58  ;;  %v3864_v54 = vor.u32 1.1754944e-38, %v3863_v14  ;;  %vm3862_vm7 = vcmp.eq.f32.partialorder %v3861_v45, 8.507059e+37  ;;  %v10851_v14 = vld [vmem:[#allocation111_spill] sm:$0xff]  ;;  %v10853_v45 = vld [vmem:[#allocation29_spill] sm:$0xff] }
 0x634   :  { %3996 = vmatmul.bf16.vlgmr.msra.gmra.mxu0 %v9324_v25  ;;  %4022 = vmatmul.bf16.vlgmr.msra.gmra.mxu2 %v9324_v25 }
 0x635   :  { %v7207_v0 = vpop.eup %7206  ;;  %4040 = vmatpush.bf16.msrb.mxu0 %v10420_v50  ;;  %4066 = vmatpush.bf16.msrb.mxu2 %v10421_v55 }
 0x636   :  { %v3853_v31 = vmul.f32 %v7207_v0, %v3851_v44  ;;  %vm3858_vm4 = vweird.f32 %v7207_v0  ;;  %v7209_v60 = vpop.eup %7208  ;;  %v10847_v44 = vld [vmem:[#allocation105_spill] sm:$0xff] }
 0x637   :  { %vm3859_vm6 = vmor %vm3857_vm5, %vm3858_vm4 }
 0x638   :  { %v3854_v57 = vsub.f32 1.0, %v3853_v31  ;;  %v10849_v31 = vld [vmem:[#allocation25_spill] sm:$0xff] }
 0x639   :  { %4041 = vmatpush.bf16.msrb.mxu0 %v10422_v51  ;;  %4067 = vmatpush.bf16.msrb.mxu2 %v10423_v21 }
 0x63a   :  { %v3855_v24 = vmul.f32 %v7207_v0, %v3854_v57  ;;  %v10850_v57 = vld [vmem:[#allocation27_spill] sm:$0xff] }
 0x63c   :  { %v3856_v29 = vadd.f32 %v7207_v0, %v3855_v24  ;;  %v10852_v24 = vld [vmem:[#allocation113_spill] sm:$0xff] }
 0x63d   :  { %4042 = vmatpush.bf16.msrb.mxu0 %v10319_v42  ;;  %4068 = vmatpush.bf16.msrb.mxu2 %v10320_v4 }
 0x63e   :  { %v3860_v3 = vsel %vm3859_vm6, %v7207_v0, %v3856_v29  ;;  %v10848_v0 = vld [vmem:[#allocation108_spill] sm:$0xff]  ;;  %v10854_v29 = vld [vmem:[#allocation31_spill] sm:$0xff] }
 0x63f   :  { %v3865_v37 = vsel %vm3862_vm7, %v3864_v54, %v3860_v3  ;;  %v10855_v54 = vld [vmem:[#allocation114_spill] sm:$0xff]  ;;  %v10856_v3 = vld [vmem:[#allocation117_spill] sm:$0xff] }
 0x640   :  { %v3871_v32 = vmul.f32 %v7209_v60, %v3865_v37  ;;  %v10858_v60 = vld [vmem:[#allocation35_spill] sm:$0xff]  ;;  %v10859_v37 = vld [vmem:[#allocation120_spill] sm:$0xff] }
 0x641   :  { %4043 = vmatpush.bf16.msrb.mxu0 %v10321_v61  ;;  %4069 = vmatpush.bf16.msrb.mxu2 %v10322_v41 }
 0x642   :  { %v9385_v47 = vsel %vm3875_vm3, %v3871_v32, %v9176_v12  ;;  %v10860_v32 = vld [vmem:[#allocation122_spill] sm:$0xff] }
 0x643   :  { %v9389_v7 = vpack.c.bf16 %v9385_v47, %v9385_v47  ;;  %v10869_v12 = vld [vmem:[#allocation134_spill] sm:$0xff] }
 0x645   :  { %3905 = vmatmul.bf16.vlgmr.msra.gmra.mxu1 %v9389_v7  ;;  %3931 = vmatmul.bf16.vlgmr.msra.gmra.mxu3 %v9389_v7 }
 0x646   :  { %4001 = vmatpush.bf16.msra.mxu1 %v10327_v23  ;;  %4027 = vmatpush.bf16.msra.mxu3 %v10328_v11 }
 0x647   :  { %4044 = vmatpush.bf16.msrb.mxu0 %v8021_v27  ;;  %4070 = vmatpush.bf16.msrb.mxu2 %v10326_v63 }
 0x64a   :  { %4002 = vmatpush.bf16.msra.mxu1 %v10331_v48  ;;  %4028 = vmatpush.bf16.msra.mxu3 %v10332_v33 }
 0x64b   :  { %4045 = vmatpush.bf16.msrb.mxu0 %v10329_v5  ;;  %4071 = vmatpush.bf16.msrb.mxu2 %v10836_v53 }
 0x64e   :  { %4003 = vmatpush.bf16.msra.mxu1 %v10837_v46  ;;  %4029 = vmatpush.bf16.msra.mxu3 %v10838_v34 }
 0x64f   :  { %4046 = vmatpush.bf16.msrb.mxu0 %v10839_v28  ;;  %4072 = vmatpush.bf16.msrb.mxu2 %v10840_v20 }
 0x652   :  { %4004 = vmatpush.bf16.msra.mxu1 %v10841_v62  ;;  %4030 = vmatpush.bf16.msra.mxu3 %v10842_v8 }
 0x653   :  { %4047 = vmatpush.bf16.msrb.mxu0 %v10843_v16  ;;  %4073 = vmatpush.bf16.msrb.mxu2 %v10844_v40 }
 0x655   :  { %3957 = vmatmul.bf16.vlgmr.msrb.gmra.mxu1 %v9389_v7  ;;  %3983 = vmatmul.bf16.vlgmr.msrb.gmra.mxu3 %v9389_v7 }
 0x656   :  { %4048 = vmatmul.bf16.vlgmr.msrb.gmra.mxu0 %v9324_v25  ;;  %4074 = vmatmul.bf16.vlgmr.msrb.gmra.mxu2 %v9324_v25  ;;  %v10857_v25 = vld [vmem:[#allocation33_spill] sm:$0xff] }
 0x657   :  { %4246 = vmatpush.bf16.msra.mxu0 %v10845_v35  ;;  %4272 = vmatpush.bf16.msra.mxu2 %v10846_v59  ;;  %v10861_v35 = vld [vmem:[#allocation124_spill] sm:$0xff]  ;;  %v10862_v59 = vld [vmem:[#allocation126_spill] sm:$0xff] }
 0x658   :  { %4005 = vmatpush.bf16.msra.mxu1 %v10847_v44  ;;  %4031 = vmatpush.bf16.msra.mxu3 %v10848_v0 }
 0x65b   :  { %4247 = vmatpush.bf16.msra.mxu0 %v10849_v31  ;;  %4273 = vmatpush.bf16.msra.mxu2 %v10850_v57  ;;  %v10863_v31 = vld [vmem:[#allocation37_spill] sm:$0xff]  ;;  %v10864_v57 = vld [vmem:[#allocation39_spill] sm:$0xff] }
 0x65c   :  { %4006 = vmatpush.bf16.msra.mxu1 %v10851_v14  ;;  %4032 = vmatpush.bf16.msra.mxu3 %v10852_v24  ;;  %v10933_v14 = vld [vmem:[#allocation148_spill] sm:$0xff] }
 0x65f   :  { %4248 = vmatpush.bf16.msra.mxu0 %v10853_v45  ;;  %4274 = vmatpush.bf16.msra.mxu2 %v10854_v29  ;;  %v10865_v45 = vld [vmem:[#allocation130_spill] sm:$0xff]  ;;  %v10866_v29 = vld [vmem:[#allocation132_spill] sm:$0xff] }
 0x660   :  { %4007 = vmatpush.bf16.msra.mxu1 %v10855_v54  ;;  %4033 = vmatpush.bf16.msra.mxu3 %v10856_v3  ;;  %v10921_v3 = vld [vmem:[#allocation62_spill] sm:$0xff] }
 0x661   :  { %v10925_v54 = vld [vmem:[#allocation70_spill] sm:$0xff] }
 0x663   :  { %4249 = vmatpush.bf16.msra.mxu0 %v10857_v25  ;;  %4275 = vmatpush.bf16.msra.mxu2 %v10858_v60  ;;  %v10867_v25 = vld [vmem:[#allocation41_spill] sm:$0xff]  ;;  %v10868_v60 = vld [vmem:[#allocation43_spill] sm:$0xff] }
 0x664   :  { %4008 = vmatpush.bf16.msra.mxu1 %v10859_v37  ;;  %4034 = vmatpush.bf16.msra.mxu3 %v10860_v32  ;;  %v10875_v32 = vld [vmem:[#allocation49_spill] sm:$0xff]  ;;  %v10919_v37 = vld [vmem:[#allocation58_spill] sm:$0xff] }
 0x667   :  { %4250 = vmatpush.bf16.msra.mxu0 %v10863_v31  ;;  %4276 = vmatpush.bf16.msra.mxu2 %v10864_v57  ;;  %v10872_v31 = vld [vmem:[#allocation47_spill] sm:$0xff] }
 0x668   :  { %4053 = vmatpush.bf16.msrb.mxu1 %v10861_v35  ;;  %4079 = vmatpush.bf16.msrb.mxu3 %v10862_v59  ;;  %v10871_v59 = vld [vmem:[#allocation45_spill] sm:$0xff]  ;;  %v10873_v57 = vld [vmem:[#allocation139_spill] sm:$0xff]  ;;  %v10874_v35 = vld [vmem:[#allocation142_spill] sm:$0xff] }
 0x669   :  { %4009 = vmatmul.bf16.vlgmr.msra.gmra.mxu1 %v9389_v7  ;;  %4035 = vmatmul.bf16.vlgmr.msra.gmra.mxu3 %v9389_v7 }
 0x66b   :  { %4251 = vmatpush.bf16.msra.mxu0 %v10867_v25  ;;  %4277 = vmatpush.bf16.msra.mxu2 %v10868_v60  ;;  %v10878_v25 = vld [vmem:[#allocation55_spill] sm:$0xff] }
 0x66c   :  { %4054 = vmatpush.bf16.msrb.mxu1 %v10865_v45  ;;  %4080 = vmatpush.bf16.msrb.mxu3 %v10866_v29  ;;  %v10876_v45 = vld [vmem:[#allocation51_spill] sm:$0xff]  ;;  %v10877_v29 = vld [vmem:[#allocation53_spill] sm:$0xff] }
 0x66d   :  { %v10879_v60 = vld [vmem:[#allocation143_spill] sm:$0xff] }
 0x66f   :  { %4252 = vmatpush.bf16.msra.mxu0 %v10871_v59  ;;  %4278 = vmatpush.bf16.msra.mxu2 %v10872_v31  ;;  %v10882_v59 = vld [vmem:[#allocation59_spill] sm:$0xff]  ;;  %v10883_v31 = vld [vmem:[#allocation149_spill] sm:$0xff] }
 0x670   :  { %4055 = vmatpush.bf16.msrb.mxu1 %v10869_v12  ;;  %4081 = vmatpush.bf16.msrb.mxu3 %v10870_v52  ;;  %v10880_v12 = vld [vmem:[#allocation145_spill] sm:$0xff] }
 0x671   :  { %v10881_v52 = vld [vmem:[#allocation57_spill] sm:$0xff] }
 0x673   :  { %4253 = vmatpush.bf16.msra.mxu0 %v10875_v32  ;;  %4279 = vmatpush.bf16.msra.mxu2 %v10876_v45  ;;  %v10886_v32 = vld [vmem:[#allocation63_spill] sm:$0xff]  ;;  %v10887_v45 = vld [vmem:[#allocation153_spill] sm:$0xff] }
 0x674   :  { %4056 = vmatpush.bf16.msrb.mxu1 %v10873_v57  ;;  %4082 = vmatpush.bf16.msrb.mxu3 %v10874_v35  ;;  %v10884_v57 = vld [vmem:[#allocation151_spill] sm:$0xff]  ;;  %v10885_v35 = vld [vmem:[#allocation61_spill] sm:$0xff] }
 0x677   :  { %4298 = vmatpush.bf16.msrb.mxu0 %v10877_v29  ;;  %4324 = vmatpush.bf16.msrb.mxu2 %v10878_v25  ;;  %v10888_v29 = vld [vmem:[#allocation155_spill] sm:$0xff]  ;;  %v10889_v25 = vld [vmem:[#allocation65_spill] sm:$0xff] }
 0x678   :  { %4057 = vmatpush.bf16.msrb.mxu1 %v10879_v60  ;;  %4083 = vmatpush.bf16.msrb.mxu3 %v10880_v12  ;;  %v10890_v60 = vld [vmem:[#allocation67_spill] sm:$0xff] }
 0x679   :  { %v10891_v12 = vld [vmem:[#allocation159_spill] sm:$0xff] }
 0x67b   :  { %4299 = vmatpush.bf16.msrb.mxu0 %v10881_v52  ;;  %4325 = vmatpush.bf16.msrb.mxu2 %v10882_v59  ;;  %v10892_v52 = vld [vmem:[#allocation161_spill] sm:$0xff]  ;;  %v10893_v59 = vld [vmem:[#allocation22_spill] sm:$0xff] }
 0x67c   :  { %4058 = vmatpush.bf16.msrb.mxu1 %v10883_v31  ;;  %4084 = vmatpush.bf16.msrb.mxu3 %v10884_v57  ;;  %v10894_v31 = vld [vmem:[#allocation24_spill] sm:$0xff]  ;;  %v10895_v57 = vld [vmem:[#allocation69_spill] sm:$0xff] }
 0x67f   :  { %4300 = vmatpush.bf16.msrb.mxu0 %v10885_v35  ;;  %4326 = vmatpush.bf16.msrb.mxu2 %v10886_v32  ;;  %v10896_v35 = vld [vmem:[#allocation71_spill] sm:$0xff]  ;;  %v10897_v32 = vld [vmem:[#allocation26_spill] sm:$0xff] }
 0x680   :  { %4059 = vmatpush.bf16.msrb.mxu1 %v10887_v45  ;;  %4085 = vmatpush.bf16.msrb.mxu3 %v10888_v29  ;;  %v10906_v29 = vld [vmem:[#allocation36_spill] sm:$0xff] }
 0x683   :  { %4301 = vmatpush.bf16.msrb.mxu0 %v10889_v25  ;;  %4327 = vmatpush.bf16.msrb.mxu2 %v10890_v60  ;;  %v10898_v25 = vld [vmem:[#allocation28_spill] sm:$0xff]  ;;  %v10899_v60 = vld [vmem:[#allocation73_spill] sm:$0xff] }
 0x684   :  { %4060 = vmatpush.bf16.msrb.mxu1 %v10891_v12  ;;  %4086 = vmatpush.bf16.msrb.mxu3 %v10892_v52  ;;  %v10900_v12 = vld [vmem:[#allocation75_spill] sm:$0xff]  ;;  %v10901_v52 = vld [vmem:[#allocation30_spill] sm:$0xff] }
 0x687   :  { %4302 = vmatpush.bf16.msrb.mxu0 %v10895_v57  ;;  %4328 = vmatpush.bf16.msrb.mxu2 %v10896_v35  ;;  %v10904_v57 = vld [vmem:[#allocation79_spill] sm:$0xff]  ;;  %v10905_v35 = vld [vmem:[#allocation34_spill] sm:$0xff] }
 0x688   :  { %4259 = vmatpush.bf16.msra.mxu1 %v10893_v59  ;;  %4285 = vmatpush.bf16.msra.mxu3 %v10894_v31  ;;  %v10902_v59 = vld [vmem:[#allocation32_spill] sm:$0xff]  ;;  %v10903_v31 = vld [vmem:[#allocation77_spill] sm:$0xff] }
 0x689   :  { %4061 = vmatmul.bf16.vlgmr.msrb.gmra.mxu1 %v9389_v7  ;;  %4087 = vmatmul.bf16.vlgmr.msrb.gmra.mxu3 %v9389_v7  ;;  %v10907_v7 = vld [vmem:[#allocation81_spill] sm:$0xff] }
 0x68b   :  { %4303 = vmatpush.bf16.msrb.mxu0 %v10899_v60  ;;  %4329 = vmatpush.bf16.msrb.mxu2 %v10900_v12  ;;  %v10910_v60 = vld [vmem:[#allocation40_spill] sm:$0xff] }
 0x68c   :  { %4260 = vmatpush.bf16.msra.mxu1 %v10897_v32  ;;  %4286 = vmatpush.bf16.msra.mxu3 %v10898_v25  ;;  %v10908_v32 = vld [vmem:[#allocation83_spill] sm:$0xff]  ;;  %v10909_v25 = vld [vmem:[#allocation38_spill] sm:$0xff] }
 0x68f   :  { %4304 = vmatpush.bf16.msrb.mxu0 %v10903_v31  ;;  %4330 = vmatpush.bf16.msrb.mxu2 %v10904_v57  ;;  %v10913_v31 = vld [vmem:[#allocation46_spill] sm:$0xff]  ;;  %v10914_v57 = vld [vmem:[#allocation48_spill] sm:$0xff] }
 0x690   :  { %4261 = vmatpush.bf16.msra.mxu1 %v10901_v52  ;;  %4287 = vmatpush.bf16.msra.mxu3 %v10902_v59  ;;  %v10911_v52 = vld [vmem:[#allocation42_spill] sm:$0xff]  ;;  %v10912_v59 = vld [vmem:[#allocation44_spill] sm:$0xff] }
 0x691   :  { %v3893_v12 = vpop.f32.mrf.mxu0 }
 0x693   :  { %4305 = vmatpush.bf16.msrb.mxu0 %v10907_v7  ;;  %4331 = vmatpush.bf16.msrb.mxu2 %v10908_v32  ;;  %v10916_v7 = vld [vmem:[#allocation52_spill] sm:$0xff]  ;;  %v10917_v32 = vld [vmem:[#allocation54_spill] sm:$0xff] }
 0x694   :  { %4262 = vmatpush.bf16.msra.mxu1 %v10905_v35  ;;  %4288 = vmatpush.bf16.msra.mxu3 %v10906_v29  ;;  %v10915_v29 = vld [vmem:[#allocation50_spill] sm:$0xff] }
 0x697   :  { %v3919_v35 = vpop.f32.mrf.mxu2 }
 0x698   :  { %4263 = vmatpush.bf16.msra.mxu1 %v10909_v25  ;;  %4289 = vmatpush.bf16.msra.mxu3 %v10910_v60  ;;  %v10918_v25 = vld [vmem:[#allocation56_spill] sm:$0xff] }
 0x699   :  { %v3895_v45 = vpop.f32.mrf.mxu0 }
 0x69a   :  { %v10923_v45 = vld [vmem:[#allocation66_spill] sm:$0xff] }
 0x69c   :  { %4264 = vmatpush.bf16.msra.mxu1 %v10911_v52  ;;  %4290 = vmatpush.bf16.msra.mxu3 %v10912_v59  ;;  %v10920_v52 = vld [vmem:[#allocation60_spill] sm:$0xff] }
 0x69f   :  { %v3921_v60 = vpop.f32.mrf.mxu2 }
 0x6a0   :  { %4265 = vmatpush.bf16.msra.mxu1 %v10913_v31  ;;  %4291 = vmatpush.bf16.msra.mxu3 %v10914_v57  ;;  %v10922_v31 = vld [vmem:[#allocation64_spill] sm:$0xff]  ;;  %v10927_v60 = vld [vmem:[#allocation74_spill] sm:$0xff] }
 0x6a1   :  { %v3945_v59 = vpop.f32.mrf.mxu0 }
 0x6a4   :  { %4266 = vmatpush.bf16.msra.mxu1 %v10915_v29  ;;  %4292 = vmatpush.bf16.msra.mxu3 %v10916_v7  ;;  %v10924_v29 = vld [vmem:[#allocation68_spill] sm:$0xff] }
 0x6a7   :  { %v3971_v57 = vpop.f32.mrf.mxu2 }
 0x6a8   :  { %4311 = vmatpush.bf16.msrb.mxu1 %v10917_v32  ;;  %4337 = vmatpush.bf16.msrb.mxu3 %v10918_v25  ;;  %v10926_v32 = vld [vmem:[#allocation72_spill] sm:$0xff] }
 0x6a9   :  { %v3947_v7 = vpop.f32.mrf.mxu0 }
 0x6ac   :  { %4312 = vmatpush.bf16.msrb.mxu1 %v10919_v37  ;;  %4338 = vmatpush.bf16.msrb.mxu3 %v10920_v52  ;;  %v10928_v37 = vld [vmem:[#allocation76_spill] sm:$0xff] }
 0x6af   :  { %v3973_v25 = vpop.f32.mrf.mxu2 }
 0x6b0   :  { %4313 = vmatpush.bf16.msrb.mxu1 %v10921_v3  ;;  %4339 = vmatpush.bf16.msrb.mxu3 %v10922_v31  ;;  %v10929_v3 = vld [vmem:[#allocation78_spill] sm:$0xff]  ;;  %v10930_v31 = vld [vmem:[#allocation80_spill] sm:$0xff] }
 0x6b1   :  { %v9501_v52 = vpop.f32.mrf.mxu0 }
 0x6b4   :  { %4314 = vmatpush.bf16.msrb.mxu1 %v10923_v45  ;;  %4340 = vmatpush.bf16.msrb.mxu3 %v10924_v29  ;;  %v10931_v45 = vld [vmem:[#allocation82_spill] sm:$0xff]  ;;  %v10932_v29 = vld [vmem:[#allocation84_spill] sm:$0xff] }
 0x6b7   :  { %v9505_v24 = vpop.f32.mrf.mxu2 }
 0x6b8   :  { %4315 = vmatpush.bf16.msrb.mxu1 %v10925_v54  ;;  %4341 = vmatpush.bf16.msrb.mxu3 %v10926_v32 }
 0x6b9   :  { %v3999_v54 = vpop.f32.mrf.mxu0 }
 0x6bc   :  { %4316 = vmatpush.bf16.msrb.mxu1 %v10927_v60  ;;  %4342 = vmatpush.bf16.msrb.mxu3 %v10928_v37  ;;  %v4092_v60 = vunpack.c.l.bf16 %v10933_v14 }
 0x6bf   :  { %v4025_v32 = vpop.f32.mrf.mxu2 }
 0x6c0   :  { %4317 = vmatpush.bf16.msrb.mxu1 %v10929_v3  ;;  %4343 = vmatpush.bf16.msrb.mxu3 %v10930_v31  ;;  %v4093_v3 = vunpack.c.h.bf16 %v10933_v14 }
 0x6c2   :  { %v3906_v7 = vpop.f32.mrf.mxu1 }
 0x6c3   :  { %v3907_v25 = vadd.f32 %v3906_v7, %v3893_v12 }
 0x6c4   :  { %4318 = vmatpush.bf16.msrb.mxu1 %v10931_v45  ;;  %4344 = vmatpush.bf16.msrb.mxu3 %v10932_v29 }
 0x6c5   :  { %v4096_v0 = vadd.f32 %v4092_v60, %v3907_v25 }
 0x6c7   :  { %v6290_v37 = vmul.f32 -1.442695, %v4096_v0  ;;  %v10934_v0 = vld [vmem:[#allocation156_spill] sm:$0xff] }
 0x6c8   :  { %v3932_v44 = vpop.f32.mrf.mxu3  ;;  %v4094_v60 = vunpack.c.l.bf16 %v10934_v0 }
 0x6c9   :  { %7210 = vpow2.f32 %v6290_v37  ;;  %v3933_v8 = vadd.f32 %v3932_v44, %v3919_v35 }
 0x6ca   :  { %v3908_v31 = vpop.f32.mrf.mxu1 }
 0x6cb   :  { %v4097_v62 = vadd.f32 %v4093_v3, %v3933_v8 }
 0x6cd   :  { %v6291_v40 = vmul.f32 -1.442695, %v4097_v62 }
 0x6cf   :  { %v7211_v16 = vpop.eup %7210  ;;  %7212 = vpow2.f32 %v6291_v40 }
 0x6d0   :  { %v4111_v45 = vadd.f32 1.0, %v7211_v16  ;;  %v3934_v29 = vpop.f32.mrf.mxu3  ;;  %v4095_v16 = vunpack.c.h.bf16 %v10934_v0 }
 0x6d2   :  { %7214 = vrcp.f32 %v4111_v45  ;;  %v3958_v54 = vpop.f32.mrf.mxu1  ;;  %v4123_v34 = vand.u32 2147483648, %v4111_v45  ;;  %vm4117_vm9 = vweird.f32 %v4111_v45 }
 0x6d3   :  { %v9511_v32 = vpop.f32.mrf.mxu0  ;;  %v3959_v12 = vadd.f32 %v3958_v54, %v3945_v59  ;;  %v4121_v54 = vand.u32 2147483647, %v4111_v45 }
 0x6d5   :  { %v7213_v7 = vpop.eup %7212  ;;  %v4098_v44 = vadd.f32 %v4094_v60, %v3959_v12  ;;  %v4124_v60 = vor.u32 1.1754944e-38, %v4123_v34  ;;  %vm4122_vm11 = vcmp.eq.f32.partialorder %v4121_v54, 8.507059e+37 }
 0x6d6   :  { %v4130_v25 = vadd.f32 1.0, %v7213_v7 }
 0x6d8   :  { %v7215_v37 = vpop.eup %7214  ;;  %7216 = vrcp.f32 %v4130_v25  ;;  %v3984_v14 = vpop.f32.mrf.mxu3  ;;  %vm4136_vm13 = vweird.f32 %v4130_v25 }
 0x6d9   :  { %v4113_v35 = vmul.f32 %v7215_v37, %v4111_v45  ;;  %v9514_v8 = vpop.f32.mrf.mxu2  ;;  %v3985_v62 = vadd.f32 %v3984_v14, %v3971_v57  ;;  %7218 = vtanh.f32 %v4098_v44  ;;  %vm4118_vm8 = vweird.f32 %v7215_v37 }
 0x6da   :  { %v3960_v40 = vpop.f32.mrf.mxu1  ;;  %vm4119_vm10 = vmor %vm4117_vm9, %vm4118_vm8 }
 0x6db   :  { %v4114_v3 = vsub.f32 1.0, %v4113_v35  ;;  %v4099_v31 = vadd.f32 %v4095_v16, %v3985_v62  ;;  %v4051_v29 = vpop.f32.mrf.mxu0  ;;  %v4142_v16 = vand.u32 2147483648, %v4130_v25 }
 0x6dd   :  { %v4115_v59 = vmul.f32 %v7215_v37, %v4114_v3  ;;  %v6292_v7 = vmul.f32 -1.442695, %v4099_v31  ;;  %v4140_v3 = vand.u32 2147483647, %v4130_v25 }
 0x6de   :  { %v7217_v46 = vpop.eup %7216 }
 0x6df   :  { %v4132_v20 = vmul.f32 %v7217_v46, %v4130_v25  ;;  %v4116_v12 = vadd.f32 %v7215_v37, %v4115_v59  ;;  %7220 = vpow2.f32 %v6292_v7  ;;  %v7219_v62 = vpop.eup %7218  ;;  %vm4137_vm12 = vweird.f32 %v7217_v46  ;;  %v10935_v59 = vld [vmem:[#allocation165_spill] sm:$0xff] }
 0x6e0   :  { %v3986_v57 = vpop.f32.mrf.mxu3  ;;  %v4100_v45 = vunpack.c.l.bf16 %v10935_v59  ;;  %vm4138_vm14 = vmor %vm4136_vm13, %vm4137_vm12  ;;  %vm4141_vm15 = vcmp.eq.f32.partialorder %v4140_v3, 8.507059e+37 }
 0x6e1   :  { %v4133_v14 = vsub.f32 1.0, %v4132_v20  ;;  %v4120_v0 = vsel %vm4119_vm10, %v7215_v37, %v4116_v12  ;;  %v4077_v35 = vpop.f32.mrf.mxu2  ;;  %v4143_v20 = vor.u32 1.1754944e-38, %v4142_v16 }
 0x6e2   :  { %v4125_v40 = vsel %vm4122_vm11, %v4124_v60, %v4120_v0 }
 0x6e3   :  { %v4134_v44 = vmul.f32 %v7217_v46, %v4133_v14  ;;  %v4167_v29 = vmul.f32 %v7219_v62, %v4125_v40 }
 0x6e5   :  { %v7221_v7 = vpop.eup %7220  ;;  %v4135_v34 = vadd.f32 %v7217_v46, %v4134_v44 }
 0x6e6   :  { %v4010_v31 = vpop.f32.mrf.mxu1  ;;  %v4150_v37 = vadd.f32 1.0, %v7221_v7 }
 0x6e7   :  { %v4011_v28 = vadd.f32 %v4010_v31, %v9501_v52  ;;  %v4139_v12 = vsel %vm4138_vm14, %v7217_v46, %v4135_v34  ;;  %v4101_v52 = vunpack.c.h.bf16 %v10935_v59 }
 0x6e8   :  { %v4144_v57 = vsel %vm4141_vm15, %v4143_v20, %v4139_v12  ;;  %7222 = vrcp.f32 %v4150_v37  ;;  %v4160_v59 = vand.u32 2147483647, %v4150_v37  ;;  %vm4156_vm1 = vweird.f32 %v4150_v37 }
 0x6e9   :  { %v4104_v54 = vadd.f32 %v4100_v45, %v4011_v28  ;;  %v4166_v60 = vmul.f32 %v4144_v57, %v9313_v6  ;;  %v4162_v6 = vand.u32 2147483648, %v4150_v37 }
 0x6ea   :  { %vm4161_vm3 = vcmp.eq.f32.partialorder %v4160_v59, 8.507059e+37 }
 0x6eb   :  { %v6293_v14 = vmul.f32 -1.442695, %v4104_v54  ;;  %v9522_v62 = vadd.f32 %v4167_v29, %v4166_v60  ;;  %v4163_v34 = vor.u32 1.1754944e-38, %v4162_v6 }
 0x6ec   :  { %v4036_v0 = vpop.f32.mrf.mxu3 }
 0x6ed   :  { %v4037_v35 = vadd.f32 %v4036_v0, %v9505_v24  ;;  %7224 = vpow2.f32 %v6293_v14 }
 0x6ee   :  { %v4012_v25 = vpop.f32.mrf.mxu1  ;;  %v7223_v16 = vpop.eup %7222 }
 0x6ef   :  { %v4105_v40 = vadd.f32 %v4101_v52, %v4037_v35  ;;  %v4152_v28 = vmul.f32 %v7223_v16, %v4150_v37  ;;  %vm4157_vm0 = vweird.f32 %v7223_v16 }
 0x6f0   :  { %vm4158_vm2 = vmor %vm4156_vm1, %vm4157_vm0 }
 0x6f1   :  { %v6294_v44 = vmul.f32 -1.442695, %v4105_v40  ;;  %v4153_v3 = vsub.f32 1.0, %v4152_v28 }
 0x6f3   :  { %7226 = vpow2.f32 %v6294_v44  ;;  %v7225_v46 = vpop.eup %7224  ;;  %v4154_v24 = vmul.f32 %v7223_v16, %v4153_v3  ;;  %v10936_v3 = vld [vmem:[#allocation166_spill] sm:$0xff] }
 0x6f4   :  { %v4038_v31 = vpop.f32.mrf.mxu3  ;;  %7228 = vtanh.f32 %v9522_v62  ;;  %v9525_v45 = vadd.f32 1.0, %v7225_v46 }
 0x6f5   :  { %v4155_v29 = vadd.f32 %v7223_v16, %v4154_v24  ;;  %v4102_v31 = vunpack.c.l.bf16 %v10936_v3 }
 0x6f6   :  { %7230 = vrcp.f32 %v9525_v45  ;;  %vm4180_vm6 = vweird.f32 %v9525_v45 }
 0x6f7   :  { %v4159_v20 = vsel %vm4158_vm2, %v7223_v16, %v4155_v29 }
 0x6f8   :  { %v4164_v57 = vsel %vm4161_vm3, %v4163_v34, %v4159_v20 }
 0x6f9   :  { %v7227_v7 = vpop.eup %7226 }
 0x6fa   :  { %v4193_v54 = vadd.f32 1.0, %v7227_v7  ;;  %v7229_v12 = vpop.eup %7228  ;;  %v4186_v7 = vand.u32 2147483648, %v9525_v45 }
 0x6fb   :  { %v4170_v60 = vmul.f32 %v7229_v12, %v4164_v57  ;;  %v4103_v57 = vunpack.c.h.bf16 %v10936_v3 }
 0x6fc   :  { %7232 = vrcp.f32 %v4193_v54  ;;  %v7231_v14 = vpop.eup %7230  ;;  %v4205_v24 = vand.u32 2147483648, %v4193_v54  ;;  %v4203_v29 = vand.u32 2147483647, %v4193_v54  ;;  %vm4199_vm7 = vweird.f32 %v4193_v54 }
 0x6fd   :  { %v9528_v0 = vpack.c.bf16 %v4170_v60, %v4170_v60  ;;  %v4176_v35 = vmul.f32 %v7231_v14, %v9525_v45  ;;  %v9532_v52 = vadd.f32 %v4170_v60, %v9318_v26  ;;  %vm4181_vm4 = vweird.f32 %v7231_v14 }
 0x6fe   :  { %vm9546_vm8 = vmor %vm4180_vm6, %vm4181_vm4  ;;  %v4206_v20 = vor.u32 1.1754944e-38, %v4205_v24  ;;  %vm4204_vm10 = vcmp.eq.f32.partialorder %v4203_v29, 8.507059e+37  ;;  %v10953_v24 = vld [vmem:[#allocation117_spill] sm:$0xff]  ;;  %v10958_v29 = vld [vmem:[#allocation130_spill] sm:$0xff] }
 0x6ff   :  { %v4177_v25 = vsub.f32 1.0, %v4176_v35  ;;  %4254 = vmatmul.bf16.vlgmr.msra.gmra.mxu0 %v9528_v0  ;;  %4280 = vmatmul.bf16.vlgmr.msra.gmra.mxu2 %v9528_v0  ;;  %v4241_v37 = vmax.f32 %v9332_v10, %v9532_v52  ;;  %v6939_v10 = vld [vmem:[#allocation12 + $0x1cc] sm:$0xf]  ;;  %v6538_v52 = vld [vmem:[#allocation12 + $0x1d8] sm:$0xf0] }
 0x700   :  { %4350 = vmatpush.bf16.msra.mxu0 %v10298_v43  ;;  %4376 = vmatpush.bf16.msra.mxu2 %v10299_v36 }
 0x701   :  { %v4178_v28 = vmul.f32 %v7231_v14, %v4177_v25  ;;  %v4187_v25 = vor.u32 1.1754944e-38, %v4186_v7  ;;  %v10959_v7 = vld [vmem:[#allocation132_spill] sm:$0xff] }
 0x702   :  { %v7233_v40 = vpop.eup %7232 }
 0x703   :  { %v4195_v16 = vmul.f32 %v7233_v40, %v4193_v54  ;;  %vm4200_vm5 = vweird.f32 %v7233_v40  ;;  %v4179_v59 = vadd.f32 %v7231_v14, %v4178_v28 }
 0x704   :  { %4351 = vmatpush.bf16.msra.mxu0 %v10300_v39  ;;  %4377 = vmatpush.bf16.msra.mxu2 %v10413_v1  ;;  %v4184_v39 = vand.u32 2147483647, %v9525_v45  ;;  %vm4201_vm9 = vmor %vm4199_vm7, %vm4200_vm5 }
 0x705   :  { %v4196_v6 = vsub.f32 1.0, %v4195_v16  ;;  %v4183_v54 = vsel %vm9546_vm8, %v7231_v14, %v4179_v59  ;;  %v10956_v59 = vld [vmem:[#allocation124_spill] sm:$0xff] }
 0x706   :  { %v4062_v44 = vpop.f32.mrf.mxu1  ;;  %vm4185_vm11 = vcmp.eq.f32.partialorder %v4184_v39, 8.507059e+37  ;;  %v10961_v39 = vld [vmem:[#allocation136_spill] sm:$0xff] }
 0x707   :  { %v4063_v46 = vadd.f32 %v4062_v44, %v9511_v32  ;;  %v4197_v36 = vmul.f32 %v7233_v40, %v4196_v6  ;;  %v10952_v6 = vld [vmem:[#allocation114_spill] sm:$0xff] }
 0x708   :  { %4352 = vmatpush.bf16.msra.mxu0 %v10416_v2  ;;  %4378 = vmatpush.bf16.msra.mxu2 %v10417_v13  ;;  %v10960_v32 = vld [vmem:[#allocation134_spill] sm:$0xff] }
 0x709   :  { %v4106_v43 = vadd.f32 %v4102_v31, %v4063_v46  ;;  %v4198_v1 = vadd.f32 %v7233_v40, %v4197_v36  ;;  %v10939_v46 = vld [vmem:[#allocation100_spill] sm:$0xff]  ;;  %v10951_v31 = vld [vmem:[#allocation113_spill] sm:$0xff]  ;;  %v10955_v36 = vld [vmem:[#allocation122_spill] sm:$0xff] }
 0x70a   :  { %vm4237_vm12 = vcmp.eq.s32.totalorder %v10939_v46, 1 }
 0x70b   :  { %7234 = vtanh.f32 %v4106_v43  ;;  %v4202_v60 = vsel %vm4201_vm9, %v7233_v40, %v4198_v1  ;;  %v10954_v43 = vld [vmem:[#allocation120_spill] sm:$0xff]  ;;  %v10962_v1 = vld [vmem:[#allocation139_spill] sm:$0xff] }
 0x70c   :  { %v4088_v34 = vpop.f32.mrf.mxu3  ;;  %v4207_v45 = vsel %vm4204_vm10, %v4206_v20, %v4202_v60  ;;  %4353 = vmatpush.bf16.msra.mxu0 %v10306_v30  ;;  %4379 = vmatpush.bf16.msra.mxu2 %v10307_v17  ;;  %v10964_v20 = vld [vmem:[#allocation143_spill] sm:$0xff]  ;;  %v10968_v60 = vld [vmem:[#allocation153_spill] sm:$0xff] }
 0x70d   :  { %v4089_v12 = vadd.f32 %v4088_v34, %v9514_v8  ;;  %v4229_v2 = vmul.f32 %v4207_v45, %v9364_v9  ;;  %v4188_v8 = vsel %vm4185_vm11, %v4187_v25, %v4183_v54  ;;  %v10963_v34 = vld [vmem:[#allocation142_spill] sm:$0xff]  ;;  %v10967_v54 = vld [vmem:[#allocation151_spill] sm:$0xff]  ;;  %v10971_v45 = vld [vmem:[#allocation161_spill] sm:$0xff] }
 0x70e   :  { %v4064_v35 = vpop.f32.mrf.mxu1  ;;  %v10970_v25 = vld [vmem:[#allocation159_spill] sm:$0xff] }
 0x70f   :  { %v4107_v16 = vadd.f32 %v4103_v57, %v4089_v12  ;;  %4306 = vmatmul.bf16.vlgmr.msrb.gmra.mxu0 %v9528_v0  ;;  %4332 = vmatmul.bf16.vlgmr.msrb.gmra.mxu2 %v9528_v0  ;;  %v10965_v12 = vld [vmem:[#allocation145_spill] sm:$0xff]  ;;  %v10969_v35 = vld [vmem:[#allocation155_spill] sm:$0xff] }
 0x710   :  { %4354 = vmatpush.bf16.msra.mxu0 %v10308_v18  ;;  %4380 = vmatpush.bf16.msra.mxu2 %v10309_v56  ;;  %v10966_v57 = vld [vmem:[#allocation149_spill] sm:$0xff] }
 0x711   :  { %v7235_v13 = vpop.eup %7234  ;;  %v6295_v44 = vmul.f32 -1.442695, %v4107_v16 }
 0x712   :  { %v4230_v28 = vmul.f32 %v7235_v13, %v4188_v8 }
 0x713   :  { %7236 = vpow2.f32 %v6295_v44 }
 0x714   :  { %v4231_v14 = vadd.f32 %v4230_v28, %v4229_v2  ;;  %v4090_v40 = vpop.f32.mrf.mxu3  ;;  %4355 = vmatpush.bf16.msra.mxu0 %v10310_v22  ;;  %4381 = vmatpush.bf16.msra.mxu2 %v10311_v49 }
 0x716   :  { %v9568_v17 = vsel %vm4237_vm12, %v4231_v14, %v9364_v9 }
 0x718   :  { %4356 = vmatpush.bf16.msra.mxu0 %v7917_v15  ;;  %4382 = vmatpush.bf16.msra.mxu2 %v10312_v38 }
 0x719   :  { %v7237_v30 = vpop.eup %7236 }
 0x71a   :  { %v4213_v3 = vadd.f32 1.0, %v7237_v30  ;;  %v6416_v30 = vld [vmem:[#allocation12 + $0xe0] sm:$0xf] }
 0x71c   :  { %7238 = vrcp.f32 %v4213_v3  ;;  %4357 = vmatpush.bf16.msra.mxu0 %v10418_v19  ;;  %4383 = vmatpush.bf16.msra.mxu2 %v10419_v58  ;;  %v4225_v15 = vand.u32 2147483648, %v4213_v3  ;;  %v4223_v38 = vand.u32 2147483647, %v4213_v3  ;;  %vm4219_vm14 = vweird.f32 %v4213_v3 }
 0x71d   :  { %7240 = vtanh.f32 %v4231_v14 }
 0x71e   :  { %v4226_v58 = vor.u32 1.1754944e-38, %v4225_v15  ;;  %vm4224_vm0 = vcmp.eq.f32.partialorder %v4223_v38, 8.507059e+37  ;;  %v6908_v38 = vld [vmem:[#allocation12 + $0xcc] sm:$0xf0] }
 0x71f   :  { %4358 = vmatmul.bf16.vlgmr.msra.gmra.mxu0 %v9528_v0  ;;  %4384 = vmatmul.bf16.vlgmr.msra.gmra.mxu2 %v9528_v0 }
 0x720   :  { %4402 = vmatpush.bf16.msrb.mxu0 %v10420_v50  ;;  %4428 = vmatpush.bf16.msrb.mxu2 %v10421_v55 }
 0x722   :  { %v7239_v18 = vpop.eup %7238 }
 0x723   :  { %v4215_v56 = vmul.f32 %v7239_v18, %v4213_v3  ;;  %vm4220_vm13 = vweird.f32 %v7239_v18  ;;  %v7241_v55 = vpop.eup %7240  ;;  %v6912_v3 = vld [vmem:[#allocation12 + $0xec] sm:$0xf0] }
 0x724   :  { %4403 = vmatpush.bf16.msrb.mxu0 %v10422_v51  ;;  %4429 = vmatpush.bf16.msrb.mxu2 %v10423_v21  ;;  %vm4221_vm15 = vmor %vm4219_vm14, %vm4220_vm13 }
 0x725   :  { %v4216_v22 = vsub.f32 1.0, %v4215_v56  ;;  %v6417_v56 = vor.u32 %v6912_v3, %v6416_v30  ;;  %v6886_v30 = vld [vmem:[#allocation12 + $0x24] sm:$0xf] }
 0x727   :  { %v4217_v49 = vmul.f32 %v7239_v18, %v4216_v22  ;;  %v6418_v22 = vld [vmem:[#allocation12 + $0xf0] sm:$0xf0] }
 0x728   :  { %4404 = vmatpush.bf16.msrb.mxu0 %v10319_v42  ;;  %4430 = vmatpush.bf16.msrb.mxu2 %v10320_v4  ;;  %v10943_v4 = vld [vmem:[#allocation98_spill] sm:$0xff] }
 0x729   :  { %v4218_v19 = vadd.f32 %v7239_v18, %v4217_v49  ;;  %v6400_v49 = vld [vmem:[#allocation12 + $0xc0] sm:$0xf] }
 0x72b   :  { %v4222_v50 = vsel %vm4221_vm15, %v7239_v18, %v4218_v19  ;;  %v6910_v18 = vld [vmem:[#allocation12 + $0xe4] sm:$0xf] }
 0x72c   :  { %v4227_v9 = vsel %vm4224_vm0, %v4226_v58, %v4222_v50  ;;  %4405 = vmatpush.bf16.msrb.mxu0 %v10321_v61  ;;  %4431 = vmatpush.bf16.msrb.mxu2 %v10322_v41  ;;  %v10940_v61 = vld [vmem:[#allocation152_spill] sm:$0xff]  ;;  %v10941_v41 = vld [vmem:[#allocation154_spill] sm:$0xff]  ;;  %v6421_v15 = vor.u32 %v6910_v18, %v6418_v22  ;;  %v6401_v58 = vor.u32 %v6908_v38, %v6400_v49 }
 0x72d   :  { %v4233_v51 = vmul.f32 %v7241_v55, %v4227_v9  ;;  %v6906_v19 = vld [vmem:[#allocation12 + $0xc4] sm:$0xf]  ;;  %v6402_v50 = vld [vmem:[#allocation12 + $0xd0] sm:$0xf0]  ;;  %v6304_v49 = vld [vmem:[#allocation12] sm:$0xf] }
 0x72e   :  { %v6405_v9 = vor.u32 %v6906_v19, %v6402_v50  ;;  %v6322_v18 = vld [vmem:[#allocation12 + $0x30] sm:$0xf0]  ;;  %v6882_v38 = vld [vmem:[#allocation12 + $0x4] sm:$0xf] }
 0x72f   :  { %v9589_v21 = vsel %vm4237_vm12, %v4233_v51, %v9385_v47  ;;  %v6325_v22 = vor.u32 %v6886_v30, %v6322_v18  ;;  %v6901_v30 = vld [vmem:[#allocation12 + $0x94] sm:$0xf0] }
 0x730   :  { %v4245_v42 = vpack.c.bf16 %v9589_v21, %v9589_v21  ;;  %4406 = vmatpush.bf16.msrb.mxu0 %v8021_v27  ;;  %4432 = vmatpush.bf16.msrb.mxu2 %v10326_v63  ;;  %v10942_v27 = vld [vmem:[#allocation95_spill] sm:$0xff]  ;;  %v10944_v63 = vld [vmem:[#allocation157_spill] sm:$0xff] }
 0x732   :  { %4267 = vmatmul.bf16.vlgmr.msra.gmra.mxu1 %v4245_v42  ;;  %4293 = vmatmul.bf16.vlgmr.msra.gmra.mxu3 %v4245_v42 }
 0x733   :  { %4363 = vmatpush.bf16.msra.mxu1 %v10327_v23  ;;  %4389 = vmatpush.bf16.msra.mxu3 %v10328_v11  ;;  %v10945_v23 = vld [vmem:[#allocation160_spill] sm:$0xff]  ;;  %v10946_v11 = vld [vmem:[#allocation101_spill] sm:$0xff] }
 0x734   :  { %4407 = vmatpush.bf16.msrb.mxu0 %v10329_v5  ;;  %4433 = vmatpush.bf16.msrb.mxu2 %v10836_v53  ;;  %v10947_v5 = vld [vmem:[#allocation103_spill] sm:$0xff] }
 0x735   :  { %v10950_v53 = vld [vmem:[#allocation111_spill] sm:$0xff] }
 0x737   :  { %4364 = vmatpush.bf16.msra.mxu1 %v10331_v48  ;;  %4390 = vmatpush.bf16.msra.mxu3 %v10332_v33  ;;  %v10948_v48 = vld [vmem:[#allocation105_spill] sm:$0xff]  ;;  %v10949_v33 = vld [vmem:[#allocation108_spill] sm:$0xff] }
 0x738   :  { %4408 = vmatpush.bf16.msrb.mxu0 %v10940_v61  ;;  %4434 = vmatpush.bf16.msrb.mxu2 %v10941_v41  ;;  %v6904_v61 = vld [vmem:[#allocation12 + $0xac] sm:$0xf0]  ;;  %v6902_v41 = vld [vmem:[#allocation12 + $0xa4] sm:$0xf] }
 0x73b   :  { %4365 = vmatpush.bf16.msra.mxu1 %v10942_v27  ;;  %4391 = vmatpush.bf16.msra.mxu3 %v10943_v4  ;;  %v6386_v4 = vld [vmem:[#allocation12 + $0xb0] sm:$0xf0] }
 0x73c   :  { %4409 = vmatpush.bf16.msrb.mxu0 %v10944_v63  ;;  %4435 = vmatpush.bf16.msrb.mxu2 %v10945_v23  ;;  %v6389_v63 = vor.u32 %v6902_v41, %v6386_v4  ;;  %v6368_v23 = vld [vmem:[#allocation12 + $0x80] sm:$0xf]  ;;  %v6913_v41 = vld [vmem:[#allocation12 + $0xf4] sm:$0xf0]  ;;  %v6426_v4 = vld [vmem:[#allocation12 + $0xf8] sm:$0xf0] }
 0x73f   :  { %4366 = vmatpush.bf16.msra.mxu1 %v10946_v11  ;;  %4392 = vmatpush.bf16.msra.mxu3 %v10947_v5  ;;  %v6900_v11 = vld [vmem:[#allocation12 + $0x8c] sm:$0xf0]  ;;  %v6898_v5 = vld [vmem:[#allocation12 + $0x84] sm:$0xf] }
 0x740   :  { %4410 = vmatmul.bf16.vlgmr.msrb.gmra.mxu0 %v9528_v0  ;;  %4436 = vmatmul.bf16.vlgmr.msrb.gmra.mxu2 %v9528_v0  ;;  %v10957_v0 = vld [vmem:[#allocation126_spill] sm:$0xff] }
 0x741   :  { %5001 = vmatpush.bf16.msra.mxu0 %v6417_v56  ;;  %5027 = vmatpush.bf16.msra.mxu2 %v6421_v15 }
 0x742   :  { %4319 = vmatmul.bf16.vlgmr.msrb.gmra.mxu1 %v4245_v42  ;;  %4345 = vmatmul.bf16.vlgmr.msrb.gmra.mxu3 %v4245_v42 }
 0x743   :  { %4367 = vmatpush.bf16.msra.mxu1 %v10948_v48  ;;  %4393 = vmatpush.bf16.msra.mxu3 %v10949_v33  ;;  %v6369_v48 = vor.u32 %v6900_v11, %v6368_v23  ;;  %v6370_v33 = vld [vmem:[#allocation12 + $0x90] sm:$0xf0] }
 0x744   :  { %v10973_v11 = vld [vmem:[#allocation162_spill] sm:$0xff] }
 0x745   :  { %5002 = vmatpush.bf16.msra.mxu0 %v6401_v58  ;;  %5028 = vmatpush.bf16.msra.mxu2 %v6405_v9 }
 0x747   :  { %4368 = vmatpush.bf16.msra.mxu1 %v10950_v53  ;;  %4394 = vmatpush.bf16.msra.mxu3 %v10951_v31  ;;  %v6373_v31 = vor.u32 %v6898_v5, %v6370_v33  ;;  %v4456_v5 = vunpack.c.l.bf16 %v10973_v11 }
 0x749   :  { %5029 = vmatpush.bf16.msra.mxu2 %v6389_v63 }
 0x74b   :  { %4369 = vmatpush.bf16.msra.mxu1 %v10952_v6  ;;  %4395 = vmatpush.bf16.msra.mxu3 %v10953_v24 }
 0x74d   :  { %5030 = vmatpush.bf16.msra.mxu2 %v6373_v31  ;;  %v6909_v31 = vld [vmem:[#allocation12 + $0xd4] sm:$0xf0] }
 0x74f   :  { %4370 = vmatpush.bf16.msra.mxu1 %v10954_v43  ;;  %4396 = vmatpush.bf16.msra.mxu3 %v10955_v36  ;;  %v10972_v43 = vld [vmem:[#allocation158_spill] sm:$0xff] }
 0x750   :  { %v4454_v36 = vunpack.c.l.bf16 %v10972_v43 }
 0x752   :  { %4371 = vmatmul.bf16.vlgmr.msra.gmra.mxu1 %v4245_v42  ;;  %4397 = vmatmul.bf16.vlgmr.msra.gmra.mxu3 %v4245_v42 }
 0x753   :  { %4415 = vmatpush.bf16.msrb.mxu1 %v10956_v59  ;;  %4441 = vmatpush.bf16.msrb.mxu3 %v10957_v0  ;;  %v6352_v59 = vld [vmem:[#allocation12 + $0x60] sm:$0xf]  ;;  %v6896_v0 = vld [vmem:[#allocation12 + $0x6c] sm:$0xf0] }
 0x757   :  { %4416 = vmatpush.bf16.msrb.mxu1 %v10958_v29  ;;  %4442 = vmatpush.bf16.msrb.mxu3 %v10959_v7  ;;  %v6894_v29 = vld [vmem:[#allocation12 + $0x64] sm:$0xf]  ;;  %v6353_v7 = vor.u32 %v6896_v0, %v6352_v59  ;;  %v6410_v59 = vld [vmem:[#allocation12 + $0xd8] sm:$0xf0] }
 0x75b   :  { %4417 = vmatpush.bf16.msrb.mxu1 %v10960_v32  ;;  %4443 = vmatpush.bf16.msrb.mxu3 %v10961_v39  ;;  %v6354_v32 = vld [vmem:[#allocation12 + $0x70] sm:$0xf0] }
 0x75f   :  { %4418 = vmatpush.bf16.msrb.mxu1 %v10962_v1  ;;  %4444 = vmatpush.bf16.msrb.mxu3 %v10963_v34  ;;  %v6357_v1 = vor.u32 %v6894_v29, %v6354_v32 }
 0x761   :  { %5031 = vmatpush.bf16.msra.mxu2 %v6357_v1  ;;  %v6392_v1 = vld [vmem:[#allocation12 + $0xa8] sm:$0xf] }
 0x763   :  { %4419 = vmatpush.bf16.msrb.mxu1 %v10964_v20  ;;  %4445 = vmatpush.bf16.msrb.mxu3 %v10965_v12  ;;  %v6336_v20 = vld [vmem:[#allocation12 + $0x40] sm:$0xf]  ;;  %v6892_v12 = vld [vmem:[#allocation12 + $0x4c] sm:$0xf0] }
 0x767   :  { %4420 = vmatpush.bf16.msrb.mxu1 %v10966_v57  ;;  %4446 = vmatpush.bf16.msrb.mxu3 %v10967_v54  ;;  %v6337_v54 = vor.u32 %v6892_v12, %v6336_v20  ;;  %v4457_v12 = vunpack.c.h.bf16 %v10973_v11 }
 0x76b   :  { %4421 = vmatpush.bf16.msrb.mxu1 %v10968_v60  ;;  %4447 = vmatpush.bf16.msrb.mxu3 %v10969_v35  ;;  %v6890_v60 = vld [vmem:[#allocation12 + $0x44] sm:$0xf]  ;;  %v6338_v35 = vld [vmem:[#allocation12 + $0x50] sm:$0xf0] }
 0x76f   :  { %4422 = vmatpush.bf16.msrb.mxu1 %v10970_v25  ;;  %4448 = vmatpush.bf16.msrb.mxu3 %v10971_v45  ;;  %v4455_v45 = vunpack.c.h.bf16 %v10972_v43 }
 0x772   :  { %4423 = vmatmul.bf16.vlgmr.msrb.gmra.mxu1 %v4245_v42  ;;  %4449 = vmatmul.bf16.vlgmr.msrb.gmra.mxu3 %v4245_v42  ;;  %v6384_v42 = vld [vmem:[#allocation12 + $0xa0] sm:$0xf] }
 0x773   :  { %v6385_v27 = vor.u32 %v6904_v61, %v6384_v42  ;;  %v6424_v42 = vld [vmem:[#allocation12 + $0xe8] sm:$0xf] }
 0x775   :  { %5003 = vmatpush.bf16.msra.mxu0 %v6385_v27  ;;  %v6911_v27 = vld [vmem:[#allocation12 + $0xec] sm:$0xf] }
 0x776   :  { %v6429_v33 = vor.u32 %v6911_v27, %v6426_v4  ;;  %v6944_v27 = vld [vmem:[#allocation12 + $0x1ec] sm:$0xf0] }
 0x779   :  { %5004 = vmatpush.bf16.msra.mxu0 %v6369_v48  ;;  %v6425_v48 = vor.u32 %v6913_v41, %v6424_v42  ;;  %v6544_v41 = vld [vmem:[#allocation12 + $0x1e0] sm:$0xf]  ;;  %v6514_v42 = vld [vmem:[#allocation12 + $0x1b0] sm:$0xf0] }
 0x77a   :  { %v6545_v11 = vor.u32 %v6944_v27, %v6544_v41  ;;  %v6328_v27 = vld [vmem:[#allocation12 + $0x28] sm:$0xf] }
 0x77c   :  { %v4255_v16 = vpop.f32.mrf.mxu0  ;;  %5014 = vmatpush.bf16.msra.mxu1 %v6545_v11 }
 0x77d   :  { %5005 = vmatpush.bf16.msra.mxu0 %v6353_v7 }
 0x781   :  { %5006 = vmatpush.bf16.msra.mxu0 %v6337_v54  ;;  %v6903_v54 = vld [vmem:[#allocation12 + $0xac] sm:$0xf] }
 0x782   :  { %v9635_v2 = vpop.f32.mrf.mxu2 }
 0x784   :  { %v4257_v13 = vpop.f32.mrf.mxu0 }
 0x78a   :  { %v4283_v8 = vpop.f32.mrf.mxu2 }
 0x78c   :  { %v9637_v44 = vpop.f32.mrf.mxu0 }
 0x792   :  { %v9639_v28 = vpop.f32.mrf.mxu2 }
 0x794   :  { %v4309_v46 = vpop.f32.mrf.mxu0 }
 0x795   :  { %v6320_v46 = vld [vmem:[#allocation12 + $0x20] sm:$0xf] }
 0x79a   :  { %v4335_v14 = vpop.f32.mrf.mxu2 }
 0x79b   :  { %v6888_v14 = vld [vmem:[#allocation12 + $0x2c] sm:$0xf0] }
 0x79c   :  { %v9641_v40 = vpop.f32.mrf.mxu0  ;;  %v6321_v3 = vor.u32 %v6888_v14, %v6320_v46  ;;  %v6376_v14 = vld [vmem:[#allocation12 + $0x88] sm:$0xf] }
 0x79e   :  { %5007 = vmatpush.bf16.msra.mxu0 %v6321_v3 }
 0x7a2   :  { %v9643_v55 = vpop.f32.mrf.mxu2 }
 0x7a4   :  { %v4361_v51 = vpop.f32.mrf.mxu0 }
 0x7a5   :  { %v6306_v51 = vld [vmem:[#allocation12 + $0x10] sm:$0xf0] }
 0x7a6   :  { %v6309_v61 = vor.u32 %v6882_v38, %v6306_v51 }
 0x7aa   :  { %v4387_v53 = vpop.f32.mrf.mxu2 }
 0x7ab   :  { %v6408_v53 = vld [vmem:[#allocation12 + $0xc8] sm:$0xf] }
 0x7ac   :  { %v6409_v43 = vor.u32 %v6909_v31, %v6408_v53 }
 0x7af   :  { %v4268_v6 = vpop.f32.mrf.mxu1 }
 0x7b0   :  { %v4269_v24 = vadd.f32 %v4268_v6, %v4255_v16  ;;  %v6341_v16 = vor.u32 %v6890_v60, %v6338_v35  ;;  %v6394_v60 = vld [vmem:[#allocation12 + $0xb8] sm:$0xf0] }
 0x7b2   :  { %v4458_v39 = vadd.f32 %v4454_v36, %v4269_v24  ;;  %5032 = vmatpush.bf16.msra.mxu2 %v6341_v16  ;;  %v6907_v36 = vld [vmem:[#allocation12 + $0xcc] sm:$0xf]  ;;  %v6397_v16 = vor.u32 %v6903_v54, %v6394_v60  ;;  %v6938_v54 = vld [vmem:[#allocation12 + $0x1c4] sm:$0xf] }
 0x7b3   :  { %v6413_v7 = vor.u32 %v6907_v36, %v6410_v59  ;;  %v6360_v36 = vld [vmem:[#allocation12 + $0x68] sm:$0xf]  ;;  %v6897_v59 = vld [vmem:[#allocation12 + $0x74] sm:$0xf0] }
 0x7b4   :  { %v6296_v34 = vmul.f32 -1.442695, %v4458_v39 }
 0x7b5   :  { %v4294_v57 = vpop.f32.mrf.mxu3 }
 0x7b6   :  { %7242 = vpow2.f32 %v6296_v34  ;;  %v4295_v25 = vadd.f32 %v4294_v57, %v9635_v2  ;;  %5033 = vmatpush.bf16.msra.mxu2 %v6325_v22  ;;  %v6884_v2 = vld [vmem:[#allocation12 + $0xc] sm:$0xf0]  ;;  %v6905_v57 = vld [vmem:[#allocation12 + $0xb4] sm:$0xf0]  ;;  %v6378_v22 = vld [vmem:[#allocation12 + $0x98] sm:$0xf0] }
 0x7b7   :  { %v4270_v13 = vpop.f32.mrf.mxu1  ;;  %v6305_v9 = vor.u32 %v6884_v2, %v6304_v49 }
 0x7b8   :  { %v4459_v8 = vadd.f32 %v4455_v45, %v4295_v25  ;;  %v6393_v45 = vor.u32 %v6905_v57, %v6392_v1  ;;  %v6361_v1 = vor.u32 %v6897_v59, %v6360_v36  ;;  %v6940_v57 = vld [vmem:[#allocation12 + $0x1cc] sm:$0xf0] }
 0x7b9   :  { %5008 = vmatpush.bf16.msra.mxu0 %v6305_v9 }
 0x7ba   :  { %v6297_v56 = vmul.f32 -1.442695, %v4459_v8  ;;  %5034 = vmatpush.bf16.msra.mxu2 %v6309_v61 }
 0x7bc   :  { %v7243_v15 = vpop.eup %7242  ;;  %7244 = vpow2.f32 %v6297_v56  ;;  %v6377_v56 = vor.u32 %v6901_v30, %v6376_v14 }
 0x7bd   :  { %v9648_v19 = vadd.f32 1.0, %v7243_v15  ;;  %v4296_v58 = vpop.f32.mrf.mxu3  ;;  %v9650_v50 = vpop.f32.mrf.mxu0  ;;  %5053 = vmatpush.bf16.msrb.mxu0 %v6425_v48  ;;  %v6546_v48 = vld [vmem:[#allocation12 + $0x1f0] sm:$0xf0] }
 0x7be   :  { %5079 = vmatpush.bf16.msrb.mxu2 %v6429_v33 }
 0x7bf   :  { %7246 = vrcp.f32 %v9648_v19  ;;  %v4320_v63 = vpop.f32.mrf.mxu1  ;;  %v4483_v35 = vand.u32 2147483647, %v9648_v19  ;;  %v4485_v8 = vand.u32 2147483648, %v9648_v19  ;;  %vm4479_vm2 = vweird.f32 %v9648_v19 }
 0x7c0   :  { %v4321_v23 = vadd.f32 %v4320_v63, %v9637_v44 }
 0x7c1   :  { %5054 = vmatpush.bf16.msrb.mxu0 %v6409_v43  ;;  %vm9668_vm3 = vcmp.eq.f32.partialorder %v4483_v35, 8.507059e+37  ;;  %v4486_v51 = vor.u32 1.1754944e-38, %v4485_v8  ;;  %v6893_v8 = vld [vmem:[#allocation12 + $0x54] sm:$0xf0] }
 0x7c2   :  { %v7245_v6 = vpop.eup %7244  ;;  %v4460_v24 = vadd.f32 %v4456_v5, %v4321_v23  ;;  %5080 = vmatpush.bf16.msrb.mxu2 %v6413_v7  ;;  %v6942_v5 = vld [vmem:[#allocation12 + $0x1e4] sm:$0xf]  ;;  %v6895_v7 = vld [vmem:[#allocation12 + $0x6c] sm:$0xf] }
 0x7c3   :  { %v9655_v0 = vadd.f32 1.0, %v7245_v6  ;;  %v9657_v29 = vpop.f32.mrf.mxu2  ;;  %v10978_v6 = vld [vmem:[#allocation163_spill] sm:$0xff]  ;;  %v6549_v43 = vor.u32 %v6942_v5, %v6546_v48  ;;  %v6887_v5 = vld [vmem:[#allocation12 + $0x2c] sm:$0xf] }
 0x7c4   :  { %v6330_v48 = vld [vmem:[#allocation12 + $0x38] sm:$0xf0] }
 0x7c5   :  { %v7247_v44 = vpop.eup %7246  ;;  %7248 = vrcp.f32 %v9655_v0  ;;  %v4346_v32 = vpop.f32.mrf.mxu3  ;;  %5055 = vmatpush.bf16.msrb.mxu0 %v6393_v45  ;;  %v4502_v61 = vand.u32 2147483647, %v9655_v0  ;;  %v4504_v63 = vand.u32 2147483648, %v9655_v0  ;;  %5040 = vmatpush.bf16.msra.mxu3 %v6549_v43  ;;  %vm4498_vm6 = vweird.f32 %v9655_v0  ;;  %v6312_v43 = vld [vmem:[#allocation12 + $0x8] sm:$0xf] }
 0x7c6   :  { %v4413_v39 = vpop.f32.mrf.mxu0  ;;  %v4475_v34 = vmul.f32 %v7247_v44, %v9648_v19  ;;  %v4347_v20 = vadd.f32 %v4346_v32, %v9639_v28  ;;  %7250 = vtanh.f32 %v4460_v24  ;;  %v6899_v28 = vld [vmem:[#allocation12 + $0x8c] sm:$0xf]  ;;  %vm4480_vm1 = vweird.f32 %v7247_v44  ;;  %5081 = vmatpush.bf16.msrb.mxu2 %v6397_v16  ;;  %v6530_v16 = vld [vmem:[#allocation12 + $0x1d0] sm:$0xf0] }
 0x7c7   :  { %v4322_v25 = vpop.f32.mrf.mxu1  ;;  %v6381_v38 = vor.u32 %v6899_v28, %v6378_v22  ;;  %vm9675_vm4 = vmor %vm4479_vm2, %vm4480_vm1  ;;  %v4462_v24 = vunpack.c.l.bf16 %v10978_v6  ;;  %v6533_v14 = vor.u32 %v6938_v54, %v6530_v16  ;;  %v6891_v28 = vld [vmem:[#allocation12 + $0x4c] sm:$0xf]  ;;  %vm4503_vm8 = vcmp.eq.f32.partialorder %v4502_v61, 8.507059e+37  ;;  %v6480_v54 = vld [vmem:[#allocation12 + $0x160] sm:$0xf] }
 0x7c8   :  { %v4476_v13 = vsub.f32 1.0, %v4475_v34  ;;  %v4461_v46 = vadd.f32 %v4457_v12, %v4347_v20  ;;  %v6362_v34 = vld [vmem:[#allocation12 + $0x78] sm:$0xf0]  ;;  %v6528_v12 = vld [vmem:[#allocation12 + $0x1c0] sm:$0xf] }
 0x7c9   :  { %5056 = vmatpush.bf16.msrb.mxu0 %v6377_v56  ;;  %v6365_v20 = vor.u32 %v6895_v7, %v6362_v34  ;;  %v6529_v45 = vor.u32 %v6940_v57, %v6528_v12  ;;  %5041 = vmatpush.bf16.msra.mxu3 %v6533_v14  ;;  %v6885_v7 = vld [vmem:[#allocation12 + $0x14] sm:$0xf0]  ;;  %v6482_v16 = vld [vmem:[#allocation12 + $0x170] sm:$0xf0] }
 0x7ca   :  { %v4477_v3 = vmul.f32 %v7247_v44, %v4476_v13  ;;  %v6298_v18 = vmul.f32 -1.442695, %v4461_v46  ;;  %5082 = vmatpush.bf16.msrb.mxu2 %v6381_v38  ;;  %v6344_v13 = vld [vmem:[#allocation12 + $0x48] sm:$0xf]  ;;  %v6936_v38 = vld [vmem:[#allocation12 + $0x1ac] sm:$0xf0]  ;;  %v6313_v34 = vor.u32 %v6885_v7, %v6312_v43 }
 0x7cb   :  { %v9665_v15 = vpop.eup %7248  ;;  %v4439_v2 = vpop.f32.mrf.mxu2  ;;  %v6345_v30 = vor.u32 %v6893_v8, %v6344_v13  ;;  %5015 = vmatpush.bf16.msra.mxu1 %v6529_v45  ;;  %v6926_v45 = vld [vmem:[#allocation12 + $0x164] sm:$0xf]  ;;  %v6943_v7 = vld [vmem:[#allocation12 + $0x1ec] sm:$0xf] }
 0x7cc   :  { %v4494_v58 = vmul.f32 %v9665_v15, %v9655_v0  ;;  %v4478_v9 = vadd.f32 %v7247_v44, %v4477_v3  ;;  %7252 = vpow2.f32 %v6298_v18  ;;  %v7251_v33 = vpop.eup %7250  ;;  %vm4499_vm5 = vweird.f32 %v9665_v15  ;;  %v6346_v3 = vld [vmem:[#allocation12 + $0x58] sm:$0xf0]  ;;  %v6512_v2 = vld [vmem:[#allocation12 + $0x1a0] sm:$0xf] }
 0x7cd   :  { %v4348_v19 = vpop.f32.mrf.mxu3  ;;  %5057 = vmatpush.bf16.msrb.mxu0 %v6361_v1  ;;  %vm4500_vm7 = vmor %vm4498_vm6, %vm4499_vm5  ;;  %v6349_v56 = vor.u32 %v6891_v28, %v6346_v3  ;;  %v6924_v28 = vld [vmem:[#allocation12 + $0x14c] sm:$0xf0] }
 0x7ce   :  { %v4495_v4 = vsub.f32 1.0, %v4494_v58  ;;  %v4482_v23 = vsel %vm9675_vm4, %v7247_v44, %v4478_v9  ;;  %5083 = vmatpush.bf16.msrb.mxu2 %v6365_v20  ;;  %v6513_v19 = vor.u32 %v6936_v38, %v6512_v2 }
 0x7cf   :  { %v4487_v53 = vsel %vm9668_vm3, %v4486_v51, %v4482_v23  ;;  %v4372_v31 = vpop.f32.mrf.mxu1  ;;  %v4463_v51 = vunpack.c.h.bf16 %v10978_v6 }
 0x7d0   :  { %v4496_v44 = vmul.f32 %v9665_v15, %v4495_v4  ;;  %v4529_v32 = vmul.f32 %v7251_v33, %v4487_v53  ;;  %v4373_v39 = vadd.f32 %v4372_v31, %v9641_v40  ;;  %v4505_v40 = vor.u32 1.1754944e-38, %v4504_v63  ;;  %v6889_v4 = vld [vmem:[#allocation12 + $0x34] sm:$0xf0]  ;;  %5016 = vmatpush.bf16.msra.mxu1 %v6513_v19  ;;  %v6932_v33 = vld [vmem:[#allocation12 + $0x18c] sm:$0xf0] }
 0x7d1   :  { %5058 = vmatpush.bf16.msrb.mxu0 %v6345_v30  ;;  %v6329_v11 = vor.u32 %v6889_v4, %v6328_v27  ;;  %v6930_v53 = vld [vmem:[#allocation12 + $0x184] sm:$0xf]  ;;  %v6464_v30 = vld [vmem:[#allocation12 + $0x140] sm:$0xf] }
 0x7d2   :  { %v7253_v60 = vpop.eup %7252  ;;  %v4497_v35 = vadd.f32 %v9665_v15, %v4496_v44  ;;  %v4466_v25 = vadd.f32 %v4462_v24, %v4373_v39  ;;  %5084 = vmatpush.bf16.msrb.mxu2 %v6349_v56  ;;  %v6498_v24 = vld [vmem:[#allocation12 + $0x190] sm:$0xf0]  ;;  %v6883_v44 = vld [vmem:[#allocation12 + $0xc] sm:$0xf]  ;;  %v6922_v56 = vld [vmem:[#allocation12 + $0x144] sm:$0xf] }
 0x7d3   :  { %v9693_v46 = vadd.f32 1.0, %v7253_v60  ;;  %v6501_v59 = vor.u32 %v6930_v53, %v6498_v24  ;;  %v6928_v60 = vld [vmem:[#allocation12 + $0x16c] sm:$0xf0]  ;;  %v6918_v19 = vld [vmem:[#allocation12 + $0x124] sm:$0xf] }
 0x7d4   :  { %v4501_v0 = vsel %vm4500_vm7, %v9665_v15, %v4497_v35  ;;  %v6299_v18 = vmul.f32 -1.442695, %v4466_v25  ;;  %v6934_v15 = vld [vmem:[#allocation12 + $0x1a4] sm:$0xf]  ;;  %v6481_v25 = vor.u32 %v6928_v60, %v6480_v54  ;;  %v6434_v53 = vld [vmem:[#allocation12 + $0x110] sm:$0xf0] }
 0x7d5   :  { %v4506_v22 = vsel %vm4503_vm8, %v4505_v40, %v4501_v0  ;;  %7254 = vrcp.f32 %v9693_v46  ;;  %v4398_v49 = vpop.f32.mrf.mxu3  ;;  %v6517_v41 = vor.u32 %v6934_v15, %v6514_v42  ;;  %5059 = vmatpush.bf16.msrb.mxu0 %v6329_v11  ;;  %v4524_v13 = vand.u32 2147483648, %v9693_v46  ;;  %v10979_v11 = vld [vmem:[#allocation115_spill] sm:$0xff]  ;;  %v10980_v60 = vld [vmem:[#allocation164_spill] sm:$0xff] }
 0x7d6   :  { %v4528_v58 = vmul.f32 %v4506_v22, %v9522_v62  ;;  %7256 = vpow2.f32 %v6299_v18  ;;  %v4399_v9 = vadd.f32 %v4398_v49, %v9643_v55  ;;  %v6333_v62 = vor.u32 %v6887_v5, %v6330_v48  ;;  %v6496_v55 = vld [vmem:[#allocation12 + $0x180] sm:$0xf]  ;;  %v6466_v22 = vld [vmem:[#allocation12 + $0x150] sm:$0xf0] }
 0x7d7   :  { %v4374_v61 = vpop.f32.mrf.mxu1  ;;  %5042 = vmatpush.bf16.msra.mxu3 %v6517_v41  ;;  %v6497_v6 = vor.u32 %v6932_v33, %v6496_v55  ;;  %v6485_v40 = vor.u32 %v6926_v45, %v6482_v16  ;;  %v4522_v14 = vand.u32 2147483647, %v9693_v46  ;;  %vm4518_vm10 = vweird.f32 %v9693_v46  ;;  %v6450_v41 = vld [vmem:[#allocation12 + $0x130] sm:$0xf0]  ;;  %v6432_v48 = vld [vmem:[#allocation12 + $0x100] sm:$0xf] }
 0x7d8   :  { %v4530_v63 = vadd.f32 %v4529_v32, %v4528_v58  ;;  %v4467_v23 = vadd.f32 %v4463_v51, %v4399_v9  ;;  %5085 = vmatpush.bf16.msrb.mxu2 %v6333_v62  ;;  %v6314_v32 = vld [vmem:[#allocation12 + $0x18] sm:$0xf0]  ;;  %v6465_v18 = vor.u32 %v6924_v28, %v6464_v30  ;;  %v6469_v2 = vor.u32 %v6922_v56, %v6466_v22  ;;  %v6448_v51 = vld [vmem:[#allocation12 + $0x120] sm:$0xf]  ;;  %v6920_v61 = vld [vmem:[#allocation12 + $0x12c] sm:$0xf0] }
 0x7d9   :  { %5017 = vmatpush.bf16.msra.mxu1 %v6497_v6  ;;  %v6317_v57 = vor.u32 %v6883_v44, %v6314_v32  ;;  %5060 = vmatpush.bf16.msrb.mxu0 %v6313_v34  ;;  %v4525_v38 = vor.u32 1.1754944e-38, %v4524_v13  ;;  %vm4523_vm12 = vcmp.eq.f32.partialorder %v4522_v14, 8.507059e+37  ;;  %v6449_v4 = vor.u32 %v6920_v61, %v6448_v51  ;;  %v6916_v62 = vld [vmem:[#allocation12 + $0x10c] sm:$0xf0]  ;;  %v6914_v55 = vld [vmem:[#allocation12 + $0x104] sm:$0xf] }
 0x7da   :  { %v6300_v31 = vmul.f32 -1.442695, %v4467_v23  ;;  %v6453_v23 = vor.u32 %v6918_v19, %v6450_v41  ;;  %v6433_v33 = vor.u32 %v6916_v62, %v6432_v48  ;;  %v6945_v6 = vld [vmem:[#allocation12 + $0x1f4] sm:$0xf0]  ;;  %v6554_v44 = vld [vmem:[#allocation12 + $0x1f8] sm:$0xf0]  ;;  %v6541_v14 = vor.u32 %v6939_v10, %v6538_v52 }
 0x7db   :  { %v7255_v36 = vpop.eup %7254  ;;  %5043 = vmatpush.bf16.msra.mxu3 %v6501_v59  ;;  %v6536_v32 = vld [vmem:[#allocation12 + $0x1c8] sm:$0xf]  ;;  %v6937_v22 = vld [vmem:[#allocation12 + $0x1b4] sm:$0xf0]  ;;  %v4465_v51 = vunpack.c.h.bf16 %v10980_v60  ;;  %v6919_v10 = vld [vmem:[#allocation12 + $0x12c] sm:$0xf] }
 0x7dc   :  { %v7257_v39 = vpop.eup %7256  ;;  %v4514_v1 = vmul.f32 %v7255_v36, %v9693_v46  ;;  %7258 = vpow2.f32 %v6300_v31  ;;  %5086 = vmatpush.bf16.msrb.mxu2 %v6317_v57  ;;  %vm4519_vm9 = vweird.f32 %v7255_v36  ;;  %v6552_v31 = vld [vmem:[#allocation12 + $0x1e8] sm:$0xf]  ;;  %v6941_v57 = vld [vmem:[#allocation12 + $0x1d4] sm:$0xf0]  ;;  %v6458_v52 = vld [vmem:[#allocation12 + $0x138] sm:$0xf0] }
 0x7dd   :  { %v9701_v20 = vadd.f32 1.0, %v7257_v39  ;;  %v4400_v12 = vpop.f32.mrf.mxu3  ;;  %5018 = vmatpush.bf16.msra.mxu1 %v6481_v25  ;;  %vm4520_vm11 = vmor %vm4518_vm10, %vm4519_vm9  ;;  %v6553_v59 = vor.u32 %v6945_v6, %v6552_v31  ;;  %v6537_v45 = vor.u32 %v6941_v57, %v6536_v32  ;;  %v6520_v56 = vld [vmem:[#allocation12 + $0x1a8] sm:$0xf]  ;;  %v6925_v32 = vld [vmem:[#allocation12 + $0x154] sm:$0xf0] }
 0x7de   :  { %v4515_v35 = vsub.f32 1.0, %v4514_v1  ;;  %v6557_v12 = vor.u32 %v6943_v7, %v6554_v44  ;;  %v6472_v44 = vld [vmem:[#allocation12 + $0x148] sm:$0xf] }
 0x7df   :  { %7260 = vrcp.f32 %v9701_v20  ;;  %5044 = vmatpush.bf16.msra.mxu3 %v6485_v40  ;;  %vm4542_vm14 = vweird.f32 %v9701_v20  ;;  %v4546_v28 = vand.u32 2147483647, %v9701_v20  ;;  %v6456_v57 = vld [vmem:[#allocation12 + $0x128] sm:$0xf] }
 0x7e0   :  { %7262 = vtanh.f32 %v4530_v63  ;;  %v4516_v8 = vmul.f32 %v7255_v36, %v4515_v35  ;;  %v4464_v35 = vunpack.c.l.bf16 %v10980_v60 }
 0x7e1   :  { %5019 = vmatpush.bf16.msra.mxu1 %v6465_v18  ;;  %vm4547_vm4 = vcmp.eq.f32.partialorder %v4546_v28, 8.507059e+37  ;;  %v10984_v28 = vld [vmem:[#allocation106_spill] sm:$0xff] }
 0x7e2   :  { %v7259_v3 = vpop.eup %7258  ;;  %v4517_v0 = vadd.f32 %v7255_v36, %v4516_v8 }
 0x7e3   :  { %v9707_v49 = vadd.f32 1.0, %v7259_v3  ;;  %5045 = vmatpush.bf16.msra.mxu3 %v6469_v2  ;;  %v4548_v3 = vand.u32 2147483648, %v9701_v20  ;;  %v6935_v2 = vld [vmem:[#allocation12 + $0x1ac] sm:$0xf] }
 0x7e4   :  { %v4521_v58 = vsel %vm4520_vm11, %v7255_v36, %v4517_v0  ;;  %v6437_v36 = vor.u32 %v6914_v55, %v6434_v53 }
 0x7e5   :  { %v9709_v9 = vpop.eup %7260  ;;  %7264 = vrcp.f32 %v9707_v49  ;;  %v4526_v42 = vsel %vm4523_vm12, %v4525_v38, %v4521_v58  ;;  %5020 = vmatpush.bf16.msra.mxu1 %v6449_v4  ;;  %v4567_v16 = vand.u32 2147483648, %v9707_v49  ;;  %vm4561_vm1 = vweird.f32 %v9707_v49 }
 0x7e6   :  { %v7263_v15 = vpop.eup %7262  ;;  %v4538_v46 = vmul.f32 %v9709_v9, %v9701_v20  ;;  %vm4543_vm13 = vweird.f32 %v9709_v9  ;;  %v4549_v19 = vor.u32 1.1754944e-38, %v4548_v3  ;;  %v2396_v3 = vadd.f32 %v9318_v26, %v10984_v28 }
 0x7e7   :  { %v4532_v27 = vmul.f32 %v7263_v15, %v4526_v42  ;;  %5046 = vmatpush.bf16.msra.mxu3 %v6453_v23  ;;  %vm9733_vm0 = vmor %vm4542_vm14, %vm4543_vm13  ;;  %v4568_v38 = vor.u32 1.1754944e-38, %v4567_v16  ;;  %v6521_v15 = vor.u32 %v6937_v22, %v6520_v56  ;;  %v6931_v23 = vld [vmem:[#allocation12 + $0x18c] sm:$0xf]  ;;  %v6917_v16 = vld [vmem:[#allocation12 + $0x114] sm:$0xf0] }
 0x7e8   :  { %v4539_v63 = vsub.f32 1.0, %v4538_v46  ;;  %v6522_v46 = vld [vmem:[#allocation12 + $0x1b8] sm:$0xf0]  ;;  %v10985_v22 = vld [vmem:[#allocation112_spill] sm:$0xff] }
 0x7e9   :  { %v4601_v5 = vadd.f32 %v4532_v27, %v10979_v11  ;;  %5021 = vmatpush.bf16.msra.mxu1 %v6433_v33  ;;  %v6525_v61 = vor.u32 %v6935_v2, %v6522_v46  ;;  %v10986_v2 = vld [vmem:[#allocation144_spill] sm:$0xff]  ;;  %v10988_v46 = vld [vmem:[#allocation138_spill] sm:$0xff] }
 0x7ea   :  { %v4540_v34 = vmul.f32 %v9709_v9, %v4539_v63  ;;  %v6933_v63 = vld [vmem:[#allocation12 + $0x194] sm:$0xf0] }
 0x7eb   :  { %v7265_v24 = vpop.eup %7264  ;;  %v4602_v43 = vmax.f32 %v4241_v37, %v4601_v5  ;;  %5047 = vmatpush.bf16.msra.mxu3 %v6437_v36  ;;  %v6927_v36 = vld [vmem:[#allocation12 + $0x16c] sm:$0xf] }
 0x7ec   :  { %v4557_v39 = vmul.f32 %v7265_v24, %v9707_v49  ;;  %vm4562_vm15 = vweird.f32 %v7265_v24  ;;  %v4541_v40 = vadd.f32 %v9709_v9, %v4540_v34  ;;  %v6473_v34 = vor.u32 %v6925_v32, %v6472_v44  ;;  %v6952_v44 = vld [vmem:[#allocation14 + $0x30] sm:$0xff]  ;;  %v6961_v32 = vld [vmem:[#allocation14 + $0x78] sm:$0xff] }
 0x7ed   :  { %v9722_v25 = vpack.c.bf16 %v4602_v43, %v4602_v43  ;;  %5066 = vmatpush.bf16.msrb.mxu1 %v6553_v59  ;;  %vm4563_vm2 = vmor %vm4561_vm1, %vm4562_vm15  ;;  %v6929_v43 = vld [vmem:[#allocation12 + $0x174] sm:$0xf0]  ;;  %v6490_v59 = vld [vmem:[#allocation12 + $0x178] sm:$0xf0] }
 0x7ee   :  { %v4558_v37 = vsub.f32 1.0, %v4557_v39  ;;  %v4545_v20 = vsel %vm9733_vm0, %v9709_v9, %v4541_v40  ;;  %v6506_v9 = vld [vmem:[#allocation12 + $0x198] sm:$0xf0]  ;;  %v6493_v7 = vor.u32 %v6927_v36, %v6490_v59  ;;  %v6923_v39 = vld [vmem:[#allocation12 + $0x14c] sm:$0xf]  ;;  %v10993_v36 = vld [vmem:[#allocation102_spill] sm:$0xff] }
 0x7ef   :  { %v4424_v1 = vpop.f32.mrf.mxu1  ;;  %5009 = vmatmul.bf16.vlgmr.msra.gmra.mxu0 %v9722_v25  ;;  %5035 = vmatmul.bf16.vlgmr.msra.gmra.mxu2 %v9722_v25  ;;  %v4550_v48 = vsel %vm4547_vm4, %v4549_v19, %v4545_v20  ;;  %v6509_v53 = vor.u32 %v6931_v23, %v6506_v9  ;;  %v10983_v40 = vld [vmem:[#allocation89_spill] sm:$0xff]  ;;  %v10992_v9 = vld [vmem:[#allocation104_spill] sm:$0xff] }
 0x7f0   :  { %v4425_v54 = vadd.f32 %v4424_v1, %v9650_v50  ;;  %v4565_v50 = vand.u32 2147483647, %v9707_v49  ;;  %v4559_v8 = vmul.f32 %v7265_v24, %v4558_v37  ;;  %5092 = vmatpush.bf16.msrb.mxu3 %v6557_v12  ;;  %v6474_v1 = vld [vmem:[#allocation12 + $0x158] sm:$0xf0]  ;;  %v10990_v19 = vld [vmem:[#allocation141_spill] sm:$0xff] }
 0x7f1   :  { %5067 = vmatpush.bf16.msrb.mxu1 %v6537_v45  ;;  %v6440_v45 = vld [vmem:[#allocation12 + $0x108] sm:$0xf] }
 0x7f2   :  { %v4468_v13 = vadd.f32 %v4464_v35, %v4425_v54  ;;  %v4560_v0 = vadd.f32 %v7265_v24, %v4559_v8  ;;  %vm4566_vm3 = vcmp.eq.f32.partialorder %v4565_v50, 8.507059e+37  ;;  %v6921_v54 = vld [vmem:[#allocation12 + $0x134] sm:$0xf0]  ;;  %v6477_v35 = vor.u32 %v6923_v39, %v6474_v1  ;;  %v6915_v50 = vld [vmem:[#allocation12 + $0x10c] sm:$0xf]  ;;  %v6960_v1 = vld [vmem:[#allocation14 + $0x70] sm:$0xff] }
 0x7f3   :  { %v6457_v37 = vor.u32 %v6921_v54, %v6456_v57  ;;  %v6442_v8 = vld [vmem:[#allocation12 + $0x118] sm:$0xf0]  ;;  %v6951_v39 = vld [vmem:[#allocation14 + $0x28] sm:$0xff] }
 0x7f4   :  { %7266 = vtanh.f32 %v4468_v13  ;;  %v4564_v49 = vsel %vm4563_vm2, %v7265_v24, %v4560_v0  ;;  %5093 = vmatpush.bf16.msrb.mxu3 %v6541_v14  ;;  %v6488_v24 = vld [vmem:[#allocation12 + $0x168] sm:$0xf]  ;;  %v6461_v13 = vor.u32 %v6919_v10, %v6458_v52  ;;  %v2016_v14 = vadd.f32 %v10979_v11, %v10983_v40  ;;  %v6977_v54 = vld [vmem:[#allocation14 + $0xf8] sm:$0xff]  ;;  %v6958_v10 = vld [vmem:[#allocation14 + $0x60] sm:$0xff] }
 0x7f5   :  { %v4450_v18 = vpop.f32.mrf.mxu3  ;;  %v4569_v41 = vsel %vm4566_vm3, %v4568_v38, %v4564_v49  ;;  %5068 = vmatpush.bf16.msrb.mxu1 %v6521_v15  ;;  %v6445_v0 = vor.u32 %v6915_v50, %v6442_v8  ;;  %v2776_v38 = vadd.f32 %v10986_v2, %v10985_v22  ;;  %v10987_v15 = vld [vmem:[#allocation135_spill] sm:$0xff]  ;;  %v6948_v52 = vld [vmem:[#allocation14 + $0x10] sm:$0xff]  ;;  %v6967_v50 = vld [vmem:[#allocation14 + $0xa8] sm:$0xff] }
 0x7f6   :  { %v4451_v58 = vadd.f32 %v4450_v18, %v9657_v29  ;;  %v4591_v4 = vmul.f32 %v4569_v41, %v9568_v17  ;;  %v6504_v29 = vld [vmem:[#allocation12 + $0x188] sm:$0xf]  ;;  %v6489_v17 = vor.u32 %v6929_v43, %v6488_v24  ;;  %v2017_v56 = vmax.f32 %v2016_v14, -1e+30  ;;  %v6956_v8 = vld [vmem:[#allocation14 + $0x50] sm:$0xff]  ;;  %v6974_v22 = vld [vmem:[#allocation14 + $0xe0] sm:$0xff] }
 0x7f7   :  { %v4426_v42 = vpop.f32.mrf.mxu1  ;;  %v6505_v55 = vor.u32 %v6933_v63, %v6504_v29  ;;  %v3156_v20 = vadd.f32 %v10988_v46, %v10987_v15  ;;  %v10991_v63 = vld [vmem:[#allocation110_spill] sm:$0xff]  ;;  %v6963_v15 = vld [vmem:[#allocation14 + $0x88] sm:$0xff] }
 0x7f8   :  { %v4469_v27 = vadd.f32 %v4465_v51, %v4451_v58  ;;  %5094 = vmatpush.bf16.msrb.mxu3 %v6525_v61  ;;  %v2397_v51 = vmax.f32 %v2017_v56, %v2396_v3  ;;  %v10989_v61 = vld [vmem:[#allocation133_spill] sm:$0xff]  ;;  %v3880_v23 = vadd.f32 %v9385_v47, %v10991_v63  ;;  %v6976_v40 = vld [vmem:[#allocation14 + $0xf0] sm:$0xff]  ;;  %v6954_v56 = vld [vmem:[#allocation14 + $0x40] sm:$0xff] }
 0x7f9   :  { %5069 = vmatpush.bf16.msrb.mxu1 %v6505_v55  ;;  %v3518_v41 = vadd.f32 %v10990_v19, %v10989_v61  ;;  %v6955_v3 = vld [vmem:[#allocation14 + $0x48] sm:$0xff]  ;;  %v6972_v46 = vld [vmem:[#allocation14 + $0xd0] sm:$0xff] }
 0x7fa   :  { %v7267_v5 = vpop.eup %7266  ;;  %v6301_v62 = vmul.f32 -1.442695, %v4469_v27  ;;  %v2777_v26 = vmax.f32 %v2397_v51, %v2776_v38  ;;  %v4598_v27 = vpop.permute.xlu2 %4597  ;;  %v6964_v38 = vld [vmem:[#allocation14 + $0x90] sm:$0xff]  ;;  %v6973_v51 = vld [vmem:[#allocation14 + $0xd8] sm:$0xff] }
 0x7fb   :  { %v4592_v33 = vmul.f32 %v7267_v5, %v4550_v48  ;;  %vm4599_vm9 = vcmp.eq.s32.totalorder %v4598_v27, 1 }
 0x7fc   :  { %7268 = vpow2.f32 %v6301_v62  ;;  %5095 = vmatpush.bf16.msrb.mxu3 %v6509_v53  ;;  %v3157_v29 = vmax.f32 %v2777_v26, %v3156_v20  ;;  %v6970_v26 = vld [vmem:[#allocation14 + $0xc0] sm:$0xff] }
 0x7fd   :  { %v4593_v31 = vadd.f32 %v4592_v33, %v4591_v4  ;;  %v4452_v6 = vpop.f32.mrf.mxu3  ;;  %5070 = vmatpush.bf16.msrb.mxu1 %v6489_v17  ;;  %v4242_v33 = vadd.f32 %v9589_v21, %v10992_v9 }
 0x7fe   :  { %v3519_v55 = vmax.f32 %v3157_v29, %v3518_v41 }
 0x7ff   :  { %5061 = vmatmul.bf16.vlgmr.msrb.gmra.mxu0 %v9722_v25  ;;  %5087 = vmatmul.bf16.vlgmr.msrb.gmra.mxu2 %v9722_v25  ;;  %v6441_v25 = vor.u32 %v6917_v16, %v6440_v45  ;;  %v6957_v45 = vld [vmem:[#allocation14 + $0x58] sm:$0xff] }
 0x800   :  { %5096 = vmatpush.bf16.msrb.mxu3 %v6493_v7  ;;  %v3881_v6 = vmax.f32 %v3519_v55, %v3880_v23  ;;  %v6953_v7 = vld [vmem:[#allocation14 + $0x38] sm:$0xff] }
 0x801   :  { %5071 = vmatpush.bf16.msrb.mxu1 %v6473_v34  ;;  %5373 = vmatpush.bf16.msra.mxu0 %v6953_v7  ;;  %v6950_v34 = vld [vmem:[#allocation14 + $0x20] sm:$0xff] }
 0x802   :  { %v7269_v12 = vpop.eup %7268  ;;  %v4243_v43 = vmax.f32 %v3881_v6, %v4242_v33 }
 0x803   :  { %v4575_v60 = vadd.f32 1.0, %v7269_v12  ;;  %v6969_v12 = vld [vmem:[#allocation14 + $0xb8] sm:$0xff] }
 0x804   :  { %5097 = vmatpush.bf16.msrb.mxu3 %v6477_v35  ;;  %5399 = vmatpush.bf16.msra.mxu2 %v6969_v12  ;;  %v6968_v35 = vld [vmem:[#allocation14 + $0xb0] sm:$0xff] }
 0x805   :  { %7270 = vrcp.f32 %v4575_v60  ;;  %5072 = vmatpush.bf16.msrb.mxu1 %v6457_v37  ;;  %v4587_v11 = vand.u32 2147483648, %v4575_v60  ;;  %v4585_v42 = vand.u32 2147483647, %v4575_v60  ;;  %vm4581_vm6 = vweird.f32 %v4575_v60  ;;  %5374 = vmatpush.bf16.msra.mxu0 %v6952_v44 }
 0x806   :  { %7272 = vtanh.f32 %v4593_v31 }
 0x807   :  { %v4588_v5 = vor.u32 1.1754944e-38, %v4587_v11  ;;  %vm4586_vm8 = vcmp.eq.f32.partialorder %v4585_v42, 8.507059e+37  ;;  %v6962_v11 = vld [vmem:[#allocation14 + $0x80] sm:$0xff]  ;;  %v4671_v42 = vld [vmem:[%s9780_s6] sm:$0xf] }
 0x808   :  { %5098 = vmatpush.bf16.msrb.mxu3 %v6461_v13  ;;  %5400 = vmatpush.bf16.msra.mxu2 %v6968_v35  ;;  %v6947_v13 = vld [vmem:[#allocation14 + $0x8] sm:$0xff]  ;;  %v4673_v61 = vperm.slane %v4671_v42, 0  ;;  %v4674_v27 = vperm.slane %v4671_v42, 1  ;;  %v4675_v9 = vperm.slane %v4671_v42, 2 }
 0x809   :  { %5073 = vmatpush.bf16.msrb.mxu1 %v6441_v25  ;;  %5375 = vmatpush.bf16.msra.mxu0 %v6951_v39  ;;  %v6946_v25 = vld [vmem:[#allocation14] sm:$0xff] }
 0x80b   :  { %v7271_v30 = vpop.eup %7270 }
 0x80c   :  { %v4577_v18 = vmul.f32 %v7271_v30, %v4575_v60  ;;  %5099 = vmatpush.bf16.msrb.mxu3 %v6445_v0  ;;  %vm4582_vm5 = vweird.f32 %v7271_v30  ;;  %v7273_v62 = vpop.eup %7272  ;;  %v6949_v60 = vld [vmem:[#allocation14 + $0x18] sm:$0xff]  ;;  %5401 = vmatpush.bf16.msra.mxu2 %v6967_v50  ;;  %v6975_v0 = vld [vmem:[#allocation14 + $0xe8] sm:$0xff] }
 0x80d   :  { %vm4583_vm7 = vmor %vm4581_vm6, %vm4582_vm5  ;;  %5376 = vmatpush.bf16.msra.mxu0 %v6950_v34 }
 0x80e   :  { %v4578_v58 = vsub.f32 1.0, %v4577_v18  ;;  %v6965_v18 = vld [vmem:[#allocation14 + $0x98] sm:$0xff] }
 0x810   :  { %v4579_v49 = vmul.f32 %v7271_v30, %v4578_v58 }
 0x811   :  { %5377 = vmatpush.bf16.msra.mxu0 %v6949_v60 }
 0x812   :  { %v4580_v4 = vadd.f32 %v7271_v30, %v4579_v49  ;;  %v6971_v49 = vld [vmem:[#allocation14 + $0xc8] sm:$0xff] }
 0x814   :  { %v4584_v48 = vsel %vm4583_vm7, %v7271_v30, %v4580_v4  ;;  %v6966_v30 = vld [vmem:[#allocation14 + $0xa0] sm:$0xff] }
 0x815   :  { %v4589_v53 = vsel %vm4586_vm8, %v4588_v5, %v4584_v48  ;;  %5378 = vmatpush.bf16.msra.mxu0 %v6948_v52  ;;  %5402 = vmatpush.bf16.msra.mxu2 %v6966_v30 }
 0x816   :  { %v4595_v31 = vmul.f32 %v7273_v62, %v4589_v53 }
 0x818   :  { %v4600_v24 = vsel %vm4599_vm9, %v4595_v31, %v9589_v21  ;;  %v6959_v21 = vld [vmem:[#allocation14 + $0x68] sm:$0xff] }
 0x819   :  { %v4603_v17 = vadd.f32 %v4600_v24, %v10993_v36  ;;  %5379 = vmatpush.bf16.msra.mxu0 %v6947_v13  ;;  %5403 = vmatpush.bf16.msra.mxu2 %v6965_v18  ;;  %v4676_v24 = vperm.slane %v4671_v42, 3 }
 0x81b   :  { %v4604_v59 = vmax.f32 %v4243_v43, %v4603_v17 }
 0x81d   :  { %v4606_v47 = vpack.c.bf16 %v4604_v59, %v4604_v59  ;;  %5380 = vmatpush.bf16.msra.mxu0 %v6946_v25  ;;  %5404 = vmatpush.bf16.msra.mxu2 %v6964_v38 }
 0x81f   :  { %5022 = vmatmul.bf16.vlgmr.msra.gmra.mxu1 %v4606_v47  ;;  %5048 = vmatmul.bf16.vlgmr.msra.gmra.mxu3 %v4606_v47 }
 0x820   :  { %5386 = vmatpush.bf16.msra.mxu1 %v6961_v32  ;;  %5412 = vmatpush.bf16.msra.mxu3 %v6977_v54  ;;  %v7017_v54 = vld [vmem:[%s9782_s8] ss:$0 sm:$0xff] }
 0x821   :  { %5405 = vmatpush.bf16.msra.mxu2 %v6963_v15 }
 0x824   :  { %5387 = vmatpush.bf16.msra.mxu1 %v6960_v1  ;;  %5413 = vmatpush.bf16.msra.mxu3 %v6976_v40 }
 0x825   :  { %5406 = vmatpush.bf16.msra.mxu2 %v6962_v11 }
 0x828   :  { %5388 = vmatpush.bf16.msra.mxu1 %v6959_v21  ;;  %5414 = vmatpush.bf16.msra.mxu3 %v6975_v0 }
 0x82c   :  { %5389 = vmatpush.bf16.msra.mxu1 %v6958_v10  ;;  %5415 = vmatpush.bf16.msra.mxu3 %v6974_v22 }
 0x82f   :  { %5074 = vmatmul.bf16.vlgmr.msrb.gmra.mxu1 %v4606_v47  ;;  %5100 = vmatmul.bf16.vlgmr.msrb.gmra.mxu3 %v4606_v47 }
 0x830   :  { %5390 = vmatpush.bf16.msra.mxu1 %v6957_v45  ;;  %5416 = vmatpush.bf16.msra.mxu3 %v6973_v51 }
 0x834   :  { %5391 = vmatpush.bf16.msra.mxu1 %v6956_v8  ;;  %5417 = vmatpush.bf16.msra.mxu3 %v6972_v46 }
 0x838   :  { %5392 = vmatpush.bf16.msra.mxu1 %v6955_v3  ;;  %5418 = vmatpush.bf16.msra.mxu3 %v6971_v49 }
 0x83c   :  { %5393 = vmatpush.bf16.msra.mxu1 %v6954_v56  ;;  %5419 = vmatpush.bf16.msra.mxu3 %v6970_v26 }
 0x86c   :  { %v5010_v57 = vpop.f32.mrf.mxu0 }
 0x86d   :  { %v5011_v19 = vadd.f32 %v5010_v57, %v4673_v61 }
 0x872   :  { %v5036_v37 = vpop.f32.mrf.mxu2 }
 0x873   :  { %v5037_v63 = vadd.f32 %v5036_v37, %v4674_v27 }
 0x874   :  { %v5012_v16 = vpop.f32.mrf.mxu0 }
 0x87a   :  { %v5038_v14 = vpop.f32.mrf.mxu2 }
 0x87c   :  { %v5062_v28 = vpop.f32.mrf.mxu0 }
 0x87d   :  { %v5063_v31 = vadd.f32 %v5062_v28, %v4675_v9 }
 0x882   :  { %v5088_v2 = vpop.f32.mrf.mxu2 }
 0x883   :  { %v5089_v17 = vadd.f32 %v5088_v2, %v4676_v24 }
 0x884   :  { %v5064_v58 = vpop.f32.mrf.mxu0 }
 0x88a   :  { %v5090_v20 = vpop.f32.mrf.mxu2 }
 0x89c   :  { %v5023_v41 = vpop.f32.mrf.mxu1 }
 0x89d   :  { %v5024_v4 = vadd.f32 %v5023_v41, %v5011_v19 }
 0x89f   :  { %v5105_v29 = vmax.f32 %v5024_v4, 0.0 }
 0x8a1   :  { %v5109_v23 = vpack.c.bf16 %v5105_v29, %v5105_v29 }
 0x8a2   :  { %v5049_v5 = vpop.f32.mrf.mxu3 }
 0x8a3   :  { %v5050_v48 = vadd.f32 %v5049_v5, %v5037_v63  ;;  %5381 = vmatmul.bf16.vlgmr.msra.gmra.mxu0 %v5109_v23 }
 0x8a4   :  { %v5025_v62 = vpop.f32.mrf.mxu1 }
 0x8a5   :  { %v5106_v55 = vmax.f32 %v5050_v48, 0.0 }
 0x8a7   :  { %v5110_v33 = vpack.c.bf16 %v5106_v55, %v5106_v55 }
 0x8a9   :  { %5394 = vmatmul.bf16.vlgmr.msra.gmra.mxu1 %v5110_v33 }
 0x8aa   :  { %v5051_v53 = vpop.f32.mrf.mxu3 }
 0x8ac   :  { %v5075_v6 = vpop.f32.mrf.mxu1 }
 0x8ad   :  { %v5076_v43 = vadd.f32 %v5075_v6, %v5063_v31 }
 0x8af   :  { %v5107_v36 = vmax.f32 %v5076_v43, 0.0 }
 0x8b1   :  { %v5111_v59 = vpack.c.bf16 %v5107_v36, %v5107_v36 }
 0x8b2   :  { %v5101_v47 = vpop.f32.mrf.mxu3 }
 0x8b3   :  { %v5102_v7 = vadd.f32 %v5101_v47, %v5089_v17  ;;  %5407 = vmatmul.bf16.vlgmr.msra.gmra.mxu2 %v5111_v59 }
 0x8b4   :  { %v5077_v44 = vpop.f32.mrf.mxu1 }
 0x8b5   :  { %v5108_v32 = vmax.f32 %v5102_v7, 0.0 }
 0x8b7   :  { %v5112_v39 = vpack.c.bf16 %v5108_v32, %v5108_v32 }
 0x8b9   :  { %5420 = vmatmul.bf16.vlgmr.msra.gmra.mxu3 %v5112_v39 }
 0x8ba   :  { %v5103_v1 = vpop.f32.mrf.mxu3 }
 0x920   :  { %v5382_v34 = vpop.f32.mrf.mxu0 }
 0x921   :  { %v5383_v35 = vadd.f32 %v7017_v54, %v5382_v34 }
 0x926   :  { %v5395_v21 = vpop.f32.mrf.mxu1 }
 0x927   :  { %v5396_v10 = vadd.f32 %v5395_v21, %v5383_v35 }
 0x928   :  { %v5384_v12 = vpop.f32.mrf.mxu0 }
 0x92e   :  { %v5397_v57 = vpop.f32.mrf.mxu1 }
 0x936   :  { %v5408_v60 = vpop.f32.mrf.mxu2 }
 0x937   :  { %v5409_v52 = vadd.f32 %v5408_v60, %v5396_v10 }
 0x93c   :  { %v5421_v37 = vpop.f32.mrf.mxu3 }
 0x93d   :  { %v5422_v45 = vadd.f32 %v5421_v37, %v5409_v52 }
 0x93e   :  { %v5410_v16 = vpop.f32.mrf.mxu2 }
 0x93f   :  { %5425 = vst [vmem:[#allocation15] sm:$0xff] %v5422_v45 }
 0x940   :  { %5436 = dma.vmem_to_hbm [thread:$0]  %s5432_s25, 128, %s5434_s27, [#allocation5]  }
 0x944   :  { %v5423_v13 = vpop.f32.mrf.mxu3 }
 0x945   :  { %7475 = dma.done.wait [#allocation5], 128  }
 0x946   :  { %7476 = vsyncadd [#allocation5], 4294967168 }
 0x947   :  { %5441 = vsyncpa [#allocation4], 1 }
 0x948   :  { %5442 = vsyncpa [#allocation7], 1 }
 0x949   :  { %5443 = vsyncpa [#allocation10], 1 }
 0x94a   :  { %5444 = vsyncpa [#allocation13], 1 }
 0x94b   :  { %5445 = vsyncpa [#allocation5], 1 }

</bundles_post_ra>
